<compile_context>
chip_gen: v6e
topology: v6e:2x2x1
jax: 0.10.0
libtpu: 0.0.40
codegen_flags: <defaults>
</compile_context>

<pallas_src>
import functools

import jax
import jax.numpy as jnp
from jax import lax
from jax.experimental import pallas as pl
from jax.experimental.pallas import tpu as pltpu


def _conv3x3_padded(act, pad_ref, w_ref, b_ref, mask_l, mask_r, *, H, W, off):
    """3x3 SAME conv on a spatially-flattened activation via a padded scratch.

    act:     (H*W, C) f32 activation (caller applies ReLU)
    pad_ref: VMEM scratch (pad_rows, c_pad) f32; rows [off, off+H*W) hold the
             data, the zero strips above/below provide vertical SAME padding
    w_ref:   Ref (3, 3, C, Cout) bf16  (kh, kw, Cin, Cout), cross-correlation
    b_ref:   Ref (1, Cout) f32
    mask_l/mask_r: (H*W, 1) f32 validity multipliers for dx = -1 / +1
    returns  (H*W, Cout) f32
    """
    HW = H * W
    C = act.shape[-1]
    Cout = w_ref.shape[-1]

    # Write the conv input into the data region of the padded scratch.
    pad_ref[off:off + HW, 0:C] = act

    # Bias fused into the accumulator init (single hoisted broadcast).
    acc = jnp.broadcast_to(b_ref[...], (HW, Cout)).astype(jnp.float32)

    for dy in (-1, 0, 1):
        for dx in (-1, 0, 1):
            if dy == 0 and dx == 0:
                tap = act                       # center tap: no slice, no mask
            else:
                start = off + dy * W + dx       # static, in-bounds by design
                tap = pad_ref[start:start + HW, 0:C]
                if dx == -1:
                    tap = tap * mask_l
                elif dx == 1:
                    tap = tap * mask_r
            acc = acc + jnp.dot(tap.astype(jnp.bfloat16),
                                w_ref[dy + 1, dx + 1],
                                preferred_element_type=jnp.float32)
    return acc


def encoder_block_b_kernel(x_ref, *refs, H, W, post_gain, identity_is_conv,
                           pad_off):
    if identity_is_conv:
        (wid_ref, bid_ref, w1_ref, b1_ref, w2_ref, b2_ref,
         w3_ref, b3_ref, w4_ref, b4_ref, o_ref, pad_ref) = refs
    else:
        (w1_ref, b1_ref, w2_ref, b2_ref,
         w3_ref, b3_ref, w4_ref, b4_ref, o_ref, pad_ref) = refs

    HW = H * W
    xf = x_ref[0]                                   # (H*W, Cin) f32

    # Zero only the vertical-padding strips; the data region is overwritten by
    # every conv and the strips stay zero afterwards.  (Done every grid step so
    # megacore splitting of the "parallel" batch axis stays correct.)
    pad_rows, c_pad = pad_ref.shape
    pad_ref[0:pad_off, :] = jnp.zeros((pad_off, c_pad), jnp.float32)
    pad_ref[pad_off + HW:pad_rows, :] = jnp.zeros(
        (pad_rows - pad_off - HW, c_pad), jnp.float32)

    # Horizontal boundary masks, computed once, reused by all three 3x3 convs.
    col = lax.broadcasted_iota(jnp.int32, (HW, 1), 0) % W
    mask_l = (col >= 1).astype(jnp.float32)          # neighbour at dx=-1 exists
    mask_r = (col <= W - 2).astype(jnp.float32)      # neighbour at dx=+1 exists

    # Identity path: Identity() or 1x1 conv.
    if identity_is_conv:
        ident = jnp.dot(xf.astype(jnp.bfloat16), wid_ref[...],
                        preferred_element_type=jnp.float32) + bid_ref[...]
    else:
        ident = xf

    # Residual path: ReLU -> conv3x3 -> ReLU -> conv3x3 -> ReLU -> conv3x3
    #                -> ReLU -> conv1x1
    conv = functools.partial(_conv3x3_padded, pad_ref=pad_ref,
                             mask_l=mask_l, mask_r=mask_r,
                             H=H, W=W, off=pad_off)
    h = conv(jnp.maximum(xf, 0.0), w_ref=w1_ref, b_ref=b1_ref)
    h = conv(jnp.maximum(h, 0.0), w_ref=w2_ref, b_ref=b2_ref)
    h = conv(jnp.maximum(h, 0.0), w_ref=w3_ref, b_ref=b3_ref)
    res = jnp.dot(jnp.maximum(h, 0.0).astype(jnp.bfloat16), w4_ref[...],
                  preferred_element_type=jnp.float32) + b4_ref[...]

    o_ref[0] = (ident + post_gain * res).astype(o_ref.dtype)


def encoder_block_b(x_nchw, params, *, num_layers):
    """Pallas implementation of EncoderBlockB.forward.  x_nchw: (N, Cin, H, W)."""
    N, Cin, H, W = x_nchw.shape
    Cout = params["w4"].shape[-1]
    Ch = params["w1"].shape[-1]
    HW = H * W
    post_gain = 1.0 / num_layers ** 2
    identity_is_conv = "w_id" in params

    # glue: NCHW -> (N, H*W, C) channels-last (channels on the lane dim).
    xf = jnp.transpose(x_nchw, (0, 2, 3, 1)).reshape(N, HW, Cin)
    xf = xf.astype(jnp.float32)

    def bf16(a):
        return jnp.asarray(a, jnp.bfloat16)

    def f32(a):
        return jnp.asarray(a, jnp.float32)

    # Only pass identity-conv params when the identity path is a conv.
    inputs = [xf]
    if identity_is_conv:
        inputs += [bf16(params["w_id"]), f32(params["b_id"])]
    inputs += [bf16(params["w1"]), f32(params["b1"]),
               bf16(params["w2"]), f32(params["b2"]),
               bf16(params["w3"]), f32(params["b3"]),
               bf16(params["w4"]), f32(params["b4"])]

    def full_spec(arr):
        nd = arr.ndim
        return pl.BlockSpec(arr.shape, lambda n, _nd=nd: (0,) * _nd)

    in_specs = [pl.BlockSpec((1, HW, Cin), lambda n: (n, 0, 0))]
    in_specs += [full_spec(a) for a in inputs[1:]]

    # Padded activation scratch: `pad_off` zero rows above the image and at
    # least W+1 below, so every (dy, dx) tap is an in-bounds static slice.
    pad_off = W + 8
    pad_rows = HW + 2 * pad_off
    pad_rows = -(-pad_rows // 8) * 8
    c_pad = max(Cin, Ch)

    # Rough per-grid-step VMEM footprint; only raise the scoped limit if the
    # default (>=16/32 MiB) would not cover it.
    est = 4 * (2 * HW * Cin + 2 * HW * Cout          # double-buffered in/out
               + pad_rows * c_pad                    # padded scratch
               + 8 * HW * max(Cin, Ch, Cout))        # live f32 intermediates
    est += sum(int(a.size) * a.dtype.itemsize for a in inputs[1:])
    vmem_limit = int(est * 1.25) if est * 1.25 > (32 << 20) else None

    kernel = functools.partial(
        encoder_block_b_kernel, H=H, W=W, post_gain=post_gain,
        identity_is_conv=identity_is_conv, pad_off=pad_off)

    out_flat = pl.pallas_call(
        kernel,
        out_shape=jax.ShapeDtypeStruct((N, HW, Cout), jnp.float32),
        grid_spec=pltpu.PrefetchScalarGridSpec(
            num_scalar_prefetch=0,
            grid=(N,),
            in_specs=in_specs,
            out_specs=pl.BlockSpec((1, HW, Cout), lambda n: (n, 0, 0)),
            scratch_shapes=[pltpu.VMEM((pad_rows, c_pad), jnp.float32)],
        ),
        compiler_params=pltpu.CompilerParams(
            dimension_semantics=("parallel",),
            vmem_limit_bytes=vmem_limit),
    )(*inputs)

    # glue: (N, H*W, Cout) -> NCHW
    return jnp.transpose(out_flat.reshape(N, H, W, Cout), (0, 3, 1, 2))


def encoder_block_b_reference(x_nchw, params, *, num_layers):
    """Pure-JAX reference (mirrors the PyTorch forward, full f32)."""
    post_gain = 1.0 / num_layers ** 2

    def conv(x, w_hwio, b, padding):
        y = lax.conv_general_dilated(
            x, w_hwio, window_strides=(1, 1), padding=padding,
            dimension_numbers=("NCHW", "HWIO", "NCHW"),
            precision=lax.Precision.HIGHEST)
        return y + b.reshape(1, -1, 1, 1)

    if "w_id" in params:
        wid = params["w_id"].reshape(1, 1, *params["w_id"].shape)
        ident = conv(x_nchw, wid, params["b_id"], "VALID")
    else:
        ident = x_nchw

    h = jax.nn.relu(x_nchw)
    h = conv(h, params["w1"], params["b1"], "SAME")
    h = jax.nn.relu(h)
    h = conv(h, params["w2"], params["b2"], "SAME")
    h = jax.nn.relu(h)
    h = conv(h, params["w3"], params["b3"], "SAME")
    h = jax.nn.relu(h)
    w4 = params["w4"].reshape(1, 1, *params["w4"].shape)
    h = conv(h, w4, params["b4"], "VALID")
    return ident + post_gain * h


if __name__ == "__main__":
    key = jax.random.PRNGKey(0)

    def init(k, shape, scale=0.1):
        return scale * jax.random.normal(k, shape, dtype=jnp.float32)

    def make_params(k, Cin, Cout, with_identity_conv):
        Ch = Cout // 4
        ks = jax.random.split(k, 10)
        p = {
            "w1": init(ks[0], (3, 3, Cin, Ch)), "b1": init(ks[1], (1, Ch)),
            "w2": init(ks[2], (3, 3, Ch, Ch)), "b2": init(ks[3], (1, Ch)),
            "w3": init(ks[4], (3, 3, Ch, Ch)), "b3": init(ks[5], (1, Ch)),
            "w4": init(ks[6], (Ch, Cout)), "b4": init(ks[7], (1, Cout)),
        }
        if with_identity_conv:
            p["w_id"] = init(ks[8], (Cin, Cout))
            p["b_id"] = init(ks[9], (1, Cout))
        return p

    N, H, W = 2, 16, 16
    num_layers = 2
    k1, k2, k3, k4 = jax.random.split(key, 4)

    # Case 1: in_channels != out_channels -> identity path is a 1x1 conv.
    params_a = make_params(k1, 4, 16, True)
    x_a = jax.random.normal(k2, (N, 4, H, W), dtype=jnp.float32)
    out_a = jax.block_until_ready(
        encoder_block_b(x_a, params_a, num_layers=num_layers))
    assert out_a.shape == (N, 16, H, W), out_a.shape
    ref_a = encoder_block_b_reference(x_a, params_a, num_layers=num_layers)
    err_a = float(jnp.max(jnp.abs(out_a - ref_a)))
    assert err_a < 3e-2, f"identity-conv case: max abs error {err_a}"

    # Case 2: in_channels == out_channels -> identity path is Identity()
    # (kernel built without the identity-conv inputs).
    params_b = make_params(k3, 16, 16, False)
    x_b = jax.random.normal(k4, (N, 16, H, W), dtype=jnp.float32)
    out_b = jax.block_until_ready(
        encoder_block_b(x_b, params_b, num_layers=num_layers))
    assert out_b.shape == (N, 16, H, W), out_b.shape
    ref_b = encoder_block_b_reference(x_b, params_b, num_layers=num_layers)
    err_b = float(jnp.max(jnp.abs(out_b - ref_b)))
    assert err_b < 3e-2, f"identity case: max abs error {err_b}"

    print("KERNEL_OK")
</pallas_src>

<mosaic_0001>
module attributes {stable_mosaic.version = 11 : i64} {
  func.func @encoder_block_b_kernel(%arg0: i32, %arg1: memref<1x256x4xf32, #tpu.memory_space<vmem>>, %arg2: memref<4x16xbf16, #tpu.memory_space<vmem>>, %arg3: memref<1x16xf32, #tpu.memory_space<vmem>>, %arg4: memref<3x3x4x4xbf16, #tpu.memory_space<vmem>>, %arg5: memref<1x4xf32, #tpu.memory_space<vmem>>, %arg6: memref<3x3x4x4xbf16, #tpu.memory_space<vmem>>, %arg7: memref<1x4xf32, #tpu.memory_space<vmem>>, %arg8: memref<3x3x4x4xbf16, #tpu.memory_space<vmem>>, %arg9: memref<1x4xf32, #tpu.memory_space<vmem>>, %arg10: memref<4x16xbf16, #tpu.memory_space<vmem>>, %arg11: memref<1x16xf32, #tpu.memory_space<vmem>>, %arg12: memref<1x256x16xf32, #tpu.memory_space<vmem>>, %arg13: memref<304x4xf32, #tpu.memory_space<vmem>>) attributes {dimension_semantics = [#tpu.dimension_semantics<parallel>], iteration_bounds = array<i64: 2>, scalar_prefetch = 0 : i64, scratch_operands = 1 : i64, tpu.core_type = #tpu.core_type<tc>, window_params = [{transform_indices = @transform_0, window_bounds = array<i64: 1, 256, 4>}, {pipeline_mode = #tpu.pipeline_mode<synchronous>, transform_indices = @transform_1, window_bounds = array<i64: 4, 16>}, {pipeline_mode = #tpu.pipeline_mode<synchronous>, transform_indices = @transform_2, window_bounds = array<i64: 1, 16>}, {pipeline_mode = #tpu.pipeline_mode<synchronous>, transform_indices = @transform_3, window_bounds = array<i64: 3, 3, 4, 4>}, {pipeline_mode = #tpu.pipeline_mode<synchronous>, transform_indices = @transform_4, window_bounds = array<i64: 1, 4>}, {pipeline_mode = #tpu.pipeline_mode<synchronous>, transform_indices = @transform_5, window_bounds = array<i64: 3, 3, 4, 4>}, {pipeline_mode = #tpu.pipeline_mode<synchronous>, transform_indices = @transform_6, window_bounds = array<i64: 1, 4>}, {pipeline_mode = #tpu.pipeline_mode<synchronous>, transform_indices = @transform_7, window_bounds = array<i64: 3, 3, 4, 4>}, {pipeline_mode = #tpu.pipeline_mode<synchronous>, transform_indices = @transform_8, window_bounds = array<i64: 1, 4>}, {pipeline_mode = #tpu.pipeline_mode<synchronous>, transform_indices = @transform_9, window_bounds = array<i64: 4, 16>}, {pipeline_mode = #tpu.pipeline_mode<synchronous>, transform_indices = @transform_10, window_bounds = array<i64: 1, 16>}, {transform_indices = @transform_11, window_bounds = array<i64: 1, 256, 16>}]} {
    %c0 = arith.constant 0 : index
    %c0_0 = arith.constant 0 : index
    %c0_1 = arith.constant 0 : index
    %0 = vector.load %arg1[%c0, %c0_0, %c0_1] : memref<1x256x4xf32, #tpu.memory_space<vmem>>, vector<1x256x4xf32>
    %1 = vector.shape_cast %0 : vector<1x256x4xf32> to vector<256x4xf32>
    %cst = arith.constant 0.000000e+00 : f32
    %2 = vector.broadcast %cst : f32 to vector<24x4xf32>
    %c0_2 = arith.constant 0 : index
    %c0_3 = arith.constant 0 : index
    %3 = vector.load %arg13[%c0_2, %c0_3] : memref<304x4xf32, #tpu.memory_space<vmem>>, vector<24x4xf32>
    tpu.vector_store %arg13[%c0_2, %c0_3], %2 {strides = array<i32>} : memref<304x4xf32, #tpu.memory_space<vmem>>, vector<24x4xf32>,
    %cst_4 = arith.constant 0.000000e+00 : f32
    %4 = vector.broadcast %cst_4 : f32 to vector<24x4xf32>
    %c280 = arith.constant 280 : index
    %c0_5 = arith.constant 0 : index
    %5 = vector.load %arg13[%c280, %c0_5] : memref<304x4xf32, #tpu.memory_space<vmem>>, vector<24x4xf32>
    tpu.vector_store %arg13[%c280, %c0_5], %4 {strides = array<i32>} : memref<304x4xf32, #tpu.memory_space<vmem>>, vector<24x4xf32>,
    %6 = tpu.iota {dimensions = array<i32: 0>} : vector<256x1xi32>
    %c16_i32 = arith.constant 16 : i32
    %c0_i32 = arith.constant 0 : i32
    %7 = arith.cmpi eq, %c16_i32, %c0_i32 : i32
    %c1_i32 = arith.constant 1 : i32
    %8 = arith.select %7, %c1_i32, %c16_i32 : i32
    %9 = vector.broadcast %8 : i32 to vector<256x1xi32>
    %10 = arith.remsi %6, %9 : vector<256x1xi32>
    %c0_i32_6 = arith.constant 0 : i32
    %11 = vector.broadcast %c0_i32_6 : i32 to vector<256x1xi32>
    %12 = arith.cmpi ne, %10, %11 : vector<256x1xi32>
    %c0_i32_7 = arith.constant 0 : i32
    %13 = vector.broadcast %c0_i32_7 : i32 to vector<256x1xi32>
    %14 = arith.cmpi slt, %10, %13 : vector<256x1xi32>
    %c0_i32_8 = arith.constant 0 : i32
    %15 = arith.cmpi slt, %8, %c0_i32_8 : i32
    %16 = vector.broadcast %15 : i1 to vector<256x1xi1>
    %17 = vector.broadcast %16 : vector<256x1xi1> to vector<256x1xi1>
    %18 = arith.xori %14, %17 : vector<256x1xi1>
    %19 = arith.andi %18, %12 : vector<256x1xi1>
    %20 = vector.broadcast %8 : i32 to vector<256x1xi32>
    %21 = arith.addi %10, %20 : vector<256x1xi32>
    %22 = arith.select %19, %21, %10 : vector<256x1xi1>, vector<256x1xi32>
    %c1_i32_9 = arith.constant 1 : i32
    %23 = vector.broadcast %c1_i32_9 : i32 to vector<256x1xi32>
    %24 = arith.cmpi sge, %22, %23 : vector<256x1xi32>
    %25 = arith.extui %24 : vector<256x1xi1> to vector<256x1xi32>
    %26 = arith.sitofp %25 : vector<256x1xi32> to vector<256x1xf32>
    %c14_i32 = arith.constant 14 : i32
    %27 = vector.broadcast %c14_i32 : i32 to vector<256x1xi32>
    %28 = arith.cmpi sle, %22, %27 : vector<256x1xi32>
    %29 = arith.extui %28 : vector<256x1xi1> to vector<256x1xi32>
    %30 = arith.sitofp %29 : vector<256x1xi32> to vector<256x1xf32>
    %31 = arith.truncf %1 : vector<256x4xf32> to vector<256x4xbf16>
    %c0_10 = arith.constant 0 : index
    %c0_11 = arith.constant 0 : index
    %32 = vector.load %arg2[%c0_10, %c0_11] : memref<4x16xbf16, #tpu.memory_space<vmem>>, vector<4x16xbf16>
    %cst_12 = arith.constant dense<0.000000e+00> : vector<256x16xf32>
    %33 = tpu.matmul %31, %32, %cst_12 {dimension_numbers = #tpu.dot_dimension_numbers<[1], [0], [0], [1], [0, 0, 1, 1], [], []>} : vector<256x4xbf16>, vector<4x16xbf16>, vector<256x16xf32> -> vector<256x16xf32>
    %c0_13 = arith.constant 0 : index
    %c0_14 = arith.constant 0 : index
    %34 = vector.load %arg3[%c0_13, %c0_14] : memref<1x16xf32, #tpu.memory_space<vmem>>, vector<1x16xf32>
    %35 = vector.broadcast %34 : vector<1x16xf32> to vector<256x16xf32>
    %36 = arith.addf %33, %35 : vector<256x16xf32>
    %cst_15 = arith.constant 0.000000e+00 : f32
    %37 = vector.broadcast %cst_15 : f32 to vector<256x4xf32>
    %38 = arith.maximumf %1, %37 : vector<256x4xf32>
    %c24 = arith.constant 24 : index
    %c0_16 = arith.constant 0 : index
    %39 = vector.load %arg13[%c24, %c0_16] : memref<304x4xf32, #tpu.memory_space<vmem>>, vector<256x4xf32>
    tpu.vector_store %arg13[%c24, %c0_16], %38 {strides = array<i32>} : memref<304x4xf32, #tpu.memory_space<vmem>>, vector<256x4xf32>,
    %c0_17 = arith.constant 0 : index
    %c0_18 = arith.constant 0 : index
    %40 = vector.load %arg5[%c0_17, %c0_18] : memref<1x4xf32, #tpu.memory_space<vmem>>, vector<1x4xf32>
    %41 = vector.shape_cast %40 : vector<1x4xf32> to vector<1x4xf32>
    %42 = vector.broadcast %41 : vector<1x4xf32> to vector<256x4xf32>
    %c7 = arith.constant 7 : index
    %c0_19 = arith.constant 0 : index
    %43 = vector.load %arg13[%c7, %c0_19] : memref<304x4xf32, #tpu.memory_space<vmem>>, vector<256x4xf32>
    %44 = vector.broadcast %26 : vector<256x1xf32> to vector<256x4xf32>
    %45 = arith.mulf %43, %44 : vector<256x4xf32>
    %46 = arith.truncf %45 : vector<256x4xf32> to vector<256x4xbf16>
    %c0_20 = arith.constant 0 : index
    %c0_21 = arith.constant 0 : index
    %c0_22 = arith.constant 0 : index
    %c0_23 = arith.constant 0 : index
    %47 = vector.load %arg4[%c0_20, %c0_21, %c0_22, %c0_23] : memref<3x3x4x4xbf16, #tpu.memory_space<vmem>>, vector<1x1x4x4xbf16>
    %48 = vector.shape_cast %47 : vector<1x1x4x4xbf16> to vector<4x4xbf16>
    %cst_24 = arith.constant dense<0.000000e+00> : vector<256x4xf32>
    %49 = tpu.matmul %46, %48, %cst_24 {dimension_numbers = #tpu.dot_dimension_numbers<[1], [0], [0], [1], [0, 0, 1, 1], [], []>} : vector<256x4xbf16>, vector<4x4xbf16>, vector<256x4xf32> -> vector<256x4xf32>
    %50 = arith.addf %42, %49 : vector<256x4xf32>
    %c8 = arith.constant 8 : index
    %c0_25 = arith.constant 0 : index
    %51 = vector.load %arg13[%c8, %c0_25] : memref<304x4xf32, #tpu.memory_space<vmem>>, vector<256x4xf32>
    %52 = arith.truncf %51 : vector<256x4xf32> to vector<256x4xbf16>
    %c0_26 = arith.constant 0 : index
    %c1 = arith.constant 1 : index
    %c0_27 = arith.constant 0 : index
    %c0_28 = arith.constant 0 : index
    %53 = vector.load %arg4[%c0_26, %c1, %c0_27, %c0_28] : memref<3x3x4x4xbf16, #tpu.memory_space<vmem>>, vector<1x1x4x4xbf16>
    %54 = vector.shape_cast %53 : vector<1x1x4x4xbf16> to vector<4x4xbf16>
    %cst_29 = arith.constant dense<0.000000e+00> : vector<256x4xf32>
    %55 = tpu.matmul %52, %54, %cst_29 {dimension_numbers = #tpu.dot_dimension_numbers<[1], [0], [0], [1], [0, 0, 1, 1], [], []>} : vector<256x4xbf16>, vector<4x4xbf16>, vector<256x4xf32> -> vector<256x4xf32>
    %56 = arith.addf %50, %55 : vector<256x4xf32>
    %c9 = arith.constant 9 : index
    %c0_30 = arith.constant 0 : index
    %57 = vector.load %arg13[%c9, %c0_30] : memref<304x4xf32, #tpu.memory_space<vmem>>, vector<256x4xf32>
    %58 = vector.broadcast %30 : vector<256x1xf32> to vector<256x4xf32>
    %59 = arith.mulf %57, %58 : vector<256x4xf32>
    %60 = arith.truncf %59 : vector<256x4xf32> to vector<256x4xbf16>
    %c0_31 = arith.constant 0 : index
    %c2 = arith.constant 2 : index
    %c0_32 = arith.constant 0 : index
    %c0_33 = arith.constant 0 : index
    %61 = vector.load %arg4[%c0_31, %c2, %c0_32, %c0_33] : memref<3x3x4x4xbf16, #tpu.memory_space<vmem>>, vector<1x1x4x4xbf16>
    %62 = vector.shape_cast %61 : vector<1x1x4x4xbf16> to vector<4x4xbf16>
    %cst_34 = arith.constant dense<0.000000e+00> : vector<256x4xf32>
    %63 = tpu.matmul %60, %62, %cst_34 {dimension_numbers = #tpu.dot_dimension_numbers<[1], [0], [0], [1], [0, 0, 1, 1], [], []>} : vector<256x4xbf16>, vector<4x4xbf16>, vector<256x4xf32> -> vector<256x4xf32>
    %64 = arith.addf %56, %63 : vector<256x4xf32>
    %c23 = arith.constant 23 : index
    %c0_35 = arith.constant 0 : index
    %65 = vector.load %arg13[%c23, %c0_35] : memref<304x4xf32, #tpu.memory_space<vmem>>, vector<256x4xf32>
    %66 = vector.broadcast %26 : vector<256x1xf32> to vector<256x4xf32>
    %67 = arith.mulf %65, %66 : vector<256x4xf32>
    %68 = arith.truncf %67 : vector<256x4xf32> to vector<256x4xbf16>
    %c1_36 = arith.constant 1 : index
    %c0_37 = arith.constant 0 : index
    %c0_38 = arith.constant 0 : index
    %c0_39 = arith.constant 0 : index
    %69 = vector.load %arg4[%c1_36, %c0_37, %c0_38, %c0_39] : memref<3x3x4x4xbf16, #tpu.memory_space<vmem>>, vector<1x1x4x4xbf16>
    %70 = vector.shape_cast %69 : vector<1x1x4x4xbf16> to vector<4x4xbf16>
    %cst_40 = arith.constant dense<0.000000e+00> : vector<256x4xf32>
    %71 = tpu.matmul %68, %70, %cst_40 {dimension_numbers = #tpu.dot_dimension_numbers<[1], [0], [0], [1], [0, 0, 1, 1], [], []>} : vector<256x4xbf16>, vector<4x4xbf16>, vector<256x4xf32> -> vector<256x4xf32>
    %72 = arith.addf %64, %71 : vector<256x4xf32>
    %73 = arith.truncf %38 : vector<256x4xf32> to vector<256x4xbf16>
    %c1_41 = arith.constant 1 : index
    %c1_42 = arith.constant 1 : index
    %c0_43 = arith.constant 0 : index
    %c0_44 = arith.constant 0 : index
    %74 = vector.load %arg4[%c1_41, %c1_42, %c0_43, %c0_44] : memref<3x3x4x4xbf16, #tpu.memory_space<vmem>>, vector<1x1x4x4xbf16>
    %75 = vector.shape_cast %74 : vector<1x1x4x4xbf16> to vector<4x4xbf16>
    %cst_45 = arith.constant dense<0.000000e+00> : vector<256x4xf32>
    %76 = tpu.matmul %73, %75, %cst_45 {dimension_numbers = #tpu.dot_dimension_numbers<[1], [0], [0], [1], [0, 0, 1, 1], [], []>} : vector<256x4xbf16>, vector<4x4xbf16>, vector<256x4xf32> -> vector<256x4xf32>
    %77 = arith.addf %72, %76 : vector<256x4xf32>
    %c25 = arith.constant 25 : index
    %c0_46 = arith.constant 0 : index
    %78 = vector.load %arg13[%c25, %c0_46] : memref<304x4xf32, #tpu.memory_space<vmem>>, vector<256x4xf32>
    %79 = vector.broadcast %30 : vector<256x1xf32> to vector<256x4xf32>
    %80 = arith.mulf %78, %79 : vector<256x4xf32>
    %81 = arith.truncf %80 : vector<256x4xf32> to vector<256x4xbf16>
    %c1_47 = arith.constant 1 : index
    %c2_48 = arith.constant 2 : index
    %c0_49 = arith.constant 0 : index
    %c0_50 = arith.constant 0 : index
    %82 = vector.load %arg4[%c1_47, %c2_48, %c0_49, %c0_50] : memref<3x3x4x4xbf16, #tpu.memory_space<vmem>>, vector<1x1x4x4xbf16>
    %83 = vector.shape_cast %82 : vector<1x1x4x4xbf16> to vector<4x4xbf16>
    %cst_51 = arith.constant dense<0.000000e+00> : vector<256x4xf32>
    %84 = tpu.matmul %81, %83, %cst_51 {dimension_numbers = #tpu.dot_dimension_numbers<[1], [0], [0], [1], [0, 0, 1, 1], [], []>} : vector<256x4xbf16>, vector<4x4xbf16>, vector<256x4xf32> -> vector<256x4xf32>
    %85 = arith.addf %77, %84 : vector<256x4xf32>
    %c39 = arith.constant 39 : index
    %c0_52 = arith.constant 0 : index
    %86 = vector.load %arg13[%c39, %c0_52] : memref<304x4xf32, #tpu.memory_space<vmem>>, vector<256x4xf32>
    %87 = vector.broadcast %26 : vector<256x1xf32> to vector<256x4xf32>
    %88 = arith.mulf %86, %87 : vector<256x4xf32>
    %89 = arith.truncf %88 : vector<256x4xf32> to vector<256x4xbf16>
    %c2_53 = arith.constant 2 : index
    %c0_54 = arith.constant 0 : index
    %c0_55 = arith.constant 0 : index
    %c0_56 = arith.constant 0 : index
    %90 = vector.load %arg4[%c2_53, %c0_54, %c0_55, %c0_56] : memref<3x3x4x4xbf16, #tpu.memory_space<vmem>>, vector<1x1x4x4xbf16>
    %91 = vector.shape_cast %90 : vector<1x1x4x4xbf16> to vector<4x4xbf16>
    %cst_57 = arith.constant dense<0.000000e+00> : vector<256x4xf32>
    %92 = tpu.matmul %89, %91, %cst_57 {dimension_numbers = #tpu.dot_dimension_numbers<[1], [0], [0], [1], [0, 0, 1, 1], [], []>} : vector<256x4xbf16>, vector<4x4xbf16>, vector<256x4xf32> -> vector<256x4xf32>
    %93 = arith.addf %85, %92 : vector<256x4xf32>
    %c40 = arith.constant 40 : index
    %c0_58 = arith.constant 0 : index
    %94 = vector.load %arg13[%c40, %c0_58] : memref<304x4xf32, #tpu.memory_space<vmem>>, vector<256x4xf32>
    %95 = arith.truncf %94 : vector<256x4xf32> to vector<256x4xbf16>
    %c2_59 = arith.constant 2 : index
    %c1_60 = arith.constant 1 : index
    %c0_61 = arith.constant 0 : index
    %c0_62 = arith.constant 0 : index
    %96 = vector.load %arg4[%c2_59, %c1_60, %c0_61, %c0_62] : memref<3x3x4x4xbf16, #tpu.memory_space<vmem>>, vector<1x1x4x4xbf16>
    %97 = vector.shape_cast %96 : vector<1x1x4x4xbf16> to vector<4x4xbf16>
    %cst_63 = arith.constant dense<0.000000e+00> : vector<256x4xf32>
    %98 = tpu.matmul %95, %97, %cst_63 {dimension_numbers = #tpu.dot_dimension_numbers<[1], [0], [0], [1], [0, 0, 1, 1], [], []>} : vector<256x4xbf16>, vector<4x4xbf16>, vector<256x4xf32> -> vector<256x4xf32>
    %99 = arith.addf %93, %98 : vector<256x4xf32>
    %c41 = arith.constant 41 : index
    %c0_64 = arith.constant 0 : index
    %100 = vector.load %arg13[%c41, %c0_64] : memref<304x4xf32, #tpu.memory_space<vmem>>, vector<256x4xf32>
    %101 = vector.broadcast %30 : vector<256x1xf32> to vector<256x4xf32>
    %102 = arith.mulf %100, %101 : vector<256x4xf32>
    %103 = arith.truncf %102 : vector<256x4xf32> to vector<256x4xbf16>
    %c2_65 = arith.constant 2 : index
    %c2_66 = arith.constant 2 : index
    %c0_67 = arith.constant 0 : index
    %c0_68 = arith.constant 0 : index
    %104 = vector.load %arg4[%c2_65, %c2_66, %c0_67, %c0_68] : memref<3x3x4x4xbf16, #tpu.memory_space<vmem>>, vector<1x1x4x4xbf16>
    %105 = vector.shape_cast %104 : vector<1x1x4x4xbf16> to vector<4x4xbf16>
    %cst_69 = arith.constant dense<0.000000e+00> : vector<256x4xf32>
    %106 = tpu.matmul %103, %105, %cst_69 {dimension_numbers = #tpu.dot_dimension_numbers<[1], [0], [0], [1], [0, 0, 1, 1], [], []>} : vector<256x4xbf16>, vector<4x4xbf16>, vector<256x4xf32> -> vector<256x4xf32>
    %107 = arith.addf %99, %106 : vector<256x4xf32>
    %cst_70 = arith.constant 0.000000e+00 : f32
    %108 = vector.broadcast %cst_70 : f32 to vector<256x4xf32>
    %109 = arith.maximumf %107, %108 : vector<256x4xf32>
    %c24_71 = arith.constant 24 : index
    %c0_72 = arith.constant 0 : index
    %110 = vector.load %arg13[%c24_71, %c0_72] : memref<304x4xf32, #tpu.memory_space<vmem>>, vector<256x4xf32>
    tpu.vector_store %arg13[%c24_71, %c0_72], %109 {strides = array<i32>} : memref<304x4xf32, #tpu.memory_space<vmem>>, vector<256x4xf32>,
    %c0_73 = arith.constant 0 : index
    %c0_74 = arith.constant 0 : index
    %111 = vector.load %arg7[%c0_73, %c0_74] : memref<1x4xf32, #tpu.memory_space<vmem>>, vector<1x4xf32>
    %112 = vector.shape_cast %111 : vector<1x4xf32> to vector<1x4xf32>
    %113 = vector.broadcast %112 : vector<1x4xf32> to vector<256x4xf32>
    %c7_75 = arith.constant 7 : index
    %c0_76 = arith.constant 0 : index
    %114 = vector.load %arg13[%c7_75, %c0_76] : memref<304x4xf32, #tpu.memory_space<vmem>>, vector<256x4xf32>
    %115 = vector.broadcast %26 : vector<256x1xf32> to vector<256x4xf32>
    %116 = arith.mulf %114, %115 : vector<256x4xf32>
    %117 = arith.truncf %116 : vector<256x4xf32> to vector<256x4xbf16>
    %c0_77 = arith.constant 0 : index
    %c0_78 = arith.constant 0 : index
    %c0_79 = arith.constant 0 : index
    %c0_80 = arith.constant 0 : index
    %118 = vector.load %arg6[%c0_77, %c0_78, %c0_79, %c0_80] : memref<3x3x4x4xbf16, #tpu.memory_space<vmem>>, vector<1x1x4x4xbf16>
    %119 = vector.shape_cast %118 : vector<1x1x4x4xbf16> to vector<4x4xbf16>
    %cst_81 = arith.constant dense<0.000000e+00> : vector<256x4xf32>
    %120 = tpu.matmul %117, %119, %cst_81 {dimension_numbers = #tpu.dot_dimension_numbers<[1], [0], [0], [1], [0, 0, 1, 1], [], []>} : vector<256x4xbf16>, vector<4x4xbf16>, vector<256x4xf32> -> vector<256x4xf32>
    %121 = arith.addf %113, %120 : vector<256x4xf32>
    %c8_82 = arith.constant 8 : index
    %c0_83 = arith.constant 0 : index
    %122 = vector.load %arg13[%c8_82, %c0_83] : memref<304x4xf32, #tpu.memory_space<vmem>>, vector<256x4xf32>
    %123 = arith.truncf %122 : vector<256x4xf32> to vector<256x4xbf16>
    %c0_84 = arith.constant 0 : index
    %c1_85 = arith.constant 1 : index
    %c0_86 = arith.constant 0 : index
    %c0_87 = arith.constant 0 : index
    %124 = vector.load %arg6[%c0_84, %c1_85, %c0_86, %c0_87] : memref<3x3x4x4xbf16, #tpu.memory_space<vmem>>, vector<1x1x4x4xbf16>
    %125 = vector.shape_cast %124 : vector<1x1x4x4xbf16> to vector<4x4xbf16>
    %cst_88 = arith.constant dense<0.000000e+00> : vector<256x4xf32>
    %126 = tpu.matmul %123, %125, %cst_88 {dimension_numbers = #tpu.dot_dimension_numbers<[1], [0], [0], [1], [0, 0, 1, 1], [], []>} : vector<256x4xbf16>, vector<4x4xbf16>, vector<256x4xf32> -> vector<256x4xf32>
    %127 = arith.addf %121, %126 : vector<256x4xf32>
    %c9_89 = arith.constant 9 : index
    %c0_90 = arith.constant 0 : index
    %128 = vector.load %arg13[%c9_89, %c0_90] : memref<304x4xf32, #tpu.memory_space<vmem>>, vector<256x4xf32>
    %129 = vector.broadcast %30 : vector<256x1xf32> to vector<256x4xf32>
    %130 = arith.mulf %128, %129 : vector<256x4xf32>
    %131 = arith.truncf %130 : vector<256x4xf32> to vector<256x4xbf16>
    %c0_91 = arith.constant 0 : index
    %c2_92 = arith.constant 2 : index
    %c0_93 = arith.constant 0 : index
    %c0_94 = arith.constant 0 : index
    %132 = vector.load %arg6[%c0_91, %c2_92, %c0_93, %c0_94] : memref<3x3x4x4xbf16, #tpu.memory_space<vmem>>, vector<1x1x4x4xbf16>
    %133 = vector.shape_cast %132 : vector<1x1x4x4xbf16> to vector<4x4xbf16>
    %cst_95 = arith.constant dense<0.000000e+00> : vector<256x4xf32>
    %134 = tpu.matmul %131, %133, %cst_95 {dimension_numbers = #tpu.dot_dimension_numbers<[1], [0], [0], [1], [0, 0, 1, 1], [], []>} : vector<256x4xbf16>, vector<4x4xbf16>, vector<256x4xf32> -> vector<256x4xf32>
    %135 = arith.addf %127, %134 : vector<256x4xf32>
    %c23_96 = arith.constant 23 : index
    %c0_97 = arith.constant 0 : index
    %136 = vector.load %arg13[%c23_96, %c0_97] : memref<304x4xf32, #tpu.memory_space<vmem>>, vector<256x4xf32>
    %137 = vector.broadcast %26 : vector<256x1xf32> to vector<256x4xf32>
    %138 = arith.mulf %136, %137 : vector<256x4xf32>
    %139 = arith.truncf %138 : vector<256x4xf32> to vector<256x4xbf16>
    %c1_98 = arith.constant 1 : index
    %c0_99 = arith.constant 0 : index
    %c0_100 = arith.constant 0 : index
    %c0_101 = arith.constant 0 : index
    %140 = vector.load %arg6[%c1_98, %c0_99, %c0_100, %c0_101] : memref<3x3x4x4xbf16, #tpu.memory_space<vmem>>, vector<1x1x4x4xbf16>
    %141 = vector.shape_cast %140 : vector<1x1x4x4xbf16> to vector<4x4xbf16>
    %cst_102 = arith.constant dense<0.000000e+00> : vector<256x4xf32>
    %142 = tpu.matmul %139, %141, %cst_102 {dimension_numbers = #tpu.dot_dimension_numbers<[1], [0], [0], [1], [0, 0, 1, 1], [], []>} : vector<256x4xbf16>, vector<4x4xbf16>, vector<256x4xf32> -> vector<256x4xf32>
    %143 = arith.addf %135, %142 : vector<256x4xf32>
    %144 = arith.truncf %109 : vector<256x4xf32> to vector<256x4xbf16>
    %c1_103 = arith.constant 1 : index
    %c1_104 = arith.constant 1 : index
    %c0_105 = arith.constant 0 : index
    %c0_106 = arith.constant 0 : index
    %145 = vector.load %arg6[%c1_103, %c1_104, %c0_105, %c0_106] : memref<3x3x4x4xbf16, #tpu.memory_space<vmem>>, vector<1x1x4x4xbf16>
    %146 = vector.shape_cast %145 : vector<1x1x4x4xbf16> to vector<4x4xbf16>
    %cst_107 = arith.constant dense<0.000000e+00> : vector<256x4xf32>
    %147 = tpu.matmul %144, %146, %cst_107 {dimension_numbers = #tpu.dot_dimension_numbers<[1], [0], [0], [1], [0, 0, 1, 1], [], []>} : vector<256x4xbf16>, vector<4x4xbf16>, vector<256x4xf32> -> vector<256x4xf32>
    %148 = arith.addf %143, %147 : vector<256x4xf32>
    %c25_108 = arith.constant 25 : index
    %c0_109 = arith.constant 0 : index
    %149 = vector.load %arg13[%c25_108, %c0_109] : memref<304x4xf32, #tpu.memory_space<vmem>>, vector<256x4xf32>
    %150 = vector.broadcast %30 : vector<256x1xf32> to vector<256x4xf32>
    %151 = arith.mulf %149, %150 : vector<256x4xf32>
    %152 = arith.truncf %151 : vector<256x4xf32> to vector<256x4xbf16>
    %c1_110 = arith.constant 1 : index
    %c2_111 = arith.constant 2 : index
    %c0_112 = arith.constant 0 : index
    %c0_113 = arith.constant 0 : index
    %153 = vector.load %arg6[%c1_110, %c2_111, %c0_112, %c0_113] : memref<3x3x4x4xbf16, #tpu.memory_space<vmem>>, vector<1x1x4x4xbf16>
    %154 = vector.shape_cast %153 : vector<1x1x4x4xbf16> to vector<4x4xbf16>
    %cst_114 = arith.constant dense<0.000000e+00> : vector<256x4xf32>
    %155 = tpu.matmul %152, %154, %cst_114 {dimension_numbers = #tpu.dot_dimension_numbers<[1], [0], [0], [1], [0, 0, 1, 1], [], []>} : vector<256x4xbf16>, vector<4x4xbf16>, vector<256x4xf32> -> vector<256x4xf32>
    %156 = arith.addf %148, %155 : vector<256x4xf32>
    %c39_115 = arith.constant 39 : index
    %c0_116 = arith.constant 0 : index
    %157 = vector.load %arg13[%c39_115, %c0_116] : memref<304x4xf32, #tpu.memory_space<vmem>>, vector<256x4xf32>
    %158 = vector.broadcast %26 : vector<256x1xf32> to vector<256x4xf32>
    %159 = arith.mulf %157, %158 : vector<256x4xf32>
    %160 = arith.truncf %159 : vector<256x4xf32> to vector<256x4xbf16>
    %c2_117 = arith.constant 2 : index
    %c0_118 = arith.constant 0 : index
    %c0_119 = arith.constant 0 : index
    %c0_120 = arith.constant 0 : index
    %161 = vector.load %arg6[%c2_117, %c0_118, %c0_119, %c0_120] : memref<3x3x4x4xbf16, #tpu.memory_space<vmem>>, vector<1x1x4x4xbf16>
    %162 = vector.shape_cast %161 : vector<1x1x4x4xbf16> to vector<4x4xbf16>
    %cst_121 = arith.constant dense<0.000000e+00> : vector<256x4xf32>
    %163 = tpu.matmul %160, %162, %cst_121 {dimension_numbers = #tpu.dot_dimension_numbers<[1], [0], [0], [1], [0, 0, 1, 1], [], []>} : vector<256x4xbf16>, vector<4x4xbf16>, vector<256x4xf32> -> vector<256x4xf32>
    %164 = arith.addf %156, %163 : vector<256x4xf32>
    %c40_122 = arith.constant 40 : index
    %c0_123 = arith.constant 0 : index
    %165 = vector.load %arg13[%c40_122, %c0_123] : memref<304x4xf32, #tpu.memory_space<vmem>>, vector<256x4xf32>
    %166 = arith.truncf %165 : vector<256x4xf32> to vector<256x4xbf16>
    %c2_124 = arith.constant 2 : index
    %c1_125 = arith.constant 1 : index
    %c0_126 = arith.constant 0 : index
    %c0_127 = arith.constant 0 : index
    %167 = vector.load %arg6[%c2_124, %c1_125, %c0_126, %c0_127] : memref<3x3x4x4xbf16, #tpu.memory_space<vmem>>, vector<1x1x4x4xbf16>
    %168 = vector.shape_cast %167 : vector<1x1x4x4xbf16> to vector<4x4xbf16>
    %cst_128 = arith.constant dense<0.000000e+00> : vector<256x4xf32>
    %169 = tpu.matmul %166, %168, %cst_128 {dimension_numbers = #tpu.dot_dimension_numbers<[1], [0], [0], [1], [0, 0, 1, 1], [], []>} : vector<256x4xbf16>, vector<4x4xbf16>, vector<256x4xf32> -> vector<256x4xf32>
    %170 = arith.addf %164, %169 : vector<256x4xf32>
    %c41_129 = arith.constant 41 : index
    %c0_130 = arith.constant 0 : index
    %171 = vector.load %arg13[%c41_129, %c0_130] : memref<304x4xf32, #tpu.memory_space<vmem>>, vector<256x4xf32>
    %172 = vector.broadcast %30 : vector<256x1xf32> to vector<256x4xf32>
    %173 = arith.mulf %171, %172 : vector<256x4xf32>
    %174 = arith.truncf %173 : vector<256x4xf32> to vector<256x4xbf16>
    %c2_131 = arith.constant 2 : index
    %c2_132 = arith.constant 2 : index
    %c0_133 = arith.constant 0 : index
    %c0_134 = arith.constant 0 : index
    %175 = vector.load %arg6[%c2_131, %c2_132, %c0_133, %c0_134] : memref<3x3x4x4xbf16, #tpu.memory_space<vmem>>, vector<1x1x4x4xbf16>
    %176 = vector.shape_cast %175 : vector<1x1x4x4xbf16> to vector<4x4xbf16>
    %cst_135 = arith.constant dense<0.000000e+00> : vector<256x4xf32>
    %177 = tpu.matmul %174, %176, %cst_135 {dimension_numbers = #tpu.dot_dimension_numbers<[1], [0], [0], [1], [0, 0, 1, 1], [], []>} : vector<256x4xbf16>, vector<4x4xbf16>, vector<256x4xf32> -> vector<256x4xf32>
    %178 = arith.addf %170, %177 : vector<256x4xf32>
    %cst_136 = arith.constant 0.000000e+00 : f32
    %179 = vector.broadcast %cst_136 : f32 to vector<256x4xf32>
    %180 = arith.maximumf %178, %179 : vector<256x4xf32>
    %c24_137 = arith.constant 24 : index
    %c0_138 = arith.constant 0 : index
    %181 = vector.load %arg13[%c24_137, %c0_138] : memref<304x4xf32, #tpu.memory_space<vmem>>, vector<256x4xf32>
    tpu.vector_store %arg13[%c24_137, %c0_138], %180 {strides = array<i32>} : memref<304x4xf32, #tpu.memory_space<vmem>>, vector<256x4xf32>,
    %c0_139 = arith.constant 0 : index
    %c0_140 = arith.constant 0 : index
    %182 = vector.load %arg9[%c0_139, %c0_140] : memref<1x4xf32, #tpu.memory_space<vmem>>, vector<1x4xf32>
    %183 = vector.shape_cast %182 : vector<1x4xf32> to vector<1x4xf32>
    %184 = vector.broadcast %183 : vector<1x4xf32> to vector<256x4xf32>
    %c7_141 = arith.constant 7 : index
    %c0_142 = arith.constant 0 : index
    %185 = vector.load %arg13[%c7_141, %c0_142] : memref<304x4xf32, #tpu.memory_space<vmem>>, vector<256x4xf32>
    %186 = vector.broadcast %26 : vector<256x1xf32> to vector<256x4xf32>
    %187 = arith.mulf %185, %186 : vector<256x4xf32>
    %188 = arith.truncf %187 : vector<256x4xf32> to vector<256x4xbf16>
    %c0_143 = arith.constant 0 : index
    %c0_144 = arith.constant 0 : index
    %c0_145 = arith.constant 0 : index
    %c0_146 = arith.constant 0 : index
    %189 = vector.load %arg8[%c0_143, %c0_144, %c0_145, %c0_146] : memref<3x3x4x4xbf16, #tpu.memory_space<vmem>>, vector<1x1x4x4xbf16>
    %190 = vector.shape_cast %189 : vector<1x1x4x4xbf16> to vector<4x4xbf16>
    %cst_147 = arith.constant dense<0.000000e+00> : vector<256x4xf32>
    %191 = tpu.matmul %188, %190, %cst_147 {dimension_numbers = #tpu.dot_dimension_numbers<[1], [0], [0], [1], [0, 0, 1, 1], [], []>} : vector<256x4xbf16>, vector<4x4xbf16>, vector<256x4xf32> -> vector<256x4xf32>
    %192 = arith.addf %184, %191 : vector<256x4xf32>
    %c8_148 = arith.constant 8 : index
    %c0_149 = arith.constant 0 : index
    %193 = vector.load %arg13[%c8_148, %c0_149] : memref<304x4xf32, #tpu.memory_space<vmem>>, vector<256x4xf32>
    %194 = arith.truncf %193 : vector<256x4xf32> to vector<256x4xbf16>
    %c0_150 = arith.constant 0 : index
    %c1_151 = arith.constant 1 : index
    %c0_152 = arith.constant 0 : index
    %c0_153 = arith.constant 0 : index
    %195 = vector.load %arg8[%c0_150, %c1_151, %c0_152, %c0_153] : memref<3x3x4x4xbf16, #tpu.memory_space<vmem>>, vector<1x1x4x4xbf16>
    %196 = vector.shape_cast %195 : vector<1x1x4x4xbf16> to vector<4x4xbf16>
    %cst_154 = arith.constant dense<0.000000e+00> : vector<256x4xf32>
    %197 = tpu.matmul %194, %196, %cst_154 {dimension_numbers = #tpu.dot_dimension_numbers<[1], [0], [0], [1], [0, 0, 1, 1], [], []>} : vector<256x4xbf16>, vector<4x4xbf16>, vector<256x4xf32> -> vector<256x4xf32>
    %198 = arith.addf %192, %197 : vector<256x4xf32>
    %c9_155 = arith.constant 9 : index
    %c0_156 = arith.constant 0 : index
    %199 = vector.load %arg13[%c9_155, %c0_156] : memref<304x4xf32, #tpu.memory_space<vmem>>, vector<256x4xf32>
    %200 = vector.broadcast %30 : vector<256x1xf32> to vector<256x4xf32>
    %201 = arith.mulf %199, %200 : vector<256x4xf32>
    %202 = arith.truncf %201 : vector<256x4xf32> to vector<256x4xbf16>
    %c0_157 = arith.constant 0 : index
    %c2_158 = arith.constant 2 : index
    %c0_159 = arith.constant 0 : index
    %c0_160 = arith.constant 0 : index
    %203 = vector.load %arg8[%c0_157, %c2_158, %c0_159, %c0_160] : memref<3x3x4x4xbf16, #tpu.memory_space<vmem>>, vector<1x1x4x4xbf16>
    %204 = vector.shape_cast %203 : vector<1x1x4x4xbf16> to vector<4x4xbf16>
    %cst_161 = arith.constant dense<0.000000e+00> : vector<256x4xf32>
    %205 = tpu.matmul %202, %204, %cst_161 {dimension_numbers = #tpu.dot_dimension_numbers<[1], [0], [0], [1], [0, 0, 1, 1], [], []>} : vector<256x4xbf16>, vector<4x4xbf16>, vector<256x4xf32> -> vector<256x4xf32>
    %206 = arith.addf %198, %205 : vector<256x4xf32>
    %c23_162 = arith.constant 23 : index
    %c0_163 = arith.constant 0 : index
    %207 = vector.load %arg13[%c23_162, %c0_163] : memref<304x4xf32, #tpu.memory_space<vmem>>, vector<256x4xf32>
    %208 = vector.broadcast %26 : vector<256x1xf32> to vector<256x4xf32>
    %209 = arith.mulf %207, %208 : vector<256x4xf32>
    %210 = arith.truncf %209 : vector<256x4xf32> to vector<256x4xbf16>
    %c1_164 = arith.constant 1 : index
    %c0_165 = arith.constant 0 : index
    %c0_166 = arith.constant 0 : index
    %c0_167 = arith.constant 0 : index
    %211 = vector.load %arg8[%c1_164, %c0_165, %c0_166, %c0_167] : memref<3x3x4x4xbf16, #tpu.memory_space<vmem>>, vector<1x1x4x4xbf16>
    %212 = vector.shape_cast %211 : vector<1x1x4x4xbf16> to vector<4x4xbf16>
    %cst_168 = arith.constant dense<0.000000e+00> : vector<256x4xf32>
    %213 = tpu.matmul %210, %212, %cst_168 {dimension_numbers = #tpu.dot_dimension_numbers<[1], [0], [0], [1], [0, 0, 1, 1], [], []>} : vector<256x4xbf16>, vector<4x4xbf16>, vector<256x4xf32> -> vector<256x4xf32>
    %214 = arith.addf %206, %213 : vector<256x4xf32>
    %215 = arith.truncf %180 : vector<256x4xf32> to vector<256x4xbf16>
    %c1_169 = arith.constant 1 : index
    %c1_170 = arith.constant 1 : index
    %c0_171 = arith.constant 0 : index
    %c0_172 = arith.constant 0 : index
    %216 = vector.load %arg8[%c1_169, %c1_170, %c0_171, %c0_172] : memref<3x3x4x4xbf16, #tpu.memory_space<vmem>>, vector<1x1x4x4xbf16>
    %217 = vector.shape_cast %216 : vector<1x1x4x4xbf16> to vector<4x4xbf16>
    %cst_173 = arith.constant dense<0.000000e+00> : vector<256x4xf32>
    %218 = tpu.matmul %215, %217, %cst_173 {dimension_numbers = #tpu.dot_dimension_numbers<[1], [0], [0], [1], [0, 0, 1, 1], [], []>} : vector<256x4xbf16>, vector<4x4xbf16>, vector<256x4xf32> -> vector<256x4xf32>
    %219 = arith.addf %214, %218 : vector<256x4xf32>
    %c25_174 = arith.constant 25 : index
    %c0_175 = arith.constant 0 : index
    %220 = vector.load %arg13[%c25_174, %c0_175] : memref<304x4xf32, #tpu.memory_space<vmem>>, vector<256x4xf32>
    %221 = vector.broadcast %30 : vector<256x1xf32> to vector<256x4xf32>
    %222 = arith.mulf %220, %221 : vector<256x4xf32>
    %223 = arith.truncf %222 : vector<256x4xf32> to vector<256x4xbf16>
    %c1_176 = arith.constant 1 : index
    %c2_177 = arith.constant 2 : index
    %c0_178 = arith.constant 0 : index
    %c0_179 = arith.constant 0 : index
    %224 = vector.load %arg8[%c1_176, %c2_177, %c0_178, %c0_179] : memref<3x3x4x4xbf16, #tpu.memory_space<vmem>>, vector<1x1x4x4xbf16>
    %225 = vector.shape_cast %224 : vector<1x1x4x4xbf16> to vector<4x4xbf16>
    %cst_180 = arith.constant dense<0.000000e+00> : vector<256x4xf32>
    %226 = tpu.matmul %223, %225, %cst_180 {dimension_numbers = #tpu.dot_dimension_numbers<[1], [0], [0], [1], [0, 0, 1, 1], [], []>} : vector<256x4xbf16>, vector<4x4xbf16>, vector<256x4xf32> -> vector<256x4xf32>
    %227 = arith.addf %219, %226 : vector<256x4xf32>
    %c39_181 = arith.constant 39 : index
    %c0_182 = arith.constant 0 : index
    %228 = vector.load %arg13[%c39_181, %c0_182] : memref<304x4xf32, #tpu.memory_space<vmem>>, vector<256x4xf32>
    %229 = vector.broadcast %26 : vector<256x1xf32> to vector<256x4xf32>
    %230 = arith.mulf %228, %229 : vector<256x4xf32>
    %231 = arith.truncf %230 : vector<256x4xf32> to vector<256x4xbf16>
    %c2_183 = arith.constant 2 : index
    %c0_184 = arith.constant 0 : index
    %c0_185 = arith.constant 0 : index
    %c0_186 = arith.constant 0 : index
    %232 = vector.load %arg8[%c2_183, %c0_184, %c0_185, %c0_186] : memref<3x3x4x4xbf16, #tpu.memory_space<vmem>>, vector<1x1x4x4xbf16>
    %233 = vector.shape_cast %232 : vector<1x1x4x4xbf16> to vector<4x4xbf16>
    %cst_187 = arith.constant dense<0.000000e+00> : vector<256x4xf32>
    %234 = tpu.matmul %231, %233, %cst_187 {dimension_numbers = #tpu.dot_dimension_numbers<[1], [0], [0], [1], [0, 0, 1, 1], [], []>} : vector<256x4xbf16>, vector<4x4xbf16>, vector<256x4xf32> -> vector<256x4xf32>
    %235 = arith.addf %227, %234 : vector<256x4xf32>
    %c40_188 = arith.constant 40 : index
    %c0_189 = arith.constant 0 : index
    %236 = vector.load %arg13[%c40_188, %c0_189] : memref<304x4xf32, #tpu.memory_space<vmem>>, vector<256x4xf32>
    %237 = arith.truncf %236 : vector<256x4xf32> to vector<256x4xbf16>
    %c2_190 = arith.constant 2 : index
    %c1_191 = arith.constant 1 : index
    %c0_192 = arith.constant 0 : index
    %c0_193 = arith.constant 0 : index
    %238 = vector.load %arg8[%c2_190, %c1_191, %c0_192, %c0_193] : memref<3x3x4x4xbf16, #tpu.memory_space<vmem>>, vector<1x1x4x4xbf16>
    %239 = vector.shape_cast %238 : vector<1x1x4x4xbf16> to vector<4x4xbf16>
    %cst_194 = arith.constant dense<0.000000e+00> : vector<256x4xf32>
    %240 = tpu.matmul %237, %239, %cst_194 {dimension_numbers = #tpu.dot_dimension_numbers<[1], [0], [0], [1], [0, 0, 1, 1], [], []>} : vector<256x4xbf16>, vector<4x4xbf16>, vector<256x4xf32> -> vector<256x4xf32>
    %241 = arith.addf %235, %240 : vector<256x4xf32>
    %c41_195 = arith.constant 41 : index
    %c0_196 = arith.constant 0 : index
    %242 = vector.load %arg13[%c41_195, %c0_196] : memref<304x4xf32, #tpu.memory_space<vmem>>, vector<256x4xf32>
    %243 = vector.broadcast %30 : vector<256x1xf32> to vector<256x4xf32>
    %244 = arith.mulf %242, %243 : vector<256x4xf32>
    %245 = arith.truncf %244 : vector<256x4xf32> to vector<256x4xbf16>
    %c2_197 = arith.constant 2 : index
    %c2_198 = arith.constant 2 : index
    %c0_199 = arith.constant 0 : index
    %c0_200 = arith.constant 0 : index
    %246 = vector.load %arg8[%c2_197, %c2_198, %c0_199, %c0_200] : memref<3x3x4x4xbf16, #tpu.memory_space<vmem>>, vector<1x1x4x4xbf16>
    %247 = vector.shape_cast %246 : vector<1x1x4x4xbf16> to vector<4x4xbf16>
    %cst_201 = arith.constant dense<0.000000e+00> : vector<256x4xf32>
    %248 = tpu.matmul %245, %247, %cst_201 {dimension_numbers = #tpu.dot_dimension_numbers<[1], [0], [0], [1], [0, 0, 1, 1], [], []>} : vector<256x4xbf16>, vector<4x4xbf16>, vector<256x4xf32> -> vector<256x4xf32>
    %249 = arith.addf %241, %248 : vector<256x4xf32>
    %cst_202 = arith.constant 0.000000e+00 : f32
    %250 = vector.broadcast %cst_202 : f32 to vector<256x4xf32>
    %251 = arith.maximumf %249, %250 : vector<256x4xf32>
    %252 = arith.truncf %251 : vector<256x4xf32> to vector<256x4xbf16>
    %c0_203 = arith.constant 0 : index
    %c0_204 = arith.constant 0 : index
    %253 = vector.load %arg10[%c0_203, %c0_204] : memref<4x16xbf16, #tpu.memory_space<vmem>>, vector<4x16xbf16>
    %cst_205 = arith.constant dense<0.000000e+00> : vector<256x16xf32>
    %254 = tpu.matmul %252, %253, %cst_205 {dimension_numbers = #tpu.dot_dimension_numbers<[1], [0], [0], [1], [0, 0, 1, 1], [], []>} : vector<256x4xbf16>, vector<4x16xbf16>, vector<256x16xf32> -> vector<256x16xf32>
    %c0_206 = arith.constant 0 : index
    %c0_207 = arith.constant 0 : index
    %255 = vector.load %arg11[%c0_206, %c0_207] : memref<1x16xf32, #tpu.memory_space<vmem>>, vector<1x16xf32>
    %256 = vector.broadcast %255 : vector<1x16xf32> to vector<256x16xf32>
    %257 = arith.addf %254, %256 : vector<256x16xf32>
    %cst_208 = arith.constant 2.500000e-01 : f32
    %258 = vector.broadcast %cst_208 : f32 to vector<256x16xf32>
    %259 = arith.mulf %258, %257 : vector<256x16xf32>
    %260 = arith.addf %36, %259 : vector<256x16xf32>
    %c0_209 = arith.constant 0 : index
    %c0_210 = arith.constant 0 : index
    %c0_211 = arith.constant 0 : index
    %261 = vector.load %arg12[%c0_209, %c0_210, %c0_211] : memref<1x256x16xf32, #tpu.memory_space<vmem>>, vector<1x256x16xf32>
    %262 = vector.shape_cast %261 : vector<1x256x16xf32> to vector<256x16xf32>
    %263 = vector.shape_cast %260 : vector<256x16xf32> to vector<1x256x16xf32>
    tpu.vector_store %arg12[%c0_209, %c0_210, %c0_211], %263 {strides = array<i32>} : memref<1x256x16xf32, #tpu.memory_space<vmem>>, vector<1x256x16xf32>,
    return
  }
  func.func @transform_0(%arg0: i32) -> (i32, i32, i32) {
    %c0_i32 = arith.constant 0 : i32
    %c0_i32_0 = arith.constant 0 : i32
    %c0_i32_1 = arith.constant 0 : i32
    return %arg0, %c0_i32, %c0_i32_0 : i32, i32, i32
  }
  func.func @transform_1(%arg0: i32) -> (i32, i32) {
    %c0_i32 = arith.constant 0 : i32
    %c0_i32_0 = arith.constant 0 : i32
    %c0_i32_1 = arith.constant 0 : i32
    return %c0_i32, %c0_i32_0 : i32, i32
  }
  func.func @transform_2(%arg0: i32) -> (i32, i32) {
    %c0_i32 = arith.constant 0 : i32
    %c0_i32_0 = arith.constant 0 : i32
    %c0_i32_1 = arith.constant 0 : i32
    return %c0_i32, %c0_i32_0 : i32, i32
  }
  func.func @transform_3(%arg0: i32) -> (i32, i32, i32, i32) {
    %c0_i32 = arith.constant 0 : i32
    %c0_i32_0 = arith.constant 0 : i32
    %c0_i32_1 = arith.constant 0 : i32
    %c0_i32_2 = arith.constant 0 : i32
    %c0_i32_3 = arith.constant 0 : i32
    return %c0_i32, %c0_i32_0, %c0_i32_1, %c0_i32_2 : i32, i32, i32, i32
  }
  func.func @transform_4(%arg0: i32) -> (i32, i32) {
    %c0_i32 = arith.constant 0 : i32
    %c0_i32_0 = arith.constant 0 : i32
    %c0_i32_1 = arith.constant 0 : i32
    return %c0_i32, %c0_i32_0 : i32, i32
  }
  func.func @transform_5(%arg0: i32) -> (i32, i32, i32, i32) {
    %c0_i32 = arith.constant 0 : i32
    %c0_i32_0 = arith.constant 0 : i32
    %c0_i32_1 = arith.constant 0 : i32
    %c0_i32_2 = arith.constant 0 : i32
    %c0_i32_3 = arith.constant 0 : i32
    return %c0_i32, %c0_i32_0, %c0_i32_1, %c0_i32_2 : i32, i32, i32, i32
  }
  func.func @transform_6(%arg0: i32) -> (i32, i32) {
    %c0_i32 = arith.constant 0 : i32
    %c0_i32_0 = arith.constant 0 : i32
    %c0_i32_1 = arith.constant 0 : i32
    return %c0_i32, %c0_i32_0 : i32, i32
  }
  func.func @transform_7(%arg0: i32) -> (i32, i32, i32, i32) {
    %c0_i32 = arith.constant 0 : i32
    %c0_i32_0 = arith.constant 0 : i32
    %c0_i32_1 = arith.constant 0 : i32
    %c0_i32_2 = arith.constant 0 : i32
    %c0_i32_3 = arith.constant 0 : i32
    return %c0_i32, %c0_i32_0, %c0_i32_1, %c0_i32_2 : i32, i32, i32, i32
  }
  func.func @transform_8(%arg0: i32) -> (i32, i32) {
    %c0_i32 = arith.constant 0 : i32
    %c0_i32_0 = arith.constant 0 : i32
    %c0_i32_1 = arith.constant 0 : i32
    return %c0_i32, %c0_i32_0 : i32, i32
  }
  func.func @transform_9(%arg0: i32) -> (i32, i32) {
    %c0_i32 = arith.constant 0 : i32
    %c0_i32_0 = arith.constant 0 : i32
    %c0_i32_1 = arith.constant 0 : i32
    return %c0_i32, %c0_i32_0 : i32, i32
  }
  func.func @transform_10(%arg0: i32) -> (i32, i32) {
    %c0_i32 = arith.constant 0 : i32
    %c0_i32_0 = arith.constant 0 : i32
    %c0_i32_1 = arith.constant 0 : i32
    return %c0_i32, %c0_i32_0 : i32, i32
  }
  func.func @transform_11(%arg0: i32) -> (i32, i32, i32) {
    %c0_i32 = arith.constant 0 : i32
    %c0_i32_0 = arith.constant 0 : i32
    %c0_i32_1 = arith.constant 0 : i32
    return %arg0, %c0_i32, %c0_i32_0 : i32, i32, i32
  }
}

</mosaic_0001>

<bundles_post_ra>
// kernel: tpu_custom_call.1
= control target key start
LH: loop header
LB: loop body
LE: loop exit
PB: predicated region body
PF: predicated region fallthrough
CT: control target
= control target key end

     0   :  { %s12452_s17 = smov 0   ;;  %s17240_s0 = inlined_call_operand.vmem [shape: f32[2,256,4], index: 0, kind: input, shape index: {}]   ;;  %s17241_s1 = inlined_call_operand.vmem [shape: bf16[4,16], index: 1, kind: input, shape index: {}]   ;;  %s17242_s2 = inlined_call_operand.vmem [shape: f32[1,16], index: 2, kind: input, shape index: {}]   ;;  %s17243_s3 = inlined_call_operand.vmem [shape: bf16[3,3,4,4], index: 3, kind: input, shape index: {}]   ;;  %s17244_s4 = inlined_call_operand.vmem [shape: f32[1,4], index: 4, kind: input, shape index: {}]   ;;  %s17245_s5 = inlined_call_operand.vmem [shape: bf16[3,3,4,4], index: 5, kind: input, shape index: {}]   ;;  %s17246_s6 = inlined_call_operand.vmem [shape: f32[1,4], index: 6, kind: input, shape index: {}]   ;;  %s17247_s7 = inlined_call_operand.vmem [shape: bf16[3,3,4,4], index: 7, kind: input, shape index: {}]   ;;  %s17248_s8 = inlined_call_operand.vmem [shape: f32[1,4], index: 8, kind: input, shape index: {}]   ;;  %s17249_s9 = inlined_call_operand.vmem [shape: bf16[4,16], index: 9, kind: input, shape index: {}]   ;;  %s17250_s10 = inlined_call_operand.vmem [shape: f32[1,16], index: 10, kind: input, shape index: {}]   ;;  %s17251_s11 = inlined_call_operand.vmem [shape: f32[2,256,16], index: 11, kind: output, shape index: {}]  }
   0x1 LB: > { %s10321_s18 = sadd.s32 4294967295, %s12389_s17   ;;  %p10325_p0 = scmp.ge.s32.totalorder %s12389_s17, 1  ;;  %s12389_s17 = sphi %s12452_s17, %s21_s17  }
   0x2   : > { %p337_p1 = scmp.lt.s32.totalorder %s12389_s17, 3 }
   0x4   : > { %p338_p2 = pnand %p10325_p0, %p337_p1 }
   0x6   : > { %341 = sbr.rel (%p338_p2) target bundleno = 1724 (0x6bc), region = 64 }
   0xb   : > { %v1052_v0 = vld [vmem:[%s17241_s1] sm:$0x3]  ;;  %vm1108_vm0 = vcmask 1041408   ;;  %p12463_p3 = scmp.lt.s32.totalorder %s10321_s18, 1  ;;  %vm420_vm1 = vcmask 31744   ;;  %v17278_v4 = vmov 0.0   ;;  %v427_v9 = vlaneseq }
   0xc   : > { %12341 = vmatprep.subr.msk.bf16.mxu1 %vm1108_vm0, %v1052_v0  ;;  %v1110_v1 = vsel %vm1108_vm0, %v1052_v0, 0  ;;  %12340 = vmatprep.subr.msk.bf16.mxu0 %vm1108_vm0, %v1052_v0  ;;  %v1424_v2 = vld [vmem:[%s17243_s3] sm:$0x3]  ;;  %v10396_v3 = vld [vmem:[%s17243_s3 + $0x2] sm:$0x3]  ;;  %421 = vst.msk [vmem:[#allocation2] sm:$0xff] %vm420_vm1, %v17278_v4 }
   0xd   : > { %422 = vst.msk [vmem:[#allocation2 + $0x8] sm:$0xff] %vm420_vm1, %v17278_v4  ;;  %423 = vst.msk [vmem:[#allocation2 + $0x10] sm:$0xff] %vm420_vm1, %v17278_v4  ;;  %12339 = vmatpush3.bf16.msra.mxu1 %v1110_v1  ;;  %11353 = vmatpush3.bf16.msra.mxu0 %v1110_v1  ;;  %s18432_s18 = smov (!%p12463_p3, %s10321_s18), 1  ;;  %v1474_v8 = vsel %vm1108_vm0, %v1424_v2, 0  ;;  %v1768_v10 = vsel %vm1108_vm0, %v10396_v3, 0  ;;  %v12579_v45 = vshrl.u32 %v427_v9, 7 }
   0xe   : > { %424 = vst.msk [vmem:[#allocation2 + $0x118] sm:$0xff] %vm420_vm1, %v17278_v4  ;;  %425 = vst.msk [vmem:[#allocation2 + $0x120] sm:$0xff] %vm420_vm1, %v17278_v4  ;;  %12342 = vmatprep.subr.msk.bf16.mxu1 %vm1108_vm0, %v1424_v2  ;;  %12343 = vmatprep.subr.msk.bf16.mxu0 %vm1108_vm0, %v10396_v3  ;;  %s10857_s26 = sshll.u32 %s18432_s18, 8  ;;  %v12526_v25 = vld [vmem:[%s17243_s3 + $0x4] sm:$0x3] }
   0xf   : > { %426 = vst.msk [vmem:[#allocation2 + $0x128] sm:$0xff] %vm420_vm1, %v17278_v4  ;;  %s12500_s29 = scalar_lea.vmem %s17240_s0, %s10857_s26  ;;  %v12545_v32 = vld [vmem:[%s17243_s3 + $0x6] sm:$0x3]  ;;  %s17079_s15 = scalar_lea.vmem %s17251_s11, %s10857_s26 }
  0x10   : > { %v404_v5 = vld [vmem:[%s12500_s29 + $0x80] sm:$0xff]  ;;  %v405_v6 = vld [vmem:[%s12500_s29 + $0x88] sm:$0xff]  ;;  %v12505_v7 = vld [vmem:[%s12500_s29 + $0x90] sm:$0xff] }
  0x11   : > { %17502 = vst [vmem:[#allocation3_spill] sm:$0xff] %v12505_v7  ;;  %v1044_v11 = vpack.c.bf16 %v405_v6, %v404_v5  ;;  %v1289_v12 = vmax.f32 %v404_v5, 0.0  ;;  %v1290_v13 = vmax.f32 %v405_v6, 0.0  ;;  %v12510_v14 = vld [vmem:[%s12500_s29 + $0x98] sm:$0xff]  ;;  %v17265_v15 = vmax.f32 %v12505_v7, 0.0  ;;  %v388_v16 = vld [vmem:[%s12500_s29] sm:$0xff] }
  0x12   : > { %17503 = vst [vmem:[#allocation4_spill] sm:$0xff] %v12510_v14  ;;  %v389_v17 = vld [vmem:[%s12500_s29 + $0x8] sm:$0xff]  ;;  %v1045_v18 = vpack.c.bf16 %v12510_v14, %v12505_v7  ;;  %v17264_v19 = vmax.f32 %v12510_v14, 0.0  ;;  %v1273_v21 = vmax.f32 %v388_v16, 0.0  ;;  %v390_v22 = vld [vmem:[%s12500_s29 + $0x10] sm:$0xff]  ;;  %v391_v23 = vld [vmem:[%s12500_s29 + $0x18] sm:$0xff] }
  0x13   : > { %v1036_v20 = vpack.c.bf16 %v389_v17, %v388_v16  ;;  %v12521_v24 = vld [vmem:[%s12500_s29 + $0xa0] sm:$0xff]  ;;  %11370 = vmatprep.mubr.msk.bf16.mxu1 %vm420_vm1, %v1044_v11  ;;  %1321 = vst.msk [vmem:[#allocation2 + $0x98] sm:$0xff] %vm420_vm1, %v1289_v12  ;;  %1322 = vst.msk [vmem:[#allocation2 + $0xa0] sm:$0xff] %vm420_vm1, %v1290_v13  ;;  %v12531_v26 = vpack.c.bf16 %v1290_v13, %v1289_v12  ;;  %v1274_v27 = vmax.f32 %v389_v17, 0.0  ;;  %v1275_v29 = vmax.f32 %v390_v22, 0.0  ;;  %v12537_v30 = vld [vmem:[%s12500_s29 + $0xa8] sm:$0xff] }
  0x14   : > { %17504 = vst [vmem:[#allocation5_spill] sm:$0xff] %v12521_v24  ;;  %1323 = vst.msk [vmem:[#allocation2 + $0xa8] sm:$0xff] %vm420_vm1, %v17265_v15  ;;  %v1037_v28 = vpack.c.bf16 %v391_v23, %v390_v22  ;;  %v12540_v31 = vld [vmem:[%s12500_s29 + $0xb0] sm:$0xff]  ;;  %11371 = vmatmul.mubr.msk.bf16.vlgmr.msra.gmra.mxu1 %vm420_vm1, %v1045_v18  ;;  %v1276_v33 = vmax.f32 %v391_v23, 0.0  ;;  %v1046_v34 = vpack.c.bf16 %v12537_v30, %v12521_v24  ;;  %v17263_v35 = vmax.f32 %v12521_v24, 0.0  ;;  %v12558_v37 = vld [vmem:[%s12500_s29 + $0xb8] sm:$0xff] }
  0x15   : > { %17505 = vst [vmem:[#allocation6_spill] sm:$0xff] %v12531_v26  ;;  %17506 = vst [vmem:[#allocation7_spill] sm:$0xff] %v12537_v30  ;;  %11354 = vmatprep.mubr.msk.bf16.mxu0 %vm420_vm1, %v1036_v20  ;;  %v17262_v36 = vmax.f32 %v12537_v30, 0.0  ;;  %v12561_v38 = vld [vmem:[%s12500_s29 + $0x20] sm:$0xff]  ;;  %v12564_v39 = vld [vmem:[%s12500_s29 + $0x28] sm:$0xff]  ;;  %11387 = vmatpush3.bf16.msra.mxu1 %v1474_v8  ;;  %v12567_v40 = vpack.c.bf16 %v1274_v27, %v1273_v21  ;;  %v17261_v41 = vmax.f32 %v12540_v31, 0.0 }
  0x16   : > { %17507 = vst [vmem:[#allocation8_spill] sm:$0xff] %v12540_v31  ;;  %1324 = vst.msk [vmem:[#allocation2 + $0xb0] sm:$0xff] %vm420_vm1, %v17264_v19  ;;  %11355 = vmatmul.mubr.msk.bf16.vlgmr.msra.gmra.mxu0 %vm420_vm1, %v1037_v28  ;;  %v17260_v42 = vmax.f32 %v12558_v37, 0.0  ;;  %v12574_v43 = vld [vmem:[%s12500_s29 + $0x30] sm:$0xff]  ;;  %v12577_v44 = vld [vmem:[%s12500_s29 + $0x38] sm:$0xff]  ;;  %v12582_v46 = vpack.c.bf16 %v1276_v33, %v1275_v29  ;;  %11374 = vmatprep.mubr.msk.bf16.mxu1 %vm420_vm1, %v1046_v34  ;;  %v1038_v47 = vpack.c.bf16 %v12564_v39, %v12561_v38 }
  0x17   : > { %1305 = vst.msk [vmem:[#allocation2 + $0x18] sm:$0xff] %vm420_vm1, %v1273_v21  ;;  %17508 = vst [vmem:[#allocation9_spill] sm:$0xff] %v12558_v37  ;;  %v17277_v48 = vmax.f32 %v12561_v38, 0.0  ;;  %v17276_v49 = vmax.f32 %v12564_v39, 0.0  ;;  %v12596_v50 = vld [vmem:[%s12500_s29 + $0xc0] sm:$0xff]  ;;  %v12599_v51 = vld [vmem:[%s12500_s29 + $0xc8] sm:$0xff]  ;;  %11421 = vmatpush3.bf16.msra.mxu0 %v1768_v10  ;;  %v1047_v52 = vpack.c.bf16 %v12558_v37, %v12540_v31  ;;  %12344 = vmatprep.subr.msk.bf16.mxu1 %vm1108_vm0, %v12526_v25 }
  0x18   : > { %1306 = vst.msk [vmem:[#allocation2 + $0x20] sm:$0xff] %vm420_vm1, %v1274_v27  ;;  %17509 = vst [vmem:[#allocation10_spill] sm:$0xff] %v12567_v40  ;;  %v17275_v53 = vmax.f32 %v12574_v43, 0.0  ;;  %v17274_v54 = vmax.f32 %v12577_v44, 0.0  ;;  %v12612_v55 = vld [vmem:[%s12500_s29 + $0xd0] sm:$0xff]  ;;  %v12615_v56 = vld [vmem:[%s12500_s29 + $0x40] sm:$0xff]  ;;  %12345 = vmatprep.subr.msk.bf16.mxu0 %vm1108_vm0, %v12545_v32  ;;  %11358 = vmatprep.mubr.msk.bf16.mxu0 %vm420_vm1, %v1038_v47  ;;  %v1039_v58 = vpack.c.bf16 %v12577_v44, %v12574_v43 }
  0x19   : > { %1307 = vst.msk [vmem:[#allocation2 + $0x28] sm:$0xff] %vm420_vm1, %v1275_v29  ;;  %1308 = vst.msk [vmem:[#allocation2 + $0x30] sm:$0xff] %vm420_vm1, %v1276_v33  ;;  %v12618_v57 = vld [vmem:[%s12500_s29 + $0x48] sm:$0xff]  ;;  %v17259_v59 = vmax.f32 %v12596_v50, 0.0  ;;  %v17258_v60 = vmax.f32 %v12599_v51, 0.0  ;;  %v12636_v61 = vld [vmem:[%s12500_s29 + $0xd8] sm:$0xff]  ;;  %v1048_v63 = vpack.c.bf16 %v12599_v51, %v12596_v50 }
  0x1a   : > { %17510 = vst [vmem:[#allocation11_spill] sm:$0xff] %v12582_v46  ;;  %1325 = vst.msk [vmem:[#allocation2 + $0xb8] sm:$0xff] %vm420_vm1, %v17263_v35  ;;  %v17257_v62 = vmax.f32 %v12612_v55, 0.0  ;;  %v17256_v0 = vmax.f32 %v12636_v61, 0.0  ;;  %v17273_v1 = vmax.f32 %v12615_v56, 0.0  ;;  %v17272_v2 = vmax.f32 %v12618_v57, 0.0 }
  0x1b   : > { %1326 = vst.msk [vmem:[#allocation2 + $0xc0] sm:$0xff] %vm420_vm1, %v17262_v36  ;;  %17511 = vst [vmem:[#allocation12_spill] sm:$0xff] %v12596_v50  ;;  %v12651_v3 = vld [vmem:[%s12500_s29 + $0x50] sm:$0xff]  ;;  %v12654_v5 = vld [vmem:[%s12500_s29 + $0x58] sm:$0xff]  ;;  %v1040_v6 = vpack.c.bf16 %v12618_v57, %v12615_v56  ;;  %v464_v13 = vand.u32 15, %v12579_v45  ;;  %v436_v36 = vadd.s32 64, %v12579_v45 }
  0x1c   : > { %17512 = vst [vmem:[#allocation13_spill] sm:$0xff] %v12599_v51  ;;  %1327 = vst.msk [vmem:[#allocation2 + $0xc8] sm:$0xff] %vm420_vm1, %v17261_v41  ;;  %v17271_v8 = vmax.f32 %v12651_v3, 0.0  ;;  %v17270_v9 = vmax.f32 %v12654_v5, 0.0  ;;  %v12670_v10 = vld [vmem:[%s12500_s29 + $0xe0] sm:$0xff]  ;;  %v12673_v11 = vld [vmem:[%s12500_s29 + $0xe8] sm:$0xff]  ;;  %11375 = vmatmul.mubr.msk.bf16.gmra.mxu1 %vm420_vm1, %v1047_v52 }
  0x1d   : > { %1328 = vst.msk [vmem:[#allocation2 + $0xd0] sm:$0xff] %vm420_vm1, %v17260_v42  ;;  %17513 = vst [vmem:[#allocation14_spill] sm:$0xff] %v12612_v55  ;;  %v12676_v12 = vld [vmem:[%s12500_s29 + $0xf0] sm:$0xff]  ;;  %v17255_v16 = vmax.f32 %v12670_v10, 0.0  ;;  %v17254_v17 = vmax.f32 %v12673_v11, 0.0  ;;  %v12691_v18 = vld [vmem:[%s12500_s29 + $0xf8] sm:$0xff]  ;;  %11378 = vmatprep.mubr.msk.bf16.mxu1 %vm420_vm1, %v1048_v63 }
  0x1e   : > { %1309 = vst.msk [vmem:[#allocation2 + $0x38] sm:$0xff] %vm420_vm1, %v17277_v48  ;;  %1310 = vst.msk [vmem:[#allocation2 + $0x40] sm:$0xff] %vm420_vm1, %v17276_v49  ;;  %v17253_v20 = vmax.f32 %v12676_v12, 0.0  ;;  %v12695_v21 = vld [vmem:[%s12500_s29 + $0x60] sm:$0xff]  ;;  %v12698_v22 = vld [vmem:[%s12500_s29 + $0x68] sm:$0xff]  ;;  %v17252_v23 = vmax.f32 %v12691_v18, 0.0  ;;  %11359 = vmatmul.mubr.msk.bf16.gmra.mxu0 %vm420_vm1, %v1039_v58  ;;  %v1049_v58 = vpack.c.bf16 %v12636_v61, %v12612_v55 }
  0x1f   : > { %17514 = vst [vmem:[#allocation15_spill] sm:$0xff] %v12636_v61  ;;  %1311 = vst.msk [vmem:[#allocation2 + $0x48] sm:$0xff] %vm420_vm1, %v17275_v53  ;;  %v17269_v27 = vmax.f32 %v12695_v21, 0.0  ;;  %v17268_v28 = vmax.f32 %v12698_v22, 0.0  ;;  %v12711_v29 = vld [vmem:[%s12500_s29 + $0x70] sm:$0xff]  ;;  %v12714_v33 = vld [vmem:[%s12500_s29 + $0x78] sm:$0xff]  ;;  %11362 = vmatprep.mubr.msk.bf16.mxu0 %vm420_vm1, %v1040_v6  ;;  %v1041_v6 = vpack.c.bf16 %v12654_v5, %v12651_v3 }
  0x20   : > { %1312 = vst.msk [vmem:[#allocation2 + $0x50] sm:$0xff] %vm420_vm1, %v17274_v54  ;;  %1329 = vst.msk [vmem:[#allocation2 + $0xd8] sm:$0xff] %vm420_vm1, %v17259_v59  ;;  %v17267_v34 = vmax.f32 %v12711_v29, 0.0  ;;  %v17266_v47 = vmax.f32 %v12714_v33, 0.0  ;;  %v430_v52 = vadd.s32 16, %v12579_v45  ;;  %vm844_vm2 = vcmp.ge.s32.totalorder %v464_v13, 1 }
  0x21   : > { %1330 = vst.msk [vmem:[#allocation2 + $0xe0] sm:$0xff] %vm420_vm1, %v17258_v60  ;;  %1331 = vst.msk [vmem:[#allocation2 + $0xe8] sm:$0xff] %vm420_vm1, %v17257_v62  ;;  %v432_v63 = vadd.s32 32, %v12579_v45  ;;  %v1345_v60 = vld [vmem:[#allocation2 + $0xf] sm:$0xff]  ;;  %v434_v59 = vadd.s32 48, %v12579_v45  ;;  %v12777_v35 = vld [vmem:[#allocation2 + $0x27] sm:$0xff] }
  0x22   : > { %17515 = vst [vmem:[#allocation16_spill] sm:$0xff] %v12670_v10  ;;  %17516 = vst [vmem:[#allocation17_spill] sm:$0xff] %v12673_v11  ;;  %v1669_v42 = vld [vmem:[#allocation2 + $0x8] sm:$0xff]  ;;  %v1670_v41 = vld [vmem:[#allocation2 + $0x10] sm:$0xff]  ;;  %v520_v19 = vand.u32 15, %v436_v36  ;;  %v438_v36 = vadd.s32 80, %v12579_v45 }
  0x23   : > { %17517 = vst [vmem:[#allocation18_spill] sm:$0xff] %v12676_v12  ;;  %1332 = vst.msk [vmem:[#allocation2 + $0xf0] sm:$0xff] %vm420_vm1, %v17256_v0  ;;  %v478_v0 = vand.u32 15, %v430_v52  ;;  %v492_v13 = vand.u32 15, %v432_v63  ;;  %v1051_v52 = vpack.c.bf16 %v12691_v18, %v12676_v12  ;;  %v506_v63 = vand.u32 15, %v434_v59  ;;  %v1674_v15 = vld [vmem:[#allocation2 + $0x30] sm:$0xff] }
  0x24   : > { %1313 = vst.msk [vmem:[#allocation2 + $0x58] sm:$0xff] %vm420_vm1, %v17273_v1  ;;  %1314 = vst.msk [vmem:[#allocation2 + $0x60] sm:$0xff] %vm420_vm1, %v17272_v2  ;;  %11379 = vmatmul.mubr.msk.bf16.gmra.mxu1 %vm420_vm1, %v1049_v58  ;;  %v1043_v58 = vpack.c.bf16 %v12714_v33, %v12711_v29  ;;  %vm852_vm6 = vcmp.ge.s32.totalorder %v520_v19, 1  ;;  %v17526_v12 = vmov 0.0   ;;  %v12899_v30 = vld [vmem:[#allocation2 + $0xa7] sm:$0xff] }
  0x25   : > { %17518 = vst [vmem:[#allocation19_spill] sm:$0xff] %v12691_v18  ;;  %1315 = vst.msk [vmem:[#allocation2 + $0x68] sm:$0xff] %vm420_vm1, %v17271_v8  ;;  %vm846_vm3 = vcmp.ge.s32.totalorder %v478_v0, 1  ;;  %vm848_vm4 = vcmp.ge.s32.totalorder %v492_v13, 1  ;;  %v1701_v0 = vpack.c.bf16 %v1670_v41, %v1669_v42  ;;  %v1671_v41 = vld [vmem:[#allocation2 + $0x18] sm:$0xff]  ;;  %v1672_v42 = vld [vmem:[#allocation2 + $0x20] sm:$0xff] }
  0x26   : > { %1316 = vst.msk [vmem:[#allocation2 + $0x70] sm:$0xff] %vm420_vm1, %v17270_v9  ;;  %1333 = vst.msk [vmem:[#allocation2 + $0xf8] sm:$0xff] %vm420_vm1, %v17255_v16  ;;  %v1344_v16 = vld [vmem:[#allocation2 + $0x7] sm:$0xff]  ;;  %11363 = vmatmul.mubr.msk.bf16.gmra.mxu0 %vm420_vm1, %v1041_v6  ;;  %v12775_v6 = vsel %vm848_vm4, 1.0, %v17278_v4  ;;  %vm850_vm5 = vcmp.ge.s32.totalorder %v506_v63, 1  ;;  %v12803_v9 = vsel %vm852_vm6, 1.0, %v17278_v4 }
  0x27   : > { %1334 = vst.msk [vmem:[#allocation2 + $0x100] sm:$0xff] %vm420_vm1, %v17254_v17  ;;  %1335 = vst.msk [vmem:[#allocation2 + $0x108] sm:$0xff] %vm420_vm1, %v17253_v20  ;;  %v1042_v20 = vpack.c.bf16 %v12698_v22, %v12695_v21  ;;  %v12756_v17 = vsel %vm844_vm2, 1.0, %v17278_v4  ;;  %v1380_v59 = vmul.f32 %v12775_v6, %v12777_v35  ;;  %v12805_v19 = vld [vmem:[#allocation2 + $0x47] sm:$0xff]  ;;  %v534_v8 = vand.u32 15, %v438_v36 }
  0x28   : > { %1336 = vst.msk [vmem:[#allocation2 + $0x110] sm:$0xff] %vm420_vm1, %v17252_v23  ;;  %1317 = vst.msk [vmem:[#allocation2 + $0x78] sm:$0xff] %vm420_vm1, %v17269_v27  ;;  %v1050_v23 = vpack.c.bf16 %v12673_v11, %v12670_v10  ;;  %v1376_v62 = vmul.f32 %v12756_v17, %v1344_v16  ;;  %v12770_v16 = vsel %vm846_vm3, 1.0, %v17278_v4  ;;  %v1676_v36 = vld [vmem:[#allocation2 + $0x40] sm:$0xff] }
  0x29   : > { %1318 = vst.msk [vmem:[#allocation2 + $0x80] sm:$0xff] %vm420_vm1, %v17268_v28  ;;  %1319 = vst.msk [vmem:[#allocation2 + $0x88] sm:$0xff] %vm420_vm1, %v17267_v34  ;;  %11366 = vmatprep.mubr.msk.bf16.mxu0 %vm420_vm1, %v1042_v20  ;;  %v12772_v20 = vld [vmem:[#allocation2 + $0x17] sm:$0xff]  ;;  %v12797_v34 = vsel %vm850_vm5, 1.0, %v17278_v4  ;;  %vm854_vm7 = vcmp.ge.s32.totalorder %v534_v8, 1  ;;  %v12925_v40 = vld [vmem:[#allocation2 + $0xc7] sm:$0xff] }
  0x2a   : > { %1320 = vst.msk [vmem:[#allocation2 + $0x90] sm:$0xff] %vm420_vm1, %v17266_v47  ;;  %17519 = vst [vmem:[#allocation20_spill] sm:$0xff] %v12756_v17  ;;  %11382 = vmatprep.mubr.msk.bf16.mxu1 %vm420_vm1, %v1050_v23  ;;  %v1408_v23 = vpack.c.bf16 %v1345_v60, %v1376_v62  ;;  %v1378_v13 = vmul.f32 %v12770_v16, %v12772_v20  ;;  %v12784_v60 = vld [vmem:[#allocation2 + $0x1f] sm:$0xff]  ;;  %v12790_v62 = vld [vmem:[#allocation2 + $0x2f] sm:$0xff]  ;;  %v1702_v47 = vpack.c.bf16 %v1672_v42, %v1671_v41 }
  0x2b   : > { %17520 = vst [vmem:[#allocation21_spill] sm:$0xff] %v12770_v16  ;;  %17521 = vst [vmem:[#allocation22_spill] sm:$0xff] %v12775_v6  ;;  %v12799_v28 = vld [vmem:[#allocation2 + $0x37] sm:$0xff]  ;;  %v1410_v63 = vpack.c.bf16 %v12790_v62, %v1380_v59  ;;  %v12815_v41 = vld [vmem:[%s17243_s3 + $0x8] sm:$0x3]  ;;  %v1384_v42 = vmul.f32 %v12803_v9, %v12805_v19  ;;  %v12833_v1 = vsel %vm854_vm7, 1.0, %v17278_v4 }
  0x2c   : > { %11383 = vmatmul.mubr.msk.bf16.gmra.mxu1 %vm420_vm1, %v1051_v52  ;;  %v1673_v52 = vld [vmem:[#allocation2 + $0x28] sm:$0xff]  ;;  %17522 = vst [vmem:[#allocation23_spill] sm:$0xff] %v12797_v34  ;;  %17523 = vst [vmem:[#allocation24_spill] sm:$0xff] %v12803_v9  ;;  %v1675_v59 = vld [vmem:[#allocation2 + $0x38] sm:$0xff] }
  0x2d   : > { %11388 = vmatprep.mubr.msk.bf16.mxu1 %vm420_vm1, %v1408_v23  ;;  %v1409_v23 = vpack.c.bf16 %v12784_v60, %v1378_v13  ;;  %v1703_v27 = vpack.c.bf16 %v1674_v15, %v1673_v52  ;;  %v2420_v13 = vsel %vm1108_vm0, %v12545_v32, 0  ;;  %v12818_v15 = vld [vmem:[#allocation2 + $0x3f] sm:$0xff]  ;;  %v12824_v32 = vld [vmem:[#allocation2 + $0x4f] sm:$0xff]  ;;  %v442_v52 = vadd.s32 112, %v12579_v45  ;;  %17524 = vst [vmem:[#allocation25_spill] sm:$0xff] %v12833_v1  ;;  %v12835_v8 = vld [vmem:[#allocation2 + $0x57] sm:$0xff] }
  0x2e   : > { %11367 = vmatmul.mubr.msk.bf16.gmra.mxu0 %vm420_vm1, %v1043_v58  ;;  %v440_v58 = vadd.s32 96, %v12579_v45  ;;  %v1682_v48 = vld [vmem:[#allocation2 + $0x70] sm:$0xff]  ;;  %17531 = vst [vmem:[#allocation31_spill] sm:$0xff] %v12899_v30  ;;  %17536 = vst [vmem:[#allocation36_spill] sm:$0xff] %v12925_v40 }
  0x2f   : > { %11422 = vmatprep.mubr.msk.bf16.mxu0 %vm420_vm1, %v1701_v0  ;;  %v2094_v0 = vsel %vm1108_vm0, %v12526_v25, 0  ;;  %v1382_v25 = vmul.f32 %v12797_v34, %v12799_v28 }
  0x30   : > { %v548_v2 = vand.u32 15, %v440_v58  ;;  %v1677_v58 = vld [vmem:[#allocation2 + $0x48] sm:$0xff] }
  0x31   : > { %v12873_v61 = vld [vmem:[#allocation2 + $0x87] sm:$0xff] }
  0x32   : > { %vm856_vm8 = vcmp.ge.s32.totalorder %v548_v2, 1  ;;  %v12840_v2 = vld [vmem:[#allocation2 + $0x67] sm:$0xff] }
  0x33   : > { %v12838_v53 = vsel %vm856_vm8, 1.0, %v17278_v4 }
  0x34   : > { %11389 = vmatmul.mubr.msk.bf16.vlgmr.msra.gmra.mxu1 %vm420_vm1, %v1409_v23  ;;  %v1678_v23 = vld [vmem:[#allocation2 + $0x50] sm:$0xff]  ;;  %17525 = vst [vmem:[#allocation26_spill] sm:$0xff] %v12838_v53 }
  0x35   : > { %11455 = vmatpush3.bf16.msra.mxu1 %v2094_v0  ;;  %11392 = vmatprep.mubr.msk.bf16.mxu1 %vm420_vm1, %v1410_v63  ;;  %v1411_v0 = vpack.c.bf16 %v12818_v15, %v1382_v25  ;;  %v1704_v63 = vpack.c.bf16 %v1676_v36, %v1675_v59  ;;  %v1705_v54 = vpack.c.bf16 %v1678_v23, %v1677_v58  ;;  %v12845_v25 = vld [vmem:[%s17243_s3 + $0xa] sm:$0x3]  ;;  %v12854_v59 = vld [vmem:[#allocation2 + $0x5f] sm:$0xff]  ;;  %v12859_v23 = vld [vmem:[#allocation2 + $0x6f] sm:$0xff] }
  0x36   : > { %11423 = vmatmul.mubr.msk.bf16.vlgmr.msra.gmra.mxu0 %vm420_vm1, %v1702_v47  ;;  %v444_v47 = vadd.s32 128, %v12579_v45  ;;  %12346 = vmatprep.subr.msk.bf16.mxu1 %vm1108_vm0, %v12815_v41  ;;  %v1388_v36 = vmul.f32 %v12838_v53, %v12840_v2  ;;  %v1680_v58 = vld [vmem:[#allocation2 + $0x60] sm:$0xff] }
  0x37   : > { %11426 = vmatprep.mubr.msk.bf16.mxu0 %vm420_vm1, %v1703_v27  ;;  %11489 = vmatpush3.bf16.msra.mxu0 %v2420_v13  ;;  %v1412_v27 = vpack.c.bf16 %v12824_v32, %v1384_v42  ;;  %v562_v13 = vand.u32 15, %v442_v52  ;;  %v1386_v42 = vmul.f32 %v12833_v1, %v12835_v8  ;;  %v1679_v52 = vld [vmem:[#allocation2 + $0x58] sm:$0xff] }
  0x38   : > { %v576_v49 = vand.u32 15, %v444_v47  ;;  %12347 = vmatprep.subr.msk.bf16.mxu0 %vm1108_vm0, %v12845_v25  ;;  %v446_v47 = vadd.s32 144, %v12579_v45  ;;  %v1706_v4 = vpack.c.bf16 %v1680_v58, %v1679_v52  ;;  %v1414_v18 = vpack.c.bf16 %v12859_v23, %v1388_v36  ;;  %v12880_v36 = vld [vmem:[#allocation2 + $0x7f] sm:$0xff] }
  0x39   : > { %vm858_vm9 = vcmp.ge.s32.totalorder %v562_v13, 1  ;;  %v1683_v52 = vld [vmem:[#allocation2 + $0x78] sm:$0xff]  ;;  %v1684_v58 = vld [vmem:[#allocation2 + $0x80] sm:$0xff] }
  0x3a   : > { %vm860_vm10 = vcmp.ge.s32.totalorder %v576_v49, 1  ;;  %v12866_v11 = vsel %vm858_vm9, 1.0, %v17526_v12  ;;  %v590_v55 = vand.u32 15, %v446_v47  ;;  %v12885_v47 = vld [vmem:[#allocation2 + $0x8f] sm:$0xff]  ;;  %v1708_v51 = vpack.c.bf16 %v1684_v58, %v1683_v52  ;;  %v1687_v58 = vld [vmem:[#allocation2 + $0x98] sm:$0xff] }
  0x3b   : > { %17527 = vst [vmem:[#allocation27_spill] sm:$0xff] %v12866_v11  ;;  %v12871_v13 = vsel %vm860_vm10, 1.0, %v17526_v12 }
  0x3c   : > { %11393 = vmatmul.mubr.msk.bf16.gmra.mxu1 %vm420_vm1, %v1411_v0  ;;  %v1681_v0 = vld [vmem:[#allocation2 + $0x68] sm:$0xff]  ;;  %17528 = vst [vmem:[#allocation28_spill] sm:$0xff] %v12871_v13  ;;  %vm862_vm11 = vcmp.ge.s32.totalorder %v590_v55, 1 }
  0x3d   : > { %11396 = vmatprep.mubr.msk.bf16.mxu1 %vm420_vm1, %v1412_v27  ;;  %v1413_v27 = vpack.c.bf16 %v12854_v59, %v1386_v42  ;;  %v1707_v10 = vpack.c.bf16 %v1682_v48, %v1681_v0  ;;  %v1392_v48 = vmul.f32 %v12871_v13, %v12873_v61  ;;  %v450_v0 = vadd.s32 176, %v12579_v45 }
  0x3e   : > { %11427 = vmatmul.mubr.msk.bf16.gmra.mxu0 %vm420_vm1, %v1704_v63  ;;  %v448_v63 = vadd.s32 160, %v12579_v45  ;;  %v12892_v37 = vsel %vm862_vm11, 1.0, %v17526_v12 }
  0x3f   : > { %11430 = vmatprep.mubr.msk.bf16.mxu0 %vm420_vm1, %v1705_v54  ;;  %v12868_v54 = vld [vmem:[#allocation2 + $0x77] sm:$0xff]  ;;  %v1416_v50 = vpack.c.bf16 %v12885_v47, %v1392_v48  ;;  %17529 = vst [vmem:[#allocation29_spill] sm:$0xff] %v12892_v37  ;;  %v618_v24 = vand.u32 15, %v450_v0  ;;  %v12906_v48 = vld [vmem:[#allocation2 + $0x9f] sm:$0xff]  ;;  %v12911_v0 = vld [vmem:[#allocation2 + $0xaf] sm:$0xff] }
  0x40   : > { %v604_v49 = vand.u32 15, %v448_v63  ;;  %v1390_v42 = vmul.f32 %v12866_v11, %v12868_v54  ;;  %v1685_v63 = vld [vmem:[#allocation2 + $0x88] sm:$0xff]  ;;  %17532 = vst [vmem:[#allocation32_spill] sm:$0xff] %v12911_v0 }
  0x41   : > { %vm866_vm13 = vcmp.ge.s32.totalorder %v618_v24, 1 }
  0x42   : > { %vm864_vm12 = vcmp.ge.s32.totalorder %v604_v49, 1  ;;  %v12918_v26 = vsel %vm866_vm13, 1.0, %v17526_v12 }
  0x43   : > { %v12897_v55 = vsel %vm864_vm12, 1.0, %v17526_v12  ;;  %17533 = vst [vmem:[#allocation33_spill] sm:$0xff] %v12918_v26 }
  0x44   : > { %11397 = vmatmul.mubr.msk.bf16.gmra.mxu1 %vm420_vm1, %v1413_v27  ;;  %v1686_v27 = vld [vmem:[#allocation2 + $0x90] sm:$0xff]  ;;  %17530 = vst [vmem:[#allocation30_spill] sm:$0xff] %v12897_v55  ;;  %v1396_v52 = vmul.f32 %v12897_v55, %v12899_v30 }
  0x45   : > { %11400 = vmatprep.mubr.msk.bf16.mxu1 %vm420_vm1, %v1414_v18  ;;  %v1415_v18 = vpack.c.bf16 %v12880_v36, %v1390_v42  ;;  %v1709_v31 = vpack.c.bf16 %v1686_v27, %v1685_v63  ;;  %v1688_v63 = vld [vmem:[#allocation2 + $0xa0] sm:$0xff]  ;;  %v454_v27 = vadd.s32 208, %v12579_v45  ;;  %v12958_v30 = vld [vmem:[#allocation2 + $0xd7] sm:$0xff] }
  0x46   : > { %11431 = vmatmul.mubr.msk.bf16.gmra.mxu0 %vm420_vm1, %v1706_v4  ;;  %v452_v4 = vadd.s32 192, %v12579_v45  ;;  %v1710_v14 = vpack.c.bf16 %v1688_v63, %v1687_v58  ;;  %v1418_v7 = vpack.c.bf16 %v12911_v0, %v1396_v52  ;;  %v12932_v52 = vld [vmem:[#allocation2 + $0xbf] sm:$0xff] }
  0x47   : > { %11434 = vmatprep.mubr.msk.bf16.mxu0 %vm420_vm1, %v1707_v10  ;;  %v12894_v10 = vld [vmem:[#allocation2 + $0x97] sm:$0xff]  ;;  %v646_v55 = vand.u32 15, %v454_v27  ;;  %v12937_v27 = vld [vmem:[#allocation2 + $0xcf] sm:$0xff] }
  0x48   : > { %v632_v49 = vand.u32 15, %v452_v4  ;;  %v1394_v42 = vmul.f32 %v12892_v37, %v12894_v10  ;;  %v1689_v4 = vld [vmem:[#allocation2 + $0xa8] sm:$0xff]  ;;  %v1691_v63 = vld [vmem:[#allocation2 + $0xb8] sm:$0xff] }
  0x49   : > { %vm870_vm15 = vcmp.ge.s32.totalorder %v646_v55, 1 }
  0x4a   : > { %vm868_vm14 = vcmp.ge.s32.totalorder %v632_v49, 1 }
  0x4b   : > { %v12923_v24 = vsel %vm868_vm14, 1.0, %v17526_v12 }
  0x4c   : > { %11401 = vmatmul.mubr.msk.bf16.gmra.mxu1 %vm420_vm1, %v1415_v18  ;;  %v1690_v18 = vld [vmem:[#allocation2 + $0xb0] sm:$0xff]  ;;  %17535 = vst [vmem:[#allocation35_spill] sm:$0xff] %v12923_v24  ;;  %v1400_v58 = vmul.f32 %v12923_v24, %v12925_v40  ;;  %v17539_v24 = vmax.f32 %v12574_v43, 0.0  ;;  %v17540_v40 = vmax.f32 %v12577_v44, 0.0 }
  0x4d   : > { %11404 = vmatprep.mubr.msk.bf16.mxu1 %vm420_vm1, %v1416_v50  ;;  %v1417_v50 = vpack.c.bf16 %v12906_v48, %v1394_v42  ;;  %v1711_v46 = vpack.c.bf16 %v1690_v18, %v1689_v4  ;;  %v1692_v4 = vld [vmem:[#allocation2 + $0xc0] sm:$0xff]  ;;  %v458_v18 = vadd.s32 240, %v12579_v45 }
  0x4e   : > { %11435 = vmatmul.mubr.msk.bf16.gmra.mxu0 %vm420_vm1, %v1708_v51  ;;  %v456_v51 = vadd.s32 224, %v12579_v45  ;;  %v12952_v55 = vpack.c.bf16 %v17540_v40, %v17539_v24  ;;  %v1420_v37 = vpack.c.bf16 %v12937_v27, %v1400_v58  ;;  %v12969_v40 = vld [vmem:[#allocation2 + $0xe7] sm:$0xff]  ;;  %v17545_v24 = vmax.f32 %v12651_v3, 0.0 }
  0x4f   : > { %11438 = vmatprep.mubr.msk.bf16.mxu0 %vm420_vm1, %v1709_v31  ;;  %v12920_v31 = vld [vmem:[#allocation2 + $0xb7] sm:$0xff]  ;;  %v674_v44 = vand.u32 15, %v458_v18  ;;  %v17546_v58 = vmax.f32 %v12654_v5, 0.0  ;;  %v12994_v5 = vld [vmem:[#allocation2 + $0xdf] sm:$0xff]  ;;  %v431_v18 = vadd.s32 24, %v12579_v45 }
  0x50   : > { %17534 = vst [vmem:[#allocation34_spill] sm:$0xff] %v12920_v31  ;;  %v660_v49 = vand.u32 15, %v456_v51  ;;  %v1398_v42 = vmul.f32 %v12918_v26, %v12920_v31  ;;  %v1693_v51 = vld [vmem:[#allocation2 + $0xc8] sm:$0xff]  ;;  %v17538_v26 = vmax.f32 %v12564_v39, 0.0  ;;  %v1712_v31 = vpack.c.bf16 %v1692_v4, %v1691_v63 }
  0x51   : > { %v12975_v63 = vpack.c.bf16 %v17546_v58, %v17545_v24  ;;  %vm874_vm3 = vcmp.ge.s32.totalorder %v674_v44, 1 }
  0x52   : > { %vm872_vm2 = vcmp.ge.s32.totalorder %v660_v49, 1  ;;  %v12956_v49 = vsel %vm870_vm15, 1.0, %v17526_v12  ;;  %v13006_v58 = vsel %vm874_vm3, 1.0, %v17526_v12 }
  0x53   : > { %17541 = vst [vmem:[#allocation37_spill] sm:$0xff] %v12956_v49  ;;  %v12967_v43 = vsel %vm872_vm2, 1.0, %v17526_v12  ;;  %v1402_v3 = vmul.f32 %v12956_v49, %v12958_v30  ;;  %17553 = vst [vmem:[#allocation41_spill] sm:$0xff] %v13006_v58 }
  0x54   : > { %11405 = vmatmul.mubr.msk.bf16.gmra.mxu1 %vm420_vm1, %v1417_v50  ;;  %v1694_v50 = vld [vmem:[#allocation2 + $0xd0] sm:$0xff]  ;;  %17544 = vst [vmem:[#allocation38_spill] sm:$0xff] %v12967_v43 }
  0x55   : > { %11408 = vmatprep.mubr.msk.bf16.mxu1 %vm420_vm1, %v1418_v7  ;;  %v17537_v7 = vmax.f32 %v12561_v38, 0.0  ;;  %v17542_v38 = vmax.f32 %v12615_v56, 0.0  ;;  %v17547_v56 = vmax.f32 %v12695_v21, 0.0  ;;  %v1404_v21 = vmul.f32 %v12967_v43, %v12969_v40 }
  0x56   : > { %11439 = vmatmul.mubr.msk.bf16.gmra.mxu0 %vm420_vm1, %v1710_v14  ;;  %v429_v14 = vadd.s32 8, %v12579_v45 }
  0x57   : > { %11442 = vmatprep.mubr.msk.bf16.mxu0 %vm420_vm1, %v1711_v46  ;;  %v12945_v0 = vpack.c.bf16 %v17538_v26, %v17537_v7  ;;  %v1419_v46 = vpack.c.bf16 %v12932_v52, %v1398_v42  ;;  %v17543_v26 = vmax.f32 %v12618_v57, 0.0  ;;  %v1713_v42 = vpack.c.bf16 %v1694_v50, %v1693_v51 }
  0x58   : > { %v471_v4 = vand.u32 15, %v429_v14  ;;  %v17548_v57 = vmax.f32 %v12698_v22, 0.0  ;;  %v17550_v51 = vmax.f32 %v12711_v29, 0.0  ;;  %v17551_v50 = vmax.f32 %v12714_v33, 0.0  ;;  %v1695_v22 = vld [vmem:[#allocation2 + $0xd8] sm:$0xff]  ;;  %v1696_v29 = vld [vmem:[#allocation2 + $0xe0] sm:$0xff] }
  0x59   : > { %v12964_v39 = vpack.c.bf16 %v17543_v26, %v17542_v38  ;;  %v12999_v33 = vld [vmem:[#allocation2 + $0xef] sm:$0xff]  ;;  %v1714_v26 = vpack.c.bf16 %v1696_v29, %v1695_v22  ;;  %v1699_v22 = vld [vmem:[#allocation2 + $0xf8] sm:$0xff]  ;;  %v1700_v29 = vld [vmem:[#allocation2 + $0x100] sm:$0xff] }
  0x5a   : > { %v12981_v7 = vpack.c.bf16 %v17548_v57, %v17547_v56  ;;  %v12987_v38 = vpack.c.bf16 %v17551_v50, %v17550_v51  ;;  %v1697_v14 = vld [vmem:[#allocation2 + $0xe8] sm:$0xff]  ;;  %vm941_vm4 = vcmp.le.s32.totalorder %v471_v4, 14  ;;  %v1422_v24 = vpack.c.bf16 %v12999_v33, %v1404_v21  ;;  %v1964_v57 = vld [vmem:[#allocation2 + $0x11] sm:$0xff] }
  0x5b   : > { %v13011_v44 = vsel %vm941_vm4, 1.0, %v17526_v12  ;;  %v485_v51 = vand.u32 15, %v431_v18  ;;  %v2321_v18 = vmul.f32 %v12756_v17, %v12772_v20  ;;  %v13036_v20 = vld [vmem:[#allocation2 + $0x31] sm:$0xff] }
  0x5c   : > { %17549 = vst [vmem:[#allocation39_spill] sm:$0xff] %v12981_v7  ;;  %17552 = vst [vmem:[#allocation40_spill] sm:$0xff] %v12987_v38  ;;  %11409 = vmatmul.mubr.msk.bf16.gmra.mxu1 %vm420_vm1, %v1419_v46  ;;  %v1698_v46 = vld [vmem:[#allocation2 + $0xf0] sm:$0xff]  ;;  %v1996_v21 = vmul.f32 %v13011_v44, %v1964_v57 }
  0x5d   : > { %11412 = vmatprep.mubr.msk.bf16.mxu1 %vm420_vm1, %v1420_v37  ;;  %v433_v37 = vadd.s32 40, %v12579_v45  ;;  %v1715_v56 = vpack.c.bf16 %v1698_v46, %v1697_v14  ;;  %17554 = vst [vmem:[#allocation42_spill] sm:$0xff] %v13011_v44  ;;  %v1963_v14 = vld [vmem:[#allocation2 + $0x9] sm:$0xff]  ;;  %vm943_vm5 = vcmp.le.s32.totalorder %v485_v51, 14  ;;  %v435_v46 = vadd.s32 56, %v12579_v45 }
  0x5e   : > { %11443 = vmatmul.mubr.msk.bf16.gmra.mxu0 %vm420_vm1, %v1712_v31  ;;  %v1421_v31 = vpack.c.bf16 %v12994_v5, %v1402_v3  ;;  %v13018_v3 = vld [vmem:[#allocation2 + $0xff] sm:$0xff]  ;;  %v13028_v57 = vsel %vm943_vm5, 1.0, %v17526_v12  ;;  %v2353_v38 = vpack.c.bf16 %v12784_v60, %v2321_v18  ;;  %v2323_v60 = vmul.f32 %v12770_v16, %v12777_v35 }
  0x5f   : > { %11446 = vmatprep.mubr.msk.bf16.mxu0 %vm420_vm1, %v1713_v42  ;;  %v13008_v42 = vld [vmem:[#allocation2 + $0xf7] sm:$0xff]  ;;  %v499_v50 = vand.u32 15, %v433_v37  ;;  %17555 = vst [vmem:[#allocation43_spill] sm:$0xff] %v13028_v57  ;;  %v513_v51 = vand.u32 15, %v435_v46  ;;  %v441_v18 = vadd.s32 104, %v12579_v45  ;;  %v2682_v35 = vsel %vm1108_vm0, %v12815_v41, 0 }
  0x60   : > { %v1406_v4 = vmul.f32 %v13006_v58, %v13008_v42  ;;  %v3008_v41 = vsel %vm1108_vm0, %v12845_v25, 0  ;;  %v13092_v25 = vld [vmem:[%s17243_s3 + $0xe] sm:$0x3] }
  0x61   : > { %vm945_vm6 = vcmp.le.s32.totalorder %v499_v50, 14  ;;  %v13043_v50 = vld [vmem:[#allocation2 + $0x19] sm:$0xff]  ;;  %vm947_vm7 = vcmp.le.s32.totalorder %v513_v51, 14 }
  0x62   : > { %v1423_v37 = vpack.c.bf16 %v13018_v3, %v1406_v4  ;;  %v13034_v7 = vsel %vm945_vm6, 1.0, %v17526_v12 }
  0x63   : > { %17556 = vst [vmem:[#allocation44_spill] sm:$0xff] %v13034_v7 }
  0x64   : > { %11413 = vmatmul.mubr.msk.bf16.gmra.mxu1 %vm420_vm1, %v1421_v31  ;;  %v437_v31 = vadd.s32 72, %v12579_v45 }
  0x65   : > { %11416 = vmatprep.mubr.msk.bf16.mxu1 %vm420_vm1, %v1422_v24  ;;  %v2027_v24 = vpack.c.bf16 %v1996_v21, %v1963_v14  ;;  %v2000_v21 = vmul.f32 %v13034_v7, %v13036_v20  ;;  %v13053_v14 = vld [vmem:[#allocation2 + $0x29] sm:$0xff] }
  0x66   : > { %11447 = vmatmul.mubr.msk.bf16.gmra.mxu0 %vm420_vm1, %v1714_v26  ;;  %v1716_v26 = vpack.c.bf16 %v1700_v29, %v1699_v22  ;;  %v527_v17 = vand.u32 15, %v437_v31  ;;  %v2325_v22 = vmul.f32 %v12775_v6, %v12799_v28  ;;  %v439_v29 = vadd.s32 88, %v12579_v45 }
  0x67   : > { %11450 = vmatprep.mubr.msk.bf16.mxu0 %vm420_vm1, %v1715_v56  ;;  %v13030_v56 = vld [vmem:[#allocation2 + $0x21] sm:$0xff]  ;;  %v13061_v31 = vsel %vm947_vm7, 1.0, %v17526_v12  ;;  %v2029_v28 = vpack.c.bf16 %v2000_v21, %v13053_v14  ;;  %v2327_v21 = vmul.f32 %v12797_v34, %v12805_v19  ;;  %v443_v19 = vadd.s32 120, %v12579_v45 }
  0x68   : > { %v1998_v4 = vmul.f32 %v13028_v57, %v13030_v56  ;;  %vm949_vm8 = vcmp.le.s32.totalorder %v527_v17, 14  ;;  %17557 = vst [vmem:[#allocation45_spill] sm:$0xff] %v13061_v31  ;;  %v541_v51 = vand.u32 15, %v439_v29  ;;  %v13096_v29 = vld [vmem:[#allocation2 + $0x49] sm:$0xff] }
  0x69   : > { %v13068_v17 = vsel %vm949_vm8, 1.0, %v17526_v12 }
  0x6a   : > { %v2028_v46 = vpack.c.bf16 %v1998_v4, %v13043_v50  ;;  %17558 = vst [vmem:[#allocation46_spill] sm:$0xff] %v13068_v17  ;;  %v555_v4 = vand.u32 15, %v441_v18  ;;  %vm951_vm9 = vcmp.le.s32.totalorder %v541_v51, 14  ;;  %v2329_v18 = vmul.f32 %v12803_v9, %v12835_v8 }
  0x6b   : > { %v13110_v8 = vsel %vm951_vm9, 1.0, %v17526_v12 }
  0x6c   : > { %11417 = vmatmul.mubr.msk.bf16.gmra.mxu1 %vm420_vm1, %v1423_v37  ;;  %v13063_v37 = vld [vmem:[#allocation2 + $0x41] sm:$0xff]  ;;  %vm953_vm10 = vcmp.le.s32.totalorder %v555_v4, 14  ;;  %17559 = vst [vmem:[#allocation47_spill] sm:$0xff] %v13110_v8  ;;  %v2357_v51 = vpack.c.bf16 %v12854_v59, %v2329_v18  ;;  %v2331_v59 = vmul.f32 %v12833_v1, %v12840_v2  ;;  %v13132_v18 = vld [vmem:[#allocation2 + $0x69] sm:$0xff] }
  0x6d   : > { %11456 = vmatprep.mubr.msk.bf16.mxu1 %vm420_vm1, %v2027_v24  ;;  %v13070_v24 = vld [vmem:[#allocation2 + $0x51] sm:$0xff]  ;;  %v13116_v4 = vsel %vm953_vm10, 1.0, %v17526_v12 }
  0x6e   : > { %11451 = vmatmul.mubr.msk.bf16.gmra.mxu0 %vm420_vm1, %v1716_v26  ;;  %v2355_v26 = vpack.c.bf16 %v12818_v15, %v2325_v22  ;;  %v13083_v15 = vld [vmem:[#allocation2 + $0x39] sm:$0xff]  ;;  %v2004_v22 = vmul.f32 %v13068_v17, %v13070_v24  ;;  %17560 = vst [vmem:[#allocation48_spill] sm:$0xff] %v13116_v4  ;;  %v2358_v2 = vpack.c.bf16 %v12859_v23, %v2331_v59 }
  0x6f   : > { %11490 = vmatprep.mubr.msk.bf16.mxu0 %vm420_vm1, %v2353_v38  ;;  %v2354_v38 = vpack.c.bf16 %v12790_v62, %v2323_v60  ;;  %v2002_v62 = vmul.f32 %v13061_v31, %v13063_v37  ;;  %v13080_v60 = vld [vmem:[%s17243_s3 + $0xc] sm:$0x3] }
  0x74   : > { %11457 = vmatmul.mubr.msk.bf16.vlgmr.msra.gmra.mxu1 %vm420_vm1, %v2028_v46  ;;  %v445_v46 = vadd.s32 136, %v12579_v45 }
  0x75   : > { %11523 = vmatpush3.bf16.msra.mxu1 %v2682_v35  ;;  %11460 = vmatprep.mubr.msk.bf16.mxu1 %vm420_vm1, %v2029_v28  ;;  %v2030_v35 = vpack.c.bf16 %v2002_v62, %v13083_v15  ;;  %v2031_v28 = vpack.c.bf16 %v2004_v22, %v13096_v29  ;;  %v569_v62 = vand.u32 15, %v443_v19  ;;  %v2333_v19 = vmul.f32 %v12838_v53, %v12868_v54  ;;  %v13150_v53 = vld [vmem:[#allocation2 + $0x91] sm:$0xff] }
  0x76   : > { %11491 = vmatmul.mubr.msk.bf16.vlgmr.msra.gmra.mxu0 %vm420_vm1, %v2354_v38  ;;  %12348 = vmatprep.subr.msk.bf16.mxu1 %vm1108_vm0, %v13080_v60  ;;  %v2356_v38 = vpack.c.bf16 %v12824_v32, %v2327_v21  ;;  %v583_v9 = vand.u32 15, %v445_v46  ;;  %v13125_v21 = vld [vmem:[#allocation2 + $0x59] sm:$0xff]  ;;  %v447_v46 = vadd.s32 152, %v12579_v45 }
  0x77   : > { %11494 = vmatprep.mubr.msk.bf16.mxu0 %vm420_vm1, %v2355_v26  ;;  %11557 = vmatpush3.bf16.msra.mxu0 %v3008_v41  ;;  %v13112_v26 = vld [vmem:[#allocation2 + $0x61] sm:$0xff]  ;;  %v13118_v41 = vld [vmem:[#allocation2 + $0x71] sm:$0xff]  ;;  %vm955_vm11 = vcmp.le.s32.totalorder %v569_v62, 14  ;;  %v2359_v62 = vpack.c.bf16 %v12880_v36, %v2333_v19  ;;  %v2335_v36 = vmul.f32 %v12866_v11, %v12873_v61  ;;  %v2337_v19 = vmul.f32 %v12871_v13, %v12894_v10 }
  0x78   : > { %12349 = vmatprep.subr.msk.bf16.mxu0 %vm1108_vm0, %v13092_v25  ;;  %v2006_v32 = vmul.f32 %v13110_v8, %v13112_v26  ;;  %v2008_v22 = vmul.f32 %v13116_v4, %v13118_v41  ;;  %vm957_vm12 = vcmp.le.s32.totalorder %v583_v9, 14  ;;  %v13142_v1 = vsel %vm955_vm11, 1.0, %v17526_v12  ;;  %v13182_v13 = vld [vmem:[#allocation2 + $0xb1] sm:$0xff] }
  0x79   : > { %17561 = vst [vmem:[#allocation49_spill] sm:$0xff] %v13142_v1  ;;  %v13148_v54 = vsel %vm957_vm12, 1.0, %v17526_v12  ;;  %v597_v9 = vand.u32 15, %v447_v46  ;;  %v451_v46 = vadd.s32 184, %v12579_v45  ;;  %v2360_v61 = vpack.c.bf16 %v12885_v47, %v2335_v36  ;;  %17565 = vst [vmem:[#allocation53_spill] sm:$0xff] %v13182_v13  ;;  %v17566_v36 = vld [vmem:[#allocation31_spill] sm:$0xff] }
  0x7a   : > { %17562 = vst [vmem:[#allocation50_spill] sm:$0xff] %v13148_v54  ;;  %v2012_v59 = vmul.f32 %v13148_v54, %v13150_v53 }
  0x7b   : > { %vm959_vm13 = vcmp.le.s32.totalorder %v597_v9, 14  ;;  %v2361_v9 = vpack.c.bf16 %v12906_v48, %v2337_v19  ;;  %v17567_v48 = vld [vmem:[#allocation29_spill] sm:$0xff] }
  0x7c   : > { %11461 = vmatmul.mubr.msk.bf16.gmra.mxu1 %vm420_vm1, %v2030_v35  ;;  %v449_v35 = vadd.s32 168, %v12579_v45 }
  0x7d   : > { %11464 = vmatprep.mubr.msk.bf16.mxu1 %vm420_vm1, %v2031_v28  ;;  %v2033_v28 = vpack.c.bf16 %v2008_v22, %v13132_v18  ;;  %v13164_v22 = vld [vmem:[#allocation2 + $0x89] sm:$0xff] }
  0x7e   : > { %11495 = vmatmul.mubr.msk.bf16.gmra.mxu0 %vm420_vm1, %v2356_v38  ;;  %v2032_v38 = vpack.c.bf16 %v2006_v32, %v13125_v21  ;;  %v611_v34 = vand.u32 15, %v449_v35  ;;  %v13157_v32 = vld [vmem:[#allocation2 + $0x79] sm:$0xff]  ;;  %v453_v35 = vadd.s32 200, %v12579_v45 }
  0x7f   : > { %11498 = vmatprep.mubr.msk.bf16.mxu0 %vm420_vm1, %v2357_v51  ;;  %v13144_v51 = vld [vmem:[#allocation2 + $0x81] sm:$0xff] }
  0x80   : > { %v2010_v23 = vmul.f32 %v13142_v1, %v13144_v51  ;;  %vm961_vm14 = vcmp.le.s32.totalorder %v611_v34, 14  ;;  %v625_v34 = vand.u32 15, %v451_v46  ;;  %v639_v11 = vand.u32 15, %v453_v35  ;;  %v13196_v46 = vld [vmem:[#allocation2 + $0xa9] sm:$0xff] }
  0x81   : > { %v13180_v10 = vsel %vm961_vm14, 1.0, %v17526_v12  ;;  %v17568_v35 = vld [vmem:[#allocation34_spill] sm:$0xff] }
  0x82   : > { %17564 = vst [vmem:[#allocation52_spill] sm:$0xff] %v13180_v10  ;;  %v2016_v19 = vmul.f32 %v13180_v10, %v13182_v13  ;;  %vm963_vm15 = vcmp.le.s32.totalorder %v625_v34, 14  ;;  %vm965_vm2 = vcmp.le.s32.totalorder %v639_v11, 14 }
  0x83   : > { %v13206_v10 = vsel %vm963_vm15, 1.0, %v17526_v12 }
  0x84   : > { %11465 = vmatmul.mubr.msk.bf16.gmra.mxu1 %vm420_vm1, %v2032_v38  ;;  %v2034_v38 = vpack.c.bf16 %v2010_v23, %v13157_v32  ;;  %v13189_v23 = vld [vmem:[#allocation2 + $0x99] sm:$0xff]  ;;  %17571 = vst [vmem:[#allocation31_spill] sm:$0xff] %v13206_v10 }
  0x85   : > { %11468 = vmatprep.mubr.msk.bf16.mxu1 %vm420_vm1, %v2033_v28  ;;  %v13174_v28 = vsel %vm959_vm13, 1.0, %v17526_v12 }
  0x86   : > { %11499 = vmatmul.mubr.msk.bf16.gmra.mxu0 %vm420_vm1, %v2358_v2  ;;  %v2035_v2 = vpack.c.bf16 %v2012_v59, %v13164_v22  ;;  %17563 = vst [vmem:[#allocation51_spill] sm:$0xff] %v13174_v28  ;;  %v2339_v59 = vmul.f32 %v17567_v48, %v17566_v36  ;;  %v2037_v48 = vpack.c.bf16 %v2016_v19, %v13196_v46 }
  0x87   : > { %11502 = vmatprep.mubr.msk.bf16.mxu0 %vm420_vm1, %v2359_v62  ;;  %v13176_v62 = vld [vmem:[#allocation2 + $0xa1] sm:$0xff] }
  0x88   : > { %v2014_v47 = vmul.f32 %v13174_v28, %v13176_v62  ;;  %v17570_v28 = vld [vmem:[#allocation32_spill] sm:$0xff] }
  0x89   : > { %v2362_v36 = vpack.c.bf16 %v17570_v28, %v2339_v59  ;;  %v17573_v59 = vld [vmem:[#allocation36_spill] sm:$0xff] }
  0x8a   : > { %v2036_v16 = vpack.c.bf16 %v2014_v47, %v13189_v23  ;;  %v13221_v47 = vld [vmem:[#allocation2 + $0xb9] sm:$0xff] }
  0x8c   : > { %11469 = vmatmul.mubr.msk.bf16.gmra.mxu1 %vm420_vm1, %v2034_v38  ;;  %v17569_v38 = vld [vmem:[#allocation30_spill] sm:$0xff] }
  0x8d   : > { %11472 = vmatprep.mubr.msk.bf16.mxu1 %vm420_vm1, %v2035_v2  ;;  %v2341_v6 = vmul.f32 %v17569_v38, %v17568_v35  ;;  %v457_v2 = vadd.s32 232, %v12579_v45  ;;  %v13212_v35 = vsel %vm965_vm2, 1.0, %v17526_v12  ;;  %v13214_v38 = vld [vmem:[#allocation2 + $0xd1] sm:$0xff] }
  0x8e   : > { %11503 = vmatmul.mubr.msk.bf16.gmra.mxu0 %vm420_vm1, %v2360_v61  ;;  %v455_v61 = vadd.s32 216, %v12579_v45  ;;  %17572 = vst [vmem:[#allocation34_spill] sm:$0xff] %v13212_v35  ;;  %v2020_v19 = vmul.f32 %v13212_v35, %v13214_v38  ;;  %v13239_v35 = vld [vmem:[#allocation2 + $0xe1] sm:$0xff] }
  0x8f   : > { %11506 = vmatprep.mubr.msk.bf16.mxu0 %vm420_vm1, %v2361_v9  ;;  %v13208_v9 = vld [vmem:[#allocation2 + $0xc1] sm:$0xff]  ;;  %v2363_v34 = vpack.c.bf16 %v12932_v52, %v2341_v6  ;;  %v667_v13 = vand.u32 15, %v457_v2 }
  0x90   : > { %v653_v11 = vand.u32 15, %v455_v61  ;;  %v2018_v28 = vmul.f32 %v13206_v10, %v13208_v9  ;;  %v17574_v6 = vld [vmem:[#allocation33_spill] sm:$0xff]  ;;  %v13228_v61 = vld [vmem:[#allocation2 + $0xc9] sm:$0xff] }
  0x91   : > { %v2343_v52 = vmul.f32 %v17574_v6, %v17573_v59  ;;  %vm969_vm4 = vcmp.le.s32.totalorder %v667_v13, 14  ;;  %v2039_v59 = vpack.c.bf16 %v2020_v19, %v13228_v61  ;;  %v2349_v19 = vmul.f32 %v12967_v43, %v13008_v42 }
  0x92   : > { %vm967_vm3 = vcmp.le.s32.totalorder %v653_v11, 14  ;;  %v13243_v11 = vsel %vm969_vm4, 1.0, %v17526_v12 }
  0x93   : > { %v2364_v10 = vpack.c.bf16 %v12937_v27, %v2343_v52  ;;  %v13237_v6 = vsel %vm967_vm3, 1.0, %v17526_v12  ;;  %17577 = vst [vmem:[#allocation36_spill] sm:$0xff] %v13243_v11  ;;  %v13252_v27 = vld [vmem:[#allocation2 + $0xd9] sm:$0xff]  ;;  %v13259_v52 = vld [vmem:[#allocation2 + $0xe9] sm:$0xff] }
  0x94   : > { %11473 = vmatmul.mubr.msk.bf16.gmra.mxu1 %vm420_vm1, %v2036_v16  ;;  %v17575_v16 = vld [vmem:[#allocation35_spill] sm:$0xff]  ;;  %17576 = vst [vmem:[#allocation32_spill] sm:$0xff] %v13237_v6  ;;  %v2022_v13 = vmul.f32 %v13237_v6, %v13239_v35 }
  0x95   : > { %11476 = vmatprep.mubr.msk.bf16.mxu1 %vm420_vm1, %v2037_v48  ;;  %v2345_v2 = vmul.f32 %v17575_v16, %v12958_v30  ;;  %v2038_v48 = vpack.c.bf16 %v2018_v28, %v13221_v47  ;;  %v13245_v30 = vld [vmem:[#allocation2 + $0xf1] sm:$0xff] }
  0x96   : > { %11507 = vmatmul.mubr.msk.bf16.gmra.mxu0 %vm420_vm1, %v2362_v36  ;;  %v459_v36 = vadd.s32 248, %v12579_v45  ;;  %v2024_v28 = vmul.f32 %v13243_v11, %v13245_v30 }
  0x97   : > { %11510 = vmatprep.mubr.msk.bf16.mxu0 %vm420_vm1, %v2363_v34  ;;  %v2365_v34 = vpack.c.bf16 %v12994_v5, %v2345_v2  ;;  %v2347_v5 = vmul.f32 %v12956_v49, %v12969_v40  ;;  %v13269_v40 = vld [vmem:[#allocation2 + $0x101] sm:$0xff] }
  0x98   : > { %v681_v45 = vand.u32 15, %v459_v36  ;;  %v2041_v36 = vpack.c.bf16 %v2024_v28, %v13259_v52 }
  0x99   : > { %v2366_v2 = vpack.c.bf16 %v12999_v33, %v2347_v5  ;;  %v13279_v33 = vld [vmem:[#allocation2 + $0xf9] sm:$0xff] }
  0x9a   : > { %vm971_vm5 = vcmp.le.s32.totalorder %v681_v45, 14  ;;  %v13284_v45 = vld [vmem:[#allocation2 + $0x10f] sm:$0xff] }
  0x9c   : > { %11477 = vmatmul.mubr.msk.bf16.gmra.mxu1 %vm420_vm1, %v2038_v48  ;;  %v13267_v48 = vsel %vm971_vm5, 1.0, %v17526_v12 }
  0x9d   : > { %11480 = vmatprep.mubr.msk.bf16.mxu1 %vm420_vm1, %v2039_v59  ;;  %17578 = vst [vmem:[#allocation54_spill] sm:$0xff] %v13267_v48  ;;  %v2367_v59 = vpack.c.bf16 %v13018_v3, %v2349_v19  ;;  %v2026_v42 = vmul.f32 %v13267_v48, %v13269_v40  ;;  %v2910_v3 = vmul.f32 %v13011_v44, %v13030_v56  ;;  %v17579_v19 = vld [vmem:[#allocation10_spill] sm:$0xff] }
  0x9e   : > { %11511 = vmatmul.mubr.msk.bf16.gmra.mxu0 %vm420_vm1, %v2364_v10  ;;  %v2040_v10 = vpack.c.bf16 %v2022_v13, %v13252_v27  ;;  %v2914_v56 = vmul.f32 %v13034_v7, %v13063_v37  ;;  %v2918_v37 = vmul.f32 %v13068_v17, %v13112_v26  ;;  %v2926_v26 = vmul.f32 %v13148_v54, %v13176_v62 }
  0x9f   : > { %11514 = vmatprep.mubr.msk.bf16.mxu0 %vm420_vm1, %v2365_v34  ;;  %v13272_v34 = vld [vmem:[#allocation2 + $0x107] sm:$0xff]  ;;  %v2042_v13 = vpack.c.bf16 %v2026_v42, %v13279_v33  ;;  %v2941_v28 = vpack.c.bf16 %v2910_v3, %v13043_v50  ;;  %v3334_v50 = vsel %vm1108_vm0, %v13080_v60, 0  ;;  %v3628_v42 = vsel %vm1108_vm0, %v13092_v25, 0  ;;  %v17587_v3 = vld [vmem:[#allocation3_spill] sm:$0xff] }
  0xa0   : > { %v2351_v12 = vmul.f32 %v13006_v58, %v13272_v34 }
  0xa2   : > { %v2368_v5 = vpack.c.bf16 %v13284_v45, %v2351_v12  ;;  %v17586_v12 = vld [vmem:[#allocation52_spill] sm:$0xff] }
  0xa3   : > { %v2930_v62 = vmul.f32 %v17586_v12, %v13208_v9  ;;  %v17597_v9 = vld [vmem:[#allocation31_spill] sm:$0xff] }
  0xa4   : > { %11481 = vmatmul.mubr.msk.bf16.gmra.mxu1 %vm420_vm1, %v2040_v10  ;;  %v2912_v10 = vmul.f32 %v13028_v57, %v13036_v20  ;;  %v13311_v20 = vld [vmem:[%s17243_s3 + $0x10] sm:$0x3] }
  0xa5   : > { %11484 = vmatprep.mubr.msk.bf16.mxu1 %vm420_vm1, %v2041_v36  ;;  %v2943_v36 = vpack.c.bf16 %v2914_v56, %v13083_v15  ;;  %v2945_v15 = vpack.c.bf16 %v2918_v37, %v13125_v21  ;;  %v2949_v21 = vpack.c.bf16 %v2926_v26, %v13189_v23  ;;  %v17593_v56 = vld [vmem:[#allocation7_spill] sm:$0xff]  ;;  %v17599_v37 = vld [vmem:[#allocation34_spill] sm:$0xff]  ;;  %v17607_v26 = vld [vmem:[#allocation12_spill] sm:$0xff] }
  0xa6   : > { %11515 = vmatmul.mubr.msk.bf16.gmra.mxu0 %vm420_vm1, %v2366_v2  ;;  %v2942_v2 = vpack.c.bf16 %v2912_v10, %v13053_v14  ;;  %v2916_v14 = vmul.f32 %v13061_v31, %v13070_v24  ;;  %v2922_v24 = vmul.f32 %v13116_v4, %v13144_v51  ;;  %v17584_v51 = vld [vmem:[#allocation53_spill] sm:$0xff] }
  0xa7   : > { %11518 = vmatprep.mubr.msk.bf16.mxu0 %vm420_vm1, %v2367_v59  ;;  %v17580_v59 = vld [vmem:[#allocation11_spill] sm:$0xff] }
  0xa8   : > { %v2944_v60 = vpack.c.bf16 %v2916_v14, %v13096_v29  ;;  %v2947_v29 = vpack.c.bf16 %v2922_v24, %v13157_v32  ;;  %v17585_v32 = vld [vmem:[#allocation51_spill] sm:$0xff] }
  0xac   : > { %11485 = vmatmul.mubr.msk.bf16.gmra.mxu1 %vm420_vm1, %v2042_v13  ;;  %v17589_v13 = vld [vmem:[#allocation4_spill] sm:$0xff] }
  0xad   : > { %11524 = vmatprep.mubr.msk.bf16.mxu1 %vm420_vm1, %v17579_v19  ;;  %v17590_v23 = vmax.f32 %v17589_v13, 0.0  ;;  %v17591_v19 = vld [vmem:[#allocation5_spill] sm:$0xff] }
  0xae   : > { %11519 = vmatmul.mubr.msk.bf16.gmra.mxu0 %vm420_vm1, %v2368_v5  ;;  %v17592_v10 = vmax.f32 %v17591_v19, 0.0  ;;  %v17620_v19 = vld [vmem:[#allocation15_spill] sm:$0xff] }
  0xaf   : > { %11558 = vmatprep.mubr.msk.bf16.mxu0 %vm420_vm1, %v2941_v28 }
  0xb4   : > { %11525 = vmatmul.mubr.msk.bf16.vlgmr.msra.gmra.mxu1 %vm420_vm1, %v17580_v59 }
  0xb5   : > { %11591 = vmatpush3.bf16.msra.mxu1 %v3334_v50  ;;  %11528 = vmatprep.mubr.msk.bf16.mxu1 %vm420_vm1, %v12945_v0  ;;  %v2920_v0 = vmul.f32 %v13110_v8, %v13118_v41 }
  0xb6   : > { %11559 = vmatmul.mubr.msk.bf16.vlgmr.msra.gmra.mxu0 %vm420_vm1, %v2942_v2  ;;  %12350 = vmatprep.subr.msk.bf16.mxu1 %vm1108_vm0, %v13311_v20  ;;  %v17594_v2 = vmax.f32 %v17593_v56, 0.0 }
  0xb7   : > { %11562 = vmatprep.mubr.msk.bf16.mxu0 %vm420_vm1, %v2943_v36  ;;  %11625 = vmatpush3.bf16.msra.mxu0 %v3628_v42  ;;  %v2946_v25 = vpack.c.bf16 %v2920_v0, %v13132_v18  ;;  %v17582_v18 = vld [vmem:[#allocation40_spill] sm:$0xff]  ;;  %v2951_v36 = vpack.c.bf16 %v2930_v62, %v13221_v47  ;;  %v2934_v47 = vmul.f32 %v17599_v37, %v13239_v35 }
  0xb8   : > { %v2625_v50 = vpack.c.bf16 %v17594_v2, %v17592_v10  ;;  %v17602_v0 = vld [vmem:[#allocation8_spill] sm:$0xff]  ;;  %v17621_v10 = vmax.f32 %v17620_v19, 0.0 }
  0xb9   : > { %v17603_v24 = vmax.f32 %v17602_v0, 0.0  ;;  %v2953_v35 = vpack.c.bf16 %v2934_v47, %v13252_v27  ;;  %v2938_v27 = vmul.f32 %v13243_v11, %v13269_v40 }
  0xbb   : > { %v2955_v40 = vpack.c.bf16 %v2938_v27, %v13279_v33  ;;  %v3530_v27 = vld [vmem:[#allocation2 + $0x30] sm:$0xff] }
  0xbc   : > { %11529 = vmatmul.mubr.msk.bf16.gmra.mxu1 %vm420_vm1, %v12952_v55  ;;  %v17581_v55 = vld [vmem:[#allocation39_spill] sm:$0xff] }
  0xbd   : > { %11532 = vmatprep.mubr.msk.bf16.mxu1 %vm420_vm1, %v12964_v39  ;;  %v2924_v39 = vmul.f32 %v13142_v1, %v13150_v53  ;;  %v2928_v53 = vmul.f32 %v17585_v32, %v17584_v51 }
  0xbe   : > { %11563 = vmatmul.mubr.msk.bf16.gmra.mxu0 %vm420_vm1, %v2944_v60 }
  0xbf   : > { %11566 = vmatprep.mubr.msk.bf16.mxu0 %vm420_vm1, %v2945_v15  ;;  %v2948_v41 = vpack.c.bf16 %v2924_v39, %v13164_v22  ;;  %v17588_v22 = vmax.f32 %v17587_v3, 0.0  ;;  %v2950_v28 = vpack.c.bf16 %v2928_v53, %v13196_v46  ;;  %v2932_v46 = vmul.f32 %v17597_v9, %v13214_v38 }
  0xc1   : > { %v2624_v5 = vpack.c.bf16 %v17590_v23, %v17588_v22  ;;  %v2952_v38 = vpack.c.bf16 %v2932_v46, %v13228_v61  ;;  %v2936_v61 = vmul.f32 %v13237_v6, %v13245_v30  ;;  %v17625_v46 = vld [vmem:[#allocation17_spill] sm:$0xff] }
  0xc2   : > { %v17626_v47 = vmax.f32 %v17625_v46, 0.0 }
  0xc3   : > { %v2954_v30 = vpack.c.bf16 %v2936_v61, %v13259_v52  ;;  %v3529_v61 = vld [vmem:[#allocation2 + $0x28] sm:$0xff] }
  0xc4   : > { %11533 = vmatmul.mubr.msk.bf16.gmra.mxu1 %vm420_vm1, %v12975_v63  ;;  %v17583_v63 = vld [vmem:[#allocation6_spill] sm:$0xff] }
  0xc5   : > { %11536 = vmatprep.mubr.msk.bf16.mxu1 %vm420_vm1, %v17581_v55 }
  0xc6   : > { %11567 = vmatmul.mubr.msk.bf16.gmra.mxu0 %vm420_vm1, %v2946_v25  ;;  %v17604_v25 = vld [vmem:[#allocation9_spill] sm:$0xff] }
  0xc7   : > { %11570 = vmatprep.mubr.msk.bf16.mxu0 %vm420_vm1, %v2947_v29  ;;  %v17605_v29 = vmax.f32 %v17604_v25, 0.0  ;;  %v13435_v25 = vld [vmem:[#allocation2 + $0x111] sm:$0xff] }
  0xc8   : > { %v2940_v52 = vmul.f32 %v13267_v48, %v13435_v25 }
  0xc9   : > { %v2626_v55 = vpack.c.bf16 %v17605_v29, %v17603_v24  ;;  %v3203_v29 = vld [vmem:[#allocation2 + $0x27] sm:$0xff] }
  0xcc   : > { %11537 = vmatmul.mubr.msk.bf16.gmra.mxu1 %vm420_vm1, %v17582_v18 }
  0xcd   : > { %11540 = vmatprep.mubr.msk.bf16.mxu1 %vm420_vm1, %v17583_v63 }
  0xce   : > { %11571 = vmatmul.mubr.msk.bf16.gmra.mxu0 %vm420_vm1, %v2948_v41  ;;  %v17608_v41 = vmax.f32 %v17607_v26, 0.0 }
  0xcf   : > { %11574 = vmatprep.mubr.msk.bf16.mxu0 %vm420_vm1, %v2949_v21  ;;  %v17609_v21 = vld [vmem:[#allocation13_spill] sm:$0xff] }
  0xd0   : > { %v17610_v18 = vmax.f32 %v17609_v21, 0.0 }
  0xd2   : > { %v2627_v63 = vpack.c.bf16 %v17610_v18, %v17608_v41  ;;  %v17631_v41 = vld [vmem:[#allocation20_spill] sm:$0xff]  ;;  %v13452_v18 = vld [vmem:[#allocation2 + $0x109] sm:$0xff] }
  0xd3   : > { %v3235_v33 = vmul.f32 %v17631_v41, %v3203_v29 }
  0xd4   : > { %v13369_v59 = vpop.f32.mrf.mxu1  ;;  %11541 = vmatmul.mubr.msk.bf16.gmra.mxu1 %vm420_vm1, %v2624_v5  ;;  %v17618_v5 = vld [vmem:[#allocation14_spill] sm:$0xff] }
  0xd5   : > { %17595 = vst [vmem:[#allocation10_spill] sm:$0xff] %v13369_v59  ;;  %11544 = vmatprep.mubr.msk.bf16.mxu1 %vm420_vm1, %v2625_v50  ;;  %v17623_v50 = vld [vmem:[#allocation16_spill] sm:$0xff] }
  0xd6   : > { %v13372_v42 = vpop.f32.mrf.mxu0  ;;  %11575 = vmatmul.mubr.msk.bf16.gmra.mxu0 %vm420_vm1, %v2950_v28  ;;  %v13378_v14 = vpop.f32.mrf.mxu1  ;;  %v17619_v28 = vmax.f32 %v17618_v5, 0.0 }
  0xd7   : > { %17596 = vst [vmem:[#allocation11_spill] sm:$0xff] %v13372_v42  ;;  %17598 = vst [vmem:[#allocation39_spill] sm:$0xff] %v13378_v14  ;;  %11578 = vmatprep.mubr.msk.bf16.mxu0 %vm420_vm1, %v2951_v36  ;;  %v17624_v36 = vmax.f32 %v17623_v50, 0.0  ;;  %v17653_v14 = vld [vmem:[#allocation24_spill] sm:$0xff] }
  0xd8   : > { %v13383_v60 = vpop.f32.mrf.mxu0  ;;  %v13385_v15 = vpop.f32.mrf.mxu1  ;;  %v2628_v56 = vpack.c.bf16 %v17621_v10, %v17619_v28  ;;  %v17635_v28 = vld [vmem:[#allocation18_spill] sm:$0xff]  ;;  %v17637_v10 = vld [vmem:[#allocation19_spill] sm:$0xff] }
  0xd9   : > { %17600 = vst [vmem:[#allocation40_spill] sm:$0xff] %v13383_v60  ;;  %17601 = vst [vmem:[#allocation6_spill] sm:$0xff] %v13385_v15  ;;  %v2629_v0 = vpack.c.bf16 %v17626_v47, %v17624_v36  ;;  %v17636_v19 = vmax.f32 %v17635_v28, 0.0  ;;  %v2956_v36 = vpack.c.bf16 %v2940_v52, %v13452_v18  ;;  %v3205_v47 = vld [vmem:[#allocation2 + $0x37] sm:$0xff]  ;;  %v17643_v28 = vld [vmem:[#allocation21_spill] sm:$0xff] }
  0xda   : > { %v13391_v39 = vpop.f32.mrf.mxu0  ;;  %v13398_v51 = vpop.f32.mrf.mxu1  ;;  %v3206_v52 = vld [vmem:[#allocation2 + $0x3f] sm:$0xff] }
  0xdb   : > { %17606 = vst [vmem:[#allocation53_spill] sm:$0xff] %v13391_v39  ;;  %17611 = vst [vmem:[#allocation3_spill] sm:$0xff] %v13398_v51  ;;  %v3211_v51 = vld [vmem:[#allocation2 + $0x67] sm:$0xff] }
  0xdc   : > { %v13401_v53 = vpop.f32.mrf.mxu0  ;;  %v13403_v62 = vpop.f32.mrf.mxu1  ;;  %11545 = vmatmul.mubr.msk.bf16.gmra.mxu1 %vm420_vm1, %v2626_v55  ;;  %v3243_v59 = vmul.f32 %v17653_v14, %v3211_v51 }
  0xdd   : > { %17612 = vst [vmem:[#allocation4_spill] sm:$0xff] %v13401_v53  ;;  %17613 = vst [vmem:[#allocation5_spill] sm:$0xff] %v13403_v62  ;;  %11548 = vmatprep.mubr.msk.bf16.mxu1 %vm420_vm1, %v2627_v63  ;;  %v3204_v63 = vld [vmem:[#allocation2 + $0x2f] sm:$0xff]  ;;  %v3219_v53 = vld [vmem:[#allocation2 + $0xa7] sm:$0xff] }
  0xde   : > { %v13406_v3 = vpop.f32.mrf.mxu0  ;;  %11579 = vmatmul.mubr.msk.bf16.gmra.mxu0 %vm420_vm1, %v2952_v38  ;;  %v13412_v22 = vpop.f32.mrf.mxu1  ;;  %v3267_v46 = vpack.c.bf16 %v3204_v63, %v3235_v33  ;;  %v3531_v63 = vld [vmem:[#allocation2 + $0x38] sm:$0xff] }
  0xdf   : > { %17614 = vst [vmem:[#allocation7_spill] sm:$0xff] %v13406_v3  ;;  %17615 = vst [vmem:[#allocation8_spill] sm:$0xff] %v13412_v22  ;;  %11582 = vmatprep.mubr.msk.bf16.mxu0 %vm420_vm1, %v2953_v35 }
  0xe0   : > { %v13417_v13 = vpop.f32.mrf.mxu0  ;;  %v13419_v23 = vpop.f32.mrf.mxu1 }
  0xe1   : > { %17616 = vst [vmem:[#allocation9_spill] sm:$0xff] %v13417_v13  ;;  %17617 = vst [vmem:[#allocation12_spill] sm:$0xff] %v13419_v23  ;;  %v3209_v23 = vld [vmem:[#allocation2 + $0x57] sm:$0xff] }
  0xe2   : > { %v13425_v2 = vpop.f32.mrf.mxu0  ;;  %v13432_v24 = vpop.f32.mrf.mxu1 }
  0xe3   : > { %17622 = vst [vmem:[#allocation13_spill] sm:$0xff] %v13425_v2  ;;  %17627 = vst [vmem:[#allocation14_spill] sm:$0xff] %v13432_v24 }
  0xe4   : > { %v13437_v55 = vpop.f32.mrf.mxu0  ;;  %v13439_v38 = vpop.f32.mrf.mxu1  ;;  %11549 = vmatmul.mubr.msk.bf16.gmra.mxu1 %vm420_vm1, %v2628_v56  ;;  %v17638_v56 = vmax.f32 %v17637_v10, 0.0 }
  0xe5   : > { %17628 = vst [vmem:[#allocation15_spill] sm:$0xff] %v13437_v55  ;;  %17629 = vst [vmem:[#allocation16_spill] sm:$0xff] %v13439_v38  ;;  %11552 = vmatprep.mubr.msk.bf16.mxu1 %vm420_vm1, %v2629_v0 }
  0xe6   : > { %v13442_v26 = vpop.f32.mrf.mxu0  ;;  %11583 = vmatmul.mubr.msk.bf16.gmra.mxu0 %vm420_vm1, %v2954_v30  ;;  %v13449_v21 = vpop.f32.mrf.mxu1  ;;  %v2630_v30 = vpack.c.bf16 %v17638_v56, %v17636_v19 }
  0xe7   : > { %17630 = vst [vmem:[#allocation17_spill] sm:$0xff] %v13442_v26  ;;  %17632 = vst [vmem:[#allocation55_spill] sm:$0xff] %v13449_v21  ;;  %11586 = vmatprep.mubr.msk.bf16.mxu0 %vm420_vm1, %v2955_v40  ;;  %v3561_v40 = vpack.c.bf16 %v3530_v27, %v3529_v61  ;;  %v3207_v21 = vld [vmem:[#allocation2 + $0x47] sm:$0xff] }
  0xe8   : > { %v13454_v35 = vpop.f32.mrf.mxu0  ;;  %v13456_v5 = vpop.f32.mrf.mxu1  ;;  %v3532_v61 = vld [vmem:[#allocation2 + $0x40] sm:$0xff]  ;;  %v17646_v27 = vld [vmem:[#allocation22_spill] sm:$0xff] }
  0xe9   : > { %17633 = vst [vmem:[#allocation56_spill] sm:$0xff] %v13454_v35  ;;  %17634 = vst [vmem:[#allocation57_spill] sm:$0xff] %v13456_v5  ;;  %v3237_v5 = vmul.f32 %v17643_v28, %v3205_v47  ;;  %v3239_v19 = vmul.f32 %v17646_v27, %v3207_v21  ;;  %v3534_v47 = vld [vmem:[#allocation2 + $0x50] sm:$0xff]  ;;  %v3954_v21 = vsel %vm1108_vm0, %v13311_v20, 0  ;;  %v3215_v35 = vld [vmem:[#allocation2 + $0x87] sm:$0xff] }
  0xea   : > { %v13462_v50 = vpop.f32.mrf.mxu0  ;;  %v13465_v0 = vpop.f32.mrf.mxu1  ;;  %v3227_v27 = vld [vmem:[#allocation2 + $0xe7] sm:$0xff] }
  0xeb   : > { %17639 = vst [vmem:[#allocation18_spill] sm:$0xff] %v13462_v50  ;;  %17640 = vst [vmem:[#allocation19_spill] sm:$0xff] %v13465_v0  ;;  %v3268_v24 = vpack.c.bf16 %v3206_v52, %v3237_v5  ;;  %v17652_v52 = vld [vmem:[#allocation23_spill] sm:$0xff] }
  0xec   : > { %v13467_v29 = vpop.f32.mrf.mxu0  ;;  %v13469_v38 = vpop.f32.mrf.mxu1  ;;  %11553 = vmatmul.mubr.msk.bf16.gmra.mxu1 %vm420_vm1, %v2630_v30  ;;  %v3208_v30 = vld [vmem:[#allocation2 + $0x4f] sm:$0xff] }
  0xed   : > { %17641 = vst [vmem:[#allocation58_spill] sm:$0xff] %v13467_v29  ;;  %17642 = vst [vmem:[#allocation59_spill] sm:$0xff] %v13469_v38  ;;  %11592 = vmatprep.mubr.msk.bf16.mxu1 %vm420_vm1, %v3267_v46  ;;  %v3533_v38 = vld [vmem:[#allocation2 + $0x48] sm:$0xff]  ;;  %v3562_v46 = vpack.c.bf16 %v3532_v61, %v3531_v63  ;;  %v3241_v63 = vmul.f32 %v17652_v52, %v3209_v23 }
  0xee   : > { %v13473_v10 = vpop.f32.mrf.mxu0  ;;  %11587 = vmatmul.mubr.msk.bf16.gmra.mxu0 %vm420_vm1, %v2956_v36  ;;  %v13477_v33 = vpop.f32.mrf.mxu1  ;;  %v3563_v62 = vpack.c.bf16 %v3534_v47, %v3533_v38  ;;  %v3535_v38 = vld [vmem:[#allocation2 + $0x58] sm:$0xff] }
  0xef   : > { %17644 = vst [vmem:[#allocation60_spill] sm:$0xff] %v13473_v10  ;;  %17645 = vst [vmem:[#allocation61_spill] sm:$0xff] %v13477_v33  ;;  %11626 = vmatprep.mubr.msk.bf16.mxu0 %vm420_vm1, %v3561_v40  ;;  %v13492_v40 = vld [vmem:[%s17244_s4] ss:$0 sm:$0xff]  ;;  %v3269_v33 = vpack.c.bf16 %v3208_v30, %v3239_v19  ;;  %v3212_v30 = vld [vmem:[#allocation2 + $0x6f] sm:$0xff] }
  0xf0   : > { %v13481_v56 = vpop.f32.mrf.mxu0  ;;  %v13483_v0 = vpop.f32.mrf.mxu1  ;;  %v3536_v19 = vld [vmem:[#allocation2 + $0x60] sm:$0xff]  ;;  %v3271_v10 = vpack.c.bf16 %v3212_v30, %v3243_v59 }
  0xf1   : > { %17647 = vst [vmem:[#allocation62_spill] sm:$0xff] %v13481_v56  ;;  %17648 = vst [vmem:[#allocation63_spill] sm:$0xff] %v13483_v0  ;;  %v3210_v0 = vld [vmem:[#allocation2 + $0x5f] sm:$0xff] }
  0xf2   : > { %v13485_v36 = vpop.f32.mrf.mxu0  ;;  %v13487_v22 = vpop.f32.mrf.mxu1  ;;  %v3214_v59 = vld [vmem:[#allocation2 + $0x7f] sm:$0xff] }
  0xf3   : > { %17649 = vst [vmem:[#allocation64_spill] sm:$0xff] %v13485_v36  ;;  %17650 = vst [vmem:[#allocation65_spill] sm:$0xff] %v13487_v22  ;;  %v3540_v30 = vld [vmem:[#allocation2 + $0x80] sm:$0xff] }
  0xf4   : > { %v13496_v15 = vpop.f32.mrf.mxu0  ;;  %v11390_v5 = vpop.f32.mrf.mxu1  ;;  %11593 = vmatmul.mubr.msk.bf16.vlgmr.msra.gmra.mxu1 %vm420_vm1, %v3268_v24 }
  0xf5   : > { %17651 = vst [vmem:[#allocation66_spill] sm:$0xff] %v13496_v15  ;;  %v1639_v61 = vadd.f32 %v11390_v5, %v13492_v40  ;;  %11659 = vmatpush3.bf16.msra.mxu1 %v3954_v21  ;;  %11596 = vmatprep.mubr.msk.bf16.mxu1 %vm420_vm1, %v3269_v33  ;;  %v3537_v21 = vld [vmem:[#allocation2 + $0x68] sm:$0xff]  ;;  %v3538_v5 = vld [vmem:[#allocation2 + $0x70] sm:$0xff]  ;;  %v3564_v33 = vpack.c.bf16 %v3536_v19, %v3535_v38 }
  0xf6   : > { %v11424_v22 = vpop.f32.mrf.mxu0  ;;  %11627 = vmatmul.mubr.msk.bf16.vlgmr.msra.gmra.mxu0 %vm420_vm1, %v3562_v46  ;;  %v1510_v20 = vpop.f32.mrf.mxu1  ;;  %v3270_v46 = vpack.c.bf16 %v3210_v0, %v3241_v63  ;;  %v3565_v50 = vpack.c.bf16 %v3538_v5, %v3537_v21  ;;  %v17654_v0 = vld [vmem:[#allocation25_spill] sm:$0xff]  ;;  %v17655_v19 = vld [vmem:[#allocation26_spill] sm:$0xff] }
  0xf7   : > { %11630 = vmatprep.mubr.msk.bf16.mxu0 %vm420_vm1, %v3563_v62  ;;  %v1637_v24 = vadd.f32 %v13492_v40, %v1510_v20  ;;  %v13506_v23 = vadd.f32 %v11424_v22, %v1639_v61  ;;  %v3213_v62 = vld [vmem:[#allocation2 + $0x77] sm:$0xff] }
  0xf8   : > { %v1804_v47 = vpop.f32.mrf.mxu0  ;;  %v11391_v15 = vpop.f32.mrf.mxu1  ;;  %v3245_v63 = vmul.f32 %v17654_v0, %v3213_v62  ;;  %v3542_v62 = vld [vmem:[#allocation2 + $0x90] sm:$0xff] }
  0xf9   : > { %v1640_v36 = vadd.f32 %v11391_v15, %v13492_v40  ;;  %v13509_v51 = vadd.f32 %v1804_v47, %v1637_v24  ;;  %v3216_v47 = vld [vmem:[#allocation2 + $0x8f] sm:$0xff] }
  0xfa   : > { %v11425_v56 = vpop.f32.mrf.mxu0  ;;  %v1513_v29 = vpop.f32.mrf.mxu1 }
  0xfb   : > { %v1638_v20 = vadd.f32 %v13492_v40, %v1513_v29  ;;  %v13512_v22 = vadd.f32 %v11425_v56, %v1640_v36  ;;  %v3247_v29 = vmul.f32 %v17655_v19, %v3215_v35  ;;  %v3539_v36 = vld [vmem:[#allocation2 + $0x78] sm:$0xff]  ;;  %v3223_v19 = vld [vmem:[#allocation2 + $0xc7] sm:$0xff] }
  0xfc   : > { %v1807_v61 = vpop.f32.mrf.mxu0  ;;  %v11394_v26 = vpop.f32.mrf.mxu1  ;;  %11597 = vmatmul.mubr.msk.bf16.gmra.mxu1 %vm420_vm1, %v3270_v46  ;;  %v3541_v46 = vld [vmem:[#allocation2 + $0x88] sm:$0xff]  ;;  %v3566_v55 = vpack.c.bf16 %v3540_v30, %v3539_v36  ;;  %v17657_v30 = vld [vmem:[#allocation28_spill] sm:$0xff] }
  0xfd   : > { %v1643_v15 = vadd.f32 %v11394_v26, %v13492_v40  ;;  %v13517_v24 = vadd.f32 %v1807_v61, %v1638_v20  ;;  %11600 = vmatprep.mubr.msk.bf16.mxu1 %vm420_vm1, %v3271_v10  ;;  %v3273_v2 = vpack.c.bf16 %v3216_v47, %v3247_v29  ;;  %v3567_v3 = vpack.c.bf16 %v3542_v62, %v3541_v46  ;;  %v3218_v29 = vld [vmem:[#allocation2 + $0x9f] sm:$0xff] }
  0xfe   : > { %v11428_v38 = vpop.f32.mrf.mxu0  ;;  %11631 = vmatmul.mubr.msk.bf16.gmra.mxu0 %vm420_vm1, %v3564_v33  ;;  %v1526_v56 = vpop.f32.mrf.mxu1  ;;  %v3272_v33 = vpack.c.bf16 %v3214_v59, %v3245_v63  ;;  %v17656_v63 = vld [vmem:[#allocation27_spill] sm:$0xff]  ;;  %v3543_v46 = vld [vmem:[#allocation2 + $0x98] sm:$0xff]  ;;  %v3544_v62 = vld [vmem:[#allocation2 + $0xa0] sm:$0xff] }
  0xff   : > { %11634 = vmatprep.mubr.msk.bf16.mxu0 %vm420_vm1, %v3565_v50  ;;  %v1641_v21 = vadd.f32 %v13492_v40, %v1526_v56  ;;  %v13524_v5 = vadd.f32 %v11428_v38, %v1643_v15  ;;  %v3217_v50 = vld [vmem:[#allocation2 + $0x97] sm:$0xff]  ;;  %v3568_v60 = vpack.c.bf16 %v3544_v62, %v3543_v46  ;;  %v17659_v62 = vld [vmem:[#allocation30_spill] sm:$0xff] }
 0x100   : > { %v1820_v26 = vpop.f32.mrf.mxu0  ;;  %v11395_v20 = vpop.f32.mrf.mxu1  ;;  %v3249_v59 = vmul.f32 %v17656_v63, %v3217_v50  ;;  %v3546_v50 = vld [vmem:[#allocation2 + $0xb0] sm:$0xff] }
 0x101   : > { %v1644_v10 = vadd.f32 %v11395_v20, %v13492_v40  ;;  %v13527_v61 = vadd.f32 %v1820_v26, %v1641_v21  ;;  %v3220_v20 = vld [vmem:[#allocation2 + $0xaf] sm:$0xff] }
 0x102   : > { %v11429_v35 = vpop.f32.mrf.mxu0  ;;  %v1529_v13 = vpop.f32.mrf.mxu1 }
 0x103   : > { %v1642_v56 = vadd.f32 %v13492_v40, %v1529_v13  ;;  %v13530_v15 = vadd.f32 %v11429_v35, %v1644_v10  ;;  %v3251_v13 = vmul.f32 %v17657_v30, %v3219_v53  ;;  %v3545_v35 = vld [vmem:[#allocation2 + $0xa8] sm:$0xff] }
 0x104   : > { %v1823_v38 = vpop.f32.mrf.mxu0  ;;  %v11398_v39 = vpop.f32.mrf.mxu1  ;;  %11601 = vmatmul.mubr.msk.bf16.gmra.mxu1 %vm420_vm1, %v3272_v33  ;;  %v3569_v63 = vpack.c.bf16 %v3546_v50, %v3545_v35  ;;  %v3547_v35 = vld [vmem:[#allocation2 + $0xb8] sm:$0xff]  ;;  %v3548_v50 = vld [vmem:[#allocation2 + $0xc0] sm:$0xff] }
 0x105   : > { %v1647_v21 = vadd.f32 %v11398_v39, %v13492_v40  ;;  %v13535_v26 = vadd.f32 %v1823_v38, %v1642_v56  ;;  %11604 = vmatprep.mubr.msk.bf16.mxu1 %vm420_vm1, %v3273_v2  ;;  %v3275_v42 = vpack.c.bf16 %v3220_v20, %v3251_v13  ;;  %v3222_v13 = vld [vmem:[#allocation2 + $0xbf] sm:$0xff] }
 0x106   : > { %v11432_v36 = vpop.f32.mrf.mxu0  ;;  %11635 = vmatmul.mubr.msk.bf16.gmra.mxu0 %vm420_vm1, %v3566_v55  ;;  %v1542_v47 = vpop.f32.mrf.mxu1  ;;  %v3274_v55 = vpack.c.bf16 %v3218_v29, %v3249_v59  ;;  %v17658_v59 = vld [vmem:[#allocation29_spill] sm:$0xff] }
 0x107   : > { %11638 = vmatprep.mubr.msk.bf16.mxu0 %vm420_vm1, %v3567_v3  ;;  %v1645_v33 = vadd.f32 %v13492_v40, %v1542_v47  ;;  %v13542_v10 = vadd.f32 %v11432_v36, %v1647_v21  ;;  %v3221_v3 = vld [vmem:[#allocation2 + $0xb7] sm:$0xff] }
 0x108   : > { %v1836_v39 = vpop.f32.mrf.mxu0  ;;  %v11399_v56 = vpop.f32.mrf.mxu1  ;;  %v3253_v29 = vmul.f32 %v17658_v59, %v3221_v3  ;;  %v3550_v3 = vld [vmem:[#allocation2 + $0xd0] sm:$0xff] }
 0x109   : > { %v1648_v2 = vadd.f32 %v11399_v56, %v13492_v40  ;;  %v13545_v38 = vadd.f32 %v1836_v39, %v1645_v33  ;;  %v3224_v56 = vld [vmem:[#allocation2 + $0xcf] sm:$0xff] }
 0x10a   : > { %v11433_v53 = vpop.f32.mrf.mxu0  ;;  %v1545_v30 = vpop.f32.mrf.mxu1 }
 0x10b   : > { %v1646_v47 = vadd.f32 %v13492_v40, %v1545_v30  ;;  %v13548_v21 = vadd.f32 %v11433_v53, %v1648_v2  ;;  %v3255_v30 = vmul.f32 %v17659_v62, %v3223_v19  ;;  %v3549_v53 = vld [vmem:[#allocation2 + $0xc8] sm:$0xff]  ;;  %v3570_v62 = vpack.c.bf16 %v3548_v50, %v3547_v35 }
 0x10c   : > { %v1839_v36 = vpop.f32.mrf.mxu0  ;;  %v11402_v0 = vpop.f32.mrf.mxu1  ;;  %11605 = vmatmul.mubr.msk.bf16.gmra.mxu1 %vm420_vm1, %v3274_v55  ;;  %v3571_v52 = vpack.c.bf16 %v3550_v3, %v3549_v53  ;;  %v3552_v53 = vld [vmem:[#allocation2 + $0xe0] sm:$0xff]  ;;  %v3228_v3 = vld [vmem:[#allocation2 + $0xef] sm:$0xff] }
 0x10d   : > { %v1651_v33 = vadd.f32 %v11402_v0, %v13492_v40  ;;  %v13553_v39 = vadd.f32 %v1839_v36, %v1646_v47  ;;  %11608 = vmatprep.mubr.msk.bf16.mxu1 %vm420_vm1, %v3275_v42  ;;  %v3277_v59 = vpack.c.bf16 %v3224_v56, %v3255_v30  ;;  %v3226_v30 = vld [vmem:[#allocation2 + $0xdf] sm:$0xff] }
 0x10e   : > { %v11436_v46 = vpop.f32.mrf.mxu0  ;;  %11639 = vmatmul.mubr.msk.bf16.gmra.mxu0 %vm420_vm1, %v3568_v60  ;;  %v1558_v20 = vpop.f32.mrf.mxu1  ;;  %v3276_v60 = vpack.c.bf16 %v3222_v13, %v3253_v29  ;;  %v17660_v29 = vld [vmem:[#allocation33_spill] sm:$0xff]  ;;  %v3551_v56 = vld [vmem:[#allocation2 + $0xd8] sm:$0xff] }
 0x10f   : > { %11642 = vmatprep.mubr.msk.bf16.mxu0 %vm420_vm1, %v3569_v63  ;;  %v1649_v55 = vadd.f32 %v13492_v40, %v1558_v20  ;;  %v13560_v2 = vadd.f32 %v11436_v46, %v1651_v33  ;;  %v3225_v63 = vld [vmem:[#allocation2 + $0xd7] sm:$0xff] }
 0x110   : > { %v1852_v0 = vpop.f32.mrf.mxu0  ;;  %v11403_v47 = vpop.f32.mrf.mxu1  ;;  %v3257_v13 = vmul.f32 %v17660_v29, %v3225_v63 }
 0x111   : > { %v1652_v42 = vadd.f32 %v11403_v47, %v13492_v40  ;;  %v13563_v36 = vadd.f32 %v1852_v0, %v1649_v55 }
 0x112   : > { %v11437_v19 = vpop.f32.mrf.mxu0  ;;  %v1561_v14 = vpop.f32.mrf.mxu1 }
 0x113   : > { %v1650_v20 = vadd.f32 %v13492_v40, %v1561_v14  ;;  %v13566_v33 = vadd.f32 %v11437_v19, %v1652_v42  ;;  %v3259_v14 = vmul.f32 %v17575_v16, %v3227_v27  ;;  %v3553_v42 = vld [vmem:[#allocation2 + $0xe8] sm:$0xff]  ;;  %v3554_v19 = vld [vmem:[#allocation2 + $0xf0] sm:$0xff] }
 0x114   : > { %v1855_v46 = vpop.f32.mrf.mxu0  ;;  %v11406_v28 = vpop.f32.mrf.mxu1  ;;  %11609 = vmatmul.mubr.msk.bf16.gmra.mxu1 %vm420_vm1, %v3276_v60  ;;  %v3573_v41 = vpack.c.bf16 %v3554_v19, %v3553_v42 }
 0x115   : > { %v1655_v55 = vadd.f32 %v11406_v28, %v13492_v40  ;;  %v13571_v0 = vadd.f32 %v1855_v46, %v1650_v20  ;;  %11612 = vmatprep.mubr.msk.bf16.mxu1 %vm420_vm1, %v3277_v59  ;;  %v3572_v46 = vpack.c.bf16 %v3552_v53, %v3551_v56  ;;  %v3279_v16 = vpack.c.bf16 %v3228_v3, %v3259_v14  ;;  %v3230_v14 = vld [vmem:[#allocation2 + $0xff] sm:$0xff] }
 0x116   : > { %v11440_v35 = vpop.f32.mrf.mxu0  ;;  %11643 = vmatmul.mubr.msk.bf16.gmra.mxu0 %vm420_vm1, %v3570_v62  ;;  %v1574_v50 = vpop.f32.mrf.mxu1  ;;  %v3278_v62 = vpack.c.bf16 %v3226_v30, %v3257_v13  ;;  %v3263_v56 = vmul.f32 %v12967_v43, %v13272_v34  ;;  %v3555_v3 = vld [vmem:[#allocation2 + $0xf8] sm:$0xff] }
 0x117   : > { %11646 = vmatprep.mubr.msk.bf16.mxu0 %vm420_vm1, %v3571_v52  ;;  %v1653_v47 = vadd.f32 %v13492_v40, %v1574_v50  ;;  %v13578_v60 = vadd.f32 %v11440_v35, %v1655_v55  ;;  %v3229_v52 = vld [vmem:[#allocation2 + $0xf7] sm:$0xff] }
 0x118   : > { %v1868_v28 = vpop.f32.mrf.mxu0  ;;  %v11407_v63 = vpop.f32.mrf.mxu1  ;;  %v3261_v13 = vmul.f32 %v12956_v49, %v3229_v52 }
 0x119   : > { %v1656_v59 = vadd.f32 %v11407_v63, %v13492_v40  ;;  %v13581_v20 = vadd.f32 %v1868_v28, %v1653_v47  ;;  %v3556_v47 = vld [vmem:[#allocation2 + $0x100] sm:$0xff]  ;;  %v3557_v63 = vld [vmem:[#allocation2 + $0x108] sm:$0xff] }
 0x11a   : > { %v11441_v27 = vpop.f32.mrf.mxu0  ;;  %v13583_v29 = vpop.f32.mrf.mxu1  ;;  %v3574_v34 = vpack.c.bf16 %v3556_v47, %v3555_v3  ;;  %v3559_v47 = vld [vmem:[#allocation2 + $0x118] sm:$0xff] }
 0x11b   : > { %v13585_v48 = vadd.f32 %v11441_v27, %v1656_v59  ;;  %v3280_v27 = vpack.c.bf16 %v3230_v14, %v3261_v13 }
 0x11c   : > { %v13587_v55 = vpop.f32.mrf.mxu0  ;;  %v11410_v35 = vpop.f32.mrf.mxu1  ;;  %11613 = vmatmul.mubr.msk.bf16.gmra.mxu1 %vm420_vm1, %v3278_v62  ;;  %v3558_v62 = vld [vmem:[#allocation2 + $0x110] sm:$0xff] }
 0x11d   : > { %17661 = vst [vmem:[#allocation67_spill] sm:$0xff] %v13587_v55  ;;  %v1659_v30 = vadd.f32 %v11410_v35, %v13492_v40  ;;  %11616 = vmatprep.mubr.msk.bf16.mxu1 %vm420_vm1, %v3279_v16  ;;  %v3281_v35 = vpack.c.bf16 %v13284_v45, %v3263_v56  ;;  %v3575_v49 = vpack.c.bf16 %v3558_v62, %v3557_v63  ;;  %v3234_v45 = vld [vmem:[#allocation2 + $0x11f] sm:$0xff]  ;;  %v3823_v63 = vld [vmem:[#allocation2 + $0x29] sm:$0xff] }
 0x11e   : > { %v11444_v50 = vpop.f32.mrf.mxu0  ;;  %11647 = vmatmul.mubr.msk.bf16.gmra.mxu0 %vm420_vm1, %v3572_v46  ;;  %v1590_v53 = vpop.f32.mrf.mxu1 }
 0x11f   : > { %11650 = vmatprep.mubr.msk.bf16.mxu0 %vm420_vm1, %v3573_v41  ;;  %v1657_v28 = vadd.f32 %v13492_v40, %v1590_v53  ;;  %v13598_v42 = vadd.f32 %v11444_v50, %v1659_v30  ;;  %v3233_v41 = vld [vmem:[#allocation2 + $0x117] sm:$0xff] }
 0x120   : > { %v1884_v19 = vpop.f32.mrf.mxu0  ;;  %v11411_v59 = vpop.f32.mrf.mxu1  ;;  %v3824_v53 = vld [vmem:[#allocation2 + $0x31] sm:$0xff]  ;;  %v3265_v13 = vmul.f32 %v13006_v58, %v3233_v41  ;;  %v3826_v58 = vld [vmem:[#allocation2 + $0x41] sm:$0xff] }
 0x121   : > { %v1660_v16 = vadd.f32 %v11411_v59, %v13492_v40  ;;  %v13601_v46 = vadd.f32 %v1884_v19, %v1657_v28  ;;  %v3856_v56 = vmul.f32 %v13011_v44, %v3824_v53  ;;  %v3560_v19 = vld [vmem:[#allocation2 + $0x120] sm:$0xff] }
 0x122   : > { %v11445_v52 = vpop.f32.mrf.mxu0  ;;  %v13604_v43 = vpop.f32.mrf.mxu1  ;;  %v3576_v41 = vpack.c.bf16 %v3560_v19, %v3559_v47  ;;  %v3827_v19 = vld [vmem:[#allocation2 + $0x49] sm:$0xff] }
 0x123   : > { %17662 = vst [vmem:[#allocation68_spill] sm:$0xff] %v13604_v43  ;;  %v13606_v30 = vadd.f32 %v11445_v52, %v1660_v16  ;;  %v3282_v16 = vpack.c.bf16 %v3234_v45, %v3265_v13  ;;  %v3887_v53 = vpack.c.bf16 %v3856_v56, %v3823_v63  ;;  %v3858_v13 = vmul.f32 %v13028_v57, %v3826_v58  ;;  %v3825_v56 = vld [vmem:[#allocation2 + $0x39] sm:$0xff]  ;;  %v3832_v57 = vld [vmem:[#allocation2 + $0x71] sm:$0xff] }
 0x124   : > { %v13608_v50 = vpop.f32.mrf.mxu0  ;;  %v11414_v55 = vpop.f32.mrf.mxu1  ;;  %11617 = vmatmul.mubr.msk.bf16.gmra.mxu1 %vm420_vm1, %v3280_v27 }
 0x125   : > { %17663 = vst [vmem:[#allocation69_spill] sm:$0xff] %v13608_v50  ;;  %v1663_v14 = vadd.f32 %v11414_v55, %v13492_v40  ;;  %11620 = vmatprep.mubr.msk.bf16.mxu1 %vm420_vm1, %v3281_v35 }
 0x126   : > { %v11448_v28 = vpop.f32.mrf.mxu0  ;;  %11651 = vmatmul.mubr.msk.bf16.gmra.mxu0 %vm420_vm1, %v3574_v34  ;;  %v1606_v3 = vpop.f32.mrf.mxu1 }
 0x127   : > { %11654 = vmatprep.mubr.msk.bf16.mxu0 %vm420_vm1, %v3575_v49  ;;  %v1661_v62 = vadd.f32 %v13492_v40, %v1606_v3  ;;  %v13618_v59 = vadd.f32 %v11448_v28, %v1663_v14  ;;  %v3828_v49 = vld [vmem:[#allocation2 + $0x51] sm:$0xff] }
 0x128   : > { %v1900_v27 = vpop.f32.mrf.mxu0  ;;  %v11415_v55 = vpop.f32.mrf.mxu1  ;;  %v3860_v3 = vmul.f32 %v13034_v7, %v3828_v49 }
 0x129   : > { %v1664_v52 = vadd.f32 %v11415_v55, %v13492_v40  ;;  %v13621_v34 = vadd.f32 %v1900_v27, %v1661_v62 }
 0x12a   : > { %v11449_v35 = vpop.f32.mrf.mxu0  ;;  %v13623_v44 = vpop.f32.mrf.mxu1 }
 0x12b   : > { %v13625_v50 = vadd.f32 %v11449_v35, %v1664_v52 }
 0x12c   : > { %v13627_v43 = vpop.f32.mrf.mxu0  ;;  %v11418_v14 = vpop.f32.mrf.mxu1  ;;  %11621 = vmatmul.mubr.msk.bf16.gmra.mxu1 %vm420_vm1, %v3282_v16  ;;  %v3888_v16 = vpack.c.bf16 %v3858_v13, %v3825_v56  ;;  %v3864_v56 = vmul.f32 %v13068_v17, %v3832_v57 }
 0x12d   : > { %v1667_v28 = vadd.f32 %v11418_v14, %v13492_v40  ;;  %11660 = vmatprep.mubr.msk.bf16.mxu1 %vm420_vm1, %v3887_v53  ;;  %v3830_v14 = vld [vmem:[#allocation2 + $0x61] sm:$0xff] }
 0x12e   : > { %v11452_v45 = vpop.f32.mrf.mxu0  ;;  %11655 = vmatmul.mubr.msk.bf16.gmra.mxu0 %vm420_vm1, %v3576_v41  ;;  %v1622_v47 = vpop.f32.mrf.mxu1  ;;  %v3889_v41 = vpack.c.bf16 %v3860_v3, %v3827_v19  ;;  %v3831_v19 = vld [vmem:[#allocation2 + $0x69] sm:$0xff] }
 0x12f   : > { %v1665_v63 = vadd.f32 %v13492_v40, %v1622_v47  ;;  %v13636_v62 = vadd.f32 %v11452_v45, %v1667_v28  ;;  %v3862_v28 = vmul.f32 %v13061_v31, %v3830_v14  ;;  %v3829_v45 = vld [vmem:[#allocation2 + $0x59] sm:$0xff]  ;;  %v3834_v31 = vld [vmem:[#allocation2 + $0x81] sm:$0xff] }
 0x130   : > { %v1916_v27 = vpop.f32.mrf.mxu0  ;;  %v11419_v55 = vpop.f32.mrf.mxu1 }
 0x131   : > { %v1668_v58 = vadd.f32 %v11419_v55, %v13492_v40  ;;  %v13639_v52 = vadd.f32 %v1916_v27, %v1665_v63 }
 0x132   : > { %v11453_v35 = vpop.f32.mrf.mxu0  ;;  %v13641_v53 = vpop.f32.mrf.mxu1 }
 0x133   : > { %17664 = vst [vmem:[#allocation70_spill] sm:$0xff] %v13641_v53  ;;  %v13643_v49 = vadd.f32 %v11453_v35, %v1668_v58  ;;  %v3890_v35 = vpack.c.bf16 %v3862_v28, %v3829_v45  ;;  %v3866_v28 = vmul.f32 %v13110_v8, %v3834_v31  ;;  %v3833_v45 = vld [vmem:[#allocation2 + $0x79] sm:$0xff]  ;;  %v4545_v8 = vld [vmem:[#allocation2 + $0x8] sm:$0xff] }
 0x134   : > { %v13645_v7 = vpop.f32.mrf.mxu0  ;;  %v11458_v47 = vpop.f32.mrf.mxu1  ;;  %11661 = vmatmul.mubr.msk.bf16.vlgmr.msra.gmra.mxu1 %vm420_vm1, %v3888_v16 }
 0x135   : > { %17665 = vst [vmem:[#allocation71_spill] sm:$0xff] %v13645_v7  ;;  %v2259_v13 = vadd.f32 %v11458_v47, %v13506_v23  ;;  %11664 = vmatprep.mubr.msk.bf16.mxu1 %vm420_vm1, %v3889_v41  ;;  %v3891_v47 = vpack.c.bf16 %v3864_v56, %v3831_v19  ;;  %v3836_v7 = vld [vmem:[#allocation2 + $0x91] sm:$0xff] }
 0x136   : > { %v11492_v40 = vpop.f32.mrf.mxu0  ;;  %v2130_v3 = vpop.f32.mrf.mxu1  ;;  %v3868_v56 = vmul.f32 %v13116_v4, %v3836_v7 }
 0x137   : > { %v2257_v63 = vadd.f32 %v2130_v3, %v13509_v51  ;;  %v13653_v27 = vadd.f32 %v11492_v40, %v2259_v13 }
 0x138   : > { %v2456_v55 = vpop.f32.mrf.mxu0  ;;  %v11459_v58 = vpop.f32.mrf.mxu1 }
 0x139   : > { %v2260_v16 = vadd.f32 %v11459_v58, %v13512_v22  ;;  %v13656_v14 = vadd.f32 %v2456_v55, %v2257_v63 }
 0x13a   : > { %v11493_v23 = vpop.f32.mrf.mxu0  ;;  %v2133_v41 = vpop.f32.mrf.mxu1 }
 0x13b   : > { %v13659_v57 = vadd.f32 %v2133_v41, %v13517_v24  ;;  %v13661_v17 = vadd.f32 %v11493_v23, %v2260_v16  ;;  %v3835_v24 = vld [vmem:[#allocation2 + $0x89] sm:$0xff]  ;;  %v3892_v16 = vpack.c.bf16 %v3866_v28, %v3833_v45  ;;  %v3838_v41 = vld [vmem:[#allocation2 + $0xa1] sm:$0xff]  ;;  %v3837_v45 = vld [vmem:[#allocation2 + $0x99] sm:$0xff] }
 0x13c   : > { %v13663_v51 = vpop.f32.mrf.mxu0  ;;  %v11462_v13 = vpop.f32.mrf.mxu1  ;;  %11665 = vmatmul.mubr.msk.bf16.gmra.mxu1 %vm420_vm1, %v3890_v35  ;;  %v3893_v23 = vpack.c.bf16 %v3868_v56, %v3835_v24  ;;  %v3870_v28 = vmul.f32 %v13142_v1, %v3838_v41 }
 0x13d   : > { %v2263_v22 = vadd.f32 %v11462_v13, %v13524_v5  ;;  %11668 = vmatprep.mubr.msk.bf16.mxu1 %vm420_vm1, %v3891_v47  ;;  %v3840_v13 = vld [vmem:[#allocation2 + $0xb1] sm:$0xff] }
 0x13e   : > { %v11496_v40 = vpop.f32.mrf.mxu0  ;;  %v2146_v3 = vpop.f32.mrf.mxu1  ;;  %v3872_v56 = vmul.f32 %v13148_v54, %v3840_v13 }
 0x13f   : > { %v2261_v19 = vadd.f32 %v2146_v3, %v13527_v61  ;;  %v13671_v63 = vadd.f32 %v11496_v40, %v2263_v22 }
 0x140   : > { %v2472_v55 = vpop.f32.mrf.mxu0  ;;  %v11463_v58 = vpop.f32.mrf.mxu1 }
 0x141   : > { %v2264_v35 = vadd.f32 %v11463_v58, %v13530_v15  ;;  %v13674_v31 = vadd.f32 %v2472_v55, %v2261_v19 }
 0x142   : > { %v11497_v5 = vpop.f32.mrf.mxu0  ;;  %v2149_v47 = vpop.f32.mrf.mxu1 }
 0x143   : > { %v13677_v7 = vadd.f32 %v2149_v47, %v13535_v26  ;;  %v13679_v4 = vadd.f32 %v11497_v5, %v2264_v35  ;;  %v3839_v26 = vld [vmem:[#allocation2 + $0xa9] sm:$0xff]  ;;  %v3894_v35 = vpack.c.bf16 %v3870_v28, %v3837_v45  ;;  %v3842_v47 = vld [vmem:[#allocation2 + $0xc1] sm:$0xff] }
 0x144   : > { %v13681_v61 = vpop.f32.mrf.mxu0  ;;  %v11466_v22 = vpop.f32.mrf.mxu1  ;;  %11669 = vmatmul.mubr.msk.bf16.gmra.mxu1 %vm420_vm1, %v3892_v16  ;;  %v3895_v41 = vpack.c.bf16 %v3872_v56, %v3839_v26  ;;  %v3874_v45 = vmul.f32 %v17585_v32, %v3842_v47  ;;  %v3841_v26 = vld [vmem:[#allocation2 + $0xb9] sm:$0xff]  ;;  %v3848_v32 = vld [vmem:[#allocation2 + $0xf1] sm:$0xff] }
 0x145   : > { %v2267_v15 = vadd.f32 %v11466_v22, %v13542_v10  ;;  %11672 = vmatprep.mubr.msk.bf16.mxu1 %vm420_vm1, %v3893_v23  ;;  %v4300_v23 = vld [vmem:[%s17245_s5] sm:$0x3]  ;;  %v3844_v22 = vld [vmem:[#allocation2 + $0xd1] sm:$0xff] }
 0x146   : > { %v11500_v40 = vpop.f32.mrf.mxu0  ;;  %v2162_v3 = vpop.f32.mrf.mxu1  ;;  %12351 = vmatprep.subr.msk.bf16.mxu0 %vm1108_vm0, %v4300_v23 }
 0x147   : > { %v2265_v24 = vadd.f32 %v2162_v3, %v13545_v38  ;;  %v13689_v19 = vadd.f32 %v11500_v40, %v2267_v15  ;;  %v4350_v38 = vsel %vm1108_vm0, %v4300_v23, 0 }
 0x148   : > { %v2488_v55 = vpop.f32.mrf.mxu0  ;;  %v11467_v58 = vpop.f32.mrf.mxu1  ;;  %11693 = vmatpush3.bf16.msra.mxu0 %v4350_v38 }
 0x149   : > { %v2268_v16 = vadd.f32 %v11467_v58, %v13548_v21  ;;  %v13692_v5 = vadd.f32 %v2488_v55, %v2265_v24  ;;  %v3876_v24 = vmul.f32 %v17586_v12, %v3844_v22  ;;  %v3843_v55 = vld [vmem:[#allocation2 + $0xc9] sm:$0xff] }
 0x14a   : > { %v11501_v10 = vpop.f32.mrf.mxu0  ;;  %v2165_v13 = vpop.f32.mrf.mxu1 }
 0x14b   : > { %v13700_v15 = vadd.f32 %v2165_v13, %v13553_v39  ;;  %v13702_v28 = vadd.f32 %v11501_v10, %v2268_v16  ;;  %v3896_v13 = vpack.c.bf16 %v3874_v45, %v3841_v26  ;;  %v3897_v38 = vpack.c.bf16 %v3876_v24, %v3843_v55  ;;  %v3845_v26 = vld [vmem:[#allocation2 + $0xd9] sm:$0xff] }
 0x14c   : > { %v13704_v21 = vpop.f32.mrf.mxu0  ;;  %v11470_v40 = vpop.f32.mrf.mxu1  ;;  %11673 = vmatmul.mubr.msk.bf16.gmra.mxu1 %vm420_vm1, %v3894_v35  ;;  %v3880_v24 = vmul.f32 %v17599_v37, %v3848_v32 }
 0x14d   : > { %v2271_v56 = vadd.f32 %v11470_v40, %v13560_v2  ;;  %11676 = vmatprep.mubr.msk.bf16.mxu1 %vm420_vm1, %v3895_v41  ;;  %v3846_v40 = vld [vmem:[#allocation2 + $0xe1] sm:$0xff] }
 0x14e   : > { %v11504_v3 = vpop.f32.mrf.mxu0  ;;  %v2178_v39 = vpop.f32.mrf.mxu1  ;;  %v3878_v45 = vmul.f32 %v17597_v9, %v3846_v40  ;;  %v10549_v9 = vld [vmem:[%s17245_s5 + $0x2] sm:$0x3] }
 0x14f   : > { %v2269_v58 = vadd.f32 %v2178_v39, %v13563_v36  ;;  %v13712_v16 = vadd.f32 %v11504_v3, %v2271_v56  ;;  %12352 = vmatprep.subr.msk.bf16.mxu1 %vm1108_vm0, %v10549_v9 }
 0x150   : > { %v2504_v10 = vpop.f32.mrf.mxu0  ;;  %v11471_v23 = vpop.f32.mrf.mxu1 }
 0x151   : > { %v2272_v35 = vadd.f32 %v11471_v23, %v13566_v33  ;;  %v13715_v47 = vadd.f32 %v2504_v10, %v2269_v58 }
 0x152   : > { %v11505_v2 = vpop.f32.mrf.mxu0  ;;  %v2181_v41 = vpop.f32.mrf.mxu1 }
 0x153   : > { %v13718_v22 = vadd.f32 %v2181_v41, %v13571_v0  ;;  %v13720_v12 = vadd.f32 %v11505_v2, %v2272_v35  ;;  %v3847_v0 = vld [vmem:[#allocation2 + $0xe9] sm:$0xff]  ;;  %v3898_v35 = vpack.c.bf16 %v3878_v45, %v3845_v26  ;;  %v3850_v41 = vld [vmem:[#allocation2 + $0x101] sm:$0xff] }
 0x154   : > { %v13722_v36 = vpop.f32.mrf.mxu0  ;;  %v11474_v56 = vpop.f32.mrf.mxu1  ;;  %11677 = vmatmul.mubr.msk.bf16.gmra.mxu1 %vm420_vm1, %v3896_v13  ;;  %v3899_v40 = vpack.c.bf16 %v3880_v24, %v3847_v0 }
 0x155   : > { %v2275_v33 = vadd.f32 %v11474_v56, %v13578_v60  ;;  %11680 = vmatprep.mubr.msk.bf16.mxu1 %vm420_vm1, %v3897_v38 }
 0x156   : > { %v11508_v3 = vpop.f32.mrf.mxu0  ;;  %v2194_v39 = vpop.f32.mrf.mxu1 }
 0x157   : > { %v2273_v55 = vadd.f32 %v2194_v39, %v13581_v20  ;;  %v13730_v58 = vadd.f32 %v11508_v3, %v2275_v33  ;;  %v3882_v20 = vmul.f32 %v13237_v6, %v3850_v41  ;;  %v3884_v3 = vmul.f32 %v13243_v11, %v13435_v25  ;;  %v17669_v41 = vld [vmem:[#allocation54_spill] sm:$0xff] }
 0x158   : > { %v2520_v10 = vpop.f32.mrf.mxu0  ;;  %v11475_v23 = vpop.f32.mrf.mxu1 }
 0x159   : > { %v2276_v13 = vadd.f32 %v11475_v23, %v13585_v48  ;;  %v13733_v2 = vadd.f32 %v2520_v10, %v2273_v55  ;;  %v3849_v48 = vld [vmem:[#allocation2 + $0xf9] sm:$0xff] }
 0x15a   : > { %v11509_v60 = vpop.f32.mrf.mxu0  ;;  %v13735_v38 = vpop.f32.mrf.mxu1  ;;  %v3900_v10 = vpack.c.bf16 %v3882_v20, %v3849_v48 }
 0x15b   : > { %v13737_v56 = vadd.f32 %v11509_v60, %v2276_v13  ;;  %v3854_v13 = vld [vmem:[#allocation2 + $0x121] sm:$0xff] }
 0x15c   : > { %v13739_v32 = vpop.f32.mrf.mxu0  ;;  %v11478_v37 = vpop.f32.mrf.mxu1  ;;  %11681 = vmatmul.mubr.msk.bf16.gmra.mxu1 %vm420_vm1, %v3898_v35 }
 0x15d   : > { %17666 = vst [vmem:[#allocation72_spill] sm:$0xff] %v13739_v32  ;;  %v2279_v45 = vadd.f32 %v11478_v37, %v13598_v42  ;;  %11684 = vmatprep.mubr.msk.bf16.mxu1 %vm420_vm1, %v3899_v40  ;;  %v3901_v42 = vpack.c.bf16 %v3884_v3, %v13452_v18 }
 0x15e   : > { %v11512_v33 = vpop.f32.mrf.mxu0  ;;  %v2210_v26 = vpop.f32.mrf.mxu1 }
 0x15f   : > { %v2277_v24 = vadd.f32 %v2210_v26, %v13601_v46  ;;  %v13748_v39 = vadd.f32 %v11512_v33, %v2279_v45  ;;  %v3886_v45 = vmul.f32 %v17669_v41, %v3854_v13  ;;  %v3853_v33 = vld [vmem:[#allocation2 + $0x119] sm:$0xff] }
 0x160   : > { %v2536_v0 = vpop.f32.mrf.mxu0  ;;  %v11479_v55 = vpop.f32.mrf.mxu1 }
 0x161   : > { %v2280_v23 = vadd.f32 %v11479_v55, %v13606_v30  ;;  %v13751_v35 = vadd.f32 %v2536_v0, %v2277_v24  ;;  %v3902_v0 = vpack.c.bf16 %v3886_v45, %v3853_v33 }
 0x162   : > { %v11513_v37 = vpop.f32.mrf.mxu0  ;;  %v13754_v60 = vpop.f32.mrf.mxu1 }
 0x163   : > { %17667 = vst [vmem:[#allocation73_spill] sm:$0xff] %v13754_v60  ;;  %v13756_v40 = vadd.f32 %v11513_v37, %v2280_v23 }
 0x164   : > { %v13758_v25 = vpop.f32.mrf.mxu0  ;;  %v11482_v46 = vpop.f32.mrf.mxu1  ;;  %11685 = vmatmul.mubr.msk.bf16.gmra.mxu1 %vm420_vm1, %v3900_v10 }
 0x165   : > { %17668 = vst [vmem:[#allocation74_spill] sm:$0xff] %v13758_v25  ;;  %v2283_v20 = vadd.f32 %v11482_v46, %v13618_v59  ;;  %11688 = vmatprep.mubr.msk.bf16.mxu1 %vm420_vm1, %v3901_v42 }
 0x166   : > { %v11516_v30 = vpop.f32.mrf.mxu0  ;;  %v2226_v48 = vpop.f32.mrf.mxu1 }
 0x167   : > { %v2281_v18 = vadd.f32 %v2226_v48, %v13621_v34  ;;  %v13765_v3 = vadd.f32 %v11516_v30, %v2283_v20 }
 0x168   : > { %v2552_v26 = vpop.f32.mrf.mxu0  ;;  %v11483_v24 = vpop.f32.mrf.mxu1 }
 0x169   : > { %v2284_v55 = vadd.f32 %v11483_v24, %v13625_v50  ;;  %v13768_v23 = vadd.f32 %v2552_v26, %v2281_v18 }
 0x16a   : > { %v11517_v10 = vpop.f32.mrf.mxu0  ;;  %v13770_v37 = vpop.f32.mrf.mxu1 }
 0x16b   : > { %17670 = vst [vmem:[#allocation75_spill] sm:$0xff] %v13770_v37  ;;  %v13772_v59 = vadd.f32 %v11517_v10, %v2284_v55 }
 0x16c   : > { %v13774_v13 = vpop.f32.mrf.mxu0  ;;  %v11486_v42 = vpop.f32.mrf.mxu1  ;;  %11689 = vmatmul.mubr.msk.bf16.gmra.mxu1 %vm420_vm1, %v3902_v0 }
 0x16d   : > { %17671 = vst [vmem:[#allocation76_spill] sm:$0xff] %v13774_v13  ;;  %v2287_v34 = vadd.f32 %v11486_v42, %v13636_v62 }
 0x16e   : > { %v11520_v46 = vpop.f32.mrf.mxu0  ;;  %v2242_v20 = vpop.f32.mrf.mxu1 }
 0x16f   : > { %v2285_v45 = vadd.f32 %v2242_v20, %v13639_v52  ;;  %v13779_v30 = vadd.f32 %v11520_v46, %v2287_v34 }
 0x170   : > { %v2568_v50 = vpop.f32.mrf.mxu0  ;;  %v11487_v33 = vpop.f32.mrf.mxu1 }
 0x171   : > { %v2288_v48 = vadd.f32 %v11487_v33, %v13643_v49  ;;  %v13782_v18 = vadd.f32 %v2568_v50, %v2285_v45 }
 0x172   : > { %v11521_v26 = vpop.f32.mrf.mxu0  ;;  %v13784_v24 = vpop.f32.mrf.mxu1 }
 0x173   : > { %17672 = vst [vmem:[#allocation77_spill] sm:$0xff] %v13784_v24  ;;  %v13786_v55 = vadd.f32 %v11521_v26, %v2288_v48 }
 0x174   : > { %v13788_v0 = vpop.f32.mrf.mxu0  ;;  %v11526_v62 = vpop.f32.mrf.mxu1 }
 0x175   : > { %17673 = vst [vmem:[#allocation78_spill] sm:$0xff] %v13788_v0  ;;  %v13791_v10 = vadd.f32 %v11526_v62, %v13653_v27  ;;  %v4546_v0 = vld [vmem:[#allocation2 + $0x10] sm:$0xff] }
 0x176   : > { %v13793_v52 = vpop.f32.mrf.mxu0  ;;  %v2718_v42 = vpop.f32.mrf.mxu1  ;;  %v4577_v37 = vpack.c.bf16 %v4546_v0, %v4545_v8 }
 0x177   : > { %v13796_v34 = vadd.f32 %v2718_v42, %v13656_v14 }
 0x178   : > { %v13798_v49 = vpop.f32.mrf.mxu0  ;;  %v11527_v46 = vpop.f32.mrf.mxu1  ;;  %11728 = vmatprep.mubr.msk.bf16.mxu1 %vm420_vm1, %v4577_v37 }
 0x179   : > { %v13801_v20 = vadd.f32 %v11527_v46, %v13661_v17 }
 0x17a   : > { %v13803_v45 = vpop.f32.mrf.mxu0  ;;  %v13805_v50 = vpop.f32.mrf.mxu1 }
 0x17c   : > { %v13807_v33 = vpop.f32.mrf.mxu0  ;;  %v11530_v27 = vpop.f32.mrf.mxu1 }
 0x17d   : > { %v13810_v48 = vadd.f32 %v11530_v27, %v13671_v63  ;;  %v4220_v63 = vld [vmem:[#allocation2 + $0x7] sm:$0xff] }
 0x17e   : > { %v13812_v26 = vpop.f32.mrf.mxu0  ;;  %v2734_v14 = vpop.f32.mrf.mxu1 }
 0x17f   : > { %v13815_v62 = vadd.f32 %v2734_v14, %v13674_v31  ;;  %v17674_v31 = vld [vmem:[#allocation20_spill] sm:$0xff] }
 0x180   : > { %v13817_v42 = vpop.f32.mrf.mxu0  ;;  %v11531_v17 = vpop.f32.mrf.mxu1  ;;  %v4252_v14 = vmul.f32 %v17674_v31, %v4220_v63 }
 0x181   : > { %v13820_v46 = vadd.f32 %v11531_v17, %v13679_v4  ;;  %v4644_v4 = vsel %vm1108_vm0, %v10549_v9, 0  ;;  %v4221_v17 = vld [vmem:[#allocation2 + $0xf] sm:$0xff] }
 0x182   : > { %v13822_v41 = vpop.f32.mrf.mxu0  ;;  %v13824_v11 = vpop.f32.mrf.mxu1  ;;  %11727 = vmatpush3.bf16.msra.mxu1 %v4644_v4  ;;  %v4284_v13 = vpack.c.bf16 %v4221_v17, %v4252_v14 }
 0x184   : > { %v13826_v6 = vpop.f32.mrf.mxu0  ;;  %v11534_v27 = vpop.f32.mrf.mxu1  ;;  %11694 = vmatprep.mubr.msk.bf16.mxu0 %vm420_vm1, %v4284_v13  ;;  %v13863_v13 = vld [vmem:[%s17245_s5 + $0x4] sm:$0x3] }
 0x185   : > { %v13833_v54 = vadd.f32 %v11534_v27, %v13689_v19  ;;  %17678 = vst [vmem:[#allocation82_spill] sm:$0xff] %v13863_v13  ;;  %12353 = vmatprep.subr.msk.bf16.mxu0 %vm1108_vm0, %v13863_v13 }
 0x186   : > { %v13835_v1 = vpop.f32.mrf.mxu0  ;;  %v2750_v24 = vpop.f32.mrf.mxu1 }
 0x187   : > { %v13840_v25 = vadd.f32 %v2750_v24, %v13692_v5 }
 0x188   : > { %v13842_v63 = vpop.f32.mrf.mxu0  ;;  %v11535_v19 = vpop.f32.mrf.mxu1 }
 0x189   : > { %v13847_v27 = vadd.f32 %v11535_v19, %v13702_v28 }
 0x18a   : > { %v13849_v9 = vpop.f32.mrf.mxu0  ;;  %v13851_v31 = vpop.f32.mrf.mxu1 }
 0x18c   : > { %v13853_v4 = vpop.f32.mrf.mxu0  ;;  %v11538_v8 = vpop.f32.mrf.mxu1 }
 0x18d   : > { %17675 = vst [vmem:[#allocation79_spill] sm:$0xff] %v13853_v4  ;;  %v13856_v5 = vadd.f32 %v11538_v8, %v13712_v16 }
 0x18e   : > { %v13858_v24 = vpop.f32.mrf.mxu0  ;;  %v2766_v37 = vpop.f32.mrf.mxu1 }
 0x18f   : > { %17676 = vst [vmem:[#allocation80_spill] sm:$0xff] %v13856_v5  ;;  %17677 = vst [vmem:[#allocation81_spill] sm:$0xff] %v13858_v24  ;;  %v13868_v28 = vadd.f32 %v2766_v37, %v13715_v47 }
 0x190   : > { %v13870_v0 = vpop.f32.mrf.mxu0  ;;  %v11539_v14 = vpop.f32.mrf.mxu1 }
 0x191   : > { %17679 = vst [vmem:[#allocation83_spill] sm:$0xff] %v13868_v28  ;;  %17680 = vst [vmem:[#allocation84_spill] sm:$0xff] %v13870_v0  ;;  %v13873_v16 = vadd.f32 %v11539_v14, %v13720_v12 }
 0x192   : > { %v13875_v17 = vpop.f32.mrf.mxu0  ;;  %v13877_v19 = vpop.f32.mrf.mxu1 }
 0x193   : > { %17681 = vst [vmem:[#allocation85_spill] sm:$0xff] %v13873_v16  ;;  %17682 = vst [vmem:[#allocation86_spill] sm:$0xff] %v13875_v17 }
 0x194   : > { %17683 = vst [vmem:[#allocation87_spill] sm:$0xff] %v13877_v19  ;;  %v13879_v8 = vpop.f32.mrf.mxu0  ;;  %v11542_v53 = vpop.f32.mrf.mxu1 }
 0x195   : > { %17684 = vst [vmem:[#allocation88_spill] sm:$0xff] %v13879_v8  ;;  %v13882_v60 = vadd.f32 %v11542_v53, %v13730_v58 }
 0x196   : > { %v13884_v24 = vpop.f32.mrf.mxu0  ;;  %v2782_v47 = vpop.f32.mrf.mxu1 }
 0x197   : > { %17685 = vst [vmem:[#allocation89_spill] sm:$0xff] %v13882_v60  ;;  %17686 = vst [vmem:[#allocation90_spill] sm:$0xff] %v13884_v24  ;;  %v13887_v37 = vadd.f32 %v2782_v47, %v13733_v2 }
 0x198   : > { %v13889_v0 = vpop.f32.mrf.mxu0  ;;  %v11543_v12 = vpop.f32.mrf.mxu1 }
 0x199   : > { %17687 = vst [vmem:[#allocation91_spill] sm:$0xff] %v13887_v37  ;;  %17688 = vst [vmem:[#allocation92_spill] sm:$0xff] %v13889_v0  ;;  %v13892_v14 = vadd.f32 %v11543_v12, %v13737_v56 }
 0x19a   : > { %v13894_v17 = vpop.f32.mrf.mxu0  ;;  %v13896_v16 = vpop.f32.mrf.mxu1 }
 0x19b   : > { %17689 = vst [vmem:[#allocation93_spill] sm:$0xff] %v13892_v14  ;;  %17690 = vst [vmem:[#allocation94_spill] sm:$0xff] %v13894_v17 }
 0x19c   : > { %17691 = vst [vmem:[#allocation95_spill] sm:$0xff] %v13896_v16  ;;  %v13898_v8 = vpop.f32.mrf.mxu0  ;;  %v11546_v53 = vpop.f32.mrf.mxu1 }
 0x19d   : > { %17692 = vst [vmem:[#allocation96_spill] sm:$0xff] %v13898_v8  ;;  %v13901_v58 = vadd.f32 %v11546_v53, %v13748_v39 }
 0x19e   : > { %v13903_v24 = vpop.f32.mrf.mxu0  ;;  %v2798_v2 = vpop.f32.mrf.mxu1 }
 0x19f   : > { %17693 = vst [vmem:[#allocation97_spill] sm:$0xff] %v13901_v58  ;;  %17694 = vst [vmem:[#allocation98_spill] sm:$0xff] %v13903_v24  ;;  %v13906_v47 = vadd.f32 %v2798_v2, %v13751_v35 }
 0x1a0   : > { %v13908_v0 = vpop.f32.mrf.mxu0  ;;  %v11547_v56 = vpop.f32.mrf.mxu1 }
 0x1a1   : > { %17695 = vst [vmem:[#allocation99_spill] sm:$0xff] %v13906_v47  ;;  %17696 = vst [vmem:[#allocation100_spill] sm:$0xff] %v13908_v0  ;;  %v13911_v12 = vadd.f32 %v11547_v56, %v13756_v40 }
 0x1a2   : > { %v13913_v17 = vpop.f32.mrf.mxu0  ;;  %v13915_v14 = vpop.f32.mrf.mxu1 }
 0x1a3   : > { %17697 = vst [vmem:[#allocation101_spill] sm:$0xff] %v13911_v12  ;;  %17698 = vst [vmem:[#allocation102_spill] sm:$0xff] %v13913_v17 }
 0x1a4   : > { %17699 = vst [vmem:[#allocation103_spill] sm:$0xff] %v13915_v14  ;;  %v13917_v8 = vpop.f32.mrf.mxu0  ;;  %v11550_v39 = vpop.f32.mrf.mxu1 }
 0x1a5   : > { %17700 = vst [vmem:[#allocation104_spill] sm:$0xff] %v13917_v8  ;;  %v13920_v53 = vadd.f32 %v11550_v39, %v13765_v3 }
 0x1a6   : > { %v13922_v24 = vpop.f32.mrf.mxu0  ;;  %v2814_v35 = vpop.f32.mrf.mxu1 }
 0x1a7   : > { %17701 = vst [vmem:[#allocation105_spill] sm:$0xff] %v13920_v53  ;;  %17702 = vst [vmem:[#allocation106_spill] sm:$0xff] %v13922_v24  ;;  %v13925_v2 = vadd.f32 %v2814_v35, %v13768_v23 }
 0x1a8   : > { %v13927_v0 = vpop.f32.mrf.mxu0  ;;  %v11551_v40 = vpop.f32.mrf.mxu1 }
 0x1a9   : > { %17703 = vst [vmem:[#allocation107_spill] sm:$0xff] %v13925_v2  ;;  %17704 = vst [vmem:[#allocation108_spill] sm:$0xff] %v13927_v0  ;;  %v13930_v56 = vadd.f32 %v11551_v40, %v13772_v59 }
 0x1aa   : > { %v13932_v17 = vpop.f32.mrf.mxu0  ;;  %v13934_v12 = vpop.f32.mrf.mxu1 }
 0x1ab   : > { %17705 = vst [vmem:[#allocation109_spill] sm:$0xff] %v13930_v56  ;;  %17706 = vst [vmem:[#allocation110_spill] sm:$0xff] %v13932_v17 }
 0x1ac   : > { %17707 = vst [vmem:[#allocation111_spill] sm:$0xff] %v13934_v12  ;;  %v13936_v8 = vpop.f32.mrf.mxu0  ;;  %v11554_v3 = vpop.f32.mrf.mxu1 }
 0x1ad   : > { %17708 = vst [vmem:[#allocation112_spill] sm:$0xff] %v13936_v8  ;;  %v13939_v39 = vadd.f32 %v11554_v3, %v13779_v30 }
 0x1ae   : > { %v13941_v24 = vpop.f32.mrf.mxu0  ;;  %v2830_v23 = vpop.f32.mrf.mxu1 }
 0x1af   : > { %17709 = vst [vmem:[#allocation113_spill] sm:$0xff] %v13939_v39  ;;  %17710 = vst [vmem:[#allocation114_spill] sm:$0xff] %v13941_v24  ;;  %v13944_v35 = vadd.f32 %v2830_v23, %v13782_v18 }
 0x1b0   : > { %v13946_v0 = vpop.f32.mrf.mxu0  ;;  %v11555_v59 = vpop.f32.mrf.mxu1 }
 0x1b1   : > { %17711 = vst [vmem:[#allocation115_spill] sm:$0xff] %v13944_v35  ;;  %17712 = vst [vmem:[#allocation116_spill] sm:$0xff] %v13946_v0  ;;  %v13949_v40 = vadd.f32 %v11555_v59, %v13786_v55 }
 0x1b2   : > { %v13951_v17 = vpop.f32.mrf.mxu0  ;;  %v13953_v56 = vpop.f32.mrf.mxu1 }
 0x1b3   : > { %17713 = vst [vmem:[#allocation117_spill] sm:$0xff] %v13949_v40  ;;  %17714 = vst [vmem:[#allocation118_spill] sm:$0xff] %v13951_v17 }
 0x1b4   : > { %17715 = vst [vmem:[#allocation119_spill] sm:$0xff] %v13953_v56  ;;  %v13955_v8 = vpop.f32.mrf.mxu0  ;;  %v11594_v30 = vpop.f32.mrf.mxu1 }
 0x1b5   : > { %17716 = vst [vmem:[#allocation120_spill] sm:$0xff] %v13955_v8  ;;  %v13974_v8 = vld [vmem:[%s17245_s5 + $0x6] sm:$0x3] }
 0x1b6   : > { %v11628_v3 = vpop.f32.mrf.mxu0  ;;  %v3370_v39 = vpop.f32.mrf.mxu1  ;;  %17717 = vst [vmem:[#allocation121_spill] sm:$0xff] %v13974_v8  ;;  %12354 = vmatprep.subr.msk.bf16.mxu1 %vm1108_vm0, %v13974_v8 }
 0x1b8   : > { %v3664_v24 = vpop.f32.mrf.mxu0  ;;  %v11595_v12 = vpop.f32.mrf.mxu1 }
 0x1ba   : > { %v3373_v2 = vpop.f32.mrf.mxu1  ;;  %v13957_v18 = vpop.f32.mrf.mxu0 }
 0x1bc   : > { %v13959_v23 = vpop.f32.mrf.mxu1  ;;  %v13961_v0 = vpop.f32.mrf.mxu0 }
 0x1be   : > { %v13963_v55 = vpop.f32.mrf.mxu1  ;;  %v13967_v17 = vpop.f32.mrf.mxu0 }
 0x1c0   : > { %v13965_v59 = vpop.f32.mrf.mxu1  ;;  %v13980_v35 = vpop.f32.mrf.mxu0 }
 0x1c2   : > { %v13969_v40 = vpop.f32.mrf.mxu1  ;;  %v13986_v47 = vpop.f32.mrf.mxu0 }
 0x1c4   : > { %v13976_v56 = vpop.f32.mrf.mxu1  ;;  %v13992_v37 = vpop.f32.mrf.mxu0 }
 0x1c6   : > { %v13982_v53 = vpop.f32.mrf.mxu1  ;;  %v13998_v28 = vpop.f32.mrf.mxu0 }
 0x1c7   : > { %17723 = vst [vmem:[#allocation127_spill] sm:$0xff] %v13998_v28 }
 0x1c8   : > { %v13984_v14 = vpop.f32.mrf.mxu1  ;;  %v14004_v13 = vpop.f32.mrf.mxu0 }
 0x1c9   : > { %17718 = vst [vmem:[#allocation122_spill] sm:$0xff] %v13984_v14  ;;  %17726 = vst [vmem:[#allocation130_spill] sm:$0xff] %v14004_v13 }
 0x1ca   : > { %v13988_v58 = vpop.f32.mrf.mxu1 }
 0x1cb   : > { %17719 = vst [vmem:[#allocation123_spill] sm:$0xff] %v13988_v58  ;;  %v14010_v58 = vpop.f32.mrf.mxu0 }
 0x1cc   : > { %v13990_v16 = vpop.f32.mrf.mxu1  ;;  %17729 = vst [vmem:[#allocation133_spill] sm:$0xff] %v14010_v58 }
 0x1cd   : > { %17720 = vst [vmem:[#allocation124_spill] sm:$0xff] %v13990_v16 }
 0x1ce   : > { %v13994_v60 = vpop.f32.mrf.mxu1 }
 0x1cf   : > { %17721 = vst [vmem:[#allocation125_spill] sm:$0xff] %v13994_v60  ;;  %v14016_v60 = vpop.f32.mrf.mxu0 }
 0x1d0   : > { %v13996_v19 = vpop.f32.mrf.mxu1  ;;  %17732 = vst [vmem:[#allocation136_spill] sm:$0xff] %v14016_v60 }
 0x1d1   : > { %17722 = vst [vmem:[#allocation126_spill] sm:$0xff] %v13996_v19 }
 0x1d2   : > { %v14000_v8 = vpop.f32.mrf.mxu1 }
 0x1d3   : > { %17724 = vst [vmem:[#allocation128_spill] sm:$0xff] %v14000_v8  ;;  %v14022_v8 = vpop.f32.mrf.mxu0 }
 0x1d4   : > { %v14002_v5 = vpop.f32.mrf.mxu1 }
 0x1d5   : > { %17725 = vst [vmem:[#allocation129_spill] sm:$0xff] %v14002_v5 }
 0x1d6   : > { %v14006_v14 = vpop.f32.mrf.mxu1 }
 0x1d7   : > { %17727 = vst [vmem:[#allocation131_spill] sm:$0xff] %v14006_v14  ;;  %v14028_v14 = vpop.f32.mrf.mxu0 }
 0x1d8   : > { %v14008_v4 = vpop.f32.mrf.mxu1  ;;  %17737 = vst [vmem:[#allocation141_spill] sm:$0xff] %v14028_v14 }
 0x1d9   : > { %17728 = vst [vmem:[#allocation132_spill] sm:$0xff] %v14008_v4 }
 0x1da   : > { %v14012_v16 = vpop.f32.mrf.mxu1 }
 0x1db   : > { %17730 = vst [vmem:[#allocation134_spill] sm:$0xff] %v14012_v16  ;;  %v14034_v16 = vpop.f32.mrf.mxu0 }
 0x1dc   : > { %v14014_v32 = vpop.f32.mrf.mxu1  ;;  %17740 = vst [vmem:[#allocation144_spill] sm:$0xff] %v14034_v16 }
 0x1dd   : > { %17731 = vst [vmem:[#allocation135_spill] sm:$0xff] %v14014_v32 }
 0x1de   : > { %v14018_v19 = vpop.f32.mrf.mxu1 }
 0x1df   : > { %17733 = vst [vmem:[#allocation137_spill] sm:$0xff] %v14018_v19  ;;  %v14044_v19 = vpop.f32.mrf.mxu0 }
 0x1e0   : > { %v14020_v28 = vpop.f32.mrf.mxu1 }
 0x1e1   : > { %17734 = vst [vmem:[#allocation138_spill] sm:$0xff] %v14020_v28  ;;  %v2584_v28 = vadd.f32 %v13663_v51, %v13659_v57  ;;  %v14055_v57 = vpop.f32.mrf.mxu0 }
 0x1e2   : > { %v14024_v5 = vpop.f32.mrf.mxu1 }
 0x1e3   : > { %17735 = vst [vmem:[#allocation139_spill] sm:$0xff] %v14024_v5  ;;  %v3173_v5 = vadd.f32 %v13793_v52, %v13791_v10 }
 0x1e4   : > { %v14026_v13 = vpop.f32.mrf.mxu1 }
 0x1e5   : > { %17736 = vst [vmem:[#allocation140_spill] sm:$0xff] %v14026_v13  ;;  %v3499_v16 = vadd.f32 %v11594_v30, %v3173_v5 }
 0x1e6   : > { %v14030_v4 = vpop.f32.mrf.mxu1 }
 0x1e7   : > { %17738 = vst [vmem:[#allocation142_spill] sm:$0xff] %v14030_v4  ;;  %v3171_v4 = vadd.f32 %v13798_v49, %v13796_v34  ;;  %v3793_v52 = vadd.f32 %v11628_v3, %v3499_v16  ;;  %v2588_v34 = vadd.f32 %v13681_v61, %v13677_v7  ;;  %v14074_v61 = vpop.f32.mrf.mxu0 }
 0x1e8   : > { %v14032_v58 = vpop.f32.mrf.mxu1 }
 0x1e9   : > { %17739 = vst [vmem:[#allocation143_spill] sm:$0xff] %v14032_v58  ;;  %v2846_v58 = vadd.f32 %v13805_v50, %v2584_v28  ;;  %v3177_v50 = vadd.f32 %v13812_v26, %v13810_v48  ;;  %v2850_v7 = vadd.f32 %v13824_v11, %v2588_v34  ;;  %v14087_v3 = vpop.f32.mrf.mxu0 }
 0x1ea   : > { %v14036_v32 = vpop.f32.mrf.mxu1 }
 0x1eb   : > { %17741 = vst [vmem:[#allocation145_spill] sm:$0xff] %v14036_v32  ;;  %v3497_v32 = vadd.f32 %v3370_v39, %v3171_v4  ;;  %v3172_v10 = vadd.f32 %v13807_v33, %v2846_v58  ;;  %v3503_v48 = vadd.f32 %v13959_v23, %v3177_v50 }
 0x1ec   : > { %v14038_v60 = vpop.f32.mrf.mxu1 }
 0x1ed   : > { %17742 = vst [vmem:[#allocation146_spill] sm:$0xff] %v14038_v60  ;;  %v3174_v60 = vadd.f32 %v13803_v45, %v13801_v20  ;;  %v3791_v5 = vadd.f32 %v3664_v24, %v3497_v32  ;;  %v3498_v28 = vadd.f32 %v3373_v2, %v3172_v10  ;;  %v14067_v20 = vld [vmem:[%s17244_s4] ss:$0 sm:$0xff]  ;;  %v3178_v24 = vadd.f32 %v13822_v41, %v13820_v46  ;;  %v17745_v2 = vld [vmem:[#allocation68_spill] sm:$0xff] }
 0x1ee   : > { %v14046_v13 = vpop.f32.mrf.mxu1  ;;  %v1654_v45 = vadd.f32 %v14067_v20, %v13583_v29  ;;  %v3176_v41 = vadd.f32 %v13826_v6, %v2850_v7  ;;  %v3797_v46 = vadd.f32 %v13967_v17, %v3503_v48  ;;  %v2592_v10 = vadd.f32 %v13704_v21, %v13700_v15 }
 0x1ef   : > { %17743 = vst [vmem:[#allocation147_spill] sm:$0xff] %v14046_v13  ;;  %v3500_v13 = vadd.f32 %v11595_v12, %v3174_v60  ;;  %v3175_v60 = vadd.f32 %v13817_v42, %v13815_v62  ;;  %v3792_v58 = vadd.f32 %v13961_v0, %v3498_v28  ;;  %v17744_v42 = vld [vmem:[#allocation67_spill] sm:$0xff]  ;;  %v3504_v39 = vadd.f32 %v13965_v59, %v3178_v24 }
 0x1f0   : > { %v14051_v14 = vpop.f32.mrf.mxu1  ;;  %v1948_v12 = vadd.f32 %v17744_v42, %v1654_v45  ;;  %v3181_v59 = vadd.f32 %v13835_v1, %v13833_v54  ;;  %v3502_v6 = vadd.f32 %v13969_v40, %v3176_v41  ;;  %v2854_v15 = vadd.f32 %v13851_v31, %v2592_v10  ;;  %v14108_v54 = vpop.f32.mrf.mxu0  ;;  %v17746_v45 = vld [vmem:[#allocation69_spill] sm:$0xff]  ;;  %v17757_v41 = vld [vmem:[#allocation123_spill] sm:$0xff] }
 0x1f1   : > { %v3794_v32 = vadd.f32 %v13957_v18, %v3500_v13  ;;  %v3501_v16 = vadd.f32 %v13963_v55, %v3175_v60  ;;  %v1658_v13 = vadd.f32 %v14067_v20, %v17745_v2  ;;  %v1662_v55 = vadd.f32 %v14067_v20, %v13623_v44  ;;  %v17755_v2 = vld [vmem:[#allocation84_spill] sm:$0xff] }
 0x1f2   : > { %v14057_v51 = vpop.f32.mrf.mxu1  ;;  %v3179_v44 = vadd.f32 %v13842_v63, %v13840_v25  ;;  %v3798_v1 = vadd.f32 %v13986_v47, %v3504_v39  ;;  %v3182_v25 = vadd.f32 %v13849_v9, %v13847_v27  ;;  %v17749_v9 = vld [vmem:[#allocation122_spill] sm:$0xff] }
 0x1f3   : > { %v14121_v47 = vadd.f32 %v13627_v43, %v1662_v55  ;;  %v17756_v39 = vld [vmem:[#allocation130_spill] sm:$0xff] }
 0x1f4   : > { %v11662_v49 = vpop.f32.mrf.mxu1  ;;  %v3505_v31 = vadd.f32 %v13982_v53, %v3179_v44  ;;  %v3508_v53 = vadd.f32 %v17749_v9, %v3182_v25 }
 0x1f5   : > { %v4119_v30 = vadd.f32 %v11662_v49, %v3793_v52  ;;  %v3795_v52 = vadd.f32 %v13980_v35, %v3501_v16  ;;  %v3507_v35 = vadd.f32 %v13976_v56, %v3181_v59  ;;  %v3796_v56 = vadd.f32 %v13992_v37, %v3502_v6  ;;  %v17750_v37 = vld [vmem:[#allocation127_spill] sm:$0xff]  ;;  %v17759_v59 = vld [vmem:[#allocation21_spill] sm:$0xff] }
 0x1f6   : > { %v3990_v33 = vpop.f32.mrf.mxu1  ;;  %v17760_v6 = vld [vmem:[#allocation87_spill] sm:$0xff] }
 0x1f7   : > { %v4151_v26 = vmax.f32 %v4119_v30, 0.0  ;;  %v4117_v4 = vadd.f32 %v3990_v33, %v3791_v5  ;;  %v2274_v5 = vadd.f32 %v13735_v38, %v1948_v12  ;;  %v14115_v38 = vadd.f32 %v17746_v45, %v1658_v13  ;;  %v17754_v12 = vld [vmem:[#allocation83_spill] sm:$0xff] }
 0x1f8   : > { %v11663_v29 = vpop.f32.mrf.mxu1  ;;  %v2596_v33 = vadd.f32 %v13722_v36, %v13718_v22  ;;  %v3801_v16 = vadd.f32 %v17750_v37, %v3507_v35  ;;  %v17752_v36 = vld [vmem:[#allocation80_spill] sm:$0xff]  ;;  %v3183_v13 = vadd.f32 %v17755_v2, %v17754_v12  ;;  %v17767_v37 = vld [vmem:[#allocation22_spill] sm:$0xff] }
 0x1f9   : > { %4183 = vst.msk [vmem:[#allocation2 + $0x28] sm:$0xff] %vm420_vm1, %v4151_v26  ;;  %v4149_v11 = vmax.f32 %v4117_v4, 0.0  ;;  %v4120_v62 = vadd.f32 %v11663_v29, %v3794_v32  ;;  %v17747_v32 = vld [vmem:[#allocation72_spill] sm:$0xff]  ;;  %v14132_v4 = vpop.f32.mrf.mxu0  ;;  %v14181_v2 = vld [vmem:[%s17245_s5 + $0x8] sm:$0x3] }
 0x1fa   : > { %v3993_v18 = vpop.f32.mrf.mxu1  ;;  %v14128_v48 = vadd.f32 %v17747_v32, %v2274_v5  ;;  %v17762_v5 = vld [vmem:[#allocation86_spill] sm:$0xff] }
 0x1fb   : > { %4181 = vst.msk [vmem:[#allocation2 + $0x18] sm:$0xff] %vm420_vm1, %v4149_v11  ;;  %v4152_v0 = vmax.f32 %v4120_v62, 0.0  ;;  %v4118_v23 = vadd.f32 %v3993_v18, %v3792_v58  ;;  %v17753_v62 = vld [vmem:[#allocation81_spill] sm:$0xff]  ;;  %v3799_v18 = vadd.f32 %v17756_v39, %v3505_v31 }
 0x1fc   : > { %v11666_v34 = vpop.f32.mrf.mxu1  ;;  %v3185_v42 = vadd.f32 %v17753_v62, %v17752_v36 }
 0x1fd   : > { %v14100_v49 = vpack.c.bf16 %v4152_v0, %v4151_v26  ;;  %4184 = vst.msk [vmem:[#allocation2 + $0x30] sm:$0xff] %vm420_vm1, %v4152_v0  ;;  %v4150_v17 = vmax.f32 %v4118_v23, 0.0  ;;  %v4123_v50 = vadd.f32 %v11666_v34, %v3797_v46  ;;  %v17748_v26 = vld [vmem:[#allocation79_spill] sm:$0xff] }
 0x1fe   : > { %v4006_v21 = vpop.f32.mrf.mxu1  ;;  %v3180_v27 = vadd.f32 %v17748_v26, %v2854_v15  ;;  %v17763_v15 = vld [vmem:[#allocation133_spill] sm:$0xff] }
 0x1ff   : > { %v14111_v40 = vpack.c.bf16 %v4150_v17, %v4149_v11  ;;  %4182 = vst.msk [vmem:[#allocation2 + $0x20] sm:$0xff] %vm420_vm1, %v4150_v17  ;;  %v4155_v28 = vmax.f32 %v4123_v50, 0.0  ;;  %v4121_v30 = vadd.f32 %v4006_v21, %v3795_v52  ;;  %v17751_v11 = vld [vmem:[#allocation82_spill] sm:$0xff]  ;;  %v2858_v17 = vadd.f32 %v17760_v6, %v2596_v33  ;;  %v17761_v50 = vld [vmem:[#allocation85_spill] sm:$0xff]  ;;  %v17764_v21 = vld [vmem:[#allocation124_spill] sm:$0xff] }
 0x200   : > { %v11667_v63 = vpop.f32.mrf.mxu1  ;;  %v4970_v22 = vsel %vm1108_vm0, %v17751_v11, 0  ;;  %v3506_v46 = vadd.f32 %v17757_v41, %v3180_v27  ;;  %v3186_v44 = vadd.f32 %v17762_v5, %v17761_v50  ;;  %v3511_v35 = vadd.f32 %v17764_v21, %v3185_v42  ;;  %v17766_v26 = vld [vmem:[#allocation125_spill] sm:$0xff] }
 0x201   : > { %4187 = vst.msk [vmem:[#allocation2 + $0x48] sm:$0xff] %vm420_vm1, %v4155_v28  ;;  %v4153_v60 = vmax.f32 %v4121_v30, 0.0  ;;  %v4124_v7 = vadd.f32 %v11667_v63, %v3798_v1  ;;  %v3802_v1 = vadd.f32 %v17763_v15, %v3508_v53  ;;  %v14156_v30 = vpop.f32.mrf.mxu0  ;;  %v3509_v27 = vadd.f32 %v17766_v26, %v3183_v13  ;;  %v17771_v13 = vld [vmem:[#allocation88_spill] sm:$0xff] }
 0x202   : > { %v4009_v43 = vpop.f32.mrf.mxu1  ;;  %v14134_v24 = vld [vmem:[#allocation2 + $0x17] sm:$0xff]  ;;  %v3184_v39 = vadd.f32 %v17771_v13, %v2858_v17  ;;  %v3805_v17 = vadd.f32 %v14022_v8, %v3511_v35 }
 0x203   : > { %4185 = vst.msk [vmem:[#allocation2 + $0x38] sm:$0xff] %vm420_vm1, %v4153_v60  ;;  %v4156_v29 = vmax.f32 %v4124_v7, 0.0  ;;  %v4122_v58 = vadd.f32 %v4009_v43, %v3796_v56  ;;  %v4254_v52 = vmul.f32 %v17759_v59, %v14134_v24  ;;  %v4547_v32 = vld [vmem:[#allocation2 + $0x18] sm:$0xff]  ;;  %v4549_v43 = vld [vmem:[#allocation2 + $0x28] sm:$0xff] }
 0x204   : > { %v11670_v0 = vpop.f32.mrf.mxu1  ;;  %v4550_v34 = vld [vmem:[#allocation2 + $0x30] sm:$0xff] }
 0x205   : > { %v14146_v23 = vpack.c.bf16 %v4156_v29, %v4155_v28  ;;  %4188 = vst.msk [vmem:[#allocation2 + $0x50] sm:$0xff] %vm420_vm1, %v4156_v29  ;;  %v4154_v55 = vmax.f32 %v4122_v58, 0.0  ;;  %v4127_v10 = vadd.f32 %v11670_v0, %v3801_v16  ;;  %v17768_v29 = vld [vmem:[#allocation121_spill] sm:$0xff]  ;;  %v14174_v42 = vpack.c.bf16 %v4550_v34, %v4549_v43  ;;  %v14176_v12 = vld [vmem:[#allocation2 + $0x2f] sm:$0xff] }
 0x206   : > { %v4022_v28 = vpop.f32.mrf.mxu1  ;;  %v14158_v45 = vld [vmem:[#allocation2 + $0x1f] sm:$0xff]  ;;  %v14160_v31 = vld [vmem:[#allocation2 + $0x27] sm:$0xff]  ;;  %v5296_v58 = vsel %vm1108_vm0, %v17768_v29, 0  ;;  %v17782_v43 = vld [vmem:[#allocation95_spill] sm:$0xff] }
 0x207   : > { %17758 = vst [vmem:[#allocation67_spill] sm:$0xff] %v14146_v23  ;;  %v4548_v25 = vld [vmem:[#allocation2 + $0x20] sm:$0xff]  ;;  %v14162_v63 = vpack.c.bf16 %v4154_v55, %v4153_v60  ;;  %4186 = vst.msk [vmem:[#allocation2 + $0x40] sm:$0xff] %vm420_vm1, %v4154_v55  ;;  %v4159_v56 = vmax.f32 %v4127_v10, 0.0  ;;  %v4125_v7 = vadd.f32 %v4022_v28, %v3799_v18  ;;  %v4285_v33 = vpack.c.bf16 %v14158_v45, %v4254_v52  ;;  %v17769_v60 = vld [vmem:[#allocation136_spill] sm:$0xff] }
 0x208   : > { %v11671_v9 = vpop.f32.mrf.mxu1  ;;  %v4578_v53 = vpack.c.bf16 %v4548_v25, %v4547_v32  ;;  %v4256_v16 = vmul.f32 %v17767_v37, %v14160_v31  ;;  %v3800_v11 = vadd.f32 %v17769_v60, %v3506_v46  ;;  %17770 = vst [vmem:[#allocation69_spill] sm:$0xff] %v14174_v42  ;;  %v17772_v18 = vld [vmem:[#allocation126_spill] sm:$0xff]  ;;  %v14185_v46 = vpop.f32.mrf.mxu0  ;;  %v17773_v34 = vld [vmem:[#allocation73_spill] sm:$0xff]  ;;  %v17777_v28 = vld [vmem:[#allocation128_spill] sm:$0xff] }
 0x209   : > { %17765 = vst [vmem:[#allocation68_spill] sm:$0xff] %v14162_v63  ;;  %4191 = vst.msk [vmem:[#allocation2 + $0x68] sm:$0xff] %vm420_vm1, %v4159_v56  ;;  %v4157_v36 = vmax.f32 %v4125_v7, 0.0  ;;  %v4128_v62 = vadd.f32 %v11671_v9, %v3802_v1  ;;  %11695 = vmatmul.mubr.msk.bf16.vlgmr.msra.gmra.mxu0 %vm420_vm1, %v4285_v33  ;;  %v3512_v41 = vadd.f32 %v17772_v18, %v3186_v44  ;;  %v14194_v52 = vld [vmem:[%s17245_s5 + $0xa] sm:$0x3]  ;;  %v17776_v1 = vld [vmem:[#allocation141_spill] sm:$0xff] }
 0x20a   : > { %11729 = vmatmul.mubr.msk.bf16.vlgmr.msra.gmra.mxu1 %vm420_vm1, %v4578_v53  ;;  %11761 = vmatpush3.bf16.msra.mxu0 %v4970_v22  ;;  %v4025_v0 = vpop.f32.mrf.mxu1  ;;  %v4286_v55 = vpack.c.bf16 %v14176_v12, %v4256_v16  ;;  %v14189_v10 = vld [vmem:[#allocation2 + $0x37] sm:$0xff]  ;;  %v2278_v6 = vadd.f32 %v17773_v34, %v14115_v38  ;;  %v17774_v22 = vld [vmem:[#allocation89_spill] sm:$0xff]  ;;  %v17775_v44 = vld [vmem:[#allocation90_spill] sm:$0xff]  ;;  %v3803_v21 = vadd.f32 %v17776_v1, %v3509_v27 }
 0x20b   : > { %4189 = vst.msk [vmem:[#allocation2 + $0x58] sm:$0xff] %vm420_vm1, %v4157_v36  ;;  %v4160_v50 = vmax.f32 %v4128_v62, 0.0  ;;  %v4126_v5 = vadd.f32 %v4025_v0, %v3800_v11  ;;  %11732 = vmatprep.mubr.msk.bf16.mxu1 %vm420_vm1, %v14174_v42  ;;  %11795 = vmatpush3.bf16.msra.mxu1 %v5296_v58  ;;  %v3189_v15 = vadd.f32 %v17775_v44, %v17774_v22  ;;  %v17779_v33 = vld [vmem:[#allocation23_spill] sm:$0xff]  ;;  %v17781_v9 = vld [vmem:[#allocation92_spill] sm:$0xff]  ;;  %v17784_v58 = vld [vmem:[#allocation129_spill] sm:$0xff]  ;;  %v14222_v11 = vpop.f32.mrf.mxu0 }
 0x20c   : > { %v3510_v25 = vadd.f32 %v17777_v28, %v3184_v39  ;;  %11698 = vmatprep.mubr.msk.bf16.mxu0 %vm420_vm1, %v4286_v55  ;;  %v11674_v38 = vpop.f32.mrf.mxu1  ;;  %12355 = vmatprep.subr.msk.bf16.mxu0 %vm1108_vm0, %v14181_v2  ;;  %v4258_v32 = vmul.f32 %v17779_v33, %v14189_v10  ;;  %v4554_v26 = vld [vmem:[#allocation2 + $0x50] sm:$0xff]  ;;  %v2862_v16 = vadd.f32 %v17782_v43, %v14128_v48  ;;  %v17783_v29 = vld [vmem:[#allocation144_spill] sm:$0xff]  ;;  %v4553_v28 = vld [vmem:[#allocation2 + $0x48] sm:$0xff] }
 0x20d   : > { %v14209_v8 = vpack.c.bf16 %v4160_v50, %v4159_v56  ;;  %4192 = vst.msk [vmem:[#allocation2 + $0x70] sm:$0xff] %vm420_vm1, %v4160_v50  ;;  %v4158_v35 = vmax.f32 %v4126_v5, 0.0  ;;  %v4131_v7 = vadd.f32 %v11674_v38, %v3805_v17  ;;  %12356 = vmatprep.subr.msk.bf16.mxu1 %vm1108_vm0, %v14194_v52  ;;  %v17780_v27 = vld [vmem:[#allocation91_spill] sm:$0xff]  ;;  %v3806_v56 = vadd.f32 %v17783_v29, %v3512_v41  ;;  %v4551_v17 = vld [vmem:[#allocation2 + $0x38] sm:$0xff]  ;;  %v17788_v41 = vld [vmem:[#allocation93_spill] sm:$0xff] }
 0x20e   : > { %v3187_v53 = vadd.f32 %v17781_v9, %v17780_v27  ;;  %v3515_v60 = vadd.f32 %v17784_v58, %v3189_v15  ;;  %v4038_v62 = vpop.f32.mrf.mxu1  ;;  %v14224_v13 = vld [vmem:[#allocation2 + $0x3f] sm:$0xff]  ;;  %v14226_v18 = vld [vmem:[#allocation2 + $0x47] sm:$0xff]  ;;  %v17790_v22 = vld [vmem:[#allocation131_spill] sm:$0xff]  ;;  %v3804_v27 = vadd.f32 %v14044_v19, %v3510_v25 }
 0x20f   : > { %17778 = vst [vmem:[#allocation72_spill] sm:$0xff] %v14209_v8  ;;  %17785 = vst [vmem:[#allocation79_spill] sm:$0xff] %v14224_v13  ;;  %v4552_v39 = vld [vmem:[#allocation2 + $0x40] sm:$0xff]  ;;  %v14228_v0 = vpack.c.bf16 %v4158_v35, %v4157_v36  ;;  %v4163_v55 = vmax.f32 %v4131_v7, 0.0  ;;  %v4129_v34 = vadd.f32 %v4038_v62, %v3803_v21  ;;  %v4287_v48 = vpack.c.bf16 %v14224_v13, %v4258_v32  ;;  %v17789_v50 = vld [vmem:[#allocation94_spill] sm:$0xff] }
 0x210   : > { %17786 = vst [vmem:[#allocation122_spill] sm:$0xff] %v14226_v18  ;;  %4190 = vst.msk [vmem:[#allocation2 + $0x60] sm:$0xff] %vm420_vm1, %v4158_v35  ;;  %v3190_v5 = vadd.f32 %v17789_v50, %v17788_v41  ;;  %v3513_v44 = vadd.f32 %v17790_v22, %v3187_v53  ;;  %v11675_v15 = vpop.f32.mrf.mxu1  ;;  %v14235_v1 = vpack.c.bf16 %v4552_v39, %v4551_v17  ;;  %v17792_v38 = vld [vmem:[#allocation24_spill] sm:$0xff]  ;;  %v14244_v32 = vld [vmem:[#allocation2 + $0x4f] sm:$0xff]  ;;  %v14250_v39 = vpop.f32.mrf.mxu0 }
 0x211   : > { %17787 = vst [vmem:[#allocation127_spill] sm:$0xff] %v14228_v0  ;;  %v4260_v36 = vmul.f32 %v17792_v38, %v14226_v18  ;;  %4195 = vst.msk [vmem:[#allocation2 + $0x88] sm:$0xff] %vm420_vm1, %v4163_v55  ;;  %v4161_v21 = vmax.f32 %v4129_v34, 0.0  ;;  %v4132_v35 = vadd.f32 %v11675_v15, %v3806_v56  ;;  %11699 = vmatmul.mubr.msk.bf16.gmra.mxu0 %vm420_vm1, %v4287_v48  ;;  %v17795_v9 = vld [vmem:[#allocation70_spill] sm:$0xff]  ;;  %v17796_v43 = vld [vmem:[#allocation96_spill] sm:$0xff] }
 0x212   : > { %17791 = vst [vmem:[#allocation82_spill] sm:$0xff] %v14235_v1  ;;  %v14242_v7 = vpack.c.bf16 %v4554_v26, %v4553_v28  ;;  %17794 = vst [vmem:[#allocation81_spill] sm:$0xff] %v14244_v32  ;;  %v1666_v53 = vadd.f32 %v14067_v20, %v17795_v9  ;;  %v3188_v29 = vadd.f32 %v17796_v43, %v2862_v16  ;;  %v17797_v58 = vld [vmem:[#allocation132_spill] sm:$0xff]  ;;  %11733 = vmatmul.mubr.msk.bf16.gmra.mxu1 %vm420_vm1, %v14235_v1  ;;  %v4041_v19 = vpop.f32.mrf.mxu1  ;;  %v17799_v26 = vld [vmem:[#allocation74_spill] sm:$0xff] }
 0x213   : > { %v3516_v62 = vadd.f32 %v17797_v58, %v3190_v5  ;;  %v4288_v25 = vpack.c.bf16 %v14244_v32, %v4260_v36  ;;  %v14255_v56 = vld [vmem:[#allocation2 + $0x57] sm:$0xff]  ;;  %v2604_v34 = vadd.f32 %v17799_v26, %v2278_v6  ;;  %v3809_v48 = vadd.f32 %v14055_v57, %v3515_v60  ;;  %4193 = vst.msk [vmem:[#allocation2 + $0x78] sm:$0xff] %vm420_vm1, %v4161_v21  ;;  %v17801_v50 = vld [vmem:[#allocation97_spill] sm:$0xff]  ;;  %v17802_v5 = vld [vmem:[#allocation98_spill] sm:$0xff] }
 0x214   : > { %17793 = vst [vmem:[#allocation80_spill] sm:$0xff] %v14242_v7  ;;  %17798 = vst [vmem:[#allocation83_spill] sm:$0xff] %v14255_v56  ;;  %v4164_v20 = vmax.f32 %v4132_v35, 0.0  ;;  %v4130_v16 = vadd.f32 %v4041_v19, %v3804_v27  ;;  %11736 = vmatprep.mubr.msk.bf16.mxu1 %vm420_vm1, %v14242_v7  ;;  %v17800_v17 = vld [vmem:[#allocation75_spill] sm:$0xff]  ;;  %v3193_v22 = vadd.f32 %v17802_v5, %v17801_v50  ;;  %v17803_v28 = vld [vmem:[#allocation134_spill] sm:$0xff]  ;;  %v11678_v57 = vpop.f32.mrf.mxu1 }
 0x215   : > { %v2282_v41 = vadd.f32 %v17800_v17, %v14121_v47  ;;  %v3807_v15 = vadd.f32 %v14074_v61, %v3513_v44  ;;  %v3514_v36 = vadd.f32 %v17803_v28, %v3188_v29  ;;  %11702 = vmatprep.mubr.msk.bf16.mxu0 %vm420_vm1, %v4288_v25  ;;  %v4135_v27 = vadd.f32 %v11678_v57, %v3809_v48  ;;  %v17805_v35 = vld [vmem:[#allocation25_spill] sm:$0xff]  ;;  %v4558_v47 = vld [vmem:[#allocation2 + $0x70] sm:$0xff]  ;;  %v17807_v58 = vld [vmem:[#allocation100_spill] sm:$0xff]  ;;  %v14279_v17 = vpop.f32.mrf.mxu0 }
 0x216   : > { %v14269_v6 = vpack.c.bf16 %v4164_v20, %v4163_v55  ;;  %4196 = vst.msk [vmem:[#allocation2 + $0x90] sm:$0xff] %vm420_vm1, %v4164_v20  ;;  %v4162_v60 = vmax.f32 %v4130_v16, 0.0  ;;  %v4262_v9 = vmul.f32 %v17805_v35, %v14255_v56  ;;  %v17806_v43 = vld [vmem:[#allocation99_spill] sm:$0xff]  ;;  %v3810_v44 = vadd.f32 %v14087_v3, %v3516_v62  ;;  %v4054_v55 = vpop.f32.mrf.mxu1  ;;  %v4555_v57 = vld [vmem:[#allocation2 + $0x58] sm:$0xff]  ;;  %v17813_v3 = vld [vmem:[#allocation101_spill] sm:$0xff] }
 0x217   : > { %v3191_v19 = vadd.f32 %v17807_v58, %v17806_v43  ;;  %v17808_v26 = vld [vmem:[#allocation103_spill] sm:$0xff]  ;;  %v14281_v50 = vld [vmem:[#allocation2 + $0x5f] sm:$0xff]  ;;  %v14283_v48 = vld [vmem:[#allocation2 + $0x67] sm:$0xff]  ;;  %v4167_v5 = vmax.f32 %v4135_v27, 0.0  ;;  %v4133_v28 = vadd.f32 %v4054_v55, %v3807_v15  ;;  %v3808_v42 = vadd.f32 %v14108_v54, %v3514_v36 }
 0x218   : > { %17804 = vst [vmem:[#allocation84_spill] sm:$0xff] %v14269_v6  ;;  %v2866_v61 = vadd.f32 %v17808_v26, %v2604_v34  ;;  %v17809_v29 = vld [vmem:[#allocation135_spill] sm:$0xff]  ;;  %17810 = vst [vmem:[#allocation130_spill] sm:$0xff] %v14281_v50  ;;  %v4556_v20 = vld [vmem:[#allocation2 + $0x60] sm:$0xff]  ;;  %v14285_v16 = vpack.c.bf16 %v4162_v60, %v4161_v21  ;;  %v4289_v34 = vpack.c.bf16 %v14281_v50, %v4262_v9  ;;  %v11679_v26 = vpop.f32.mrf.mxu1 }
 0x219   : > { %v3519_v25 = vadd.f32 %v17809_v29, %v3193_v22  ;;  %17811 = vst [vmem:[#allocation123_spill] sm:$0xff] %v14283_v48  ;;  %4194 = vst.msk [vmem:[#allocation2 + $0x80] sm:$0xff] %vm420_vm1, %v4162_v60  ;;  %v17814_v62 = vld [vmem:[#allocation102_spill] sm:$0xff]  ;;  %v17815_v43 = vld [vmem:[#allocation137_spill] sm:$0xff]  ;;  %v14292_v29 = vpack.c.bf16 %v4556_v20, %v4555_v57  ;;  %v4165_v15 = vmax.f32 %v4133_v28, 0.0  ;;  %v4136_v60 = vadd.f32 %v11679_v26, %v3810_v44 }
 0x21a   : > { %17812 = vst [vmem:[#allocation87_spill] sm:$0xff] %v14285_v16  ;;  %v3194_v22 = vadd.f32 %v17814_v62, %v17813_v3  ;;  %v3517_v58 = vadd.f32 %v17815_v43, %v3191_v19  ;;  %v4557_v7 = vld [vmem:[#allocation2 + $0x68] sm:$0xff]  ;;  %4199 = vst.msk [vmem:[#allocation2 + $0xa8] sm:$0xff] %vm420_vm1, %v4167_v5  ;;  %11703 = vmatmul.mubr.msk.bf16.gmra.mxu0 %vm420_vm1, %v4289_v34  ;;  %v17820_v19 = vld [vmem:[#allocation71_spill] sm:$0xff]  ;;  %v14306_v43 = vpop.f32.mrf.mxu0  ;;  %v4057_v54 = vpop.f32.mrf.mxu1 }
 0x21b   : > { %17816 = vst [vmem:[#allocation85_spill] sm:$0xff] %v14292_v29  ;;  %v17817_v1 = vld [vmem:[#allocation26_spill] sm:$0xff]  ;;  %v14299_v27 = vpack.c.bf16 %v4558_v47, %v4557_v7  ;;  %v1960_v55 = vadd.f32 %v17820_v19, %v1666_v53  ;;  %v17821_v20 = vld [vmem:[#allocation104_spill] sm:$0xff]  ;;  %11737 = vmatmul.mubr.msk.bf16.gmra.mxu1 %vm420_vm1, %v14292_v29  ;;  %v3813_v28 = vadd.f32 %v14132_v4, %v3519_v25  ;;  %4197 = vst.msk [vmem:[#allocation2 + $0x98] sm:$0xff] %vm420_vm1, %v4165_v15 }
 0x21c   : > { %v4264_v21 = vmul.f32 %v17817_v1, %v14283_v48  ;;  %v14301_v9 = vld [vmem:[#allocation2 + $0x6f] sm:$0xff]  ;;  %v3192_v57 = vadd.f32 %v17821_v20, %v2866_v61  ;;  %v14311_v44 = vld [vmem:[#allocation2 + $0x77] sm:$0xff]  ;;  %v4168_v53 = vmax.f32 %v4136_v60, 0.0  ;;  %v4134_v61 = vadd.f32 %v4057_v54, %v3808_v42  ;;  %v17825_v34 = vld [vmem:[#allocation77_spill] sm:$0xff] }
 0x21d   : > { %17818 = vst [vmem:[#allocation86_spill] sm:$0xff] %v14299_v27  ;;  %17819 = vst [vmem:[#allocation133_spill] sm:$0xff] %v14301_v9  ;;  %v17822_v3 = vld [vmem:[#allocation138_spill] sm:$0xff]  ;;  %v17824_v7 = vld [vmem:[#allocation76_spill] sm:$0xff]  ;;  %11740 = vmatprep.mubr.msk.bf16.mxu1 %vm420_vm1, %v14299_v27 }
 0x21e   : > { %v3520_v62 = vadd.f32 %v17822_v3, %v3194_v22  ;;  %v4290_v36 = vpack.c.bf16 %v14301_v9, %v4264_v21  ;;  %17823 = vst [vmem:[#allocation124_spill] sm:$0xff] %v14311_v44  ;;  %v2608_v47 = vadd.f32 %v17824_v7, %v2282_v41  ;;  %v2286_v22 = vadd.f32 %v17825_v34, %v1960_v55  ;;  %v17826_v26 = vld [vmem:[#allocation105_spill] sm:$0xff]  ;;  %v17827_v19 = vld [vmem:[#allocation106_spill] sm:$0xff]  ;;  %v17828_v3 = vld [vmem:[#allocation139_spill] sm:$0xff]  ;;  %v11682_v41 = vpop.f32.mrf.mxu1 }
 0x21f   : > { %v3197_v20 = vadd.f32 %v17827_v19, %v17826_v26  ;;  %v3811_v21 = vadd.f32 %v14156_v30, %v3517_v58  ;;  %v3518_v29 = vadd.f32 %v17828_v3, %v3192_v57  ;;  %v14324_v4 = vpack.c.bf16 %v4168_v53, %v4167_v5  ;;  %4200 = vst.msk [vmem:[#allocation2 + $0xb0] sm:$0xff] %vm420_vm1, %v4168_v53  ;;  %v17830_v60 = vld [vmem:[#allocation27_spill] sm:$0xff]  ;;  %v17832_v34 = vld [vmem:[#allocation108_spill] sm:$0xff]  ;;  %v14334_v3 = vpop.f32.mrf.mxu0  ;;  %v4561_v16 = vld [vmem:[#allocation2 + $0x88] sm:$0xff] }
 0x220   : > { %11706 = vmatprep.mubr.msk.bf16.mxu0 %vm420_vm1, %v4290_v36  ;;  %v4166_v42 = vmax.f32 %v4134_v61, 0.0  ;;  %v4139_v25 = vadd.f32 %v11682_v41, %v3813_v28  ;;  %v4266_v54 = vmul.f32 %v17830_v60, %v14311_v44  ;;  %v4562_v55 = vld [vmem:[#allocation2 + $0x90] sm:$0xff]  ;;  %v3814_v58 = vadd.f32 %v14185_v46, %v3520_v62  ;;  %v17834_v57 = vld [vmem:[#allocation140_spill] sm:$0xff]  ;;  %v4070_v5 = vpop.f32.mrf.mxu1  ;;  %v4560_v53 = vld [vmem:[#allocation2 + $0x80] sm:$0xff] }
 0x221   : > { %17829 = vst [vmem:[#allocation125_spill] sm:$0xff] %v14324_v4  ;;  %v17831_v7 = vld [vmem:[#allocation107_spill] sm:$0xff]  ;;  %v3523_v36 = vadd.f32 %v17834_v57, %v3197_v20  ;;  %v14336_v27 = vld [vmem:[#allocation2 + $0x7f] sm:$0xff]  ;;  %v14338_v28 = vld [vmem:[#allocation2 + $0x87] sm:$0xff] }
 0x222   : > { %v3195_v26 = vadd.f32 %v17832_v34, %v17831_v7  ;;  %v17833_v19 = vld [vmem:[#allocation111_spill] sm:$0xff]  ;;  %17835 = vst [vmem:[#allocation121_spill] sm:$0xff] %v14336_v27  ;;  %17836 = vst [vmem:[#allocation136_spill] sm:$0xff] %v14338_v28  ;;  %v14340_v61 = vpack.c.bf16 %v4166_v42, %v4165_v15  ;;  %v4171_v41 = vmax.f32 %v4139_v25, 0.0  ;;  %v4137_v7 = vadd.f32 %v4070_v5, %v3811_v21  ;;  %v4559_v34 = vld [vmem:[#allocation2 + $0x78] sm:$0xff]  ;;  %v11683_v4 = vpop.f32.mrf.mxu1 }
 0x223   : > { %v2870_v30 = vadd.f32 %v17833_v19, %v2608_v47  ;;  %4198 = vst.msk [vmem:[#allocation2 + $0xa0] sm:$0xff] %vm420_vm1, %v4166_v42  ;;  %v4291_v47 = vpack.c.bf16 %v14336_v27, %v4266_v54  ;;  %v17838_v46 = vld [vmem:[#allocation109_spill] sm:$0xff]  ;;  %v17839_v62 = vld [vmem:[#allocation110_spill] sm:$0xff]  ;;  %v14347_v6 = vpack.c.bf16 %v4560_v53, %v4559_v34  ;;  %v17842_v8 = vld [vmem:[#allocation28_spill] sm:$0xff]  ;;  %v4140_v42 = vadd.f32 %v11683_v4, %v3814_v58 }
 0x224   : > { %17837 = vst [vmem:[#allocation88_spill] sm:$0xff] %v14340_v61  ;;  %v3198_v20 = vadd.f32 %v17839_v62, %v17838_v46  ;;  %v17840_v19 = vld [vmem:[#allocation142_spill] sm:$0xff]  ;;  %v4268_v15 = vmul.f32 %v17842_v8, %v14338_v28  ;;  %v3812_v61 = vadd.f32 %v14222_v11, %v3518_v29  ;;  %4203 = vst.msk [vmem:[#allocation2 + $0xc8] sm:$0xff] %vm420_vm1, %v4171_v41  ;;  %v4169_v21 = vmax.f32 %v4137_v7, 0.0  ;;  %v17846_v53 = vld [vmem:[#allocation143_spill] sm:$0xff]  ;;  %v11656_v46 = vpop.f32.mrf.mxu0  ;;  %v4073_v62 = vpop.f32.mrf.mxu1 }
 0x225   : > { %v3521_v57 = vadd.f32 %v17840_v19, %v3195_v26  ;;  %17841 = vst [vmem:[#allocation126_spill] sm:$0xff] %v14347_v6  ;;  %11707 = vmatmul.mubr.msk.bf16.gmra.mxu0 %vm420_vm1, %v4291_v47  ;;  %v14354_v25 = vpack.c.bf16 %v4562_v55, %v4561_v16  ;;  %v14356_v54 = vld [vmem:[#allocation2 + $0x8f] sm:$0xff]  ;;  %v17845_v26 = vld [vmem:[#allocation112_spill] sm:$0xff]  ;;  %11741 = vmatmul.mubr.msk.bf16.gmra.mxu1 %vm420_vm1, %v14347_v6  ;;  %v4172_v16 = vmax.f32 %v4140_v42, 0.0  ;;  %v17849_v7 = vld [vmem:[#allocation113_spill] sm:$0xff] }
 0x226   : > { %17844 = vst [vmem:[#allocation89_spill] sm:$0xff] %v14356_v54  ;;  %v3196_v5 = vadd.f32 %v17845_v26, %v2870_v30  ;;  %v3524_v34 = vadd.f32 %v17846_v53, %v3198_v20  ;;  %v4292_v11 = vpack.c.bf16 %v14356_v54, %v4268_v15  ;;  %v14363_v29 = vld [vmem:[#allocation2 + $0x97] sm:$0xff]  ;;  %v3817_v4 = vadd.f32 %v14250_v39, %v3523_v36  ;;  %v17848_v30 = vld [vmem:[#allocation78_spill] sm:$0xff]  ;;  %v17851_v26 = vld [vmem:[#allocation145_spill] sm:$0xff]  ;;  %v11686_v53 = vpop.f32.mrf.mxu1 }
 0x227   : > { %17843 = vst [vmem:[#allocation73_spill] sm:$0xff] %v14354_v25  ;;  %17847 = vst [vmem:[#allocation90_spill] sm:$0xff] %v14363_v29  ;;  %v4138_v55 = vadd.f32 %v4073_v62, %v3812_v61  ;;  %11744 = vmatprep.mubr.msk.bf16.mxu1 %vm420_vm1, %v14354_v25  ;;  %v2612_v58 = vadd.f32 %v17848_v30, %v2286_v22  ;;  %v17850_v47 = vld [vmem:[#allocation114_spill] sm:$0xff]  ;;  %v3815_v19 = vadd.f32 %v14279_v17, %v3521_v57  ;;  %v17853_v42 = vld [vmem:[#allocation29_spill] sm:$0xff] }
 0x228   : > { %4201 = vst.msk [vmem:[#allocation2 + $0xb8] sm:$0xff] %vm420_vm1, %v4169_v21  ;;  %v3201_v20 = vadd.f32 %v17850_v47, %v17849_v7  ;;  %v3522_v15 = vadd.f32 %v17851_v26, %v3196_v5  ;;  %11710 = vmatprep.mubr.msk.bf16.mxu0 %vm420_vm1, %v4292_v11  ;;  %v14375_v39 = vpack.c.bf16 %v4172_v16, %v4171_v41  ;;  %4204 = vst.msk [vmem:[#allocation2 + $0xd0] sm:$0xff] %vm420_vm1, %v4172_v16  ;;  %v4566_v22 = vld [vmem:[#allocation2 + $0xb0] sm:$0xff]  ;;  %v17855_v25 = vld [vmem:[#allocation116_spill] sm:$0xff]  ;;  %v3776_v26 = vpop.f32.mrf.mxu0  ;;  %v4086_v41 = vpop.f32.mrf.mxu1 }
 0x229   : > { %v4170_v36 = vmax.f32 %v4138_v55, 0.0  ;;  %v4143_v61 = vadd.f32 %v11686_v53, %v3817_v4  ;;  %v4270_v62 = vmul.f32 %v17853_v42, %v14363_v29  ;;  %v17854_v30 = vld [vmem:[#allocation115_spill] sm:$0xff]  ;;  %v3818_v57 = vadd.f32 %v14306_v43, %v3524_v34  ;;  %v17857_v5 = vld [vmem:[#allocation146_spill] sm:$0xff] }
 0x22a   : > { %17852 = vst [vmem:[#allocation141_spill] sm:$0xff] %v14375_v39  ;;  %v3199_v7 = vadd.f32 %v17855_v25, %v17854_v30  ;;  %v17856_v47 = vld [vmem:[#allocation119_spill] sm:$0xff]  ;;  %v3527_v11 = vadd.f32 %v17857_v5, %v3201_v20  ;;  %v14385_v6 = vld [vmem:[#allocation2 + $0x9f] sm:$0xff]  ;;  %v14387_v55 = vld [vmem:[#allocation2 + $0xa7] sm:$0xff]  ;;  %v4141_v39 = vadd.f32 %v4086_v41, %v3815_v19  ;;  %v11687_v5 = vpop.f32.mrf.mxu1 }
 0x22b   : > { %v2874_v17 = vadd.f32 %v17856_v47, %v2612_v58  ;;  %17858 = vst [vmem:[#allocation128_spill] sm:$0xff] %v14385_v6  ;;  %v4564_v16 = vld [vmem:[#allocation2 + $0xa0] sm:$0xff]  ;;  %17859 = vst [vmem:[#allocation91_spill] sm:$0xff] %v14387_v55  ;;  %v14389_v4 = vpack.c.bf16 %v4170_v36, %v4169_v21  ;;  %v4175_v53 = vmax.f32 %v4143_v61, 0.0  ;;  %v4293_v25 = vpack.c.bf16 %v14385_v6, %v4270_v62  ;;  %v4563_v58 = vld [vmem:[#allocation2 + $0x98] sm:$0xff] }
 0x22c   : > { %4202 = vst.msk [vmem:[#allocation2 + $0xc0] sm:$0xff] %vm420_vm1, %v4170_v36  ;;  %v17861_v30 = vld [vmem:[#allocation117_spill] sm:$0xff]  ;;  %v17862_v43 = vld [vmem:[#allocation118_spill] sm:$0xff]  ;;  %v17863_v20 = vld [vmem:[#allocation147_spill] sm:$0xff]  ;;  %v14396_v0 = vpack.c.bf16 %v4564_v16, %v4563_v58  ;;  %v4173_v19 = vmax.f32 %v4141_v39, 0.0  ;;  %v4144_v36 = vadd.f32 %v11687_v5, %v3818_v57  ;;  %v11657_v58 = vpop.f32.mrf.mxu0  ;;  %v3821_v39 = vadd.f32 %v11656_v46, %v3527_v11 }
 0x22d   : > { %17860 = vst [vmem:[#allocation92_spill] sm:$0xff] %v14389_v4  ;;  %v3202_v34 = vadd.f32 %v17862_v43, %v17861_v30  ;;  %v3525_v47 = vadd.f32 %v17863_v20, %v3199_v7  ;;  %v4565_v23 = vld [vmem:[#allocation2 + $0xa8] sm:$0xff]  ;;  %v3816_v4 = vadd.f32 %v14334_v3, %v3522_v15  ;;  %4207 = vst.msk [vmem:[#allocation2 + $0xe8] sm:$0xff] %vm420_vm1, %v4175_v53  ;;  %11711 = vmatmul.mubr.msk.bf16.gmra.mxu0 %vm420_vm1, %v4293_v25  ;;  %v17868_v7 = vld [vmem:[#allocation120_spill] sm:$0xff]  ;;  %v4089_v30 = vpop.f32.mrf.mxu1 }
 0x22e   : > { %17864 = vst [vmem:[#allocation95_spill] sm:$0xff] %v14396_v0  ;;  %v17865_v63 = vld [vmem:[#allocation30_spill] sm:$0xff]  ;;  %v14403_v61 = vpack.c.bf16 %v4566_v22, %v4565_v23  ;;  %v3200_v41 = vadd.f32 %v17868_v7, %v2874_v17  ;;  %11745 = vmatmul.mubr.msk.bf16.gmra.mxu1 %vm420_vm1, %v14396_v0  ;;  %4205 = vst.msk [vmem:[#allocation2 + $0xd8] sm:$0xff] %vm420_vm1, %v4173_v19  ;;  %v4176_v23 = vmax.f32 %v4144_v36, 0.0  ;;  %v17871_v46 = vld [vmem:[#allocation33_spill] sm:$0xff]  ;;  %v3779_v5 = vpop.f32.mrf.mxu0 }
 0x22f   : > { %v4272_v21 = vmul.f32 %v17865_v63, %v14387_v55  ;;  %v14405_v62 = vld [vmem:[#allocation2 + $0xaf] sm:$0xff]  ;;  %v3528_v16 = vadd.f32 %v14051_v14, %v3202_v34  ;;  %v14412_v15 = vld [vmem:[#allocation2 + $0xb7] sm:$0xff]  ;;  %v4142_v22 = vadd.f32 %v4089_v30, %v3816_v4  ;;  %v3819_v17 = vadd.f32 %v3776_v26, %v3525_v47  ;;  %v11690_v57 = vpop.f32.mrf.mxu1 }
 0x230   : > { %17866 = vst [vmem:[#allocation144_spill] sm:$0xff] %v14403_v61  ;;  %17867 = vst [vmem:[#allocation129_spill] sm:$0xff] %v14405_v62  ;;  %11748 = vmatprep.mubr.msk.bf16.mxu1 %vm420_vm1, %v14403_v61  ;;  %v3526_v14 = vadd.f32 %v14057_v51, %v3200_v41  ;;  %v14419_v25 = vpack.c.bf16 %v4176_v23, %v4175_v53  ;;  %v4147_v34 = vadd.f32 %v11690_v57, %v3821_v39  ;;  %v4570_v20 = vld [vmem:[#allocation2 + $0xd0] sm:$0xff]  ;;  %v4567_v30 = vld [vmem:[#allocation2 + $0xb8] sm:$0xff] }
 0x231   : > { %v4294_v3 = vpack.c.bf16 %v14405_v62, %v4272_v21  ;;  %17869 = vst [vmem:[#allocation93_spill] sm:$0xff] %v14412_v15  ;;  %4208 = vst.msk [vmem:[#allocation2 + $0xf0] sm:$0xff] %vm420_vm1, %v4176_v23  ;;  %v4174_v43 = vmax.f32 %v4142_v22, 0.0  ;;  %v4274_v11 = vmul.f32 %v17871_v46, %v14412_v15  ;;  %v3822_v4 = vadd.f32 %v11657_v58, %v3528_v16  ;;  %v4102_v21 = vpop.f32.mrf.mxu1  ;;  %v4569_v16 = vld [vmem:[#allocation2 + $0xc8] sm:$0xff]  ;;  %v17875_v58 = vld [vmem:[#allocation35_spill] sm:$0xff] }
 0x232   : > { %17870 = vst [vmem:[#allocation94_spill] sm:$0xff] %v14419_v25  ;;  %v4179_v53 = vmax.f32 %v4147_v34, 0.0  ;;  %v4145_v7 = vadd.f32 %v4102_v21, %v3819_v17  ;;  %v3820_v22 = vadd.f32 %v3779_v5, %v3526_v14  ;;  %v14440_v17 = vld [vmem:[#allocation2 + $0xcf] sm:$0xff]  ;;  %v14491_v25 = vld [vmem:[#allocation2 + $0x21] sm:$0xff] }
 0x233   : > { %11714 = vmatprep.mubr.msk.bf16.mxu0 %vm420_vm1, %v4294_v3  ;;  %v14424_v36 = vld [vmem:[#allocation2 + $0xbf] sm:$0xff]  ;;  %v14426_v51 = vld [vmem:[#allocation2 + $0xc7] sm:$0xff]  ;;  %v14428_v47 = vpack.c.bf16 %v4174_v43, %v4173_v19  ;;  %4206 = vst.msk [vmem:[#allocation2 + $0xe0] sm:$0xff] %vm420_vm1, %v4174_v43  ;;  %v11691_v3 = vpop.f32.mrf.mxu1  ;;  %v14438_v43 = vpack.c.bf16 %v4570_v20, %v4569_v16  ;;  %17877 = vst [vmem:[#allocation74_spill] sm:$0xff] %v14440_v17 }
 0x234   : > { %17872 = vst [vmem:[#allocation131_spill] sm:$0xff] %v14424_v36  ;;  %v4568_v26 = vld [vmem:[#allocation2 + $0xc0] sm:$0xff]  ;;  %17873 = vst [vmem:[#allocation70_spill] sm:$0xff] %v14426_v51  ;;  %v4295_v41 = vpack.c.bf16 %v14424_v36, %v4274_v11  ;;  %v4276_v23 = vmul.f32 %v17875_v58, %v14426_v51  ;;  %v4177_v57 = vmax.f32 %v4145_v7, 0.0  ;;  %v4148_v19 = vadd.f32 %v11691_v3, %v3822_v4 }
 0x235   : > { %v14432_v39 = vpack.c.bf16 %v4568_v26, %v4567_v30  ;;  %4211 = vst.msk [vmem:[#allocation2 + $0x108] sm:$0xff] %vm420_vm1, %v4179_v53  ;;  %17876 = vst [vmem:[#allocation132_spill] sm:$0xff] %v14438_v43  ;;  %v4105_v34 = vpop.f32.mrf.mxu1  ;;  %v14445_v21 = vld [vmem:[#allocation2 + $0xd7] sm:$0xff]  ;;  %v17880_v26 = vld [vmem:[#allocation37_spill] sm:$0xff] }
 0x236   : > { %11715 = vmatmul.mubr.msk.bf16.gmra.mxu0 %vm420_vm1, %v4295_v41  ;;  %v4296_v11 = vpack.c.bf16 %v14440_v17, %v4276_v23  ;;  %17878 = vst [vmem:[#allocation75_spill] sm:$0xff] %v14445_v21  ;;  %4209 = vst.msk [vmem:[#allocation2 + $0xf8] sm:$0xff] %vm420_vm1, %v4177_v57  ;;  %v4180_v14 = vmax.f32 %v4148_v19, 0.0  ;;  %v4146_v5 = vadd.f32 %v4105_v34, %v3820_v22  ;;  %v4571_v41 = vld [vmem:[#allocation2 + $0xd8] sm:$0xff]  ;;  %v17885_v34 = vld [vmem:[#allocation38_spill] sm:$0xff] }
 0x237   : > { %17874 = vst [vmem:[#allocation96_spill] sm:$0xff] %v14432_v39  ;;  %11749 = vmatmul.mubr.msk.bf16.gmra.mxu1 %vm420_vm1, %v14432_v39  ;;  %v4278_v7 = vmul.f32 %v17880_v26, %v14445_v21 }
 0x238   : > { %11752 = vmatprep.mubr.msk.bf16.mxu1 %vm420_vm1, %v14438_v43  ;;  %11718 = vmatprep.mubr.msk.bf16.mxu0 %vm420_vm1, %v4296_v11  ;;  %v14451_v20 = vpack.c.bf16 %v4180_v14, %v4179_v53  ;;  %4212 = vst.msk [vmem:[#allocation2 + $0x110] sm:$0xff] %vm420_vm1, %v4180_v14  ;;  %v4178_v4 = vmax.f32 %v4146_v5, 0.0  ;;  %v4574_v30 = vld [vmem:[#allocation2 + $0xf0] sm:$0xff]  ;;  %v4573_v14 = vld [vmem:[#allocation2 + $0xe8] sm:$0xff] }
 0x239   : > { %v14468_v5 = vld [vmem:[#allocation2 + $0xef] sm:$0xff]  ;;  %v14471_v43 = vpack.c.bf16 %v4574_v30, %v4573_v14 }
 0x23a   : > { %17879 = vst [vmem:[#allocation97_spill] sm:$0xff] %v14451_v20  ;;  %v14456_v3 = vld [vmem:[#allocation2 + $0xdf] sm:$0xff]  ;;  %v14458_v23 = vld [vmem:[#allocation2 + $0xe7] sm:$0xff]  ;;  %v14460_v22 = vpack.c.bf16 %v4178_v4, %v4177_v57  ;;  %4210 = vst.msk [vmem:[#allocation2 + $0x100] sm:$0xff] %vm420_vm1, %v4178_v4 }
 0x23b   : > { %17881 = vst [vmem:[#allocation98_spill] sm:$0xff] %v14456_v3  ;;  %v4572_v16 = vld [vmem:[#allocation2 + $0xe0] sm:$0xff]  ;;  %17882 = vst [vmem:[#allocation134_spill] sm:$0xff] %v14458_v23  ;;  %v4297_v53 = vpack.c.bf16 %v14456_v3, %v4278_v7  ;;  %v4280_v11 = vmul.f32 %v17885_v34, %v14458_v23  ;;  %v4840_v57 = vld [vmem:[#allocation2 + $0x11] sm:$0xff] }
 0x23c   : > { %17883 = vst [vmem:[#allocation99_spill] sm:$0xff] %v14460_v22  ;;  %v14464_v19 = vpack.c.bf16 %v4572_v16, %v4571_v41  ;;  %17886 = vst [vmem:[#allocation103_spill] sm:$0xff] %v14471_v43  ;;  %v17888_v7 = vld [vmem:[#allocation42_spill] sm:$0xff]  ;;  %v17889_v16 = vld [vmem:[#allocation41_spill] sm:$0xff] }
 0x23d   : > { %v4298_v39 = vpack.c.bf16 %v14468_v5, %v4280_v11  ;;  %v14476_v4 = vld [vmem:[#allocation2 + $0xf7] sm:$0xff]  ;;  %v4872_v41 = vmul.f32 %v17888_v7, %v4840_v57  ;;  %v4839_v30 = vld [vmem:[#allocation2 + $0x9] sm:$0xff] }
 0x23e   : > { %17884 = vst [vmem:[#allocation100_spill] sm:$0xff] %v14464_v19  ;;  %11719 = vmatmul.mubr.msk.bf16.gmra.mxu0 %vm420_vm1, %v4297_v53  ;;  %17887 = vst [vmem:[#allocation135_spill] sm:$0xff] %v14476_v4  ;;  %v4282_v53 = vmul.f32 %v17889_v16, %v14476_v4  ;;  %v4575_v11 = vld [vmem:[#allocation2 + $0xf8] sm:$0xff] }
 0x23f   : > { %11753 = vmatmul.mubr.msk.bf16.gmra.mxu1 %vm420_vm1, %v14464_v19  ;;  %11722 = vmatprep.mubr.msk.bf16.mxu0 %vm420_vm1, %v4298_v39  ;;  %v17892_v20 = vld [vmem:[#allocation20_spill] sm:$0xff] }
 0x240   : > { %11756 = vmatprep.mubr.msk.bf16.mxu1 %vm420_vm1, %v14471_v43  ;;  %v5197_v22 = vmul.f32 %v17892_v20, %v14134_v24  ;;  %v4903_v43 = vpack.c.bf16 %v4872_v41, %v4839_v30  ;;  %v14498_v57 = vld [vmem:[#allocation2 + $0x31] sm:$0xff]  ;;  %v5199_v24 = vmul.f32 %v17759_v59, %v14160_v31  ;;  %v14507_v30 = vld [vmem:[#allocation2 + $0x19] sm:$0xff] }
 0x241   : > { %v14484_v14 = vld [vmem:[#allocation2 + $0xff] sm:$0xff]  ;;  %v14522_v20 = vld [vmem:[#allocation2 + $0x51] sm:$0xff] }
 0x242   : > { %17890 = vst [vmem:[#allocation101_spill] sm:$0xff] %v14484_v14  ;;  %v4576_v61 = vld [vmem:[#allocation2 + $0x100] sm:$0xff]  ;;  %v4299_v0 = vpack.c.bf16 %v14484_v14, %v4282_v53  ;;  %v5229_v39 = vpack.c.bf16 %v14158_v45, %v5197_v22  ;;  %v17894_v41 = vld [vmem:[#allocation44_spill] sm:$0xff]  ;;  %v5201_v22 = vmul.f32 %v17767_v37, %v14189_v10 }
 0x243   : > { %v14487_v19 = vpack.c.bf16 %v4576_v61, %v4575_v11  ;;  %v17893_v61 = vld [vmem:[#allocation43_spill] sm:$0xff]  ;;  %v5230_v11 = vpack.c.bf16 %v14176_v12, %v5199_v24  ;;  %v14535_v12 = vld [vmem:[%s17245_s5 + $0xe] sm:$0x3]  ;;  %v17895_v24 = vld [vmem:[#allocation45_spill] sm:$0xff] }
 0x244   : > { %v4874_v53 = vmul.f32 %v17893_v61, %v14491_v25  ;;  %v5231_v59 = vpack.c.bf16 %v14224_v13, %v5201_v22 }
 0x245   : > { %17891 = vst [vmem:[#allocation102_spill] sm:$0xff] %v14487_v19 }
 0x246   : > { %11723 = vmatmul.mubr.msk.bf16.gmra.mxu0 %vm420_vm1, %v4299_v0  ;;  %v4876_v0 = vmul.f32 %v17894_v41, %v14498_v57  ;;  %v4904_v45 = vpack.c.bf16 %v4874_v53, %v14507_v30  ;;  %v14529_v53 = vld [vmem:[%s17245_s5 + $0xc] sm:$0x3] }
 0x247   : > { %11757 = vmatmul.mubr.msk.bf16.gmra.mxu1 %vm420_vm1, %v14487_v19  ;;  %11762 = vmatprep.mubr.msk.bf16.mxu0 %vm420_vm1, %v4903_v43  ;;  %v5558_v43 = vsel %vm1108_vm0, %v14181_v2, 0  ;;  %v14517_v19 = vld [vmem:[#allocation2 + $0x41] sm:$0xff]  ;;  %v5884_v2 = vsel %vm1108_vm0, %v14194_v52, 0 }
 0x248   : > { %11796 = vmatprep.mubr.msk.bf16.mxu1 %vm420_vm1, %v5229_v39  ;;  %v14515_v39 = vld [vmem:[#allocation2 + $0x29] sm:$0xff]  ;;  %v4878_v52 = vmul.f32 %v17895_v24, %v14517_v19 }
 0x249   : > { %v4905_v31 = vpack.c.bf16 %v4876_v0, %v14515_v39  ;;  %v5203_v0 = vmul.f32 %v17779_v33, %v14226_v18  ;;  %v14562_v18 = vld [vmem:[#allocation2 + $0x71] sm:$0xff] }
 0x24b   : > { %v5232_v33 = vpack.c.bf16 %v14244_v32, %v5203_v0  ;;  %v5207_v0 = vmul.f32 %v17805_v35, %v14283_v48  ;;  %v14582_v32 = vld [vmem:[#allocation2 + $0x81] sm:$0xff]  ;;  %v14586_v48 = vld [vmem:[#allocation2 + $0x91] sm:$0xff] }
 0x24e   : > { %11763 = vmatmul.mubr.msk.bf16.vlgmr.msra.gmra.mxu0 %vm420_vm1, %v4904_v45  ;;  %v17896_v45 = vld [vmem:[#allocation46_spill] sm:$0xff] }
 0x24f   : > { %11797 = vmatmul.mubr.msk.bf16.vlgmr.msra.gmra.mxu1 %vm420_vm1, %v5230_v11  ;;  %11829 = vmatpush3.bf16.msra.mxu0 %v5558_v43  ;;  %v4880_v22 = vmul.f32 %v17896_v45, %v14522_v20  ;;  %v14549_v43 = vld [vmem:[#allocation2 + $0x39] sm:$0xff]  ;;  %v14552_v11 = vld [vmem:[#allocation2 + $0x49] sm:$0xff] }
 0x250   : > { %11766 = vmatprep.mubr.msk.bf16.mxu0 %vm420_vm1, %v4905_v31  ;;  %11800 = vmatprep.mubr.msk.bf16.mxu1 %vm420_vm1, %v5231_v59  ;;  %v4906_v59 = vpack.c.bf16 %v4878_v52, %v14549_v43  ;;  %v5205_v31 = vmul.f32 %v17792_v38, %v14255_v56  ;;  %v17897_v52 = vld [vmem:[#allocation47_spill] sm:$0xff] }
 0x251   : > { %11863 = vmatpush3.bf16.msra.mxu1 %v5884_v2  ;;  %12357 = vmatprep.subr.msk.bf16.mxu0 %vm1108_vm0, %v14529_v53  ;;  %v4907_v13 = vpack.c.bf16 %v4880_v22, %v14552_v11  ;;  %v14558_v2 = vld [vmem:[#allocation2 + $0x61] sm:$0xff]  ;;  %v17898_v22 = vld [vmem:[#allocation48_spill] sm:$0xff] }
 0x252   : > { %12358 = vmatprep.subr.msk.bf16.mxu1 %vm1108_vm0, %v14535_v12  ;;  %v5233_v37 = vpack.c.bf16 %v14281_v50, %v5205_v31  ;;  %v4882_v56 = vmul.f32 %v17897_v52, %v14558_v2  ;;  %v4884_v38 = vmul.f32 %v17898_v22, %v14562_v18  ;;  %v14576_v50 = vld [vmem:[#allocation2 + $0x69] sm:$0xff] }
 0x256   : > { %11767 = vmatmul.mubr.msk.bf16.gmra.mxu0 %vm420_vm1, %v4906_v59  ;;  %v14573_v59 = vld [vmem:[#allocation2 + $0x59] sm:$0xff] }
 0x257   : > { %11801 = vmatmul.mubr.msk.bf16.gmra.mxu1 %vm420_vm1, %v5232_v33  ;;  %11770 = vmatprep.mubr.msk.bf16.mxu0 %vm420_vm1, %v4907_v13  ;;  %v4908_v31 = vpack.c.bf16 %v4882_v56, %v14573_v59  ;;  %v5209_v33 = vmul.f32 %v17817_v1, %v14311_v44  ;;  %v4909_v13 = vpack.c.bf16 %v4884_v38, %v14576_v50  ;;  %v17899_v56 = vld [vmem:[#allocation49_spill] sm:$0xff] }
 0x258   : > { %11804 = vmatprep.mubr.msk.bf16.mxu1 %vm420_vm1, %v5233_v37  ;;  %v5234_v37 = vpack.c.bf16 %v14301_v9, %v5207_v0  ;;  %v4886_v44 = vmul.f32 %v17899_v56, %v14582_v32  ;;  %v5211_v38 = vmul.f32 %v17830_v60, %v14338_v28  ;;  %v17900_v0 = vld [vmem:[#allocation50_spill] sm:$0xff]  ;;  %v14610_v28 = vld [vmem:[#allocation2 + $0xb1] sm:$0xff] }
 0x259   : > { %v5235_v35 = vpack.c.bf16 %v14336_v27, %v5209_v33  ;;  %v4888_v1 = vmul.f32 %v17900_v0, %v14586_v48  ;;  %v14600_v27 = vld [vmem:[#allocation2 + $0x89] sm:$0xff]  ;;  %v14606_v9 = vld [vmem:[#allocation2 + $0xa1] sm:$0xff] }
 0x25e   : > { %11771 = vmatmul.mubr.msk.bf16.gmra.mxu0 %vm420_vm1, %v4908_v31  ;;  %v14597_v31 = vld [vmem:[#allocation2 + $0x79] sm:$0xff] }
 0x25f   : > { %11805 = vmatmul.mubr.msk.bf16.gmra.mxu1 %vm420_vm1, %v5234_v37  ;;  %11774 = vmatprep.mubr.msk.bf16.mxu0 %vm420_vm1, %v4909_v13  ;;  %v4910_v33 = vpack.c.bf16 %v4886_v44, %v14597_v31  ;;  %v5213_v37 = vmul.f32 %v17842_v8, %v14363_v29  ;;  %v4911_v13 = vpack.c.bf16 %v4888_v1, %v14600_v27  ;;  %v17901_v44 = vld [vmem:[#allocation51_spill] sm:$0xff] }
 0x260   : > { %11808 = vmatprep.mubr.msk.bf16.mxu1 %vm420_vm1, %v5235_v35  ;;  %v5236_v35 = vpack.c.bf16 %v14356_v54, %v5211_v38  ;;  %v4890_v29 = vmul.f32 %v17901_v44, %v14606_v9  ;;  %v5215_v1 = vmul.f32 %v17853_v42, %v14387_v55  ;;  %v17902_v38 = vld [vmem:[#allocation52_spill] sm:$0xff]  ;;  %v14630_v54 = vld [vmem:[#allocation2 + $0xc1] sm:$0xff] }
 0x261   : > { %v5237_v60 = vpack.c.bf16 %v14385_v6, %v5213_v37  ;;  %v4892_v8 = vmul.f32 %v17902_v38, %v14610_v28  ;;  %v14624_v6 = vld [vmem:[#allocation2 + $0xa9] sm:$0xff]  ;;  %v14634_v55 = vld [vmem:[#allocation2 + $0xd1] sm:$0xff] }
 0x266   : > { %11775 = vmatmul.mubr.msk.bf16.gmra.mxu0 %vm420_vm1, %v4910_v33  ;;  %v14621_v33 = vld [vmem:[#allocation2 + $0x99] sm:$0xff] }
 0x267   : > { %11809 = vmatmul.mubr.msk.bf16.gmra.mxu1 %vm420_vm1, %v5236_v35  ;;  %11778 = vmatprep.mubr.msk.bf16.mxu0 %vm420_vm1, %v4911_v13  ;;  %v4912_v37 = vpack.c.bf16 %v4890_v29, %v14621_v33  ;;  %v5217_v35 = vmul.f32 %v17865_v63, %v14412_v15  ;;  %v4913_v13 = vpack.c.bf16 %v4892_v8, %v14624_v6  ;;  %v17903_v29 = vld [vmem:[#allocation31_spill] sm:$0xff] }
 0x268   : > { %11812 = vmatprep.mubr.msk.bf16.mxu1 %vm420_vm1, %v5237_v60  ;;  %v5238_v60 = vpack.c.bf16 %v14405_v62, %v5215_v1  ;;  %v4894_v15 = vmul.f32 %v17903_v29, %v14630_v54  ;;  %v5219_v8 = vmul.f32 %v17871_v46, %v14426_v51  ;;  %v17904_v1 = vld [vmem:[#allocation34_spill] sm:$0xff]  ;;  %v14658_v51 = vld [vmem:[#allocation2 + $0xf1] sm:$0xff] }
 0x269   : > { %v5239_v42 = vpack.c.bf16 %v14424_v36, %v5217_v35  ;;  %v4896_v63 = vmul.f32 %v17904_v1, %v14634_v55  ;;  %v14648_v36 = vld [vmem:[#allocation2 + $0xc9] sm:$0xff]  ;;  %v14654_v62 = vld [vmem:[#allocation2 + $0xe1] sm:$0xff] }
 0x26e   : > { %11779 = vmatmul.mubr.msk.bf16.gmra.mxu0 %vm420_vm1, %v4912_v37  ;;  %v14645_v37 = vld [vmem:[#allocation2 + $0xb9] sm:$0xff] }
 0x26f   : > { %11813 = vmatmul.mubr.msk.bf16.gmra.mxu1 %vm420_vm1, %v5238_v60  ;;  %11782 = vmatprep.mubr.msk.bf16.mxu0 %vm420_vm1, %v4913_v13  ;;  %v4914_v35 = vpack.c.bf16 %v4894_v15, %v14645_v37  ;;  %v5221_v60 = vmul.f32 %v17875_v58, %v14445_v21  ;;  %v4915_v13 = vpack.c.bf16 %v4896_v63, %v14648_v36  ;;  %v17905_v15 = vld [vmem:[#allocation32_spill] sm:$0xff] }
 0x270   : > { %11816 = vmatprep.mubr.msk.bf16.mxu1 %vm420_vm1, %v5239_v42  ;;  %v5240_v42 = vpack.c.bf16 %v14440_v17, %v5219_v8  ;;  %v4898_v21 = vmul.f32 %v17905_v15, %v14654_v62  ;;  %v5223_v63 = vmul.f32 %v17880_v26, %v14458_v23  ;;  %v17906_v8 = vld [vmem:[#allocation36_spill] sm:$0xff]  ;;  %v14678_v17 = vld [vmem:[#allocation2 + $0x101] sm:$0xff] }
 0x271   : > { %v5241_v46 = vpack.c.bf16 %v14456_v3, %v5221_v60  ;;  %v4900_v58 = vmul.f32 %v17906_v8, %v14658_v51  ;;  %v14672_v3 = vld [vmem:[#allocation2 + $0xe9] sm:$0xff] }
 0x272   : > { %v14682_v23 = vld [vmem:[#allocation2 + $0x107] sm:$0xff] }
 0x276   : > { %11783 = vmatmul.mubr.msk.bf16.gmra.mxu0 %vm420_vm1, %v4914_v35  ;;  %v14669_v35 = vld [vmem:[#allocation2 + $0xd9] sm:$0xff] }
 0x277   : > { %11817 = vmatmul.mubr.msk.bf16.gmra.mxu1 %vm420_vm1, %v5240_v42  ;;  %11786 = vmatprep.mubr.msk.bf16.mxu0 %vm420_vm1, %v4915_v13  ;;  %v4916_v60 = vpack.c.bf16 %v4898_v21, %v14669_v35  ;;  %v5225_v42 = vmul.f32 %v17885_v34, %v14476_v4  ;;  %v4917_v13 = vpack.c.bf16 %v4900_v58, %v14672_v3  ;;  %v17907_v21 = vld [vmem:[#allocation54_spill] sm:$0xff] }
 0x278   : > { %11820 = vmatprep.mubr.msk.bf16.mxu1 %vm420_vm1, %v5241_v46  ;;  %v5242_v46 = vpack.c.bf16 %v14468_v5, %v5223_v63  ;;  %v4902_v4 = vmul.f32 %v17907_v21, %v14678_v17  ;;  %v5227_v58 = vmul.f32 %v17889_v16, %v14682_v23  ;;  %v5786_v63 = vmul.f32 %v17888_v7, %v14491_v25 }
 0x279   : > { %v5243_v26 = vpack.c.bf16 %v14484_v14, %v5225_v42  ;;  %v14696_v14 = vld [vmem:[#allocation2 + $0x10f] sm:$0xff]  ;;  %v5788_v25 = vmul.f32 %v17893_v61, %v14498_v57 }
 0x27e   : > { %11787 = vmatmul.mubr.msk.bf16.gmra.mxu0 %vm420_vm1, %v4916_v60  ;;  %v14693_v60 = vld [vmem:[#allocation2 + $0xf9] sm:$0xff] }
 0x27f   : > { %11821 = vmatmul.mubr.msk.bf16.gmra.mxu1 %vm420_vm1, %v5242_v46  ;;  %11790 = vmatprep.mubr.msk.bf16.mxu0 %vm420_vm1, %v4917_v13  ;;  %v4918_v42 = vpack.c.bf16 %v4902_v4, %v14693_v60  ;;  %v5244_v46 = vpack.c.bf16 %v14696_v14, %v5227_v58  ;;  %v5790_v4 = vmul.f32 %v17894_v41, %v14517_v19  ;;  %v6210_v13 = vsel %vm1108_vm0, %v14529_v53, 0  ;;  %v17908_v19 = vld [vmem:[#allocation68_spill] sm:$0xff] }
 0x280   : > { %11824 = vmatprep.mubr.msk.bf16.mxu1 %vm420_vm1, %v5243_v26  ;;  %v5817_v26 = vpack.c.bf16 %v5786_v63, %v14507_v30  ;;  %v5818_v58 = vpack.c.bf16 %v5788_v25, %v14515_v39  ;;  %v14720_v63 = vld [vmem:[%s17245_s5 + $0x10] sm:$0x3]  ;;  %v5794_v53 = vmul.f32 %v17896_v45, %v14558_v2  ;;  %v5798_v2 = vmul.f32 %v17898_v22, %v14582_v32 }
 0x281   : > { %v5819_v30 = vpack.c.bf16 %v5790_v4, %v14549_v43  ;;  %v17909_v43 = vld [vmem:[#allocation67_spill] sm:$0xff]  ;;  %v5802_v32 = vmul.f32 %v17900_v0, %v14606_v9  ;;  %v17913_v4 = vld [vmem:[#allocation84_spill] sm:$0xff]  ;;  %v5806_v9 = vmul.f32 %v17902_v38, %v14630_v54  ;;  %v5810_v54 = vmul.f32 %v17904_v1, %v14654_v62 }
 0x282   : > { %v17912_v25 = vld [vmem:[#allocation87_spill] sm:$0xff]  ;;  %v5814_v62 = vmul.f32 %v17906_v8, %v14678_v17  ;;  %v12380_v17 = vld [vmem:[#allocation2 + $0x27] sm:$0xff] }
 0x286   : > { %11791 = vmatmul.mubr.msk.bf16.gmra.mxu0 %vm420_vm1, %v4918_v42  ;;  %v5821_v42 = vpack.c.bf16 %v5794_v53, %v14573_v59  ;;  %v5823_v59 = vpack.c.bf16 %v5798_v2, %v14597_v31  ;;  %v5825_v31 = vpack.c.bf16 %v5802_v32, %v14621_v33  ;;  %v5827_v33 = vpack.c.bf16 %v5806_v9, %v14645_v37  ;;  %v17920_v53 = vld [vmem:[#allocation20_spill] sm:$0xff]  ;;  %v17923_v2 = vld [vmem:[#allocation21_spill] sm:$0xff]  ;;  %v17926_v32 = vld [vmem:[#allocation79_spill] sm:$0xff] }
 0x287   : > { %11825 = vmatmul.mubr.msk.bf16.gmra.mxu1 %vm420_vm1, %v5244_v46  ;;  %11830 = vmatprep.mubr.msk.bf16.mxu0 %vm420_vm1, %v14111_v40  ;;  %v6504_v40 = vsel %vm1108_vm0, %v14535_v12, 0  ;;  %v17910_v46 = vld [vmem:[#allocation127_spill] sm:$0xff]  ;;  %v5829_v37 = vpack.c.bf16 %v5810_v54, %v14669_v35  ;;  %v5831_v35 = vpack.c.bf16 %v5814_v62, %v14693_v60 }
 0x288   : > { %11864 = vmatprep.mubr.msk.bf16.mxu1 %vm420_vm1, %v5817_v26  ;;  %v17911_v26 = vld [vmem:[#allocation72_spill] sm:$0xff]  ;;  %v12381_v60 = vld [vmem:[#allocation2 + $0x2f] sm:$0xff] }
 0x289   : > { %v17930_v54 = vld [vmem:[#allocation123_spill] sm:$0xff] }
 0x28a   : > { %v17933_v62 = vld [vmem:[#allocation23_spill] sm:$0xff] }
 0x28e   : > { %11831 = vmatmul.mubr.msk.bf16.vlgmr.msra.gmra.mxu0 %vm420_vm1, %v14100_v49  ;;  %v5792_v49 = vmul.f32 %v17895_v24, %v14522_v20  ;;  %v5796_v20 = vmul.f32 %v17897_v52, %v14562_v18  ;;  %v5800_v18 = vmul.f32 %v17899_v56, %v14586_v48  ;;  %v5804_v48 = vmul.f32 %v17901_v44, %v14610_v28 }
 0x28f   : > { %11865 = vmatmul.mubr.msk.bf16.vlgmr.msra.gmra.mxu1 %vm420_vm1, %v5818_v58  ;;  %11897 = vmatpush3.bf16.msra.mxu0 %v6210_v13  ;;  %v17914_v13 = vld [vmem:[#allocation88_spill] sm:$0xff]  ;;  %v17915_v58 = vld [vmem:[#allocation125_spill] sm:$0xff]  ;;  %v5808_v28 = vmul.f32 %v17903_v29, %v14634_v55  ;;  %v5812_v55 = vmul.f32 %v17905_v15, %v14658_v51 }
 0x290   : > { %11834 = vmatprep.mubr.msk.bf16.mxu0 %vm420_vm1, %v17908_v19  ;;  %11868 = vmatprep.mubr.msk.bf16.mxu1 %vm420_vm1, %v5819_v30  ;;  %v5820_v12 = vpack.c.bf16 %v5792_v49, %v14552_v11  ;;  %v5822_v11 = vpack.c.bf16 %v5796_v20, %v14576_v50  ;;  %v5824_v50 = vpack.c.bf16 %v5800_v18, %v14600_v27  ;;  %v17916_v30 = vld [vmem:[#allocation92_spill] sm:$0xff]  ;;  %v17918_v19 = vld [vmem:[#allocation94_spill] sm:$0xff]  ;;  %v17922_v20 = vld [vmem:[#allocation69_spill] sm:$0xff] }
 0x291   : > { %11931 = vmatpush3.bf16.msra.mxu1 %v6504_v40  ;;  %12359 = vmatprep.subr.msk.bf16.mxu0 %vm1108_vm0, %v14720_v63  ;;  %v5826_v27 = vpack.c.bf16 %v5804_v48, %v14624_v6  ;;  %v5828_v6 = vpack.c.bf16 %v5808_v28, %v14648_v36  ;;  %v17917_v40 = vld [vmem:[#allocation141_spill] sm:$0xff]  ;;  %v5830_v36 = vpack.c.bf16 %v5812_v55, %v14672_v3  ;;  %v14796_v49 = vld [vmem:[#allocation2 + $0x111] sm:$0xff] }
 0x292   : > { %v5816_v51 = vmul.f32 %v17907_v21, %v14796_v49  ;;  %v6111_v3 = vmul.f32 %v12380_v17, %v17920_v53  ;;  %v14821_v18 = vld [vmem:[%s17246_s6] ss:$0 sm:$0xff]  ;;  %v17932_v55 = vld [vmem:[#allocation83_spill] sm:$0xff]  ;;  %v17934_v17 = vld [vmem:[#allocation130_spill] sm:$0xff] }
 0x296   : > { %11835 = vmatmul.mubr.msk.bf16.gmra.mxu0 %vm420_vm1, %v17909_v43 }
 0x297   : > { %11869 = vmatmul.mubr.msk.bf16.gmra.mxu1 %vm420_vm1, %v5820_v12  ;;  %11838 = vmatprep.mubr.msk.bf16.mxu0 %vm420_vm1, %v17910_v46  ;;  %v14805_v12 = vld [vmem:[#allocation2 + $0x109] sm:$0xff]  ;;  %v17921_v46 = vld [vmem:[#allocation97_spill] sm:$0xff] }
 0x298   : > { %11872 = vmatprep.mubr.msk.bf16.mxu1 %vm420_vm1, %v5821_v42  ;;  %v5832_v43 = vpack.c.bf16 %v5816_v51, %v14805_v12  ;;  %v6143_v42 = vpack.c.bf16 %v12381_v60, %v6111_v3 }
 0x29e   : > { %11839 = vmatmul.mubr.msk.bf16.gmra.mxu0 %vm420_vm1, %v17911_v26  ;;  %v17924_v26 = vld [vmem:[#allocation122_spill] sm:$0xff] }
 0x29f   : > { %11873 = vmatmul.mubr.msk.bf16.gmra.mxu1 %vm420_vm1, %v5822_v11  ;;  %11842 = vmatprep.mubr.msk.bf16.mxu0 %vm420_vm1, %v17912_v25  ;;  %v6113_v11 = vmul.f32 %v17923_v2, %v14189_v10 }
 0x2a0   : > { %11876 = vmatprep.mubr.msk.bf16.mxu1 %vm420_vm1, %v5823_v59  ;;  %v17925_v59 = vld [vmem:[#allocation22_spill] sm:$0xff] }
 0x2a1   : > { %v6115_v25 = vmul.f32 %v17925_v59, %v17924_v26  ;;  %v6434_v59 = vld [vmem:[#allocation2 + $0x110] sm:$0xff] }
 0x2a6   : > { %11843 = vmatmul.mubr.msk.bf16.gmra.mxu0 %vm420_vm1, %v17913_v4  ;;  %v6830_v4 = vsel %vm1108_vm0, %v14720_v63, 0 }
 0x2a7   : > { %11877 = vmatmul.mubr.msk.bf16.gmra.mxu1 %vm420_vm1, %v5824_v50  ;;  %11846 = vmatprep.mubr.msk.bf16.mxu0 %vm420_vm1, %v17914_v13  ;;  %v6144_v50 = vpack.c.bf16 %v17926_v32, %v6113_v11  ;;  %v17927_v13 = vld [vmem:[#allocation81_spill] sm:$0xff] }
 0x2a8   : > { %11880 = vmatprep.mubr.msk.bf16.mxu1 %vm420_vm1, %v5825_v31  ;;  %v6145_v48 = vpack.c.bf16 %v17927_v13, %v6115_v25 }
 0x2ae   : > { %11847 = vmatmul.mubr.msk.bf16.gmra.mxu0 %vm420_vm1, %v17915_v58  ;;  %v17929_v58 = vld [vmem:[#allocation80_spill] sm:$0xff] }
 0x2af   : > { %11881 = vmatmul.mubr.msk.bf16.gmra.mxu1 %vm420_vm1, %v5826_v27  ;;  %11850 = vmatprep.mubr.msk.bf16.mxu0 %vm420_vm1, %v17916_v30  ;;  %v17928_v27 = vld [vmem:[#allocation82_spill] sm:$0xff] }
 0x2b0   : > { %11884 = vmatprep.mubr.msk.bf16.mxu1 %vm420_vm1, %v5827_v33 }
 0x2b6   : > { %11851 = vmatmul.mubr.msk.bf16.gmra.mxu0 %vm420_vm1, %v17917_v40 }
 0x2b7   : > { %11885 = vmatmul.mubr.msk.bf16.gmra.mxu1 %vm420_vm1, %v5828_v6  ;;  %11854 = vmatprep.mubr.msk.bf16.mxu0 %vm420_vm1, %v14428_v47  ;;  %v17919_v47 = vld [vmem:[#allocation99_spill] sm:$0xff]  ;;  %v17931_v6 = vld [vmem:[#allocation24_spill] sm:$0xff] }
 0x2b8   : > { %11888 = vmatprep.mubr.msk.bf16.mxu1 %vm420_vm1, %v5829_v37  ;;  %v6119_v40 = vmul.f32 %v17931_v6, %v17930_v54 }
 0x2be   : > { %11855 = vmatmul.mubr.msk.bf16.gmra.mxu0 %vm420_vm1, %v17918_v19 }
 0x2bf   : > { %11889 = vmatmul.mubr.msk.bf16.gmra.mxu1 %vm420_vm1, %v5830_v36  ;;  %11858 = vmatprep.mubr.msk.bf16.mxu0 %vm420_vm1, %v17919_v47  ;;  %v6117_v36 = vmul.f32 %v17933_v62, %v17932_v55 }
 0x2c0   : > { %11892 = vmatprep.mubr.msk.bf16.mxu1 %vm420_vm1, %v5831_v35 }
 0x2c1   : > { %v6146_v3 = vpack.c.bf16 %v17934_v17, %v6117_v36 }
 0x2c6   : > { %11859 = vmatmul.mubr.msk.bf16.gmra.mxu0 %vm420_vm1, %v17921_v46  ;;  %v17935_v46 = vld [vmem:[#allocation133_spill] sm:$0xff] }
 0x2c7   : > { %11893 = vmatmul.mubr.msk.bf16.gmra.mxu1 %vm420_vm1, %v5832_v43  ;;  %11898 = vmatprep.mubr.msk.bf16.mxu0 %vm420_vm1, %v6143_v42 }
 0x2c8   : > { %11932 = vmatprep.mubr.msk.bf16.mxu1 %vm420_vm1, %v17922_v20  ;;  %v6147_v20 = vpack.c.bf16 %v17935_v46, %v6119_v40 }
 0x2c9   : > { %v11696_v31 = vpop.f32.mrf.mxu0 }
 0x2ca   : > { %v4515_v10 = vadd.f32 %v11696_v31, %v14821_v18  ;;  %v11730_v9 = vpop.f32.mrf.mxu1 }
 0x2cb   : > { %v4386_v33 = vpop.f32.mrf.mxu0 }
 0x2cc   : > { %v14834_v30 = vadd.f32 %v11730_v9, %v4515_v10  ;;  %v4513_v63 = vadd.f32 %v14821_v18, %v4386_v33  ;;  %v4680_v28 = vpop.f32.mrf.mxu1  ;;  %v17938_v9 = vld [vmem:[#allocation136_spill] sm:$0xff] }
 0x2cd   : > { %v11697_v37 = vpop.f32.mrf.mxu0 }
 0x2ce   : > { %11899 = vmatmul.mubr.msk.bf16.vlgmr.msra.gmra.mxu0 %vm420_vm1, %v6144_v50  ;;  %v14841_v19 = vadd.f32 %v4680_v28, %v4513_v63  ;;  %v4516_v35 = vadd.f32 %v11697_v37, %v14821_v18  ;;  %v11731_v47 = vpop.f32.mrf.mxu1  ;;  %v17936_v50 = vld [vmem:[#allocation85_spill] sm:$0xff]  ;;  %v17940_v63 = vld [vmem:[#allocation124_spill] sm:$0xff] }
 0x2cf   : > { %11933 = vmatmul.mubr.msk.bf16.vlgmr.msra.gmra.mxu1 %vm420_vm1, %v17928_v27  ;;  %11965 = vmatpush3.bf16.msra.mxu0 %v6830_v4  ;;  %v4389_v51 = vpop.f32.mrf.mxu0  ;;  %v17937_v4 = vld [vmem:[#allocation86_spill] sm:$0xff]  ;;  %v17941_v28 = vld [vmem:[#allocation25_spill] sm:$0xff] }
 0x2d0   : > { %11902 = vmatprep.mubr.msk.bf16.mxu0 %vm420_vm1, %v6145_v48  ;;  %11936 = vmatprep.mubr.msk.bf16.mxu1 %vm420_vm1, %v17929_v58  ;;  %v14845_v43 = vadd.f32 %v11731_v47, %v4516_v35  ;;  %v4514_v60 = vadd.f32 %v14821_v18, %v4389_v51  ;;  %v4683_v42 = vpop.f32.mrf.mxu1  ;;  %v17939_v27 = vld [vmem:[#allocation26_spill] sm:$0xff]  ;;  %v6121_v54 = vmul.f32 %v17941_v28, %v17940_v63  ;;  %v17942_v35 = vld [vmem:[#allocation121_spill] sm:$0xff] }
 0x2d1   : > { %v11700_v11 = vpop.f32.mrf.mxu0  ;;  %v6123_v58 = vmul.f32 %v17939_v27, %v17938_v9  ;;  %v17946_v9 = vld [vmem:[#allocation91_spill] sm:$0xff]  ;;  %v17959_v27 = vld [vmem:[#allocation74_spill] sm:$0xff] }
 0x2d2   : > { %v14850_v26 = vadd.f32 %v4683_v42, %v4514_v60  ;;  %v4519_v25 = vadd.f32 %v11700_v11, %v14821_v18  ;;  %v11734_v32 = vpop.f32.mrf.mxu1  ;;  %v6148_v47 = vpack.c.bf16 %v17942_v35, %v6121_v54  ;;  %v17943_v60 = vld [vmem:[#allocation89_spill] sm:$0xff]  ;;  %v17948_v54 = vld [vmem:[#allocation90_spill] sm:$0xff] }
 0x2d3   : > { %v4402_v31 = vpop.f32.mrf.mxu0  ;;  %v6149_v42 = vpack.c.bf16 %v17943_v60, %v6123_v58  ;;  %v17947_v58 = vld [vmem:[#allocation28_spill] sm:$0xff] }
 0x2d4   : > { %v14858_v13 = vadd.f32 %v11734_v32, %v4519_v25  ;;  %v4517_v48 = vadd.f32 %v14821_v18, %v4402_v31  ;;  %v4696_v10 = vpop.f32.mrf.mxu1  ;;  %v17944_v32 = vld [vmem:[#allocation126_spill] sm:$0xff] }
 0x2d5   : > { %v11701_v33 = vpop.f32.mrf.mxu0 }
 0x2d6   : > { %11903 = vmatmul.mubr.msk.bf16.gmra.mxu0 %vm420_vm1, %v6146_v3  ;;  %v14865_v40 = vadd.f32 %v4696_v10, %v4517_v48  ;;  %v4520_v37 = vadd.f32 %v11701_v33, %v14821_v18  ;;  %v11735_v55 = vpop.f32.mrf.mxu1  ;;  %v6127_v33 = vmul.f32 %v17947_v58, %v17946_v9  ;;  %v17952_v9 = vld [vmem:[#allocation95_spill] sm:$0xff] }
 0x2d7   : > { %11937 = vmatmul.mubr.msk.bf16.gmra.mxu1 %vm420_vm1, %v17936_v50  ;;  %11906 = vmatprep.mubr.msk.bf16.mxu0 %vm420_vm1, %v6147_v20  ;;  %v4405_v36 = vpop.f32.mrf.mxu0  ;;  %v17945_v50 = vld [vmem:[#allocation73_spill] sm:$0xff] }
 0x2d8   : > { %11940 = vmatprep.mubr.msk.bf16.mxu1 %vm420_vm1, %v17937_v4  ;;  %v14869_v51 = vadd.f32 %v11735_v55, %v4520_v37  ;;  %v4518_v17 = vadd.f32 %v14821_v18, %v4405_v36  ;;  %v4699_v3 = vpop.f32.mrf.mxu1  ;;  %v17949_v37 = vld [vmem:[#allocation27_spill] sm:$0xff] }
 0x2d9   : > { %v6125_v55 = vmul.f32 %v17949_v37, %v17948_v54 }
 0x2da   : > { %v11704_v46 = vpop.f32.mrf.mxu0  ;;  %v14874_v20 = vadd.f32 %v4699_v3, %v4518_v17  ;;  %v17950_v3 = vld [vmem:[#allocation128_spill] sm:$0xff] }
 0x2db   : > { %v4523_v11 = vadd.f32 %v11704_v46, %v14821_v18  ;;  %v11738_v25 = vpop.f32.mrf.mxu1  ;;  %v6150_v60 = vpack.c.bf16 %v17950_v3, %v6125_v55 }
 0x2dc   : > { %v4418_v4 = vpop.f32.mrf.mxu0 }
 0x2dd   : > { %v14882_v31 = vadd.f32 %v11738_v25, %v4523_v11  ;;  %v4521_v48 = vadd.f32 %v14821_v18, %v4418_v4  ;;  %v4712_v10 = vpop.f32.mrf.mxu1  ;;  %v17951_v25 = vld [vmem:[#allocation129_spill] sm:$0xff] }
 0x2de   : > { %11907 = vmatmul.mubr.msk.bf16.gmra.mxu0 %vm420_vm1, %v6148_v47  ;;  %v11705_v63 = vpop.f32.mrf.mxu0 }
 0x2df   : > { %11941 = vmatmul.mubr.msk.bf16.gmra.mxu1 %vm420_vm1, %v17944_v32  ;;  %11910 = vmatprep.mubr.msk.bf16.mxu0 %vm420_vm1, %v6149_v42  ;;  %v14889_v36 = vadd.f32 %v4712_v10, %v4521_v48  ;;  %v4524_v35 = vadd.f32 %v11705_v63, %v14821_v18  ;;  %v11739_v47 = vpop.f32.mrf.mxu1  ;;  %v6151_v32 = vpack.c.bf16 %v17951_v25, %v6127_v33  ;;  %v17953_v63 = vld [vmem:[#allocation144_spill] sm:$0xff] }
 0x2e0   : > { %11944 = vmatprep.mubr.msk.bf16.mxu1 %vm420_vm1, %v17945_v50  ;;  %v4421_v17 = vpop.f32.mrf.mxu0 }
 0x2e1   : > { %v14893_v42 = vadd.f32 %v11739_v47, %v4524_v35  ;;  %v4522_v46 = vadd.f32 %v14821_v18, %v4421_v17  ;;  %v4715_v11 = vpop.f32.mrf.mxu1  ;;  %v17954_v47 = vld [vmem:[#allocation70_spill] sm:$0xff] }
 0x2e2   : > { %v17955_v17 = vld [vmem:[#allocation30_spill] sm:$0xff] }
 0x2e3   : > { %v14898_v4 = vadd.f32 %v4715_v11, %v4522_v46  ;;  %v6131_v3 = vmul.f32 %v17955_v17, %v17954_v47  ;;  %v17956_v46 = vld [vmem:[#allocation93_spill] sm:$0xff] }
 0x2e4   : > { %v17957_v11 = vld [vmem:[#allocation29_spill] sm:$0xff] }
 0x2e5   : > { %v11708_v50 = vpop.f32.mrf.mxu0  ;;  %v11742_v10 = vpop.f32.mrf.mxu1  ;;  %v6129_v25 = vmul.f32 %v17957_v11, %v17956_v46  ;;  %v6153_v28 = vpack.c.bf16 %v17959_v27, %v6131_v3  ;;  %v17961_v46 = vld [vmem:[#allocation132_spill] sm:$0xff] }
 0x2e6   : > { %11911 = vmatmul.mubr.msk.bf16.gmra.mxu0 %vm420_vm1, %v6150_v60  ;;  %v4527_v48 = vadd.f32 %v11708_v50, %v14821_v18 }
 0x2e7   : > { %11945 = vmatmul.mubr.msk.bf16.gmra.mxu1 %vm420_vm1, %v17952_v9  ;;  %11914 = vmatprep.mubr.msk.bf16.mxu0 %vm420_vm1, %v6151_v32  ;;  %v4434_v54 = vpop.f32.mrf.mxu0  ;;  %v4728_v35 = vpop.f32.mrf.mxu1 }
 0x2e8   : > { %11948 = vmatprep.mubr.msk.bf16.mxu1 %vm420_vm1, %v17953_v63  ;;  %v14906_v55 = vadd.f32 %v11742_v10, %v4527_v48  ;;  %v4525_v33 = vadd.f32 %v14821_v18, %v4434_v54  ;;  %v17958_v63 = vld [vmem:[#allocation131_spill] sm:$0xff] }
 0x2e9   : > { %v11709_v60 = vpop.f32.mrf.mxu0  ;;  %v11743_v9 = vpop.f32.mrf.mxu1  ;;  %v6152_v37 = vpack.c.bf16 %v17958_v63, %v6129_v25 }
 0x2ea   : > { %v14913_v50 = vadd.f32 %v4728_v35, %v4525_v33  ;;  %v4528_v32 = vadd.f32 %v11709_v60, %v14821_v18  ;;  %v17960_v60 = vld [vmem:[#allocation96_spill] sm:$0xff] }
 0x2eb   : > { %v4437_v58 = vpop.f32.mrf.mxu0  ;;  %v4731_v54 = vpop.f32.mrf.mxu1 }
 0x2ec   : > { %v14917_v48 = vadd.f32 %v11743_v9, %v4528_v32  ;;  %v4526_v10 = vadd.f32 %v14821_v18, %v4437_v58  ;;  %v17963_v32 = vld [vmem:[#allocation35_spill] sm:$0xff] }
 0x2ed   : > { %v11712_v47 = vpop.f32.mrf.mxu0 }
 0x2ee   : > { %11915 = vmatmul.mubr.msk.bf16.gmra.mxu0 %vm420_vm1, %v6152_v37  ;;  %v14922_v17 = vadd.f32 %v4731_v54, %v4526_v10  ;;  %v4531_v33 = vadd.f32 %v11712_v47, %v14821_v18  ;;  %v11746_v35 = vpop.f32.mrf.mxu1  ;;  %v17962_v37 = vld [vmem:[#allocation134_spill] sm:$0xff]  ;;  %v17964_v10 = vld [vmem:[#allocation75_spill] sm:$0xff]  ;;  %v17965_v54 = vld [vmem:[#allocation33_spill] sm:$0xff] }
 0x2ef   : > { %11949 = vmatmul.mubr.msk.bf16.gmra.mxu1 %vm420_vm1, %v17960_v60  ;;  %11918 = vmatprep.mubr.msk.bf16.mxu0 %vm420_vm1, %v6153_v28  ;;  %v4450_v58 = vpop.f32.mrf.mxu0  ;;  %v6135_v9 = vmul.f32 %v17963_v32, %v17962_v37  ;;  %v6133_v47 = vmul.f32 %v17965_v54, %v17964_v10 }
 0x2f0   : > { %11952 = vmatprep.mubr.msk.bf16.mxu1 %vm420_vm1, %v17961_v46  ;;  %v14930_v25 = vadd.f32 %v11746_v35, %v4531_v33  ;;  %v4529_v27 = vadd.f32 %v14821_v18, %v4450_v58  ;;  %v4744_v3 = vpop.f32.mrf.mxu1  ;;  %v17967_v46 = vld [vmem:[#allocation98_spill] sm:$0xff] }
 0x2f1   : > { %v11713_v63 = vpop.f32.mrf.mxu0  ;;  %v6154_v33 = vpack.c.bf16 %v17967_v46, %v6133_v47  ;;  %v6155_v62 = vpack.c.bf16 %v14468_v5, %v6135_v9  ;;  %v6139_v9 = vmul.f32 %v17885_v34, %v14682_v23  ;;  %v6433_v34 = vld [vmem:[#allocation2 + $0x108] sm:$0xff] }
 0x2f2   : > { %v14937_v11 = vadd.f32 %v4744_v3, %v4529_v27  ;;  %v4532_v28 = vadd.f32 %v11713_v63, %v14821_v18  ;;  %v11747_v60 = vpop.f32.mrf.mxu1  ;;  %v17969_v3 = vld [vmem:[#allocation100_spill] sm:$0xff]  ;;  %v17970_v63 = vld [vmem:[#allocation103_spill] sm:$0xff] }
 0x2f3   : > { %v14940_v6 = vpop.f32.mrf.mxu0  ;;  %v6157_v23 = vpack.c.bf16 %v14696_v14, %v6139_v9  ;;  %v6435_v14 = vld [vmem:[#allocation2 + $0x118] sm:$0xff]  ;;  %v6436_v9 = vld [vmem:[#allocation2 + $0x120] sm:$0xff] }
 0x2f4   : > { %17966 = vst [vmem:[#allocation137_spill] sm:$0xff] %v14940_v6  ;;  %v14943_v35 = vadd.f32 %v11747_v60, %v4532_v28  ;;  %v14945_v58 = vpop.f32.mrf.mxu1 }
 0x2f5   : > { %17968 = vst [vmem:[#allocation71_spill] sm:$0xff] %v14945_v58  ;;  %v6109_v58 = vld [vmem:[#allocation2 + $0x117] sm:$0xff] }
 0x2f6   : > { %v11716_v37 = vpop.f32.mrf.mxu0  ;;  %11919 = vmatmul.mubr.msk.bf16.gmra.mxu0 %vm420_vm1, %v6154_v33  ;;  %v17971_v33 = vld [vmem:[#allocation135_spill] sm:$0xff] }
 0x2f7   : > { %v4535_v10 = vadd.f32 %v11716_v37, %v14821_v18  ;;  %v11750_v27 = vpop.f32.mrf.mxu1  ;;  %11953 = vmatmul.mubr.msk.bf16.gmra.mxu1 %vm420_vm1, %v17969_v3  ;;  %11922 = vmatprep.mubr.msk.bf16.mxu0 %vm420_vm1, %v6155_v62  ;;  %v17972_v37 = vld [vmem:[#allocation37_spill] sm:$0xff] }
 0x2f8   : > { %11956 = vmatprep.mubr.msk.bf16.mxu1 %vm420_vm1, %v17970_v63  ;;  %v4466_v47 = vpop.f32.mrf.mxu0  ;;  %v6137_v32 = vmul.f32 %v17972_v37, %v17971_v33  ;;  %v17976_v33 = vld [vmem:[#allocation102_spill] sm:$0xff]  ;;  %v6452_v37 = vpack.c.bf16 %v6436_v9, %v6435_v14 }
 0x2f9   : > { %v14955_v28 = vadd.f32 %v11750_v27, %v4535_v10  ;;  %v4533_v60 = vadd.f32 %v14821_v18, %v4466_v47  ;;  %v4760_v5 = vpop.f32.mrf.mxu1  ;;  %v17974_v10 = vld [vmem:[#allocation101_spill] sm:$0xff] }
 0x2fa   : > { %v11717_v46 = vpop.f32.mrf.mxu0  ;;  %v6156_v27 = vpack.c.bf16 %v17974_v10, %v6137_v32 }
 0x2fb   : > { %v14962_v54 = vadd.f32 %v4760_v5, %v4533_v60  ;;  %v4536_v62 = vadd.f32 %v11717_v46, %v14821_v18  ;;  %v11751_v3 = vpop.f32.mrf.mxu1  ;;  %v6451_v60 = vpack.c.bf16 %v6434_v59, %v6433_v34  ;;  %v6110_v59 = vld [vmem:[#allocation2 + $0x11f] sm:$0xff] }
 0x2fc   : > { %v14965_v63 = vpop.f32.mrf.mxu0 }
 0x2fd   : > { %17973 = vst [vmem:[#allocation104_spill] sm:$0xff] %v14965_v63  ;;  %v14968_v2 = vadd.f32 %v11751_v3, %v4536_v62  ;;  %v14970_v47 = vpop.f32.mrf.mxu1  ;;  %v6141_v62 = vmul.f32 %v17889_v16, %v6109_v58 }
 0x2fe   : > { %17975 = vst [vmem:[#allocation138_spill] sm:$0xff] %v14970_v47  ;;  %v11720_v6 = vpop.f32.mrf.mxu0  ;;  %11923 = vmatmul.mubr.msk.bf16.gmra.mxu0 %vm420_vm1, %v6156_v27 }
 0x2ff   : > { %v4539_v5 = vadd.f32 %v11720_v6, %v14821_v18  ;;  %v11754_v46 = vpop.f32.mrf.mxu1  ;;  %11957 = vmatmul.mubr.msk.bf16.gmra.mxu1 %vm420_vm1, %v17976_v33  ;;  %11926 = vmatprep.mubr.msk.bf16.mxu0 %vm420_vm1, %v6157_v23  ;;  %v6732_v6 = vmul.f32 %v17888_v7, %v14498_v57  ;;  %v6158_v58 = vpack.c.bf16 %v6110_v59, %v6141_v62  ;;  %v6704_v57 = vld [vmem:[#allocation2 + $0x51] sm:$0xff]  ;;  %v6703_v7 = vld [vmem:[#allocation2 + $0x49] sm:$0xff] }
 0x300   : > { %11960 = vmatprep.mubr.msk.bf16.mxu1 %vm420_vm1, %v6451_v60  ;;  %v4482_v32 = vpop.f32.mrf.mxu0 }
 0x301   : > { %v14980_v3 = vadd.f32 %v11754_v46, %v4539_v5  ;;  %v4537_v10 = vadd.f32 %v14821_v18, %v4482_v32  ;;  %v4776_v34 = vpop.f32.mrf.mxu1  ;;  %v6763_v46 = vpack.c.bf16 %v6732_v6, %v14515_v39  ;;  %v6702_v32 = vld [vmem:[#allocation2 + $0x41] sm:$0xff]  ;;  %v6736_v6 = vmul.f32 %v17894_v41, %v6704_v57  ;;  %v6708_v57 = vld [vmem:[#allocation2 + $0x71] sm:$0xff] }
 0x302   : > { %v11721_v27 = vpop.f32.mrf.mxu0  ;;  %v6734_v62 = vmul.f32 %v17893_v61, %v6702_v32 }
 0x303   : > { %v14985_v33 = vadd.f32 %v4776_v34, %v4537_v10  ;;  %v4540_v23 = vadd.f32 %v11721_v27, %v14821_v18  ;;  %v11755_v60 = vpop.f32.mrf.mxu1 }
 0x304   : > { %v14988_v47 = vpop.f32.mrf.mxu0 }
 0x305   : > { %v14990_v16 = vadd.f32 %v11755_v60, %v4540_v23  ;;  %v14992_v5 = vpop.f32.mrf.mxu1 }
 0x306   : > { %17977 = vst [vmem:[#allocation76_spill] sm:$0xff] %v14992_v5  ;;  %v11724_v63 = vpop.f32.mrf.mxu0  ;;  %11927 = vmatmul.mubr.msk.bf16.gmra.mxu0 %vm420_vm1, %v6158_v58  ;;  %v6701_v58 = vld [vmem:[#allocation2 + $0x39] sm:$0xff] }
 0x307   : > { %v4543_v10 = vadd.f32 %v11724_v63, %v14821_v18  ;;  %v11758_v34 = vpop.f32.mrf.mxu1  ;;  %11966 = vmatprep.mubr.msk.bf16.mxu0 %vm420_vm1, %v6763_v46  ;;  %11961 = vmatmul.mubr.msk.bf16.gmra.mxu1 %vm420_vm1, %v6452_v37  ;;  %v6764_v37 = vpack.c.bf16 %v6734_v62, %v6701_v58 }
 0x308   : > { %v4498_v14 = vpop.f32.mrf.mxu0 }
 0x309   : > { %v15000_v9 = vadd.f32 %v11758_v34, %v4543_v10  ;;  %v4541_v59 = vadd.f32 %v14821_v18, %v4498_v14  ;;  %v4792_v39 = vpop.f32.mrf.mxu1  ;;  %v6765_v10 = vpack.c.bf16 %v6736_v6, %v6703_v7  ;;  %v6706_v34 = vld [vmem:[#allocation2 + $0x61] sm:$0xff]  ;;  %v6740_v7 = vmul.f32 %v17896_v45, %v6708_v57 }
 0x30a   : > { %v11725_v27 = vpop.f32.mrf.mxu0 }
 0x30b   : > { %v15004_v23 = vadd.f32 %v4792_v39, %v4541_v59  ;;  %v4544_v63 = vadd.f32 %v11725_v27, %v14821_v18  ;;  %v11759_v60 = vpop.f32.mrf.mxu1  ;;  %v6738_v27 = vmul.f32 %v17895_v24, %v6706_v34 }
 0x30c   : > { %v15007_v46 = vpop.f32.mrf.mxu0 }
 0x30d   : > { %v15009_v5 = vadd.f32 %v11759_v60, %v4544_v63  ;;  %v15011_v32 = vpop.f32.mrf.mxu1 }
 0x30e   : > { %17978 = vst [vmem:[#allocation77_spill] sm:$0xff] %v15011_v32  ;;  %v11764_v14 = vpop.f32.mrf.mxu0  ;;  %11967 = vmatmul.mubr.msk.bf16.vlgmr.msra.gmra.mxu0 %vm420_vm1, %v6764_v37 }
 0x30f   : > { %v5135_v59 = vadd.f32 %v11764_v14, %v14834_v30  ;;  %v11798_v39 = vpop.f32.mrf.mxu1  ;;  %11970 = vmatprep.mubr.msk.bf16.mxu0 %vm420_vm1, %v6765_v10  ;;  %v6705_v30 = vld [vmem:[#allocation2 + $0x59] sm:$0xff]  ;;  %v6707_v10 = vld [vmem:[#allocation2 + $0x69] sm:$0xff] }
 0x310   : > { %v5006_v18 = vpop.f32.mrf.mxu0  ;;  %v6766_v61 = vpack.c.bf16 %v6738_v27, %v6705_v30 }
 0x311   : > { %v15017_v62 = vadd.f32 %v11798_v39, %v5135_v59  ;;  %v5133_v63 = vadd.f32 %v5006_v18, %v14841_v19  ;;  %v5332_v60 = vpop.f32.mrf.mxu1  ;;  %v6767_v19 = vpack.c.bf16 %v6740_v7, %v6707_v10  ;;  %v6710_v39 = vld [vmem:[#allocation2 + $0x81] sm:$0xff]  ;;  %v6712_v18 = vld [vmem:[#allocation2 + $0x91] sm:$0xff] }
 0x312   : > { %v11765_v6 = vpop.f32.mrf.mxu0  ;;  %v6744_v7 = vmul.f32 %v17898_v22, %v6712_v18 }
 0x313   : > { %v15021_v58 = vadd.f32 %v5332_v60, %v5133_v63  ;;  %v5136_v37 = vadd.f32 %v11765_v6, %v14845_v43  ;;  %v11799_v41 = vpop.f32.mrf.mxu1 }
 0x314   : > { %v5009_v14 = vpop.f32.mrf.mxu0 }
 0x315   : > { %v15024_v32 = vadd.f32 %v11799_v41, %v5136_v37  ;;  %v15027_v34 = vadd.f32 %v5009_v14, %v14850_v26  ;;  %v15029_v59 = vpop.f32.mrf.mxu1  ;;  %v6742_v41 = vmul.f32 %v17897_v52, %v6710_v39  ;;  %v10702_v52 = vld [vmem:[%s17247_s7 + $0x2] sm:$0x3] }
 0x316   : > { %v11768_v57 = vpop.f32.mrf.mxu0  ;;  %11971 = vmatmul.mubr.msk.bf16.gmra.mxu0 %vm420_vm1, %v6766_v61  ;;  %12361 = vmatprep.subr.msk.bf16.mxu0 %vm1108_vm0, %v10702_v52 }
 0x317   : > { %v5139_v43 = vadd.f32 %v11768_v57, %v14858_v13  ;;  %v11802_v63 = vpop.f32.mrf.mxu1  ;;  %11974 = vmatprep.mubr.msk.bf16.mxu0 %vm420_vm1, %v6767_v19  ;;  %v6709_v13 = vld [vmem:[#allocation2 + $0x79] sm:$0xff]  ;;  %v6711_v19 = vld [vmem:[#allocation2 + $0x89] sm:$0xff] }
 0x318   : > { %v5022_v27 = vpop.f32.mrf.mxu0  ;;  %v6768_v57 = vpack.c.bf16 %v6742_v41, %v6709_v13 }
 0x319   : > { %v15035_v60 = vadd.f32 %v11802_v63, %v5139_v43  ;;  %v5137_v26 = vadd.f32 %v5022_v27, %v14865_v40  ;;  %v5348_v6 = vpop.f32.mrf.mxu1  ;;  %v6769_v40 = vpack.c.bf16 %v6744_v7, %v6711_v19  ;;  %v6714_v63 = vld [vmem:[#allocation2 + $0xa1] sm:$0xff]  ;;  %v6716_v27 = vld [vmem:[#allocation2 + $0xb1] sm:$0xff] }
 0x31a   : > { %v11769_v37 = vpop.f32.mrf.mxu0  ;;  %v6748_v7 = vmul.f32 %v17900_v0, %v6716_v27  ;;  %v7176_v27 = vld [vmem:[%s17247_s7] sm:$0x3] }
 0x31b   : > { %v15039_v30 = vadd.f32 %v5348_v6, %v5137_v26  ;;  %v5140_v61 = vadd.f32 %v11769_v37, %v14869_v51  ;;  %v11803_v14 = vpop.f32.mrf.mxu1  ;;  %v6746_v6 = vmul.f32 %v17899_v56, %v6714_v63  ;;  %12360 = vmatprep.subr.msk.bf16.mxu1 %vm1108_vm0, %v7176_v27 }
 0x31c   : > { %v5025_v10 = vpop.f32.mrf.mxu0 }
 0x31d   : > { %v15042_v45 = vadd.f32 %v11803_v14, %v5140_v61  ;;  %v15045_v39 = vadd.f32 %v5025_v10, %v14874_v20  ;;  %v15047_v43 = vpop.f32.mrf.mxu1 }
 0x31e   : > { %v11772_v18 = vpop.f32.mrf.mxu0  ;;  %11975 = vmatmul.mubr.msk.bf16.gmra.mxu0 %vm420_vm1, %v6768_v57 }
 0x31f   : > { %v5143_v51 = vadd.f32 %v11772_v18, %v14882_v31  ;;  %v11806_v26 = vpop.f32.mrf.mxu1  ;;  %11978 = vmatprep.mubr.msk.bf16.mxu0 %vm420_vm1, %v6769_v40  ;;  %v6713_v31 = vld [vmem:[#allocation2 + $0x99] sm:$0xff]  ;;  %v6715_v40 = vld [vmem:[#allocation2 + $0xa9] sm:$0xff] }
 0x320   : > { %v5038_v41 = vpop.f32.mrf.mxu0  ;;  %v6770_v18 = vpack.c.bf16 %v6746_v6, %v6713_v31  ;;  %v7226_v6 = vsel %vm1108_vm0, %v7176_v27, 0  ;;  %v6717_v27 = vld [vmem:[#allocation2 + $0xb9] sm:$0xff] }
 0x321   : > { %v15053_v37 = vadd.f32 %v11806_v26, %v5143_v51  ;;  %v5141_v20 = vadd.f32 %v5038_v41, %v14889_v36  ;;  %v5364_v61 = vpop.f32.mrf.mxu1  ;;  %v6771_v36 = vpack.c.bf16 %v6748_v7, %v6715_v40  ;;  %v6718_v26 = vld [vmem:[#allocation2 + $0xc1] sm:$0xff]  ;;  %11999 = vmatpush3.bf16.msra.mxu1 %v7226_v6  ;;  %v6719_v6 = vld [vmem:[#allocation2 + $0xc9] sm:$0xff] }
 0x322   : > { %v11773_v14 = vpop.f32.mrf.mxu0  ;;  %v6750_v7 = vmul.f32 %v17901_v44, %v6718_v26 }
 0x323   : > { %v15057_v13 = vadd.f32 %v5364_v61, %v5141_v20  ;;  %v5144_v10 = vadd.f32 %v11773_v14, %v14893_v42  ;;  %v11807_v57 = vpop.f32.mrf.mxu1  ;;  %v6720_v42 = vld [vmem:[#allocation2 + $0xd1] sm:$0xff] }
 0x324   : > { %v5041_v19 = vpop.f32.mrf.mxu0  ;;  %v6752_v31 = vmul.f32 %v17902_v38, %v6720_v42 }
 0x325   : > { %v15060_v22 = vadd.f32 %v11807_v57, %v5144_v10  ;;  %v15063_v63 = vadd.f32 %v5041_v19, %v14898_v4  ;;  %v15065_v51 = vpop.f32.mrf.mxu1 }
 0x326   : > { %v11776_v41 = vpop.f32.mrf.mxu0  ;;  %11979 = vmatmul.mubr.msk.bf16.gmra.mxu0 %vm420_vm1, %v6770_v18 }
 0x327   : > { %v5147_v20 = vadd.f32 %v11776_v41, %v14906_v55  ;;  %v11810_v4 = vpop.f32.mrf.mxu1  ;;  %11982 = vmatprep.mubr.msk.bf16.mxu0 %vm420_vm1, %v6771_v36  ;;  %v6772_v36 = vpack.c.bf16 %v6750_v7, %v6717_v27 }
 0x328   : > { %v5054_v61 = vpop.f32.mrf.mxu0 }
 0x329   : > { %v15076_v14 = vadd.f32 %v11810_v4, %v5147_v20  ;;  %v5145_v10 = vadd.f32 %v5054_v61, %v14913_v50  ;;  %v5380_v57 = vpop.f32.mrf.mxu1  ;;  %v6773_v50 = vpack.c.bf16 %v6752_v31, %v6719_v6  ;;  %v6722_v4 = vld [vmem:[#allocation2 + $0xe1] sm:$0xff]  ;;  %v6724_v61 = vld [vmem:[#allocation2 + $0xf1] sm:$0xff] }
 0x32a   : > { %v11777_v19 = vpop.f32.mrf.mxu0  ;;  %v6756_v31 = vmul.f32 %v17904_v1, %v6724_v61 }
 0x32b   : > { %v15080_v18 = vadd.f32 %v5380_v57, %v5145_v10  ;;  %v5148_v40 = vadd.f32 %v11777_v19, %v14917_v48  ;;  %v11811_v55 = vpop.f32.mrf.mxu1  ;;  %v6754_v57 = vmul.f32 %v17903_v29, %v6722_v4 }
 0x32c   : > { %v5057_v41 = vpop.f32.mrf.mxu0 }
 0x32d   : > { %v15083_v0 = vadd.f32 %v11811_v55, %v5148_v40  ;;  %v15086_v26 = vadd.f32 %v5057_v41, %v14922_v17  ;;  %v15088_v20 = vpop.f32.mrf.mxu1 }
 0x32e   : > { %v11780_v42 = vpop.f32.mrf.mxu0  ;;  %11983 = vmatmul.mubr.msk.bf16.gmra.mxu0 %vm420_vm1, %v6772_v36 }
 0x32f   : > { %v5151_v48 = vadd.f32 %v11780_v42, %v14930_v25  ;;  %v11814_v10 = vpop.f32.mrf.mxu1  ;;  %11986 = vmatprep.mubr.msk.bf16.mxu0 %vm420_vm1, %v6773_v50  ;;  %v6721_v25 = vld [vmem:[#allocation2 + $0xd9] sm:$0xff]  ;;  %v6723_v42 = vld [vmem:[#allocation2 + $0xe9] sm:$0xff] }
 0x330   : > { %v5070_v7 = vpop.f32.mrf.mxu0  ;;  %v6774_v50 = vpack.c.bf16 %v6754_v57, %v6721_v25 }
 0x331   : > { %v15094_v19 = vadd.f32 %v11814_v10, %v5151_v48  ;;  %v5149_v17 = vadd.f32 %v5070_v7, %v14937_v11  ;;  %v5396_v40 = vpop.f32.mrf.mxu1  ;;  %v6775_v48 = vpack.c.bf16 %v6756_v31, %v6723_v42  ;;  %v6726_v11 = vld [vmem:[#allocation2 + $0x101] sm:$0xff]  ;;  %v6760_v31 = vmul.f32 %v17906_v8, %v14796_v49 }
 0x332   : > { %v11781_v55 = vpop.f32.mrf.mxu0  ;;  %v6730_v42 = vld [vmem:[#allocation2 + $0x121] sm:$0xff] }
 0x333   : > { %v15098_v27 = vadd.f32 %v5396_v40, %v5149_v17  ;;  %v5152_v41 = vadd.f32 %v11781_v55, %v14943_v35  ;;  %v11815_v36 = vpop.f32.mrf.mxu1  ;;  %v6758_v17 = vmul.f32 %v17905_v15, %v6726_v11  ;;  %v6762_v49 = vmul.f32 %v17907_v21, %v6730_v42 }
 0x334   : > { %v15101_v6 = vpop.f32.mrf.mxu0 }
 0x335   : > { %v15103_v38 = vadd.f32 %v11815_v36, %v5152_v41  ;;  %v15105_v4 = vpop.f32.mrf.mxu1 }
 0x336   : > { %v11784_v10 = vpop.f32.mrf.mxu0  ;;  %11987 = vmatmul.mubr.msk.bf16.gmra.mxu0 %vm420_vm1, %v6774_v50  ;;  %v6725_v50 = vld [vmem:[#allocation2 + $0xf9] sm:$0xff] }
 0x337   : > { %v5155_v61 = vadd.f32 %v11784_v10, %v14955_v28  ;;  %v11818_v7 = vpop.f32.mrf.mxu1  ;;  %11990 = vmatprep.mubr.msk.bf16.mxu0 %vm420_vm1, %v6775_v48  ;;  %v6776_v10 = vpack.c.bf16 %v6758_v17, %v6725_v50 }
 0x338   : > { %v5086_v35 = vpop.f32.mrf.mxu0 }
 0x339   : > { %v15111_v40 = vadd.f32 %v11818_v7, %v5155_v61  ;;  %v5153_v57 = vadd.f32 %v5086_v35, %v14962_v54  ;;  %v5412_v55 = vpop.f32.mrf.mxu1  ;;  %v6777_v54 = vpack.c.bf16 %v6760_v31, %v14805_v12 }
 0x33a   : > { %v11785_v41 = vpop.f32.mrf.mxu0 }
 0x33b   : > { %v15116_v36 = vadd.f32 %v5412_v55, %v5153_v57  ;;  %v5156_v25 = vadd.f32 %v11785_v41, %v14968_v2  ;;  %v11819_v28 = vpop.f32.mrf.mxu1  ;;  %v6729_v57 = vld [vmem:[#allocation2 + $0x119] sm:$0xff] }
 0x33c   : > { %v15119_v48 = vpop.f32.mrf.mxu0  ;;  %v6778_v50 = vpack.c.bf16 %v6762_v49, %v6729_v57 }
 0x33d   : > { %v15121_v11 = vadd.f32 %v11819_v28, %v5156_v25  ;;  %v15123_v61 = vpop.f32.mrf.mxu1 }
 0x33e   : > { %v11788_v7 = vpop.f32.mrf.mxu0  ;;  %11991 = vmatmul.mubr.msk.bf16.gmra.mxu0 %vm420_vm1, %v6776_v10 }
 0x33f   : > { %v5159_v35 = vadd.f32 %v11788_v7, %v14980_v3  ;;  %v11822_v2 = vpop.f32.mrf.mxu1  ;;  %11994 = vmatprep.mubr.msk.bf16.mxu0 %vm420_vm1, %v6777_v54 }
 0x340   : > { %v5102_v55 = vpop.f32.mrf.mxu0 }
 0x341   : > { %v15130_v41 = vadd.f32 %v11822_v2, %v5159_v35  ;;  %v5157_v17 = vadd.f32 %v5102_v55, %v14985_v33  ;;  %v5428_v25 = vpop.f32.mrf.mxu1 }
 0x342   : > { %v11789_v28 = vpop.f32.mrf.mxu0 }
 0x343   : > { %v15133_v12 = vadd.f32 %v5428_v25, %v5157_v17  ;;  %v5160_v31 = vadd.f32 %v11789_v28, %v14990_v16  ;;  %v11823_v10 = vpop.f32.mrf.mxu1 }
 0x344   : > { %v15136_v42 = vpop.f32.mrf.mxu0 }
 0x345   : > { %v15138_v3 = vadd.f32 %v11823_v10, %v5160_v31  ;;  %v15140_v7 = vpop.f32.mrf.mxu1 }
 0x346   : > { %v11792_v54 = vpop.f32.mrf.mxu0  ;;  %11995 = vmatmul.mubr.msk.bf16.gmra.mxu0 %vm420_vm1, %v6778_v50 }
 0x347   : > { %v5163_v35 = vadd.f32 %v11792_v54, %v15000_v9  ;;  %v11826_v33 = vpop.f32.mrf.mxu1 }
 0x348   : > { %v5118_v2 = vpop.f32.mrf.mxu0 }
 0x349   : > { %v15144_v55 = vadd.f32 %v11826_v33, %v5163_v35  ;;  %v5161_v49 = vadd.f32 %v5118_v2, %v15004_v23  ;;  %v5444_v57 = vpop.f32.mrf.mxu1 }
 0x34a   : > { %v11793_v16 = vpop.f32.mrf.mxu0 }
 0x34b   : > { %v15147_v17 = vadd.f32 %v5444_v57, %v5161_v49  ;;  %v5164_v25 = vadd.f32 %v11793_v16, %v15009_v5  ;;  %v11827_v28 = vpop.f32.mrf.mxu1 }
 0x34c   : > { %v15150_v31 = vpop.f32.mrf.mxu0 }
 0x34d   : > { %v15152_v10 = vadd.f32 %v11827_v28, %v5164_v25  ;;  %v15154_v50 = vpop.f32.mrf.mxu1 }
 0x34e   : > { %v11832_v9 = vpop.f32.mrf.mxu0 }
 0x34f   : > { %v15157_v54 = vadd.f32 %v11832_v9, %v15017_v62  ;;  %v15159_v35 = vpop.f32.mrf.mxu1 }
 0x350   : > { %v5594_v23 = vpop.f32.mrf.mxu0 }
 0x351   : > { %v15162_v33 = vadd.f32 %v5594_v23, %v15021_v58  ;;  %v15164_v2 = vpop.f32.mrf.mxu1 }
 0x352   : > { %v11833_v5 = vpop.f32.mrf.mxu0 }
 0x353   : > { %v15167_v49 = vadd.f32 %v11833_v5, %v15024_v32  ;;  %v15169_v57 = vpop.f32.mrf.mxu1 }
 0x354   : > { %v15171_v16 = vpop.f32.mrf.mxu0 }
 0x355   : > { %v15173_v25 = vpop.f32.mrf.mxu1 }
 0x356   : > { %v11836_v62 = vpop.f32.mrf.mxu0 }
 0x357   : > { %v15176_v28 = vadd.f32 %v11836_v62, %v15035_v60  ;;  %v15178_v9 = vpop.f32.mrf.mxu1 }
 0x358   : > { %v5610_v58 = vpop.f32.mrf.mxu0 }
 0x359   : > { %v15181_v23 = vadd.f32 %v5610_v58, %v15039_v30  ;;  %v15183_v21 = vpop.f32.mrf.mxu1 }
 0x35a   : > { %v11837_v32 = vpop.f32.mrf.mxu0 }
 0x35b   : > { %v15186_v5 = vadd.f32 %v11837_v32, %v15042_v45  ;;  %v15188_v1 = vpop.f32.mrf.mxu1 }
 0x35c   : > { %v15190_v8 = vpop.f32.mrf.mxu0 }
 0x35d   : > { %v15192_v15 = vpop.f32.mrf.mxu1 }
 0x35e   : > { %v11840_v60 = vpop.f32.mrf.mxu0 }
 0x35f   : > { %v15195_v62 = vadd.f32 %v11840_v60, %v15053_v37  ;;  %v15197_v29 = vpop.f32.mrf.mxu1 }
 0x360   : > { %17979 = vst [vmem:[#allocation105_spill] sm:$0xff] %v15197_v29  ;;  %v5626_v30 = vpop.f32.mrf.mxu0  ;;  %v7422_v29 = vld [vmem:[#allocation2 + $0x10] sm:$0xff] }
 0x361   : > { %v15200_v58 = vadd.f32 %v5626_v30, %v15057_v13  ;;  %v15202_v44 = vpop.f32.mrf.mxu1  ;;  %v7520_v13 = vsel %vm1108_vm0, %v10702_v52, 0 }
 0x362   : > { %17981 = vst [vmem:[#allocation139_spill] sm:$0xff] %v15202_v44  ;;  %v11841_v45 = vpop.f32.mrf.mxu0  ;;  %12033 = vmatpush3.bf16.msra.mxu0 %v7520_v13 }
 0x363   : > { %17980 = vst [vmem:[#allocation106_spill] sm:$0xff] %v15200_v58  ;;  %v15205_v32 = vadd.f32 %v11841_v45, %v15060_v22  ;;  %v15207_v56 = vpop.f32.mrf.mxu1  ;;  %v7096_v45 = vld [vmem:[#allocation2 + $0x7] sm:$0xff] }
 0x364   : > { %17983 = vst [vmem:[#allocation108_spill] sm:$0xff] %v15207_v56  ;;  %v15212_v37 = vpop.f32.mrf.mxu0  ;;  %v7097_v56 = vld [vmem:[#allocation2 + $0xf] sm:$0xff]  ;;  %v7128_v58 = vmul.f32 %v17920_v53, %v7096_v45 }
 0x365   : > { %17982 = vst [vmem:[#allocation107_spill] sm:$0xff] %v15205_v32  ;;  %v15215_v60 = vpop.f32.mrf.mxu1  ;;  %v7421_v32 = vld [vmem:[#allocation2 + $0x8] sm:$0xff] }
 0x366   : > { %17984 = vst [vmem:[#allocation111_spill] sm:$0xff] %v15215_v60  ;;  %v11844_v30 = vpop.f32.mrf.mxu0  ;;  %v15227_v60 = vld [vmem:[%s17247_s7 + $0x4] sm:$0x3] }
 0x367   : > { %v15219_v24 = vadd.f32 %v11844_v30, %v15076_v14  ;;  %v15221_v22 = vpop.f32.mrf.mxu1  ;;  %17987 = vst [vmem:[#allocation110_spill] sm:$0xff] %v15227_v60  ;;  %v7453_v14 = vpack.c.bf16 %v7422_v29, %v7421_v32  ;;  %12362 = vmatprep.subr.msk.bf16.mxu1 %vm1108_vm0, %v15227_v60 }
 0x368   : > { %17986 = vst [vmem:[#allocation109_spill] sm:$0xff] %v15221_v22  ;;  %v5642_v44 = vpop.f32.mrf.mxu0  ;;  %v7160_v22 = vpack.c.bf16 %v7097_v56, %v7128_v58 }
 0x369   : > { %17985 = vst [vmem:[#allocation140_spill] sm:$0xff] %v15219_v24  ;;  %v15230_v52 = vadd.f32 %v5642_v44, %v15080_v18  ;;  %v15232_v13 = vpop.f32.mrf.mxu1  ;;  %12034 = vmatprep.mubr.msk.bf16.mxu0 %vm420_vm1, %v7453_v14 }
 0x36a   : > { %17989 = vst [vmem:[#allocation112_spill] sm:$0xff] %v15232_v13  ;;  %v11845_v30 = vpop.f32.mrf.mxu0  ;;  %12000 = vmatprep.mubr.msk.bf16.mxu1 %vm420_vm1, %v7160_v22 }
 0x36b   : > { %17988 = vst [vmem:[#allocation142_spill] sm:$0xff] %v15230_v52  ;;  %v15237_v24 = vadd.f32 %v11845_v30, %v15083_v0  ;;  %v15239_v45 = vpop.f32.mrf.mxu1 }
 0x36c   : > { %17991 = vst [vmem:[#allocation78_spill] sm:$0xff] %v15239_v45  ;;  %v15242_v53 = vpop.f32.mrf.mxu0 }
 0x36d   : > { %17990 = vst [vmem:[#allocation143_spill] sm:$0xff] %v15237_v24  ;;  %v15245_v44 = vpop.f32.mrf.mxu1 }
 0x36e   : > { %17992 = vst [vmem:[#allocation113_spill] sm:$0xff] %v15245_v44  ;;  %v11848_v18 = vpop.f32.mrf.mxu0 }
 0x36f   : > { %v15248_v29 = vadd.f32 %v11848_v18, %v15094_v19  ;;  %v15250_v32 = vpop.f32.mrf.mxu1 }
 0x370   : > { %17994 = vst [vmem:[#allocation145_spill] sm:$0xff] %v15250_v32  ;;  %v5658_v56 = vpop.f32.mrf.mxu0 }
 0x371   : > { %17993 = vst [vmem:[#allocation114_spill] sm:$0xff] %v15248_v29  ;;  %v15253_v0 = vadd.f32 %v5658_v56, %v15098_v27  ;;  %v15255_v58 = vpop.f32.mrf.mxu1 }
 0x372   : > { %17996 = vst [vmem:[#allocation116_spill] sm:$0xff] %v15255_v58  ;;  %v11849_v30 = vpop.f32.mrf.mxu0 }
 0x373   : > { %17995 = vst [vmem:[#allocation115_spill] sm:$0xff] %v15253_v0  ;;  %v15258_v14 = vadd.f32 %v11849_v30, %v15103_v38  ;;  %v15260_v45 = vpop.f32.mrf.mxu1 }
 0x374   : > { %17998 = vst [vmem:[#allocation146_spill] sm:$0xff] %v15260_v45  ;;  %v15262_v22 = vpop.f32.mrf.mxu0 }
 0x375   : > { %17997 = vst [vmem:[#allocation119_spill] sm:$0xff] %v15258_v14  ;;  %17999 = vst [vmem:[#allocation117_spill] sm:$0xff] %v15262_v22  ;;  %v15264_v44 = vpop.f32.mrf.mxu1  ;;  %v18061_v22 = vld [vmem:[#allocation71_spill] sm:$0xff] }
 0x376   : > { %18000 = vst [vmem:[#allocation118_spill] sm:$0xff] %v15264_v44  ;;  %v11852_v19 = vpop.f32.mrf.mxu0 }
 0x377   : > { %v15267_v18 = vadd.f32 %v11852_v19, %v15111_v40  ;;  %v15269_v32 = vpop.f32.mrf.mxu1 }
 0x378   : > { %18002 = vst [vmem:[#allocation120_spill] sm:$0xff] %v15269_v32  ;;  %v5674_v27 = vpop.f32.mrf.mxu0 }
 0x379   : > { %18001 = vst [vmem:[#allocation147_spill] sm:$0xff] %v15267_v18  ;;  %v15272_v56 = vadd.f32 %v5674_v27, %v15116_v36  ;;  %v15274_v58 = vpop.f32.mrf.mxu1 }
 0x37a   : > { %18004 = vst [vmem:[#allocation67_spill] sm:$0xff] %v15274_v58  ;;  %v11853_v38 = vpop.f32.mrf.mxu0 }
 0x37b   : > { %18003 = vst [vmem:[#allocation68_spill] sm:$0xff] %v15272_v56  ;;  %v15277_v30 = vadd.f32 %v11853_v38, %v15121_v11  ;;  %v15279_v45 = vpop.f32.mrf.mxu1 }
 0x37c   : > { %18006 = vst [vmem:[#allocation72_spill] sm:$0xff] %v15279_v45  ;;  %v15281_v14 = vpop.f32.mrf.mxu0 }
 0x37d   : > { %18005 = vst [vmem:[#allocation127_spill] sm:$0xff] %v15277_v30  ;;  %18007 = vst [vmem:[#allocation87_spill] sm:$0xff] %v15281_v14  ;;  %v15283_v44 = vpop.f32.mrf.mxu1 }
 0x37e   : > { %18008 = vst [vmem:[#allocation84_spill] sm:$0xff] %v15283_v44  ;;  %v11856_v40 = vpop.f32.mrf.mxu0 }
 0x37f   : > { %v15286_v19 = vadd.f32 %v11856_v40, %v15130_v41  ;;  %v15288_v32 = vpop.f32.mrf.mxu1 }
 0x380   : > { %18010 = vst [vmem:[#allocation125_spill] sm:$0xff] %v15288_v32  ;;  %v5690_v36 = vpop.f32.mrf.mxu0 }
 0x381   : > { %18009 = vst [vmem:[#allocation88_spill] sm:$0xff] %v15286_v19  ;;  %v15291_v27 = vadd.f32 %v5690_v36, %v15133_v12  ;;  %v15293_v58 = vpop.f32.mrf.mxu1 }
 0x382   : > { %18012 = vst [vmem:[#allocation141_spill] sm:$0xff] %v15293_v58  ;;  %v11857_v11 = vpop.f32.mrf.mxu0 }
 0x383   : > { %18011 = vst [vmem:[#allocation92_spill] sm:$0xff] %v15291_v27  ;;  %v15296_v38 = vadd.f32 %v11857_v11, %v15138_v3  ;;  %v15298_v45 = vpop.f32.mrf.mxu1 }
 0x384   : > { %18014 = vst [vmem:[#allocation99_spill] sm:$0xff] %v15298_v45  ;;  %v15300_v30 = vpop.f32.mrf.mxu0 }
 0x385   : > { %18013 = vst [vmem:[#allocation94_spill] sm:$0xff] %v15296_v38  ;;  %18015 = vst [vmem:[#allocation97_spill] sm:$0xff] %v15300_v30  ;;  %v15302_v44 = vpop.f32.mrf.mxu1 }
 0x386   : > { %18016 = vst [vmem:[#allocation69_spill] sm:$0xff] %v15302_v44  ;;  %v11860_v41 = vpop.f32.mrf.mxu0 }
 0x387   : > { %v15305_v40 = vadd.f32 %v11860_v41, %v15144_v55  ;;  %v15307_v32 = vpop.f32.mrf.mxu1 }
 0x388   : > { %18018 = vst [vmem:[#allocation79_spill] sm:$0xff] %v15307_v32  ;;  %v5706_v12 = vpop.f32.mrf.mxu0 }
 0x389   : > { %18017 = vst [vmem:[#allocation122_spill] sm:$0xff] %v15305_v40  ;;  %v15310_v36 = vadd.f32 %v5706_v12, %v15147_v17  ;;  %v15312_v58 = vpop.f32.mrf.mxu1 }
 0x38a   : > { %18020 = vst [vmem:[#allocation82_spill] sm:$0xff] %v15312_v58  ;;  %v11861_v3 = vpop.f32.mrf.mxu0 }
 0x38b   : > { %18019 = vst [vmem:[#allocation81_spill] sm:$0xff] %v15310_v36  ;;  %v15315_v11 = vadd.f32 %v11861_v3, %v15152_v10  ;;  %v15317_v45 = vpop.f32.mrf.mxu1 }
 0x38c   : > { %18022 = vst [vmem:[#allocation123_spill] sm:$0xff] %v15317_v45  ;;  %v15319_v38 = vpop.f32.mrf.mxu0 }
 0x38d   : > { %18021 = vst [vmem:[#allocation80_spill] sm:$0xff] %v15315_v11  ;;  %18023 = vst [vmem:[#allocation83_spill] sm:$0xff] %v15319_v38  ;;  %v15321_v44 = vpop.f32.mrf.mxu1  ;;  %v15346_v38 = vld [vmem:[%s17247_s7 + $0x6] sm:$0x3] }
 0x38e   : > { %18024 = vst [vmem:[#allocation130_spill] sm:$0xff] %v15321_v44  ;;  %v11900_v55 = vpop.f32.mrf.mxu0  ;;  %18026 = vst [vmem:[#allocation85_spill] sm:$0xff] %v15346_v38  ;;  %12363 = vmatprep.subr.msk.bf16.mxu0 %vm1108_vm0, %v15346_v38 }
 0x38f   : > { %v15323_v41 = vpop.f32.mrf.mxu1 }
 0x390   : > { %v6246_v32 = vpop.f32.mrf.mxu0 }
 0x391   : > { %v15325_v40 = vpop.f32.mrf.mxu1 }
 0x392   : > { %v15327_v17 = vpop.f32.mrf.mxu0 }
 0x393   : > { %v15331_v58 = vpop.f32.mrf.mxu1 }
 0x394   : > { %v15329_v12 = vpop.f32.mrf.mxu0 }
 0x395   : > { %v15337_v45 = vpop.f32.mrf.mxu1 }
 0x396   : > { %v15333_v10 = vpop.f32.mrf.mxu0 }
 0x397   : > { %v15348_v36 = vpop.f32.mrf.mxu1 }
 0x398   : > { %v15335_v3 = vpop.f32.mrf.mxu0 }
 0x399   : > { %v15356_v19 = vpop.f32.mrf.mxu1 }
 0x39a   : > { %v15339_v11 = vpop.f32.mrf.mxu0  ;;  %18029 = vst [vmem:[#allocation124_spill] sm:$0xff] %v15356_v19 }
 0x39b   : > { %v15362_v14 = vpop.f32.mrf.mxu1 }
 0x39c   : > { %v15341_v44 = vpop.f32.mrf.mxu0  ;;  %18032 = vst [vmem:[#allocation126_spill] sm:$0xff] %v15362_v14 }
 0x39d   : > { %18025 = vst [vmem:[#allocation133_spill] sm:$0xff] %v15341_v44  ;;  %v15368_v24 = vpop.f32.mrf.mxu1 }
 0x39e   : > { %v15350_v30 = vpop.f32.mrf.mxu0  ;;  %18035 = vst [vmem:[#allocation90_spill] sm:$0xff] %v15368_v24 }
 0x39f   : > { %18027 = vst [vmem:[#allocation86_spill] sm:$0xff] %v15350_v30  ;;  %v15374_v38 = vpop.f32.mrf.mxu1 }
 0x3a0   : > { %v15354_v27 = vpop.f32.mrf.mxu0  ;;  %18038 = vst [vmem:[#allocation95_spill] sm:$0xff] %v15374_v38 }
 0x3a1   : > { %18028 = vst [vmem:[#allocation136_spill] sm:$0xff] %v15354_v27 }
 0x3a2   : > { %v15358_v56 = vpop.f32.mrf.mxu0 }
 0x3a3   : > { %18030 = vst [vmem:[#allocation121_spill] sm:$0xff] %v15358_v56  ;;  %v15380_v56 = vpop.f32.mrf.mxu1 }
 0x3a4   : > { %v15360_v18 = vpop.f32.mrf.mxu0  ;;  %18041 = vst [vmem:[#allocation93_spill] sm:$0xff] %v15380_v56 }
 0x3a5   : > { %18031 = vst [vmem:[#allocation89_spill] sm:$0xff] %v15360_v18 }
 0x3a6   : > { %v15364_v0 = vpop.f32.mrf.mxu0 }
 0x3a7   : > { %18033 = vst [vmem:[#allocation73_spill] sm:$0xff] %v15364_v0  ;;  %v15386_v0 = vpop.f32.mrf.mxu1 }
 0x3a8   : > { %v15366_v29 = vpop.f32.mrf.mxu0  ;;  %18044 = vst [vmem:[#allocation96_spill] sm:$0xff] %v15386_v0 }
 0x3a9   : > { %18034 = vst [vmem:[#allocation91_spill] sm:$0xff] %v15366_v29 }
 0x3aa   : > { %v15370_v13 = vpop.f32.mrf.mxu0 }
 0x3ab   : > { %18036 = vst [vmem:[#allocation128_spill] sm:$0xff] %v15370_v13  ;;  %v15392_v13 = vpop.f32.mrf.mxu1 }
 0x3ac   : > { %v15372_v52 = vpop.f32.mrf.mxu0  ;;  %18047 = vst [vmem:[#allocation75_spill] sm:$0xff] %v15392_v13 }
 0x3ad   : > { %18037 = vst [vmem:[#allocation129_spill] sm:$0xff] %v15372_v52 }
 0x3ae   : > { %v15376_v27 = vpop.f32.mrf.mxu0 }
 0x3af   : > { %18039 = vst [vmem:[#allocation144_spill] sm:$0xff] %v15376_v27  ;;  %v15398_v27 = vpop.f32.mrf.mxu1 }
 0x3b0   : > { %v15378_v30 = vpop.f32.mrf.mxu0  ;;  %18050 = vst [vmem:[#allocation103_spill] sm:$0xff] %v15398_v27 }
 0x3b1   : > { %18040 = vst [vmem:[#allocation70_spill] sm:$0xff] %v15378_v30 }
 0x3b2   : > { %v15382_v18 = vpop.f32.mrf.mxu0 }
 0x3b3   : > { %18042 = vst [vmem:[#allocation131_spill] sm:$0xff] %v15382_v18  ;;  %v15404_v18 = vpop.f32.mrf.mxu1 }
 0x3b4   : > { %v15384_v60 = vpop.f32.mrf.mxu0  ;;  %18053 = vst [vmem:[#allocation102_spill] sm:$0xff] %v15404_v18  ;;  %v18059_v18 = vld [vmem:[#allocation104_spill] sm:$0xff] }
 0x3b5   : > { %18043 = vst [vmem:[#allocation74_spill] sm:$0xff] %v15384_v60  ;;  %v15414_v13 = vpop.f32.mrf.mxu1 }
 0x3b6   : > { %v15388_v29 = vpop.f32.mrf.mxu0 }
 0x3b7   : > { %18045 = vst [vmem:[#allocation132_spill] sm:$0xff] %v15388_v29  ;;  %v18056_v29 = vld [vmem:[#allocation137_spill] sm:$0xff] }
 0x3b8   : > { %v15390_v24 = vpop.f32.mrf.mxu0  ;;  %18057 = vst [vmem:[#allocation137_spill] sm:$0xff] %v15414_v13 }
 0x3b9   : > { %18046 = vst [vmem:[#allocation134_spill] sm:$0xff] %v15390_v24  ;;  %v12382_v24 = vld [vmem:[%s17246_s6] ss:$0 sm:$0xff] }
 0x3ba   : > { %v15394_v52 = vpop.f32.mrf.mxu0  ;;  %v4542_v27 = vadd.f32 %v12382_v24, %v15007_v46  ;;  %v18063_v46 = vld [vmem:[#allocation76_spill] sm:$0xff] }
 0x3bb   : > { %18048 = vst [vmem:[#allocation98_spill] sm:$0xff] %v15394_v52  ;;  %v4530_v52 = vadd.f32 %v12382_v24, %v18056_v29  ;;  %v6047_v29 = vadd.f32 %v15164_v2, %v15162_v33 }
 0x3bc   : > { %v15396_v38 = vpop.f32.mrf.mxu0 }
 0x3bd   : > { %18049 = vst [vmem:[#allocation100_spill] sm:$0xff] %v15396_v38  ;;  %v4824_v44 = vadd.f32 %v18061_v22, %v4530_v52 }
 0x3be   : > { %v15400_v30 = vpop.f32.mrf.mxu0 }
 0x3bf   : > { %18051 = vst [vmem:[#allocation135_spill] sm:$0xff] %v15400_v30  ;;  %v5460_v30 = vadd.f32 %v15029_v59, %v15027_v34  ;;  %v15431_v34 = vpop.f32.mrf.mxu1  ;;  %v5150_v33 = vadd.f32 %v15101_v6, %v4824_v44 }
 0x3c0   : > { %v15402_v56 = vpop.f32.mrf.mxu0 }
 0x3c1   : > { %18052 = vst [vmem:[#allocation101_spill] sm:$0xff] %v15402_v56  ;;  %v6049_v56 = vadd.f32 %v15159_v35, %v15157_v54  ;;  %v5722_v13 = vadd.f32 %v15171_v16, %v5460_v30  ;;  %v6050_v54 = vadd.f32 %v15169_v57, %v15167_v49  ;;  %v18062_v35 = vld [vmem:[#allocation138_spill] sm:$0xff]  ;;  %v5464_v16 = vadd.f32 %v15047_v43, %v15045_v39  ;;  %v15454_v44 = vpop.f32.mrf.mxu1 }
 0x3c2   : > { %v15406_v60 = vpop.f32.mrf.mxu0  ;;  %v5468_v57 = vadd.f32 %v15065_v51, %v15063_v63  ;;  %v6053_v39 = vadd.f32 %v15178_v9, %v15176_v28  ;;  %v5476_v63 = vadd.f32 %v15105_v4, %v5150_v33  ;;  %v6054_v30 = vadd.f32 %v15188_v1, %v15186_v5  ;;  %v18065_v5 = vld [vmem:[#allocation105_spill] sm:$0xff] }
 0x3c3   : > { %18054 = vst [vmem:[#allocation148_spill] sm:$0xff] %v15406_v60  ;;  %v4534_v60 = vadd.f32 %v12382_v24, %v18059_v18  ;;  %v6048_v52 = vadd.f32 %v15173_v25, %v5722_v13  ;;  %v6376_v49 = vadd.f32 %v15327_v17, %v6050_v54 }
 0x3c4   : > { %v15408_v0 = vpop.f32.mrf.mxu0  ;;  %v5730_v4 = vadd.f32 %v15212_v37, %v5468_v57  ;;  %v6057_v37 = vadd.f32 %v18065_v5, %v15195_v62  ;;  %v18071_v62 = vld [vmem:[#allocation124_spill] sm:$0xff] }
 0x3c5   : > { %18055 = vst [vmem:[#allocation149_spill] sm:$0xff] %v15408_v0  ;;  %v4538_v0 = vadd.f32 %v12382_v24, %v14988_v47  ;;  %v6373_v47 = vadd.f32 %v6246_v32, %v6047_v29  ;;  %v4828_v24 = vadd.f32 %v18062_v35, %v4534_v60  ;;  %v5472_v60 = vadd.f32 %v15088_v20, %v15086_v26  ;;  %v18070_v29 = vld [vmem:[#allocation111_spill] sm:$0xff] }
 0x3c6   : > { %v15416_v38 = vpop.f32.mrf.mxu0  ;;  %v6374_v25 = vadd.f32 %v15329_v12, %v6048_v52  ;;  %v6051_v26 = vadd.f32 %v15183_v21, %v15181_v23  ;;  %v5726_v20 = vadd.f32 %v15190_v8, %v5464_v16  ;;  %v18074_v16 = vld [vmem:[#allocation140_spill] sm:$0xff]  ;;  %v18075_v52 = vld [vmem:[#allocation109_spill] sm:$0xff] }
 0x3c7   : > { %18058 = vst [vmem:[#allocation150_spill] sm:$0xff] %v15416_v38  ;;  %v6375_v38 = vadd.f32 %v11900_v55, %v6049_v56  ;;  %v4832_v18 = vadd.f32 %v18063_v46, %v4538_v0  ;;  %v5154_v32 = vadd.f32 %v15119_v48, %v4828_v24  ;;  %v6667_v43 = vadd.f32 %v15325_v40, %v6373_v47  ;;  %v18066_v55 = vld [vmem:[#allocation106_spill] sm:$0xff]  ;;  %v18072_v24 = vld [vmem:[#allocation133_spill] sm:$0xff] }
 0x3c8   : > { %v15425_v14 = vpop.f32.mrf.mxu0  ;;  %v6668_v23 = vadd.f32 %v15337_v45, %v6374_v25  ;;  %v6052_v1 = vadd.f32 %v15192_v15, %v5726_v20  ;;  %v6056_v15 = vadd.f32 %v18070_v29, %v5730_v4  ;;  %v5734_v54 = vadd.f32 %v15242_v53, %v5472_v60  ;;  %v18082_v20 = vld [vmem:[#allocation112_spill] sm:$0xff] }
 0x3c9   : > { %18060 = vst [vmem:[#allocation104_spill] sm:$0xff] %v15425_v14  ;;  %v18064_v14 = vld [vmem:[#allocation77_spill] sm:$0xff]  ;;  %v6669_v22 = vadd.f32 %v15323_v41, %v6375_v38  ;;  %v5158_v6 = vadd.f32 %v15136_v42, %v4832_v18  ;;  %v6670_v42 = vadd.f32 %v15331_v58, %v6376_v49  ;;  %v5480_v56 = vadd.f32 %v15123_v61, %v5154_v32  ;;  %v18077_v32 = vld [vmem:[#allocation126_spill] sm:$0xff] }
 0x3ca   : > { %v15433_v59 = vpop.f32.mrf.mxu0  ;;  %v4836_v19 = vadd.f32 %v18064_v14, %v4542_v27  ;;  %v6379_v14 = vadd.f32 %v15333_v10, %v6053_v39  ;;  %v6380_v38 = vadd.f32 %v15339_v11, %v6054_v30  ;;  %v18068_v10 = vld [vmem:[#allocation107_spill] sm:$0xff]  ;;  %v6378_v46 = vadd.f32 %v18072_v24, %v6052_v1  ;;  %v18076_v49 = vld [vmem:[#allocation117_spill] sm:$0xff]  ;;  %v18079_v39 = vld [vmem:[#allocation86_spill] sm:$0xff] }
 0x3cb   : > { %v15475_v8 = vadd.f32 %v15140_v7, %v5158_v6  ;;  %v18067_v7 = vld [vmem:[#allocation139_spill] sm:$0xff]  ;;  %v5738_v57 = vadd.f32 %v18076_v49, %v5476_v63  ;;  %v18078_v6 = vld [vmem:[#allocation110_spill] sm:$0xff]  ;;  %v18086_v30 = vld [vmem:[#allocation136_spill] sm:$0xff] }
 0x3cc   : > { %v15441_v2 = vpop.f32.mrf.mxu0  ;;  %v5162_v51 = vadd.f32 %v15150_v31, %v4836_v19  ;;  %v6377_v31 = vadd.f32 %v15335_v3, %v6051_v26  ;;  %v15472_v19 = vpop.f32.mrf.mxu1  ;;  %v6055_v41 = vadd.f32 %v18067_v7, %v18066_v55  ;;  %v6673_v45 = vadd.f32 %v15348_v36, %v6379_v14  ;;  %v18081_v26 = vld [vmem:[#allocation142_spill] sm:$0xff]  ;;  %v18091_v55 = vld [vmem:[#allocation116_spill] sm:$0xff]  ;;  %v18097_v24 = vld [vmem:[#allocation95_spill] sm:$0xff] }
 0x3cd   : > { %v6674_v53 = vadd.f32 %v18077_v32, %v6380_v38  ;;  %v18084_v63 = vld [vmem:[#allocation78_spill] sm:$0xff]  ;;  %v18100_v32 = vld [vmem:[#allocation68_spill] sm:$0xff] }
 0x3ce   : > { %v11968_v0 = vpop.f32.mrf.mxu0  ;;  %v15480_v61 = vadd.f32 %v15154_v50, %v5162_v51  ;;  %v18069_v50 = vld [vmem:[#allocation108_spill] sm:$0xff]  ;;  %v6671_v47 = vadd.f32 %v18071_v62, %v6377_v31  ;;  %v15495_v11 = vpop.f32.mrf.mxu1  ;;  %v6381_v4 = vadd.f32 %v18086_v30, %v6055_v41  ;;  %v18089_v1 = vld [vmem:[#allocation90_spill] sm:$0xff]  ;;  %v18106_v30 = vld [vmem:[#allocation127_spill] sm:$0xff] }
 0x3cf   : > { %v6995_v13 = vadd.f32 %v11968_v0, %v6669_v22  ;;  %v6058_v3 = vadd.f32 %v18069_v50, %v18068_v10  ;;  %v6061_v22 = vadd.f32 %v18075_v52, %v18074_v16  ;;  %v15507_v0 = vsel %vm1108_vm0, %v18078_v6, 0  ;;  %v18095_v50 = vld [vmem:[#allocation121_spill] sm:$0xff]  ;;  %v18098_v16 = vld [vmem:[#allocation147_spill] sm:$0xff]  ;;  %v18099_v52 = vld [vmem:[#allocation120_spill] sm:$0xff] }
 0x3d0   : > { %v6866_v48 = vpop.f32.mrf.mxu0  ;;  %v15521_v31 = vpop.f32.mrf.mxu1  ;;  %v6672_v5 = vadd.f32 %v18089_v1, %v6378_v46  ;;  %v15548_v49 = vadd.f32 %v18099_v52, %v18098_v16  ;;  %v18103_v6 = vld [vmem:[#allocation89_spill] sm:$0xff] }
 0x3d1   : > { %v7027_v28 = vmax.f32 %v6995_v13, 0.0  ;;  %v6993_v9 = vadd.f32 %v6866_v48, %v6667_v43  ;;  %v6383_v43 = vadd.f32 %v18079_v39, %v6057_v37  ;;  %v6059_v48 = vadd.f32 %v18082_v20, %v18081_v26  ;;  %v18114_v52 = vld [vmem:[#allocation85_spill] sm:$0xff] }
 0x3d2   : > { %v11969_v21 = vpop.f32.mrf.mxu0  ;;  %v6384_v29 = vadd.f32 %v18095_v50, %v6058_v3  ;;  %v18102_v3 = vld [vmem:[#allocation93_spill] sm:$0xff]  ;;  %v6382_v39 = vadd.f32 %v18103_v6, %v6056_v15  ;;  %v18109_v15 = vld [vmem:[#allocation96_spill] sm:$0xff] }
 0x3d3   : > { %7059 = vst.msk [vmem:[#allocation2 + $0x28] sm:$0xff] %vm420_vm1, %v7027_v28  ;;  %v7025_v58 = vmax.f32 %v6993_v9, 0.0  ;;  %v6996_v27 = vadd.f32 %v11969_v21, %v6670_v42  ;;  %v18083_v42 = vld [vmem:[#allocation143_spill] sm:$0xff]  ;;  %v6677_v46 = vadd.f32 %v18097_v24, %v6383_v43 }
 0x3d4   : > { %v6869_v40 = vpop.f32.mrf.mxu0  ;;  %v6062_v14 = vadd.f32 %v18084_v63, %v18083_v42  ;;  %v18105_v42 = vld [vmem:[#allocation21_spill] sm:$0xff]  ;;  %v6678_v1 = vadd.f32 %v18109_v15, %v6384_v29  ;;  %v18120_v15 = vld [vmem:[#allocation88_spill] sm:$0xff] }
 0x3d5   : > { %7057 = vst.msk [vmem:[#allocation2 + $0x18] sm:$0xff] %vm420_vm1, %v7025_v58  ;;  %v7028_v17 = vmax.f32 %v6996_v27, 0.0  ;;  %v6994_v12 = vadd.f32 %v6869_v40, %v6668_v23  ;;  %v18087_v23 = vld [vmem:[#allocation114_spill] sm:$0xff]  ;;  %v18090_v40 = vld [vmem:[#allocation115_spill] sm:$0xff] }
 0x3d6   : > { %v11972_v35 = vpop.f32.mrf.mxu0  ;;  %v15531_v7 = vadd.f32 %v18091_v55, %v18090_v40 }
 0x3d7   : > { %v15498_v18 = vpack.c.bf16 %v7028_v17, %v7027_v28  ;;  %7060 = vst.msk [vmem:[#allocation2 + $0x30] sm:$0xff] %vm420_vm1, %v7028_v17  ;;  %v7026_v36 = vmax.f32 %v6994_v12, 0.0  ;;  %v6999_v33 = vadd.f32 %v11972_v35, %v6673_v45  ;;  %v18085_v28 = vld [vmem:[#allocation113_spill] sm:$0xff]  ;;  %v18092_v45 = vld [vmem:[#allocation119_spill] sm:$0xff]  ;;  %v18093_v17 = vld [vmem:[#allocation146_spill] sm:$0xff] }
 0x3d8   : > { %v6882_v60 = vpop.f32.mrf.mxu0  ;;  %v15518_v9 = vadd.f32 %v18085_v28, %v5734_v54  ;;  %v15535_v41 = vadd.f32 %v18093_v17, %v18092_v45  ;;  %v18094_v12 = vld [vmem:[#allocation87_spill] sm:$0xff] }
 0x3d9   : > { %18073 = vst [vmem:[#allocation71_spill] sm:$0xff] %v15498_v18  ;;  %v15510_v25 = vpack.c.bf16 %v7026_v36, %v7025_v58  ;;  %7058 = vst.msk [vmem:[#allocation2 + $0x20] sm:$0xff] %vm420_vm1, %v7026_v36  ;;  %v7031_v13 = vmax.f32 %v6999_v33, 0.0  ;;  %v6997_v51 = vadd.f32 %v6882_v60, %v6671_v47  ;;  %v18088_v58 = vld [vmem:[#allocation145_spill] sm:$0xff]  ;;  %v5742_v10 = vadd.f32 %v18094_v12, %v5480_v56  ;;  %v18096_v47 = vld [vmem:[#allocation118_spill] sm:$0xff] }
 0x3da   : > { %v11973_v21 = vpop.f32.mrf.mxu0  ;;  %v15525_v27 = vadd.f32 %v18088_v58, %v18087_v23  ;;  %v15542_v35 = vadd.f32 %v18096_v47, %v5738_v57  ;;  %v18101_v56 = vld [vmem:[#allocation67_spill] sm:$0xff]  ;;  %v6675_v60 = vadd.f32 %v18102_v3, %v6381_v4  ;;  %v15556_v57 = vpop.f32.mrf.mxu1  ;;  %v18108_v4 = vld [vmem:[#allocation84_spill] sm:$0xff]  ;;  %v18155_v18 = vld [vmem:[#allocation26_spill] sm:$0xff] }
 0x3db   : > { %18080 = vst [vmem:[#allocation138_spill] sm:$0xff] %v15510_v25  ;;  %7063 = vst.msk [vmem:[#allocation2 + $0x48] sm:$0xff] %vm420_vm1, %v7031_v13  ;;  %v7029_v37 = vmax.f32 %v6997_v51, 0.0  ;;  %v7000_v38 = vadd.f32 %v11973_v21, %v6674_v53  ;;  %v15552_v53 = vadd.f32 %v18101_v56, %v18100_v32  ;;  %v18107_v21 = vld [vmem:[#allocation72_spill] sm:$0xff]  ;;  %v15568_v58 = vadd.f32 %v18108_v4, %v5742_v10  ;;  %v18112_v47 = vld [vmem:[#allocation91_spill] sm:$0xff] }
 0x3dc   : > { %v6885_v54 = vpop.f32.mrf.mxu0  ;;  %v15539_v62 = vld [vmem:[#allocation2 + $0x17] sm:$0xff]  ;;  %v15565_v23 = vadd.f32 %v18107_v21, %v18106_v30  ;;  %v6385_v24 = vadd.f32 %v18112_v47, %v6059_v48  ;;  %v15581_v29 = vpop.f32.mrf.mxu1  ;;  %v18125_v47 = vld [vmem:[#allocation102_spill] sm:$0xff] }
 0x3dd   : > { %7061 = vst.msk [vmem:[#allocation2 + $0x38] sm:$0xff] %vm420_vm1, %v7029_v37  ;;  %v7032_v36 = vmax.f32 %v7000_v38, 0.0  ;;  %v6998_v33 = vadd.f32 %v6885_v54, %v6672_v5  ;;  %v7130_v63 = vmul.f32 %v18105_v42, %v15539_v62  ;;  %v18110_v5 = vld [vmem:[#allocation73_spill] sm:$0xff]  ;;  %v7423_v10 = vld [vmem:[#allocation2 + $0x18] sm:$0xff]  ;;  %v18115_v32 = vld [vmem:[#allocation75_spill] sm:$0xff] }
 0x3de   : > { %v11976_v51 = vpop.f32.mrf.mxu0  ;;  %v7426_v28 = vld [vmem:[#allocation2 + $0x30] sm:$0xff]  ;;  %v6676_v56 = vadd.f32 %v18115_v32, %v6382_v39  ;;  %v18118_v21 = vld [vmem:[#allocation20_spill] sm:$0xff] }
 0x3df   : > { %v15558_v43 = vpack.c.bf16 %v7032_v36, %v7031_v13  ;;  %7064 = vst.msk [vmem:[#allocation2 + $0x50] sm:$0xff] %vm420_vm1, %v7032_v36  ;;  %v7030_v26 = vmax.f32 %v6998_v33, 0.0  ;;  %v7003_v20 = vadd.f32 %v11976_v51, %v6677_v46  ;;  %v6387_v13 = vadd.f32 %v18110_v5, %v6061_v22  ;;  %v7425_v36 = vld [vmem:[#allocation2 + $0x28] sm:$0xff]  ;;  %v18122_v5 = vld [vmem:[#allocation103_spill] sm:$0xff] }
 0x3e0   : > { %v6898_v38 = vpop.f32.mrf.mxu0  ;;  %v15572_v40 = vld [vmem:[#allocation2 + $0x1f] sm:$0xff]  ;;  %v15574_v45 = vld [vmem:[#allocation2 + $0x27] sm:$0xff]  ;;  %v15590_v48 = vpack.c.bf16 %v7426_v28, %v7425_v36  ;;  %v15592_v6 = vld [vmem:[#allocation2 + $0x2f] sm:$0xff] }
 0x3e1   : > { %18104 = vst [vmem:[#allocation76_spill] sm:$0xff] %v15558_v43  ;;  %v7424_v55 = vld [vmem:[#allocation2 + $0x20] sm:$0xff]  ;;  %v15576_v17 = vpack.c.bf16 %v7030_v26, %v7029_v37  ;;  %7062 = vst.msk [vmem:[#allocation2 + $0x40] sm:$0xff] %vm420_vm1, %v7030_v26  ;;  %v7035_v12 = vmax.f32 %v7003_v20, 0.0  ;;  %v7001_v50 = vadd.f32 %v6898_v38, %v6675_v60  ;;  %v7161_v54 = vpack.c.bf16 %v15572_v40, %v7130_v63  ;;  %v18113_v33 = vld [vmem:[#allocation22_spill] sm:$0xff] }
 0x3e2   : > { %v11977_v22 = vpop.f32.mrf.mxu0  ;;  %v7454_v46 = vpack.c.bf16 %v7424_v55, %v7423_v10  ;;  %v7132_v16 = vmul.f32 %v18113_v33, %v15574_v45  ;;  %v8172_v37 = vsel %vm1108_vm0, %v18114_v52, 0  ;;  %18116 = vst [vmem:[#allocation105_spill] sm:$0xff] %v15590_v48  ;;  %v15597_v51 = vld [vmem:[%s17247_s7 + $0x8] sm:$0x3]  ;;  %v18117_v26 = vld [vmem:[#allocation128_spill] sm:$0xff]  ;;  %v15612_v4 = vmul.f32 %v18118_v21, %v15574_v45 }
 0x3e3   : > { %18111 = vst [vmem:[#allocation77_spill] sm:$0xff] %v15576_v17  ;;  %7067 = vst.msk [vmem:[#allocation2 + $0x68] sm:$0xff] %vm420_vm1, %v7035_v12  ;;  %v7033_v3 = vmax.f32 %v7001_v50, 0.0  ;;  %v7004_v60 = vadd.f32 %v11977_v22, %v6678_v1  ;;  %12001 = vmatmul.mubr.msk.bf16.vlgmr.msra.gmra.mxu1 %vm420_vm1, %v7161_v54  ;;  %v6388_v20 = vadd.f32 %v18117_v26, %v6062_v14  ;;  %v15608_v28 = vld [vmem:[%s17247_s7 + $0xa] sm:$0x3]  ;;  %v18121_v14 = vld [vmem:[#allocation125_spill] sm:$0xff] }
 0x3e4   : > { %12035 = vmatmul.mubr.msk.bf16.vlgmr.msra.gmra.mxu0 %vm420_vm1, %v7454_v46  ;;  %12067 = vmatpush3.bf16.msra.mxu1 %v15507_v0  ;;  %v6901_v39 = vpop.f32.mrf.mxu0  ;;  %v7162_v63 = vpack.c.bf16 %v15592_v6, %v7132_v16  ;;  %v15603_v30 = vld [vmem:[#allocation2 + $0x37] sm:$0xff]  ;;  %18119 = vst [vmem:[#allocation106_spill] sm:$0xff] %v15612_v4  ;;  %v15616_v1 = vadd.f32 %v18121_v14, %v18120_v15  ;;  %v18124_v54 = vld [vmem:[#allocation141_spill] sm:$0xff]  ;;  %v15629_v16 = vpop.f32.mrf.mxu1 }
 0x3e5   : > { %v6681_v0 = vadd.f32 %v18122_v5, %v6387_v13  ;;  %7065 = vst.msk [vmem:[#allocation2 + $0x58] sm:$0xff] %vm420_vm1, %v7033_v3  ;;  %v7036_v38 = vmax.f32 %v7004_v60, 0.0  ;;  %v7002_v55 = vadd.f32 %v6901_v39, %v6676_v56  ;;  %12038 = vmatprep.mubr.msk.bf16.mxu0 %vm420_vm1, %v15590_v48  ;;  %12101 = vmatpush3.bf16.msra.mxu0 %v8172_v37  ;;  %v18123_v50 = vld [vmem:[#allocation92_spill] sm:$0xff]  ;;  %v18126_v46 = vld [vmem:[#allocation129_spill] sm:$0xff]  ;;  %v18128_v56 = vld [vmem:[#allocation23_spill] sm:$0xff] }
 0x3e6   : > { %v15624_v10 = vadd.f32 %v18124_v54, %v18123_v50  ;;  %v6679_v22 = vadd.f32 %v18125_v47, %v6385_v24  ;;  %v6386_v36 = vadd.f32 %v18126_v46, %v15518_v9  ;;  %12004 = vmatprep.mubr.msk.bf16.mxu1 %vm420_vm1, %v7162_v63  ;;  %v11980_v13 = vpop.f32.mrf.mxu0  ;;  %12364 = vmatprep.subr.msk.bf16.mxu1 %vm1108_vm0, %v15597_v51  ;;  %v7430_v60 = vld [vmem:[#allocation2 + $0x50] sm:$0xff]  ;;  %v18129_v9 = vld [vmem:[#allocation97_spill] sm:$0xff]  ;;  %v18131_v15 = vld [vmem:[#allocation144_spill] sm:$0xff] }
 0x3e7   : > { %v15634_v52 = vpack.c.bf16 %v7036_v38, %v7035_v12  ;;  %7068 = vst.msk [vmem:[#allocation2 + $0x70] sm:$0xff] %vm420_vm1, %v7036_v38  ;;  %v7034_v37 = vmax.f32 %v7002_v55, 0.0  ;;  %v7007_v32 = vadd.f32 %v11980_v13, %v6681_v0  ;;  %v7134_v24 = vmul.f32 %v18128_v56, %v15603_v30  ;;  %12365 = vmatprep.subr.msk.bf16.mxu0 %vm1108_vm0, %v15608_v28  ;;  %v18130_v39 = vld [vmem:[#allocation137_spill] sm:$0xff]  ;;  %v7427_v47 = vld [vmem:[#allocation2 + $0x38] sm:$0xff]  ;;  %v15658_v13 = vpop.f32.mrf.mxu1  ;;  %v18140_v48 = vld [vmem:[#allocation131_spill] sm:$0xff] }
 0x3e8   : > { %v5746_v26 = vadd.f32 %v18129_v9, %v15475_v8  ;;  %v6682_v63 = vadd.f32 %v18130_v39, %v6388_v20  ;;  %v6391_v12 = vadd.f32 %v18131_v15, %v15525_v27  ;;  %v6914_v14 = vpop.f32.mrf.mxu0  ;;  %v15646_v5 = vld [vmem:[#allocation2 + $0x3f] sm:$0xff]  ;;  %v15648_v0 = vld [vmem:[#allocation2 + $0x47] sm:$0xff]  ;;  %v6392_v4 = vadd.f32 %v18140_v48, %v15535_v41 }
 0x3e9   : > { %18127 = vst [vmem:[#allocation139_spill] sm:$0xff] %v15634_v52  ;;  %v7428_v38 = vld [vmem:[#allocation2 + $0x40] sm:$0xff]  ;;  %v15652_v50 = vpack.c.bf16 %v7034_v37, %v7033_v3  ;;  %7066 = vst.msk [vmem:[#allocation2 + $0x60] sm:$0xff] %vm420_vm1, %v7034_v37  ;;  %v7039_v54 = vmax.f32 %v7007_v32, 0.0  ;;  %v7005_v8 = vadd.f32 %v6914_v14, %v6679_v22  ;;  %v7163_v20 = vpack.c.bf16 %v15646_v5, %v7134_v24  ;;  %v18133_v27 = vld [vmem:[#allocation70_spill] sm:$0xff] }
 0x3ea   : > { %v6389_v46 = vadd.f32 %v18133_v27, %v15531_v7  ;;  %v11981_v9 = vpop.f32.mrf.mxu0  ;;  %v15660_v39 = vpack.c.bf16 %v7428_v38, %v7427_v47  ;;  %v7429_v15 = vld [vmem:[#allocation2 + $0x48] sm:$0xff]  ;;  %v18135_v55 = vld [vmem:[#allocation24_spill] sm:$0xff]  ;;  %v15666_v37 = vmul.f32 %v18105_v42, %v15603_v30  ;;  %v6680_v22 = vadd.f32 %v15431_v34, %v6386_v36  ;;  %v18139_v47 = vld [vmem:[#allocation99_spill] sm:$0xff] }
 0x3eb   : > { %18132 = vst [vmem:[#allocation107_spill] sm:$0xff] %v15652_v50  ;;  %v7136_v3 = vmul.f32 %v18135_v55, %v15648_v0  ;;  %7071 = vst.msk [vmem:[#allocation2 + $0x88] sm:$0xff] %vm420_vm1, %v7039_v54  ;;  %v7037_v32 = vmax.f32 %v7005_v8, 0.0  ;;  %v7008_v24 = vadd.f32 %v11981_v9, %v6682_v63  ;;  %12005 = vmatmul.mubr.msk.bf16.gmra.mxu1 %vm420_vm1, %v7163_v20  ;;  %v15673_v14 = vld [vmem:[#allocation2 + $0x4f] sm:$0xff]  ;;  %v18141_v20 = vld [vmem:[#allocation69_spill] sm:$0xff] }
 0x3ec   : > { %18134 = vst [vmem:[#allocation108_spill] sm:$0xff] %v15660_v39  ;;  %18136 = vst [vmem:[#allocation111_spill] sm:$0xff] %v15666_v37  ;;  %v15671_v7 = vpack.c.bf16 %v7430_v60, %v7429_v15  ;;  %v18138_v38 = vld [vmem:[#allocation94_spill] sm:$0xff]  ;;  %12039 = vmatmul.mubr.msk.bf16.gmra.mxu0 %vm420_vm1, %v15660_v39  ;;  %v6917_v34 = vpop.f32.mrf.mxu0  ;;  %v15684_v63 = vld [vmem:[#allocation2 + $0x57] sm:$0xff]  ;;  %v15691_v9 = vadd.f32 %v18141_v20, %v5746_v26  ;;  %v6685_v15 = vadd.f32 %v15454_v44, %v6391_v12  ;;  %v15704_v26 = vpop.f32.mrf.mxu1 }
 0x3ed   : > { %v15677_v27 = vadd.f32 %v18139_v47, %v18138_v38  ;;  %v7164_v36 = vpack.c.bf16 %v15673_v14, %v7136_v3  ;;  %v15686_v8 = vld [vmem:[#allocation2 + $0x51] sm:$0xff]  ;;  %7069 = vst.msk [vmem:[#allocation2 + $0x78] sm:$0xff] %vm420_vm1, %v7037_v32  ;;  %v7040_v41 = vmax.f32 %v7008_v24, 0.0  ;;  %v7006_v48 = vadd.f32 %v6917_v34, %v6680_v22  ;;  %v18142_v3 = vld [vmem:[#allocation122_spill] sm:$0xff]  ;;  %v18145_v12 = vld [vmem:[#allocation45_spill] sm:$0xff] }
 0x3ee   : > { %18137 = vst [vmem:[#allocation124_spill] sm:$0xff] %v15671_v7  ;;  %12042 = vmatprep.mubr.msk.bf16.mxu0 %vm420_vm1, %v15671_v7  ;;  %v18143_v38 = vld [vmem:[#allocation79_spill] sm:$0xff]  ;;  %v6683_v39 = vadd.f32 %v15472_v19, %v6389_v46  ;;  %v18144_v60 = vld [vmem:[#allocation74_spill] sm:$0xff]  ;;  %v11984_v44 = vpop.f32.mrf.mxu0  ;;  %v15709_v22 = vmul.f32 %v18145_v12, %v15686_v8  ;;  %v18148_v19 = vld [vmem:[#allocation25_spill] sm:$0xff]  ;;  %v15737_v43 = vpop.f32.mrf.mxu1 }
 0x3ef   : > { %v15699_v47 = vadd.f32 %v18143_v38, %v18142_v3  ;;  %v6390_v37 = vadd.f32 %v18144_v60, %v15542_v35  ;;  %12008 = vmatprep.mubr.msk.bf16.mxu1 %vm420_vm1, %v7164_v36  ;;  %v15711_v24 = vpack.c.bf16 %v7040_v41, %v7039_v54  ;;  %7072 = vst.msk [vmem:[#allocation2 + $0x90] sm:$0xff] %vm420_vm1, %v7040_v41  ;;  %v7038_v34 = vmax.f32 %v7006_v48, 0.0  ;;  %v7434_v3 = vld [vmem:[#allocation2 + $0x70] sm:$0xff]  ;;  %v18149_v36 = vld [vmem:[#allocation132_spill] sm:$0xff] }
 0x3f0   : > { %18146 = vst [vmem:[#allocation133_spill] sm:$0xff] %v15709_v22  ;;  %v7011_v20 = vadd.f32 %v11984_v44, %v6685_v15  ;;  %v7138_v46 = vmul.f32 %v18148_v19, %v15684_v63  ;;  %v15716_v35 = vld [vmem:[#allocation2 + $0x49] sm:$0xff]  ;;  %v6686_v60 = vadd.f32 %v15495_v11, %v6392_v4  ;;  %v6395_v38 = vadd.f32 %v18149_v36, %v15548_v49  ;;  %v6930_v7 = vpop.f32.mrf.mxu0  ;;  %v15721_v52 = vld [vmem:[#allocation2 + $0x5f] sm:$0xff] }
 0x3f1   : > { %18147 = vst [vmem:[#allocation140_spill] sm:$0xff] %v15711_v24  ;;  %18150 = vst [vmem:[#allocation109_spill] sm:$0xff] %v15721_v52  ;;  %v7432_v54 = vld [vmem:[#allocation2 + $0x60] sm:$0xff]  ;;  %v15729_v41 = vmul.f32 %v18113_v33, %v15648_v0  ;;  %v15731_v48 = vpack.c.bf16 %v7038_v34, %v7037_v32  ;;  %v7009_v4 = vadd.f32 %v6930_v7, %v6683_v39  ;;  %v7431_v44 = vld [vmem:[#allocation2 + $0x58] sm:$0xff] }
 0x3f2   : > { %v15723_v24 = vld [vmem:[#allocation2 + $0x67] sm:$0xff]  ;;  %7070 = vst.msk [vmem:[#allocation2 + $0x80] sm:$0xff] %vm420_vm1, %v7038_v34  ;;  %v7043_v11 = vmax.f32 %v7011_v20, 0.0  ;;  %v7165_v49 = vpack.c.bf16 %v15721_v52, %v7138_v46  ;;  %v11985_v17 = vpop.f32.mrf.mxu0  ;;  %v15739_v15 = vpack.c.bf16 %v7432_v54, %v7431_v44  ;;  %v15745_v34 = vmul.f32 %v18128_v56, %v15684_v63  ;;  %v15752_v46 = vld [vmem:[#allocation2 + $0x6f] sm:$0xff] }
 0x3f3   : > { %18151 = vst [vmem:[#allocation117_spill] sm:$0xff] %v15729_v41  ;;  %18152 = vst [vmem:[#allocation126_spill] sm:$0xff] %v15731_v48  ;;  %v18153_v36 = vld [vmem:[#allocation134_spill] sm:$0xff]  ;;  %v7140_v32 = vmul.f32 %v18155_v18, %v15723_v24  ;;  %v6684_v39 = vadd.f32 %v15521_v31, %v6390_v37  ;;  %v7041_v7 = vmax.f32 %v7009_v4, 0.0  ;;  %v7012_v20 = vadd.f32 %v11985_v17, %v6686_v60  ;;  %v15780_v41 = vpop.f32.mrf.mxu1 }
 0x3f4   : > { %v6393_v50 = vadd.f32 %v18153_v36, %v15552_v53  ;;  %18154 = vst [vmem:[#allocation110_spill] sm:$0xff] %v15739_v15  ;;  %v7433_v22 = vld [vmem:[#allocation2 + $0x68] sm:$0xff]  ;;  %18156 = vst [vmem:[#allocation86_spill] sm:$0xff] %v15745_v34  ;;  %12009 = vmatmul.mubr.msk.bf16.gmra.mxu1 %vm420_vm1, %v7165_v49  ;;  %12043 = vmatmul.mubr.msk.bf16.gmra.mxu0 %vm420_vm1, %v15739_v15  ;;  %v6933_v36 = vpop.f32.mrf.mxu0  ;;  %v15759_v31 = vld [vmem:[#allocation2 + $0x77] sm:$0xff] }
 0x3f5   : > { %7075 = vst.msk [vmem:[#allocation2 + $0xa8] sm:$0xff] %vm420_vm1, %v7043_v11  ;;  %v15750_v53 = vpack.c.bf16 %v7434_v3, %v7433_v22  ;;  %v18158_v54 = vld [vmem:[#allocation98_spill] sm:$0xff]  ;;  %v7166_v48 = vpack.c.bf16 %v15752_v46, %v7140_v32  ;;  %18159 = vst [vmem:[#allocation112_spill] sm:$0xff] %v15759_v31  ;;  %v15761_v37 = vld [vmem:[#allocation2 + $0x71] sm:$0xff]  ;;  %v7044_v49 = vmax.f32 %v7012_v20, 0.0  ;;  %v7010_v32 = vadd.f32 %v6933_v36, %v6684_v39 }
 0x3f6   : > { %v6396_v44 = vadd.f32 %v18158_v54, %v15565_v23  ;;  %18160 = vst [vmem:[#allocation143_spill] sm:$0xff] %v15761_v37  ;;  %v18161_v3 = vld [vmem:[#allocation81_spill] sm:$0xff]  ;;  %v18162_v60 = vld [vmem:[#allocation82_spill] sm:$0xff]  ;;  %v6689_v23 = vadd.f32 %v15556_v57, %v6395_v38  ;;  %7073 = vst.msk [vmem:[#allocation2 + $0x98] sm:$0xff] %vm420_vm1, %v7041_v7  ;;  %v6687_v17 = vadd.f32 %v15581_v29, %v6393_v50  ;;  %v11988_v57 = vpop.f32.mrf.mxu0 }
 0x3f7   : > { %18157 = vst [vmem:[#allocation142_spill] sm:$0xff] %v15750_v53  ;;  %v15769_v4 = vadd.f32 %v18162_v60, %v18161_v3  ;;  %12046 = vmatprep.mubr.msk.bf16.mxu0 %vm420_vm1, %v15750_v53  ;;  %v18163_v54 = vld [vmem:[#allocation83_spill] sm:$0xff]  ;;  %v18164_v22 = vld [vmem:[#allocation100_spill] sm:$0xff]  ;;  %12012 = vmatprep.mubr.msk.bf16.mxu1 %vm420_vm1, %v7166_v48  ;;  %v15787_v39 = vpack.c.bf16 %v7044_v49, %v7043_v11  ;;  %7076 = vst.msk [vmem:[#allocation2 + $0xb0] sm:$0xff] %vm420_vm1, %v7044_v49  ;;  %v7042_v36 = vmax.f32 %v7010_v32, 0.0 }
 0x3f8   : > { %v5750_v15 = vadd.f32 %v18163_v54, %v15480_v61  ;;  %v6394_v34 = vadd.f32 %v18164_v22, %v15568_v58  ;;  %v18165_v38 = vld [vmem:[#allocation47_spill] sm:$0xff]  ;;  %v7015_v61 = vadd.f32 %v11988_v57, %v6689_v23  ;;  %v6690_v22 = vadd.f32 %v15629_v16, %v6396_v44  ;;  %v6946_v54 = vpop.f32.mrf.mxu0  ;;  %v7435_v57 = vld [vmem:[#allocation2 + $0x78] sm:$0xff]  ;;  %v7437_v23 = vld [vmem:[#allocation2 + $0x88] sm:$0xff] }
 0x3f9   : > { %v15785_v20 = vmul.f32 %v18165_v38, %v15761_v37  ;;  %18167 = vst [vmem:[#allocation113_spill] sm:$0xff] %v15787_v39  ;;  %v18168_v29 = vld [vmem:[#allocation27_spill] sm:$0xff]  ;;  %v15797_v53 = vld [vmem:[#allocation2 + $0x7f] sm:$0xff]  ;;  %v15799_v39 = vld [vmem:[#allocation2 + $0x87] sm:$0xff]  ;;  %v15805_v49 = vmul.f32 %v18135_v55, %v15723_v24  ;;  %v15807_v32 = vpack.c.bf16 %v7042_v36, %v7041_v7  ;;  %v7013_v44 = vadd.f32 %v6946_v54, %v6687_v17  ;;  %v6639_v37 = vpop.f32.mrf.mxu1 }
 0x3fa   : > { %v7142_v50 = vmul.f32 %v18168_v29, %v15759_v31  ;;  %v7438_v3 = vld [vmem:[#allocation2 + $0x90] sm:$0xff]  ;;  %v7436_v11 = vld [vmem:[#allocation2 + $0x80] sm:$0xff]  ;;  %7074 = vst.msk [vmem:[#allocation2 + $0xa0] sm:$0xff] %vm420_vm1, %v7042_v36  ;;  %v7047_v16 = vmax.f32 %v7015_v61, 0.0  ;;  %v11989_v38 = vpop.f32.mrf.mxu0  ;;  %v15819_v7 = vmul.f32 %v18148_v19, %v15759_v31  ;;  %v6688_v17 = vadd.f32 %v15658_v13, %v6394_v34  ;;  %v18178_v54 = vld [vmem:[#allocation148_spill] sm:$0xff] }
 0x3fb   : > { %18166 = vst [vmem:[#allocation78_spill] sm:$0xff] %v15785_v20  ;;  %v15792_v58 = vld [vmem:[#allocation2 + $0x69] sm:$0xff]  ;;  %18171 = vst [vmem:[#allocation114_spill] sm:$0xff] %v15805_v49  ;;  %v15813_v52 = vpack.c.bf16 %v7436_v11, %v7435_v57  ;;  %v18175_v20 = vld [vmem:[#allocation28_spill] sm:$0xff]  ;;  %v7045_v36 = vmax.f32 %v7013_v44, 0.0  ;;  %v7016_v61 = vadd.f32 %v11989_v38, %v6690_v22  ;;  %v6400_v11 = vadd.f32 %v18178_v54, %v15677_v27  ;;  %v15830_v57 = vpop.f32.mrf.mxu1 }
 0x3fc   : > { %18169 = vst [vmem:[#allocation136_spill] sm:$0xff] %v15792_v58  ;;  %v18170_v48 = vld [vmem:[#allocation135_spill] sm:$0xff]  ;;  %18172 = vst [vmem:[#allocation145_spill] sm:$0xff] %v15807_v32  ;;  %v7144_v58 = vmul.f32 %v18175_v20, %v15799_v39 }
 0x3fd   : > { %v6399_v60 = vadd.f32 %v18170_v48, %v15616_v1  ;;  %v7167_v1 = vpack.c.bf16 %v15797_v53, %v7142_v50  ;;  %v18173_v48 = vld [vmem:[#allocation101_spill] sm:$0xff]  ;;  %18174 = vst [vmem:[#allocation90_spill] sm:$0xff] %v15813_v52  ;;  %18176 = vst [vmem:[#allocation115_spill] sm:$0xff] %v15819_v7  ;;  %v15826_v50 = vld [vmem:[#allocation2 + $0x8f] sm:$0xff]  ;;  %12047 = vmatmul.mubr.msk.bf16.gmra.mxu0 %vm420_vm1, %v15813_v52  ;;  %v7048_v54 = vmax.f32 %v7016_v61, 0.0 }
 0x3fe   : > { %v6397_v25 = vadd.f32 %v18173_v48, %v15624_v10  ;;  %7079 = vst.msk [vmem:[#allocation2 + $0xc8] sm:$0xff] %vm420_vm1, %v7047_v16  ;;  %v15824_v10 = vpack.c.bf16 %v7438_v3, %v7437_v23  ;;  %v6949_v48 = vpop.f32.mrf.mxu0  ;;  %v7168_v13 = vpack.c.bf16 %v15826_v50, %v7144_v58  ;;  %v15835_v34 = vld [vmem:[#allocation2 + $0x97] sm:$0xff]  ;;  %7077 = vst.msk [vmem:[#allocation2 + $0xb8] sm:$0xff] %vm420_vm1, %v7045_v36  ;;  %v18182_v58 = vld [vmem:[#allocation130_spill] sm:$0xff] }
 0x3ff   : > { %12013 = vmatmul.mubr.msk.bf16.gmra.mxu1 %vm420_vm1, %v7167_v1  ;;  %v15837_v38 = vld [vmem:[#allocation2 + $0x91] sm:$0xff]  ;;  %v6693_v1 = vadd.f32 %v15704_v26, %v6399_v60  ;;  %v7014_v52 = vadd.f32 %v6949_v48, %v6688_v17  ;;  %v6076_v32 = vadd.f32 %v18182_v58, %v5750_v15  ;;  %v18183_v3 = vld [vmem:[#allocation149_spill] sm:$0xff]  ;;  %v15858_v60 = vpack.c.bf16 %v7048_v54, %v7047_v16 }
 0x400   : > { %18177 = vst [vmem:[#allocation116_spill] sm:$0xff] %v15824_v10  ;;  %18179 = vst [vmem:[#allocation119_spill] sm:$0xff] %v15837_v38  ;;  %v18180_v23 = vld [vmem:[#allocation80_spill] sm:$0xff]  ;;  %v18181_v27 = vld [vmem:[#allocation123_spill] sm:$0xff]  ;;  %12050 = vmatprep.mubr.msk.bf16.mxu0 %vm420_vm1, %v15824_v10  ;;  %v6691_v31 = vadd.f32 %v15737_v43, %v6397_v25  ;;  %v6398_v49 = vadd.f32 %v18183_v3, %v15691_v9  ;;  %12016 = vmatprep.mubr.msk.bf16.mxu1 %vm420_vm1, %v7168_v13  ;;  %v11992_v22 = vpop.f32.mrf.mxu0 }
 0x401   : > { %v6078_v44 = vadd.f32 %v18181_v27, %v18180_v23  ;;  %v18184_v23 = vld [vmem:[#allocation49_spill] sm:$0xff]  ;;  %18186 = vst [vmem:[#allocation87_spill] sm:$0xff] %v15858_v60  ;;  %7080 = vst.msk [vmem:[#allocation2 + $0xd0] sm:$0xff] %vm420_vm1, %v7048_v54  ;;  %v7046_v17 = vmax.f32 %v7014_v52, 0.0  ;;  %v7019_v61 = vadd.f32 %v11992_v22, %v6693_v1  ;;  %v7442_v25 = vld [vmem:[#allocation2 + $0xb0] sm:$0xff]  ;;  %v6694_v9 = vadd.f32 %v15780_v41, %v6400_v11  ;;  %v6652_v27 = vpop.f32.mrf.mxu1 }
 0x402   : > { %v15856_v26 = vmul.f32 %v18184_v23, %v15837_v38  ;;  %v18187_v15 = vld [vmem:[#allocation29_spill] sm:$0xff]  ;;  %v15863_v43 = vld [vmem:[#allocation2 + $0x89] sm:$0xff]  ;;  %v6962_v58 = vpop.f32.mrf.mxu0  ;;  %v15876_v22 = vmul.f32 %v18155_v18, %v15799_v39  ;;  %v7439_v54 = vld [vmem:[#allocation2 + $0x98] sm:$0xff] }
 0x403   : > { %v7146_v48 = vmul.f32 %v18187_v15, %v15835_v34  ;;  %18188 = vst [vmem:[#allocation121_spill] sm:$0xff] %v15863_v43  ;;  %v18189_v13 = vld [vmem:[#allocation150_spill] sm:$0xff]  ;;  %v15868_v10 = vld [vmem:[#allocation2 + $0x9f] sm:$0xff]  ;;  %v15878_v1 = vpack.c.bf16 %v7046_v17, %v7045_v36  ;;  %7078 = vst.msk [vmem:[#allocation2 + $0xc0] sm:$0xff] %vm420_vm1, %v7046_v17  ;;  %v7051_v41 = vmax.f32 %v7019_v61, 0.0  ;;  %v15890_v36 = vmul.f32 %v18168_v29, %v15835_v34 }
 0x404   : > { %18185 = vst [vmem:[#allocation146_spill] sm:$0xff] %v15856_v26  ;;  %v6403_v3 = vadd.f32 %v18189_v13, %v15699_v47  ;;  %v7440_v16 = vld [vmem:[#allocation2 + $0xa0] sm:$0xff]  ;;  %18190 = vst [vmem:[#allocation118_spill] sm:$0xff] %v15876_v22  ;;  %v7017_v47 = vadd.f32 %v6962_v58, %v6691_v31  ;;  %v18192_v13 = vld [vmem:[#allocation104_spill] sm:$0xff]  ;;  %v11993_v38 = vpop.f32.mrf.mxu0  ;;  %v6692_v17 = vadd.f32 %v6639_v37, %v6398_v49 }
 0x405   : > { %v15870_v7 = vld [vmem:[#allocation2 + $0xa7] sm:$0xff]  ;;  %18191 = vst [vmem:[#allocation95_spill] sm:$0xff] %v15878_v1  ;;  %v7169_v11 = vpack.c.bf16 %v15868_v10, %v7146_v48  ;;  %v6401_v60 = vadd.f32 %v18192_v13, %v15769_v4  ;;  %v15884_v23 = vpack.c.bf16 %v7440_v16, %v7439_v54  ;;  %18195 = vst [vmem:[#allocation120_spill] sm:$0xff] %v15890_v36  ;;  %v15896_v4 = vld [vmem:[#allocation2 + $0xaf] sm:$0xff]  ;;  %v11963_v16 = vpop.f32.mrf.mxu1 }
 0x406   : > { %v7441_v52 = vld [vmem:[#allocation2 + $0xa8] sm:$0xff]  ;;  %7083 = vst.msk [vmem:[#allocation2 + $0xe8] sm:$0xff] %vm420_vm1, %v7051_v41  ;;  %v7049_v31 = vmax.f32 %v7017_v47, 0.0  ;;  %v7020_v61 = vadd.f32 %v11993_v38, %v6694_v9  ;;  %v6404_v58 = vadd.f32 %v15433_v59, %v6078_v44  ;;  %v6965_v54 = vpop.f32.mrf.mxu0  ;;  %v15902_v37 = vld [vmem:[#allocation2 + $0xb7] sm:$0xff]  ;;  %v6697_v9 = vadd.f32 %v15830_v57, %v6403_v3 }
 0x407   : > { %18193 = vst [vmem:[#allocation147_spill] sm:$0xff] %v15884_v23  ;;  %v18194_v26 = vld [vmem:[#allocation30_spill] sm:$0xff]  ;;  %12017 = vmatmul.mubr.msk.bf16.gmra.mxu1 %vm420_vm1, %v7169_v11  ;;  %v15894_v48 = vpack.c.bf16 %v7442_v25, %v7441_v52  ;;  %12051 = vmatmul.mubr.msk.bf16.gmra.mxu0 %vm420_vm1, %v15884_v23  ;;  %v15904_v49 = vld [vmem:[#allocation2 + $0xb1] sm:$0xff]  ;;  %v7018_v44 = vadd.f32 %v6965_v54, %v6692_v17  ;;  %v18200_v17 = vld [vmem:[#allocation33_spill] sm:$0xff] }
 0x408   : > { %v7148_v43 = vmul.f32 %v18194_v26, %v15870_v7  ;;  %7081 = vst.msk [vmem:[#allocation2 + $0xd8] sm:$0xff] %vm420_vm1, %v7049_v31  ;;  %v7052_v59 = vmax.f32 %v7020_v61, 0.0  ;;  %v6402_v52 = vadd.f32 %v15441_v2, %v6076_v32  ;;  %v11996_v47 = vpop.f32.mrf.mxu0  ;;  %v18197_v11 = vld [vmem:[#allocation51_spill] sm:$0xff]  ;;  %v7150_v61 = vmul.f32 %v18200_v17, %v15902_v37  ;;  %v6655_v32 = vpop.f32.mrf.mxu1 }
 0x409   : > { %18196 = vst [vmem:[#allocation68_spill] sm:$0xff] %v15894_v48  ;;  %12054 = vmatprep.mubr.msk.bf16.mxu0 %vm420_vm1, %v15894_v48  ;;  %v15918_v38 = vmul.f32 %v18197_v11, %v15904_v49  ;;  %v7050_v57 = vmax.f32 %v7018_v44, 0.0  ;;  %v7023_v3 = vadd.f32 %v11996_v47, %v6697_v9  ;;  %v7446_v54 = vld [vmem:[#allocation2 + $0xd0] sm:$0xff]  ;;  %v6698_v2 = vadd.f32 %v11963_v16, %v6404_v58  ;;  %v7443_v47 = vld [vmem:[#allocation2 + $0xb8] sm:$0xff] }
 0x40a   : > { %v7170_v13 = vpack.c.bf16 %v15896_v4, %v7148_v43  ;;  %v6695_v43 = vadd.f32 %v6652_v27, %v6401_v60  ;;  %v15920_v25 = vpack.c.bf16 %v7052_v59, %v7051_v41  ;;  %7084 = vst.msk [vmem:[#allocation2 + $0xf0] sm:$0xff] %vm420_vm1, %v7052_v59  ;;  %v15925_v60 = vld [vmem:[#allocation2 + $0xa9] sm:$0xff]  ;;  %v6978_v27 = vpop.f32.mrf.mxu0  ;;  %v7444_v48 = vld [vmem:[#allocation2 + $0xc0] sm:$0xff]  ;;  %v15935_v9 = vmul.f32 %v18175_v20, %v15870_v7 }
 0x40b   : > { %18198 = vst [vmem:[#allocation67_spill] sm:$0xff] %v15918_v38  ;;  %v15929_v23 = vld [vmem:[#allocation2 + $0xc7] sm:$0xff]  ;;  %v15937_v59 = vpack.c.bf16 %v7050_v57, %v7049_v31  ;;  %7082 = vst.msk [vmem:[#allocation2 + $0xe0] sm:$0xff] %vm420_vm1, %v7050_v57  ;;  %v7055_v44 = vmax.f32 %v7023_v3, 0.0  ;;  %v15941_v22 = vpack.c.bf16 %v7444_v48, %v7443_v47  ;;  %v18206_v1 = vld [vmem:[#allocation35_spill] sm:$0xff]  ;;  %v15947_v38 = vmul.f32 %v18187_v15, %v15902_v37 }
 0x40c   : > { %12020 = vmatprep.mubr.msk.bf16.mxu1 %vm420_vm1, %v7170_v13  ;;  %18199 = vst [vmem:[#allocation93_spill] sm:$0xff] %v15920_v25  ;;  %v15927_v13 = vld [vmem:[#allocation2 + $0xbf] sm:$0xff]  ;;  %18202 = vst [vmem:[#allocation21_spill] sm:$0xff] %v15929_v23  ;;  %v7021_v58 = vadd.f32 %v6978_v27, %v6695_v43  ;;  %v11997_v36 = vpop.f32.mrf.mxu0  ;;  %v7445_v25 = vld [vmem:[#allocation2 + $0xc8] sm:$0xff]  ;;  %v7152_v41 = vmul.f32 %v18206_v1, %v15929_v23  ;;  %v6696_v31 = vadd.f32 %v6655_v32, %v6402_v52 }
 0x40d   : > { %18201 = vst [vmem:[#allocation89_spill] sm:$0xff] %v15927_v13  ;;  %18203 = vst [vmem:[#allocation127_spill] sm:$0xff] %v15935_v9  ;;  %v7171_v16 = vpack.c.bf16 %v15927_v13, %v7150_v61  ;;  %v7024_v3 = vadd.f32 %v11997_v36, %v6698_v2  ;;  %v15951_v43 = vpack.c.bf16 %v7446_v54, %v7445_v25  ;;  %v15953_v61 = vld [vmem:[#allocation2 + $0xcf] sm:$0xff]  ;;  %v18214_v36 = vld [vmem:[#allocation37_spill] sm:$0xff] }
 0x40e   : > { %18204 = vst [vmem:[#allocation72_spill] sm:$0xff] %v15937_v59  ;;  %18205 = vst [vmem:[#allocation84_spill] sm:$0xff] %v15941_v22  ;;  %v7053_v57 = vmax.f32 %v7021_v58, 0.0  ;;  %v6981_v48 = vpop.f32.mrf.mxu0  ;;  %v7172_v27 = vpack.c.bf16 %v15953_v61, %v7152_v41  ;;  %v15969_v2 = vld [vmem:[#allocation2 + $0x31] sm:$0xff]  ;;  %v15981_v52 = vld [vmem:[#allocation2 + $0xc9] sm:$0xff] }
 0x40f   : > { %18207 = vst [vmem:[#allocation96_spill] sm:$0xff] %v15947_v38  ;;  %7087 = vst.msk [vmem:[#allocation2 + $0x108] sm:$0xff] %vm420_vm1, %v7055_v44  ;;  %12021 = vmatmul.mubr.msk.bf16.gmra.mxu1 %vm420_vm1, %v7171_v16  ;;  %12055 = vmatmul.mubr.msk.bf16.gmra.mxu0 %vm420_vm1, %v15941_v22  ;;  %v15958_v47 = vld [vmem:[#allocation2 + $0xd7] sm:$0xff]  ;;  %v7056_v25 = vmax.f32 %v7024_v3, 0.0  ;;  %v7022_v54 = vadd.f32 %v6981_v48, %v6696_v31  ;;  %v18223_v13 = vld [vmem:[#allocation38_spill] sm:$0xff] }
 0x410   : > { %18208 = vst [vmem:[#allocation73_spill] sm:$0xff] %v15951_v43  ;;  %18209 = vst [vmem:[#allocation91_spill] sm:$0xff] %v15958_v47  ;;  %v15960_v59 = vld [vmem:[#allocation2 + $0xd1] sm:$0xff]  ;;  %12058 = vmatprep.mubr.msk.bf16.mxu0 %vm420_vm1, %v15951_v43  ;;  %12024 = vmatprep.mubr.msk.bf16.mxu1 %vm420_vm1, %v7172_v27  ;;  %v7154_v3 = vmul.f32 %v18214_v36, %v15958_v47  ;;  %v15985_v43 = vmul.f32 %v18194_v26, %v15929_v23 }
 0x411   : > { %18210 = vst [vmem:[#allocation22_spill] sm:$0xff] %v15960_v59  ;;  %7085 = vst.msk [vmem:[#allocation2 + $0xf8] sm:$0xff] %vm420_vm1, %v7053_v57  ;;  %v18211_v32 = vld [vmem:[#allocation31_spill] sm:$0xff]  ;;  %v15976_v58 = vpack.c.bf16 %v7056_v25, %v7055_v44  ;;  %v7054_v16 = vmax.f32 %v7022_v54, 0.0  ;;  %v7447_v31 = vld [vmem:[#allocation2 + $0xd8] sm:$0xff] }
 0x412   : > { %v15974_v41 = vmul.f32 %v18211_v32, %v15960_v59  ;;  %7088 = vst.msk [vmem:[#allocation2 + $0x110] sm:$0xff] %vm420_vm1, %v7056_v25  ;;  %v7450_v48 = vld [vmem:[#allocation2 + $0xf0] sm:$0xff]  ;;  %18215 = vst [vmem:[#allocation128_spill] sm:$0xff] %v15981_v52  ;;  %v15987_v27 = vld [vmem:[#allocation2 + $0xdf] sm:$0xff]  ;;  %v15995_v25 = vmul.f32 %v18200_v17, %v15958_v47 }
 0x413   : > { %18213 = vst [vmem:[#allocation75_spill] sm:$0xff] %v15976_v58  ;;  %18216 = vst [vmem:[#allocation20_spill] sm:$0xff] %v15985_v43  ;;  %v7448_v22 = vld [vmem:[#allocation2 + $0xe0] sm:$0xff]  ;;  %v18219_v54 = vld [vmem:[#allocation42_spill] sm:$0xff]  ;;  %v16001_v58 = vpack.c.bf16 %v7054_v16, %v7053_v57  ;;  %v7173_v59 = vpack.c.bf16 %v15987_v27, %v7154_v3 }
 0x414   : > { %18212 = vst [vmem:[#allocation85_spill] sm:$0xff] %v15974_v41  ;;  %v15989_v38 = vld [vmem:[#allocation2 + $0xe7] sm:$0xff]  ;;  %18218 = vst [vmem:[#allocation125_spill] sm:$0xff] %v15995_v25  ;;  %v15999_v9 = vmul.f32 %v18219_v54, %v15969_v2  ;;  %v16005_v23 = vpack.c.bf16 %v7448_v22, %v7447_v31  ;;  %v16011_v52 = vld [vmem:[#allocation2 + $0xef] sm:$0xff] }
 0x415   : > { %18217 = vst [vmem:[#allocation88_spill] sm:$0xff] %v15989_v38  ;;  %18221 = vst [vmem:[#allocation92_spill] sm:$0xff] %v16001_v58  ;;  %v7449_v32 = vld [vmem:[#allocation2 + $0xe8] sm:$0xff]  ;;  %v7156_v44 = vmul.f32 %v18223_v13, %v15989_v38  ;;  %v7716_v57 = vld [vmem:[#allocation2 + $0x11] sm:$0xff]  ;;  %v16023_v3 = vmul.f32 %v18206_v1, %v15989_v38 }
 0x416   : > { %18220 = vst [vmem:[#allocation103_spill] sm:$0xff] %v15999_v9  ;;  %7086 = vst.msk [vmem:[#allocation2 + $0x100] sm:$0xff] %vm420_vm1, %v7054_v16  ;;  %v16009_v41 = vpack.c.bf16 %v7450_v48, %v7449_v32  ;;  %v16015_v58 = vld [vmem:[#allocation2 + $0x29] sm:$0xff]  ;;  %v7748_v48 = vmul.f32 %v18219_v54, %v7716_v57 }
 0x417   : > { %18222 = vst [vmem:[#allocation141_spill] sm:$0xff] %v16005_v23  ;;  %18225 = vst [vmem:[#allocation129_spill] sm:$0xff] %v16011_v52  ;;  %12025 = vmatmul.mubr.msk.bf16.gmra.mxu1 %vm420_vm1, %v7173_v59  ;;  %v7174_v47 = vpack.c.bf16 %v16011_v52, %v7156_v44  ;;  %12059 = vmatmul.mubr.msk.bf16.gmra.mxu0 %vm420_vm1, %v16005_v23  ;;  %v18228_v44 = vld [vmem:[#allocation32_spill] sm:$0xff]  ;;  %v18229_v23 = vld [vmem:[#allocation41_spill] sm:$0xff] }
 0x418   : > { %18224 = vst [vmem:[#allocation102_spill] sm:$0xff] %v16009_v41  ;;  %18226 = vst [vmem:[#allocation23_spill] sm:$0xff] %v16023_v3  ;;  %v16027_v32 = vld [vmem:[#allocation2 + $0xf7] sm:$0xff]  ;;  %12062 = vmatprep.mubr.msk.bf16.mxu0 %vm420_vm1, %v16009_v41  ;;  %v7715_v43 = vld [vmem:[#allocation2 + $0x9] sm:$0xff]  ;;  %v8073_v3 = vmul.f32 %v18118_v21, %v15539_v62 }
 0x419   : > { %v16029_v59 = vld [vmem:[#allocation2 + $0xf1] sm:$0xff]  ;;  %12028 = vmatprep.mubr.msk.bf16.mxu1 %vm420_vm1, %v7174_v47  ;;  %v7158_v25 = vmul.f32 %v18229_v23, %v16027_v32  ;;  %v16045_v38 = vld [vmem:[#allocation2 + $0xe9] sm:$0xff]  ;;  %v16053_v57 = vmul.f32 %v18214_v36, %v16027_v32  ;;  %v7779_v52 = vpack.c.bf16 %v7748_v48, %v7715_v43  ;;  %v16088_v48 = vld [vmem:[#allocation2 + $0x19] sm:$0xff] }
 0x41a   : > { %18227 = vst [vmem:[#allocation97_spill] sm:$0xff] %v16029_v59  ;;  %v16039_v22 = vmul.f32 %v18228_v44, %v16029_v59  ;;  %v7451_v9 = vld [vmem:[#allocation2 + $0xf8] sm:$0xff]  ;;  %v16062_v59 = vld [vmem:[#allocation2 + $0x21] sm:$0xff]  ;;  %v8105_v47 = vpack.c.bf16 %v15572_v40, %v8073_v3  ;;  %v16075_v62 = vld [vmem:[#allocation2 + $0x10f] sm:$0xff]  ;;  %v8075_v40 = vmul.f32 %v18105_v42, %v15574_v45  ;;  %v8077_v44 = vmul.f32 %v18113_v33, %v15603_v30 }
 0x41b   : > { %18230 = vst [vmem:[#allocation137_spill] sm:$0xff] %v16053_v57  ;;  %v18233_v21 = vld [vmem:[#allocation43_spill] sm:$0xff]  ;;  %v18235_v43 = vld [vmem:[#allocation36_spill] sm:$0xff]  ;;  %v16100_v45 = vld [vmem:[#allocation2 + $0x41] sm:$0xff] }
 0x41c   : > { %v8106_v42 = vpack.c.bf16 %v15592_v6, %v8075_v40  ;;  %v8107_v57 = vpack.c.bf16 %v15646_v5, %v8077_v44  ;;  %v16112_v33 = vld [vmem:[%s17247_s7 + $0xc] sm:$0x3]  ;;  %v16120_v40 = vld [vmem:[%s17247_s7 + $0xe] sm:$0x3]  ;;  %v8079_v44 = vmul.f32 %v18128_v56, %v15648_v0  ;;  %v16141_v0 = vld [vmem:[#allocation2 + $0x61] sm:$0xff] }
 0x41d   : > { %v16047_v31 = vld [vmem:[#allocation2 + $0xff] sm:$0xff]  ;;  %v16060_v23 = vld [vmem:[#allocation2 + $0x107] sm:$0xff] }
 0x41e   : > { %v7452_v41 = vld [vmem:[#allocation2 + $0x100] sm:$0xff]  ;;  %v7175_v54 = vpack.c.bf16 %v16047_v31, %v7158_v25  ;;  %v16070_v25 = vmul.f32 %v18223_v13, %v16060_v23 }
 0x41f   : > { %v16056_v16 = vpack.c.bf16 %v7452_v41, %v7451_v9  ;;  %v7750_v9 = vmul.f32 %v18233_v21, %v16062_v59  ;;  %v16084_v41 = vld [vmem:[#allocation2 + $0x111] sm:$0xff] }
 0x420   : > { %12029 = vmatmul.mubr.msk.bf16.gmra.mxu1 %vm420_vm1, %v7175_v54  ;;  %18232 = vst [vmem:[#allocation70_spill] sm:$0xff] %v16070_v25  ;;  %v18234_v54 = vld [vmem:[#allocation44_spill] sm:$0xff]  ;;  %v16097_v25 = vmul.f32 %v18235_v43, %v16084_v41 }
 0x421   : > { %18231 = vst [vmem:[#allocation144_spill] sm:$0xff] %v16056_v16  ;;  %12063 = vmatmul.mubr.msk.bf16.gmra.mxu0 %vm420_vm1, %v16056_v16  ;;  %12068 = vmatprep.mubr.msk.bf16.mxu1 %vm420_vm1, %v7779_v52  ;;  %v7752_v3 = vmul.f32 %v18234_v54, %v15969_v2  ;;  %v7780_v52 = vpack.c.bf16 %v7750_v9, %v16088_v48  ;;  %v16102_v16 = vld [vmem:[#allocation2 + $0x109] sm:$0xff] }
 0x422   : > { %12102 = vmatprep.mubr.msk.bf16.mxu0 %vm420_vm1, %v8105_v47  ;;  %v8434_v47 = vsel %vm1108_vm0, %v15597_v51, 0  ;;  %18236 = vst [vmem:[#allocation24_spill] sm:$0xff] %v16097_v25  ;;  %v8760_v51 = vsel %vm1108_vm0, %v15608_v28, 0  ;;  %v7754_v28 = vmul.f32 %v18145_v12, %v16100_v45  ;;  %v16154_v25 = vld [vmem:[#allocation2 + $0x59] sm:$0xff] }
 0x423   : > { %v7781_v9 = vpack.c.bf16 %v7752_v3, %v16015_v58  ;;  %v18237_v3 = vld [vmem:[#allocation46_spill] sm:$0xff]  ;;  %v18243_v12 = vld [vmem:[#allocation136_spill] sm:$0xff] }
 0x428   : > { %12069 = vmatmul.mubr.msk.bf16.vlgmr.msra.gmra.mxu1 %vm420_vm1, %v7780_v52  ;;  %v7756_v52 = vmul.f32 %v18237_v3, %v15686_v8  ;;  %v18238_v8 = vld [vmem:[#allocation109_spill] sm:$0xff] }
 0x429   : > { %12103 = vmatmul.mubr.msk.bf16.vlgmr.msra.gmra.mxu0 %vm420_vm1, %v8106_v42  ;;  %12135 = vmatpush3.bf16.msra.mxu1 %v8434_v47  ;;  %v16134_v47 = vld [vmem:[#allocation2 + $0x39] sm:$0xff]  ;;  %v8081_v42 = vmul.f32 %v18135_v55, %v15684_v63  ;;  %v8083_v55 = vmul.f32 %v18148_v19, %v15723_v24  ;;  %v18240_v63 = vld [vmem:[#allocation143_spill] sm:$0xff] }
 0x42a   : > { %12072 = vmatprep.mubr.msk.bf16.mxu1 %vm420_vm1, %v7781_v9  ;;  %12106 = vmatprep.mubr.msk.bf16.mxu0 %vm420_vm1, %v8107_v57  ;;  %v7782_v57 = vpack.c.bf16 %v7754_v28, %v16134_v47  ;;  %v8108_v9 = vpack.c.bf16 %v15673_v14, %v8079_v44  ;;  %v7783_v56 = vpack.c.bf16 %v7756_v52, %v15716_v35  ;;  %v18239_v28 = vld [vmem:[#allocation47_spill] sm:$0xff]  ;;  %v18241_v44 = vld [vmem:[#allocation48_spill] sm:$0xff]  ;;  %v18244_v19 = vld [vmem:[#allocation49_spill] sm:$0xff] }
 0x42b   : > { %12169 = vmatpush3.bf16.msra.mxu0 %v8760_v51  ;;  %12366 = vmatprep.subr.msk.bf16.mxu1 %vm1108_vm0, %v16112_v33  ;;  %v8109_v51 = vpack.c.bf16 %v18238_v8, %v8081_v42  ;;  %v7758_v30 = vmul.f32 %v18239_v28, %v16141_v0  ;;  %v7760_v52 = vmul.f32 %v18241_v44, %v18240_v63  ;;  %v18242_v42 = vld [vmem:[#allocation112_spill] sm:$0xff]  ;;  %v16161_v8 = vld [vmem:[#allocation2 + $0x81] sm:$0xff] }
 0x42c   : > { %12367 = vmatprep.subr.msk.bf16.mxu0 %vm1108_vm0, %v16120_v40  ;;  %v18246_v63 = vld [vmem:[#allocation50_spill] sm:$0xff] }
 0x42d   : > { %v16181_v28 = vld [vmem:[#allocation2 + $0xa1] sm:$0xff] }
 0x430   : > { %12073 = vmatmul.mubr.msk.bf16.gmra.mxu1 %vm420_vm1, %v7782_v57  ;;  %v7784_v57 = vpack.c.bf16 %v7758_v30, %v16154_v25  ;;  %v7762_v30 = vmul.f32 %v18244_v19, %v16161_v8  ;;  %v16221_v19 = vld [vmem:[#allocation2 + $0xe1] sm:$0xff] }
 0x431   : > { %12107 = vmatmul.mubr.msk.bf16.gmra.mxu0 %vm420_vm1, %v8108_v9  ;;  %12076 = vmatprep.mubr.msk.bf16.mxu1 %vm420_vm1, %v7783_v56  ;;  %v8085_v9 = vmul.f32 %v18155_v18, %v18242_v42  ;;  %v8110_v56 = vpack.c.bf16 %v15752_v46, %v8083_v55  ;;  %v8087_v18 = vmul.f32 %v18168_v29, %v15799_v39  ;;  %v18245_v55 = vld [vmem:[#allocation119_spill] sm:$0xff]  ;;  %v16174_v42 = vld [vmem:[#allocation2 + $0x79] sm:$0xff] }
 0x432   : > { %12110 = vmatprep.mubr.msk.bf16.mxu0 %vm420_vm1, %v8109_v51  ;;  %v7785_v51 = vpack.c.bf16 %v7760_v52, %v18243_v12  ;;  %v7764_v52 = vmul.f32 %v18246_v63, %v18245_v55  ;;  %v7766_v29 = vmul.f32 %v18197_v11, %v16181_v28  ;;  %v18255_v11 = vld [vmem:[#allocation128_spill] sm:$0xff] }
 0x433   : > { %v8111_v24 = vpack.c.bf16 %v15797_v53, %v8085_v9  ;;  %v8089_v9 = vmul.f32 %v18175_v20, %v15835_v34  ;;  %v8091_v20 = vmul.f32 %v18187_v15, %v15870_v7  ;;  %v18248_v34 = vld [vmem:[#allocation52_spill] sm:$0xff]  ;;  %v18250_v15 = vld [vmem:[#allocation31_spill] sm:$0xff] }
 0x435   : > { %v8113_v39 = vpack.c.bf16 %v15868_v10, %v8089_v9 }
 0x438   : > { %12077 = vmatmul.mubr.msk.bf16.gmra.mxu1 %vm420_vm1, %v7784_v57  ;;  %v7786_v57 = vpack.c.bf16 %v7762_v30, %v16174_v42  ;;  %v7768_v30 = vmul.f32 %v18248_v34, %v15904_v49 }
 0x439   : > { %12111 = vmatmul.mubr.msk.bf16.gmra.mxu0 %vm420_vm1, %v8110_v56  ;;  %12080 = vmatprep.mubr.msk.bf16.mxu1 %vm420_vm1, %v7785_v51  ;;  %v8112_v56 = vpack.c.bf16 %v15826_v50, %v8087_v18  ;;  %v18247_v51 = vld [vmem:[#allocation121_spill] sm:$0xff] }
 0x43a   : > { %12114 = vmatprep.mubr.msk.bf16.mxu0 %vm420_vm1, %v8111_v24  ;;  %v7787_v24 = vpack.c.bf16 %v7764_v52, %v18247_v51  ;;  %v16194_v18 = vld [vmem:[#allocation2 + $0x99] sm:$0xff]  ;;  %v8093_v52 = vmul.f32 %v18194_v26, %v15902_v37  ;;  %v7789_v9 = vpack.c.bf16 %v7768_v30, %v15925_v60 }
 0x43b   : > { %v7788_v55 = vpack.c.bf16 %v7766_v29, %v16194_v18  ;;  %v18251_v26 = vld [vmem:[#allocation21_spill] sm:$0xff]  ;;  %v18253_v29 = vld [vmem:[#allocation34_spill] sm:$0xff] }
 0x43c   : > { %v8095_v37 = vmul.f32 %v18200_v17, %v18251_v26  ;;  %v16214_v30 = vld [vmem:[#allocation2 + $0xb9] sm:$0xff] }
 0x440   : > { %12081 = vmatmul.mubr.msk.bf16.gmra.mxu1 %vm420_vm1, %v7786_v57  ;;  %v8114_v57 = vpack.c.bf16 %v15896_v4, %v8091_v20 }
 0x441   : > { %12115 = vmatmul.mubr.msk.bf16.gmra.mxu0 %vm420_vm1, %v8112_v56  ;;  %12084 = vmatprep.mubr.msk.bf16.mxu1 %vm420_vm1, %v7787_v24  ;;  %v16201_v56 = vld [vmem:[#allocation2 + $0xc1] sm:$0xff] }
 0x442   : > { %12118 = vmatprep.mubr.msk.bf16.mxu0 %vm420_vm1, %v8113_v39  ;;  %v18249_v24 = vld [vmem:[#allocation89_spill] sm:$0xff]  ;;  %v7770_v49 = vmul.f32 %v18250_v15, %v16201_v56  ;;  %v18252_v39 = vld [vmem:[#allocation22_spill] sm:$0xff] }
 0x443   : > { %v8115_v7 = vpack.c.bf16 %v18249_v24, %v8093_v52  ;;  %v7772_v20 = vmul.f32 %v18253_v29, %v18252_v39  ;;  %v18254_v52 = vld [vmem:[#allocation91_spill] sm:$0xff]  ;;  %v18258_v39 = vld [vmem:[#allocation97_spill] sm:$0xff] }
 0x444   : > { %v7746_v15 = vld [vmem:[#allocation2 + $0x101] sm:$0xff] }
 0x448   : > { %12085 = vmatmul.mubr.msk.bf16.gmra.mxu1 %vm420_vm1, %v7788_v55  ;;  %v7790_v55 = vpack.c.bf16 %v7770_v49, %v16214_v30  ;;  %v18256_v49 = vld [vmem:[#allocation32_spill] sm:$0xff] }
 0x449   : > { %12119 = vmatmul.mubr.msk.bf16.gmra.mxu0 %vm420_vm1, %v8114_v57  ;;  %12088 = vmatprep.mubr.msk.bf16.mxu1 %vm420_vm1, %v7789_v9  ;;  %v8097_v57 = vmul.f32 %v18206_v1, %v18254_v52  ;;  %v8116_v9 = vpack.c.bf16 %v15953_v61, %v8095_v37  ;;  %v7774_v26 = vmul.f32 %v18256_v49, %v16221_v19  ;;  %v18257_v1 = vld [vmem:[#allocation88_spill] sm:$0xff] }
 0x44a   : > { %12122 = vmatprep.mubr.msk.bf16.mxu0 %vm420_vm1, %v8115_v7  ;;  %v7791_v7 = vpack.c.bf16 %v7772_v20, %v18255_v11  ;;  %v8099_v37 = vmul.f32 %v18214_v36, %v18257_v1  ;;  %v7776_v20 = vmul.f32 %v18235_v43, %v18258_v39  ;;  %v16234_v52 = vld [vmem:[#allocation2 + $0xd9] sm:$0xff]  ;;  %v18260_v36 = vld [vmem:[#allocation54_spill] sm:$0xff] }
 0x44b   : > { %v8117_v17 = vpack.c.bf16 %v15987_v27, %v8097_v57  ;;  %v8101_v57 = vmul.f32 %v18223_v13, %v16027_v32  ;;  %v18261_v1 = vld [vmem:[#allocation41_spill] sm:$0xff]  ;;  %v18262_v32 = vld [vmem:[#allocation42_spill] sm:$0xff] }
 0x44c   : > { %v8103_v13 = vmul.f32 %v18261_v1, %v16060_v23  ;;  %v7745_v39 = vld [vmem:[#allocation2 + $0xf9] sm:$0xff]  ;;  %v8664_v23 = vmul.f32 %v18233_v21, %v15969_v2  ;;  %v10821_v2 = vld [vmem:[%s17247_s7 + $0x10] sm:$0x3] }
 0x44d   : > { %v8119_v49 = vpack.c.bf16 %v16047_v31, %v8101_v57 }
 0x450   : > { %12089 = vmatmul.mubr.msk.bf16.gmra.mxu1 %vm420_vm1, %v7790_v55  ;;  %v7792_v55 = vpack.c.bf16 %v7774_v26, %v16234_v52  ;;  %v7778_v26 = vmul.f32 %v18260_v36, %v7746_v15 }
 0x451   : > { %12123 = vmatmul.mubr.msk.bf16.gmra.mxu0 %vm420_vm1, %v8116_v9  ;;  %12092 = vmatprep.mubr.msk.bf16.mxu1 %vm420_vm1, %v7791_v7  ;;  %v18259_v9 = vld [vmem:[#allocation129_spill] sm:$0xff] }
 0x452   : > { %12126 = vmatprep.mubr.msk.bf16.mxu0 %vm420_vm1, %v8117_v17  ;;  %v8118_v7 = vpack.c.bf16 %v18259_v9, %v8099_v37  ;;  %v7793_v17 = vpack.c.bf16 %v7776_v20, %v16045_v38  ;;  %v8662_v37 = vmul.f32 %v18262_v32, %v16062_v59  ;;  %v7794_v20 = vpack.c.bf16 %v7778_v26, %v7745_v39  ;;  %v18264_v26 = vld [vmem:[#allocation71_spill] sm:$0xff]  ;;  %v18267_v32 = vld [vmem:[#allocation133_spill] sm:$0xff] }
 0x453   : > { %v8666_v59 = vmul.f32 %v18234_v54, %v16100_v45  ;;  %v18265_v45 = vld [vmem:[#allocation77_spill] sm:$0xff] }
 0x454   : > { %v8693_v57 = vpack.c.bf16 %v8662_v37, %v16088_v48  ;;  %v18268_v37 = vpack.c.bf16 %v18267_v32, %v15716_v35  ;;  %v18273_v35 = vld [vmem:[#allocation126_spill] sm:$0xff]  ;;  %v18287_v32 = vpack.c.bf16 %v16039_v22, %v16045_v38  ;;  %v18292_v22 = vld [vmem:[#allocation105_spill] sm:$0xff] }
 0x455   : > { %v8695_v48 = vpack.c.bf16 %v8666_v59, %v16134_v47  ;;  %v18266_v47 = vld [vmem:[#allocation76_spill] sm:$0xff] }
 0x456   : > { %v18274_v59 = vld [vmem:[#allocation140_spill] sm:$0xff] }
 0x458   : > { %12093 = vmatmul.mubr.msk.bf16.gmra.mxu1 %vm420_vm1, %v7792_v55  ;;  %v8120_v55 = vpack.c.bf16 %v16075_v62, %v8103_v13  ;;  %v9380_v13 = vsel %vm1108_vm0, %v16120_v40, 0 }
 0x459   : > { %12127 = vmatmul.mubr.msk.bf16.gmra.mxu0 %vm420_vm1, %v8118_v7  ;;  %12096 = vmatprep.mubr.msk.bf16.mxu1 %vm420_vm1, %v7793_v17  ;;  %v18263_v7 = vld [vmem:[#allocation138_spill] sm:$0xff]  ;;  %v8694_v17 = vpack.c.bf16 %v8664_v23, %v16015_v58  ;;  %v8678_v23 = vmul.f32 %v18246_v63, %v16181_v28 }
 0x45a   : > { %12130 = vmatprep.mubr.msk.bf16.mxu0 %vm420_vm1, %v8119_v49  ;;  %v9086_v49 = vsel %vm1108_vm0, %v16112_v33, 0  ;;  %v8670_v33 = vmul.f32 %v18237_v3, %v16141_v0 }
 0x45c   : > { %v8697_v40 = vpack.c.bf16 %v8670_v33, %v16154_v25  ;;  %v18283_v33 = vld [vmem:[#allocation85_spill] sm:$0xff] }
 0x460   : > { %12097 = vmatmul.mubr.msk.bf16.gmra.mxu1 %vm420_vm1, %v7794_v20  ;;  %v18269_v20 = vld [vmem:[#allocation107_spill] sm:$0xff] }
 0x461   : > { %12131 = vmatmul.mubr.msk.bf16.gmra.mxu0 %vm420_vm1, %v8120_v55  ;;  %12136 = vmatprep.mubr.msk.bf16.mxu1 %vm420_vm1, %v18263_v7  ;;  %v8674_v55 = vmul.f32 %v18241_v44, %v16161_v8  ;;  %v18271_v7 = vld [vmem:[#allocation78_spill] sm:$0xff]  ;;  %v8701_v8 = vpack.c.bf16 %v8678_v23, %v16194_v18  ;;  %v18298_v23 = vld [vmem:[#allocation124_spill] sm:$0xff] }
 0x462   : > { %12170 = vmatprep.mubr.msk.bf16.mxu0 %vm420_vm1, %v8693_v57  ;;  %v18270_v57 = vld [vmem:[#allocation139_spill] sm:$0xff]  ;;  %v18272_v25 = vpack.c.bf16 %v18271_v7, %v18243_v12  ;;  %v18277_v12 = vld [vmem:[#allocation145_spill] sm:$0xff]  ;;  %v18295_v7 = vld [vmem:[#allocation108_spill] sm:$0xff] }
 0x463   : > { %v8699_v0 = vpack.c.bf16 %v8674_v55, %v16174_v42  ;;  %v18293_v55 = vld [vmem:[#allocation111_spill] sm:$0xff] }
 0x468   : > { %12137 = vmatmul.mubr.msk.bf16.vlgmr.msra.gmra.mxu1 %vm420_vm1, %v18264_v26  ;;  %v18278_v26 = vld [vmem:[#allocation113_spill] sm:$0xff] }
 0x469   : > { %12171 = vmatmul.mubr.msk.bf16.vlgmr.msra.gmra.mxu0 %vm420_vm1, %v8694_v17  ;;  %12203 = vmatpush3.bf16.msra.mxu1 %v9086_v49  ;;  %v18275_v49 = vld [vmem:[#allocation146_spill] sm:$0xff]  ;;  %v8682_v17 = vmul.f32 %v18248_v34, %v16201_v56 }
 0x46a   : > { %12140 = vmatprep.mubr.msk.bf16.mxu1 %vm420_vm1, %v18265_v45  ;;  %12174 = vmatprep.mubr.msk.bf16.mxu0 %vm420_vm1, %v8695_v48  ;;  %v18276_v42 = vpack.c.bf16 %v18275_v49, %v18247_v51  ;;  %v18279_v48 = vld [vmem:[#allocation67_spill] sm:$0xff] }
 0x46b   : > { %12237 = vmatpush3.bf16.msra.mxu0 %v9380_v13  ;;  %12368 = vmatprep.subr.msk.bf16.mxu1 %vm1108_vm0, %v10821_v2  ;;  %v8703_v28 = vpack.c.bf16 %v8682_v17, %v16214_v30  ;;  %v18280_v18 = vpack.c.bf16 %v18279_v48, %v15925_v60  ;;  %v18281_v51 = vld [vmem:[#allocation95_spill] sm:$0xff]  ;;  %v8686_v13 = vmul.f32 %v18253_v29, %v16221_v19  ;;  %v18285_v60 = vld [vmem:[#allocation72_spill] sm:$0xff] }
 0x46c   : > { %v18282_v45 = vld [vmem:[#allocation87_spill] sm:$0xff]  ;;  %v18284_v30 = vpack.c.bf16 %v18283_v33, %v18255_v11  ;;  %v8692_v11 = vmul.f32 %v18260_v36, %v16084_v41  ;;  %v9706_v41 = vsel %vm1108_vm0, %v10821_v2, 0 }
 0x46d   : > { %v8705_v56 = vpack.c.bf16 %v8686_v13, %v16234_v52  ;;  %v18288_v52 = vld [vmem:[#allocation92_spill] sm:$0xff]  ;;  %v18300_v13 = vld [vmem:[#allocation86_spill] sm:$0xff] }
 0x470   : > { %12141 = vmatmul.mubr.msk.bf16.gmra.mxu1 %vm420_vm1, %v18266_v47  ;;  %v8690_v47 = vmul.f32 %v18235_v43, %v7746_v15  ;;  %v18289_v43 = vld [vmem:[#allocation75_spill] sm:$0xff]  ;;  %v18290_v15 = vld [vmem:[#allocation106_spill] sm:$0xff] }
 0x471   : > { %12175 = vmatmul.mubr.msk.bf16.gmra.mxu0 %vm420_vm1, %v18268_v37  ;;  %12144 = vmatprep.mubr.msk.bf16.mxu1 %vm420_vm1, %v18269_v20  ;;  %v8708_v37 = vpack.c.bf16 %v8692_v11, %v16102_v16  ;;  %v18291_v38 = vpack.c.bf16 %v15592_v6, %v18290_v15 }
 0x472   : > { %12178 = vmatprep.mubr.msk.bf16.mxu0 %vm420_vm1, %v8697_v40  ;;  %v18286_v40 = vld [vmem:[#allocation93_spill] sm:$0xff]  ;;  %v8707_v19 = vpack.c.bf16 %v8690_v47, %v7745_v39  ;;  %v18303_v47 = vld [vmem:[#allocation114_spill] sm:$0xff] }
 0x473   : > { %v16363_v39 = vld [vmem:[%s17248_s8] ss:$0 sm:$0xff] }
 0x478   : > { %12145 = vmatmul.mubr.msk.bf16.gmra.mxu1 %vm420_vm1, %v18270_v57  ;;  %v18294_v57 = vpack.c.bf16 %v15646_v5, %v18293_v55 }
 0x479   : > { %12179 = vmatmul.mubr.msk.bf16.gmra.mxu0 %vm420_vm1, %v18272_v25  ;;  %12148 = vmatprep.mubr.msk.bf16.mxu1 %vm420_vm1, %v18273_v35  ;;  %v18296_v25 = vld [vmem:[#allocation117_spill] sm:$0xff] }
 0x47a   : > { %12182 = vmatprep.mubr.msk.bf16.mxu0 %vm420_vm1, %v8699_v0  ;;  %v18297_v35 = vpack.c.bf16 %v15673_v14, %v18296_v25 }
 0x480   : > { %12149 = vmatmul.mubr.msk.bf16.gmra.mxu1 %vm420_vm1, %v18274_v59 }
 0x481   : > { %12183 = vmatmul.mubr.msk.bf16.gmra.mxu0 %vm420_vm1, %v18276_v42  ;;  %12152 = vmatprep.mubr.msk.bf16.mxu1 %vm420_vm1, %v18277_v12 }
 0x482   : > { %12186 = vmatprep.mubr.msk.bf16.mxu0 %vm420_vm1, %v8701_v8 }
 0x488   : > { %12153 = vmatmul.mubr.msk.bf16.gmra.mxu1 %vm420_vm1, %v18278_v26 }
 0x489   : > { %12187 = vmatmul.mubr.msk.bf16.gmra.mxu0 %vm420_vm1, %v18280_v18  ;;  %12156 = vmatprep.mubr.msk.bf16.mxu1 %vm420_vm1, %v18281_v51  ;;  %v18299_v51 = vld [vmem:[#allocation109_spill] sm:$0xff] }
 0x48a   : > { %12190 = vmatprep.mubr.msk.bf16.mxu0 %vm420_vm1, %v8703_v28 }
 0x490   : > { %12157 = vmatmul.mubr.msk.bf16.gmra.mxu1 %vm420_vm1, %v18282_v45  ;;  %v18301_v45 = vpack.c.bf16 %v18299_v51, %v18300_v13 }
 0x491   : > { %12191 = vmatmul.mubr.msk.bf16.gmra.mxu0 %vm420_vm1, %v18284_v30  ;;  %12160 = vmatprep.mubr.msk.bf16.mxu1 %vm420_vm1, %v18285_v60  ;;  %v18302_v60 = vld [vmem:[#allocation110_spill] sm:$0xff] }
 0x492   : > { %12194 = vmatprep.mubr.msk.bf16.mxu0 %vm420_vm1, %v8705_v56 }
 0x498   : > { %12161 = vmatmul.mubr.msk.bf16.gmra.mxu1 %vm420_vm1, %v18286_v40  ;;  %v18304_v40 = vpack.c.bf16 %v15752_v46, %v18303_v47 }
 0x499   : > { %12195 = vmatmul.mubr.msk.bf16.gmra.mxu0 %vm420_vm1, %v18287_v32  ;;  %12164 = vmatprep.mubr.msk.bf16.mxu1 %vm420_vm1, %v18288_v52 }
 0x49a   : > { %12198 = vmatprep.mubr.msk.bf16.mxu0 %vm420_vm1, %v8707_v19  ;;  %v18305_v19 = vld [vmem:[#allocation142_spill] sm:$0xff] }
 0x4a0   : > { %12165 = vmatmul.mubr.msk.bf16.gmra.mxu1 %vm420_vm1, %v18289_v43 }
 0x4a1   : > { %12199 = vmatmul.mubr.msk.bf16.gmra.mxu0 %vm420_vm1, %v8708_v37  ;;  %12204 = vmatprep.mubr.msk.bf16.mxu1 %vm420_vm1, %v18291_v38 }
 0x4a2   : > { %12238 = vmatprep.mubr.msk.bf16.mxu0 %vm420_vm1, %v18292_v22 }
 0x4a3   : > { %v12002_v20 = vpop.f32.mrf.mxu1 }
 0x4a4   : > { %v7391_v6 = vadd.f32 %v12002_v20, %v16363_v39  ;;  %v12036_v0 = vpop.f32.mrf.mxu0 }
 0x4a5   : > { %v7262_v2 = vpop.f32.mrf.mxu1 }
 0x4a6   : > { %v16379_v59 = vadd.f32 %v12036_v0, %v7391_v6  ;;  %v7389_v5 = vadd.f32 %v16363_v39, %v7262_v2  ;;  %v7556_v8 = vpop.f32.mrf.mxu0  ;;  %v18306_v6 = vld [vmem:[#allocation115_spill] sm:$0xff]  ;;  %v18309_v2 = vld [vmem:[#allocation118_spill] sm:$0xff] }
 0x4a7   : > { %v12003_v49 = vpop.f32.mrf.mxu1  ;;  %v18307_v0 = vpack.c.bf16 %v15797_v53, %v18306_v6 }
 0x4a8   : > { %12205 = vmatmul.mubr.msk.bf16.vlgmr.msra.gmra.mxu1 %vm420_vm1, %v18294_v57  ;;  %v16382_v42 = vadd.f32 %v7556_v8, %v7389_v5  ;;  %v7392_v12 = vadd.f32 %v12003_v49, %v16363_v39  ;;  %v12037_v17 = vpop.f32.mrf.mxu0  ;;  %v18310_v5 = vpack.c.bf16 %v15826_v50, %v18309_v2  ;;  %v18311_v8 = vld [vmem:[#allocation116_spill] sm:$0xff] }
 0x4a9   : > { %12239 = vmatmul.mubr.msk.bf16.vlgmr.msra.gmra.mxu0 %vm420_vm1, %v18295_v7  ;;  %12271 = vmatpush3.bf16.msra.mxu1 %v9706_v41  ;;  %v7265_v26 = vpop.f32.mrf.mxu1  ;;  %v18318_v2 = vld [vmem:[#allocation96_spill] sm:$0xff] }
 0x4aa   : > { %12208 = vmatprep.mubr.msk.bf16.mxu1 %vm420_vm1, %v18297_v35  ;;  %12242 = vmatprep.mubr.msk.bf16.mxu0 %vm420_vm1, %v18298_v23  ;;  %v16385_v28 = vadd.f32 %v12037_v17, %v7392_v12  ;;  %v7390_v14 = vadd.f32 %v16363_v39, %v7265_v26  ;;  %v7559_v48 = vpop.f32.mrf.mxu0  ;;  %v18308_v23 = vld [vmem:[#allocation90_spill] sm:$0xff] }
 0x4ab   : > { %v12006_v18 = vpop.f32.mrf.mxu1 }
 0x4ac   : > { %v16392_v56 = vadd.f32 %v7559_v48, %v7390_v14  ;;  %v7395_v33 = vadd.f32 %v12006_v18, %v16363_v39  ;;  %v12040_v30 = vpop.f32.mrf.mxu0 }
 0x4ad   : > { %v7278_v32 = vpop.f32.mrf.mxu1 }
 0x4ae   : > { %v16403_v52 = vadd.f32 %v12040_v30, %v7395_v33  ;;  %v7393_v11 = vadd.f32 %v16363_v39, %v7278_v32  ;;  %v7572_v37 = vpop.f32.mrf.mxu0  ;;  %v18312_v30 = vld [vmem:[#allocation120_spill] sm:$0xff]  ;;  %v18314_v32 = vld [vmem:[#allocation147_spill] sm:$0xff] }
 0x4af   : > { %v12007_v43 = vpop.f32.mrf.mxu1 }
 0x4b0   : > { %12209 = vmatmul.mubr.msk.bf16.gmra.mxu1 %vm420_vm1, %v18301_v45  ;;  %v16406_v15 = vadd.f32 %v7572_v37, %v7393_v11  ;;  %v7396_v38 = vadd.f32 %v12007_v43, %v16363_v39  ;;  %v12041_v22 = vpop.f32.mrf.mxu0  ;;  %v18315_v11 = vld [vmem:[#allocation127_spill] sm:$0xff]  ;;  %v18317_v43 = vld [vmem:[#allocation68_spill] sm:$0xff] }
 0x4b1   : > { %12243 = vmatmul.mubr.msk.bf16.gmra.mxu0 %vm420_vm1, %v18302_v60  ;;  %12212 = vmatprep.mubr.msk.bf16.mxu1 %vm420_vm1, %v18304_v40  ;;  %v7281_v41 = vpop.f32.mrf.mxu1  ;;  %v18313_v60 = vpack.c.bf16 %v15868_v10, %v18312_v30  ;;  %v18316_v37 = vpack.c.bf16 %v15896_v4, %v18315_v11 }
 0x4b2   : > { %12246 = vmatprep.mubr.msk.bf16.mxu0 %vm420_vm1, %v18305_v19  ;;  %v16409_v20 = vadd.f32 %v12041_v22, %v7396_v38  ;;  %v7394_v46 = vadd.f32 %v16363_v39, %v7281_v41  ;;  %v7575_v55 = vpop.f32.mrf.mxu0 }
 0x4b4   : > { %v12010_v57 = vpop.f32.mrf.mxu1  ;;  %v16416_v7 = vadd.f32 %v7575_v55, %v7394_v46  ;;  %v12044_v35 = vpop.f32.mrf.mxu0 }
 0x4b5   : > { %v7399_v25 = vadd.f32 %v12010_v57, %v16363_v39 }
 0x4b6   : > { %v7294_v49 = vpop.f32.mrf.mxu1  ;;  %v7588_v17 = vpop.f32.mrf.mxu0 }
 0x4b7   : > { %v16427_v53 = vadd.f32 %v12044_v35, %v7399_v25  ;;  %v7397_v12 = vadd.f32 %v16363_v39, %v7294_v49 }
 0x4b8   : > { %12213 = vmatmul.mubr.msk.bf16.gmra.mxu1 %vm420_vm1, %v18307_v0  ;;  %v12011_v26 = vpop.f32.mrf.mxu1  ;;  %v12045_v18 = vpop.f32.mrf.mxu0 }
 0x4b9   : > { %12247 = vmatmul.mubr.msk.bf16.gmra.mxu0 %vm420_vm1, %v18308_v23  ;;  %12216 = vmatprep.mubr.msk.bf16.mxu1 %vm420_vm1, %v18310_v5  ;;  %v16430_v14 = vadd.f32 %v7588_v17, %v7397_v12  ;;  %v7400_v48 = vadd.f32 %v12011_v26, %v16363_v39  ;;  %v18319_v5 = vpack.c.bf16 %v18249_v24, %v18318_v2  ;;  %v18320_v17 = vld [vmem:[#allocation84_spill] sm:$0xff] }
 0x4ba   : > { %12250 = vmatprep.mubr.msk.bf16.mxu0 %vm420_vm1, %v18311_v8  ;;  %v7297_v51 = vpop.f32.mrf.mxu1  ;;  %v7591_v45 = vpop.f32.mrf.mxu0  ;;  %v18321_v26 = vld [vmem:[#allocation20_spill] sm:$0xff] }
 0x4bb   : > { %v16433_v13 = vadd.f32 %v12045_v18, %v7400_v48  ;;  %v7398_v50 = vadd.f32 %v16363_v39, %v7297_v51  ;;  %v18322_v48 = vpack.c.bf16 %v15953_v61, %v18321_v26  ;;  %v18323_v18 = vld [vmem:[#allocation73_spill] sm:$0xff] }
 0x4bd   : > { %v16440_v47 = vadd.f32 %v7591_v45, %v7398_v50  ;;  %v12048_v19 = vpop.f32.mrf.mxu0 }
 0x4bf   : > { %v12014_v33 = vpop.f32.mrf.mxu1  ;;  %v7604_v41 = vpop.f32.mrf.mxu0 }
 0x4c0   : > { %12217 = vmatmul.mubr.msk.bf16.gmra.mxu1 %vm420_vm1, %v18313_v60  ;;  %v7403_v40 = vadd.f32 %v12014_v33, %v16363_v39 }
 0x4c1   : > { %12251 = vmatmul.mubr.msk.bf16.gmra.mxu0 %vm420_vm1, %v18314_v32  ;;  %12220 = vmatprep.mubr.msk.bf16.mxu1 %vm420_vm1, %v18316_v37  ;;  %v7310_v38 = vpop.f32.mrf.mxu1  ;;  %v12049_v6 = vpop.f32.mrf.mxu0  ;;  %v18324_v37 = vld [vmem:[#allocation125_spill] sm:$0xff] }
 0x4c2   : > { %12254 = vmatprep.mubr.msk.bf16.mxu0 %vm420_vm1, %v18317_v43  ;;  %v16451_v10 = vadd.f32 %v12048_v19, %v7403_v40  ;;  %v7401_v22 = vadd.f32 %v16363_v39, %v7310_v38  ;;  %v18325_v43 = vpack.c.bf16 %v15987_v27, %v18324_v37  ;;  %v18333_v37 = vld [vmem:[#allocation70_spill] sm:$0xff] }
 0x4c3   : > { %v12015_v46 = vpop.f32.mrf.mxu1  ;;  %v7607_v35 = vpop.f32.mrf.mxu0 }
 0x4c4   : > { %v16454_v55 = vadd.f32 %v7604_v41, %v7401_v22  ;;  %v7404_v57 = vadd.f32 %v12015_v46, %v16363_v39  ;;  %v18326_v41 = vld [vmem:[#allocation141_spill] sm:$0xff]  ;;  %v18327_v46 = vld [vmem:[#allocation23_spill] sm:$0xff] }
 0x4c5   : > { %v7313_v0 = vpop.f32.mrf.mxu1 }
 0x4c6   : > { %v16457_v25 = vadd.f32 %v12049_v6, %v7404_v57  ;;  %v7402_v4 = vadd.f32 %v16363_v39, %v7313_v0  ;;  %v18328_v57 = vpack.c.bf16 %v18259_v9, %v18327_v46  ;;  %v18329_v6 = vld [vmem:[#allocation102_spill] sm:$0xff] }
 0x4c7   : > { %v12018_v23 = vpop.f32.mrf.mxu1  ;;  %v12052_v12 = vpop.f32.mrf.mxu0 }
 0x4c8   : > { %12221 = vmatmul.mubr.msk.bf16.gmra.mxu1 %vm420_vm1, %v18319_v5  ;;  %v16464_v8 = vadd.f32 %v7607_v35, %v7402_v4  ;;  %v7407_v49 = vadd.f32 %v12018_v23, %v16363_v39 }
 0x4c9   : > { %12255 = vmatmul.mubr.msk.bf16.gmra.mxu0 %vm420_vm1, %v18320_v17  ;;  %12224 = vmatprep.mubr.msk.bf16.mxu1 %vm420_vm1, %v18322_v48  ;;  %v7326_v51 = vpop.f32.mrf.mxu1  ;;  %v7620_v45 = vpop.f32.mrf.mxu0  ;;  %v9309_v48 = vld [vmem:[#allocation2 + $0x108] sm:$0xff] }
 0x4ca   : > { %12258 = vmatprep.mubr.msk.bf16.mxu0 %vm420_vm1, %v18323_v18  ;;  %v16475_v24 = vadd.f32 %v12052_v12, %v7407_v49  ;;  %v7405_v50 = vadd.f32 %v16363_v39, %v7326_v51  ;;  %v9310_v12 = vld [vmem:[#allocation2 + $0x110] sm:$0xff] }
 0x4cb   : > { %v12019_v33 = vpop.f32.mrf.mxu1  ;;  %v12053_v40 = vpop.f32.mrf.mxu0  ;;  %v8985_v18 = vld [vmem:[#allocation2 + $0x117] sm:$0xff] }
 0x4cc   : > { %v16478_v30 = vadd.f32 %v7620_v45, %v7405_v50  ;;  %v7408_v60 = vadd.f32 %v12019_v33, %v16363_v39  ;;  %v18330_v50 = vld [vmem:[#allocation137_spill] sm:$0xff]  ;;  %v9327_v33 = vpack.c.bf16 %v9310_v12, %v9309_v48 }
 0x4cd   : > { %v16481_v19 = vpop.f32.mrf.mxu1  ;;  %v16485_v32 = vpop.f32.mrf.mxu0  ;;  %v18331_v45 = vpack.c.bf16 %v16047_v31, %v18330_v50  ;;  %v9311_v31 = vld [vmem:[#allocation2 + $0x118] sm:$0xff] }
 0x4ce   : > { %v16483_v61 = vadd.f32 %v12053_v40, %v7408_v60  ;;  %v9580_v50 = vld [vmem:[#allocation2 + $0x51] sm:$0xff] }
 0x4cf   : > { %v12022_v11 = vpop.f32.mrf.mxu1  ;;  %v12056_v22 = vpop.f32.mrf.mxu0 }
 0x4d0   : > { %12225 = vmatmul.mubr.msk.bf16.gmra.mxu1 %vm420_vm1, %v18325_v43  ;;  %v7411_v38 = vadd.f32 %v12022_v11, %v16363_v39  ;;  %v18332_v11 = vld [vmem:[#allocation144_spill] sm:$0xff]  ;;  %v18334_v43 = vpack.c.bf16 %v16075_v62, %v18333_v37 }
 0x4d1   : > { %12259 = vmatmul.mubr.msk.bf16.gmra.mxu0 %vm420_vm1, %v18326_v41  ;;  %12228 = vmatprep.mubr.msk.bf16.mxu1 %vm420_vm1, %v18328_v57  ;;  %v7342_v0 = vpop.f32.mrf.mxu1  ;;  %v7636_v35 = vpop.f32.mrf.mxu0  ;;  %v9312_v41 = vld [vmem:[#allocation2 + $0x120] sm:$0xff] }
 0x4d2   : > { %12262 = vmatprep.mubr.msk.bf16.mxu0 %vm420_vm1, %v18329_v6  ;;  %v16500_v4 = vadd.f32 %v12056_v22, %v7411_v38  ;;  %v7409_v27 = vadd.f32 %v16363_v39, %v7342_v0  ;;  %v9017_v22 = vmul.f32 %v18261_v1, %v8985_v18  ;;  %v8986_v0 = vld [vmem:[#allocation2 + $0x11f] sm:$0xff] }
 0x4d3   : > { %v12023_v23 = vpop.f32.mrf.mxu1  ;;  %v12057_v49 = vpop.f32.mrf.mxu0  ;;  %v9578_v18 = vld [vmem:[#allocation2 + $0x41] sm:$0xff] }
 0x4d4   : > { %v16503_v2 = vadd.f32 %v7636_v35, %v7409_v27  ;;  %v7412_v5 = vadd.f32 %v12023_v23, %v16363_v39  ;;  %v9034_v12 = vpack.c.bf16 %v8986_v0, %v9017_v22  ;;  %v9610_v37 = vmul.f32 %v18233_v21, %v9578_v18  ;;  %v9577_v0 = vld [vmem:[#allocation2 + $0x39] sm:$0xff]  ;;  %v9582_v18 = vld [vmem:[#allocation2 + $0x61] sm:$0xff] }
 0x4d5   : > { %v16506_v17 = vpop.f32.mrf.mxu1  ;;  %v16510_v26 = vpop.f32.mrf.mxu0 }
 0x4d6   : > { %v16508_v9 = vadd.f32 %v12057_v49, %v7412_v5  ;;  %v9328_v5 = vpack.c.bf16 %v9312_v41, %v9311_v31  ;;  %v9612_v31 = vmul.f32 %v18234_v54, %v9580_v50  ;;  %v9584_v54 = vld [vmem:[#allocation2 + $0x71] sm:$0xff] }
 0x4d7   : > { %v12026_v51 = vpop.f32.mrf.mxu1  ;;  %v12060_v40 = vpop.f32.mrf.mxu0 }
 0x4d8   : > { %12229 = vmatmul.mubr.msk.bf16.gmra.mxu1 %vm420_vm1, %v18331_v45  ;;  %v7415_v60 = vadd.f32 %v12026_v51, %v16363_v39 }
 0x4d9   : > { %12263 = vmatmul.mubr.msk.bf16.gmra.mxu0 %vm420_vm1, %v18332_v11  ;;  %12232 = vmatprep.mubr.msk.bf16.mxu1 %vm420_vm1, %v18334_v43  ;;  %v7358_v38 = vpop.f32.mrf.mxu1  ;;  %v7652_v6 = vpop.f32.mrf.mxu0 }
 0x4da   : > { %12266 = vmatprep.mubr.msk.bf16.mxu0 %vm420_vm1, %v9327_v33  ;;  %v16525_v46 = vadd.f32 %v12060_v40, %v7415_v60  ;;  %v7413_v57 = vadd.f32 %v16363_v39, %v7358_v38  ;;  %v18335_v60 = vld [vmem:[#allocation103_spill] sm:$0xff] }
 0x4db   : > { %v12027_v27 = vpop.f32.mrf.mxu1  ;;  %v12061_v23 = vpop.f32.mrf.mxu0  ;;  %v18336_v40 = vpack.c.bf16 %v18335_v60, %v16015_v58  ;;  %v18337_v60 = vld [vmem:[#allocation45_spill] sm:$0xff] }
 0x4dc   : > { %v16528_v35 = vadd.f32 %v7652_v6, %v7413_v57  ;;  %v7416_v62 = vadd.f32 %v12027_v27, %v16363_v39 }
 0x4dd   : > { %v16531_v49 = vpop.f32.mrf.mxu1  ;;  %v16535_v1 = vpop.f32.mrf.mxu0 }
 0x4de   : > { %v16533_v48 = vadd.f32 %v12061_v23, %v7416_v62  ;;  %v9640_v62 = vpack.c.bf16 %v9610_v37, %v9577_v0  ;;  %v9579_v23 = vld [vmem:[#allocation2 + $0x49] sm:$0xff] }
 0x4e0   : > { %v12030_v51 = vpop.f32.mrf.mxu1  ;;  %12233 = vmatmul.mubr.msk.bf16.gmra.mxu1 %vm420_vm1, %v9034_v12  ;;  %v9641_v12 = vpack.c.bf16 %v9612_v31, %v9579_v23  ;;  %v9583_v23 = vld [vmem:[#allocation2 + $0x69] sm:$0xff] }
 0x4e1   : > { %v7419_v45 = vadd.f32 %v12030_v51, %v16363_v39  ;;  %v12064_v33 = vpop.f32.mrf.mxu0  ;;  %12272 = vmatprep.mubr.msk.bf16.mxu1 %vm420_vm1, %v18336_v40  ;;  %12267 = vmatmul.mubr.msk.bf16.gmra.mxu0 %vm420_vm1, %v9328_v5  ;;  %v9614_v40 = vmul.f32 %v18337_v60, %v9582_v18  ;;  %v18338_v60 = vld [vmem:[#allocation47_spill] sm:$0xff] }
 0x4e2   : > { %v7374_v11 = vpop.f32.mrf.mxu1 }
 0x4e3   : > { %v16545_v43 = vadd.f32 %v12064_v33, %v7419_v45  ;;  %v7417_v38 = vadd.f32 %v16363_v39, %v7374_v11  ;;  %v7668_v22 = vpop.f32.mrf.mxu0 }
 0x4e4   : > { %v12031_v41 = vpop.f32.mrf.mxu1 }
 0x4e5   : > { %v16549_v57 = vadd.f32 %v7668_v22, %v7417_v38  ;;  %v7420_v6 = vadd.f32 %v12031_v41, %v16363_v39  ;;  %v12065_v58 = vpop.f32.mrf.mxu0  ;;  %v9616_v22 = vmul.f32 %v18237_v3, %v9584_v54  ;;  %v9588_v54 = vld [vmem:[#allocation2 + $0x91] sm:$0xff] }
 0x4e6   : > { %v16552_v27 = vpop.f32.mrf.mxu1 }
 0x4e7   : > { %v16554_v5 = vadd.f32 %v12065_v58, %v7420_v6  ;;  %v16556_v21 = vpop.f32.mrf.mxu0 }
 0x4e8   : > { %v12070_v51 = vpop.f32.mrf.mxu1  ;;  %12273 = vmatmul.mubr.msk.bf16.vlgmr.msra.gmra.mxu1 %vm420_vm1, %v9640_v62 }
 0x4e9   : > { %v8011_v50 = vadd.f32 %v12070_v51, %v16379_v59  ;;  %v12104_v45 = vpop.f32.mrf.mxu0  ;;  %12276 = vmatprep.mubr.msk.bf16.mxu1 %vm420_vm1, %v9641_v12  ;;  %v9581_v59 = vld [vmem:[#allocation2 + $0x59] sm:$0xff] }
 0x4ea   : > { %v7882_v33 = vpop.f32.mrf.mxu1  ;;  %v9642_v62 = vpack.c.bf16 %v9614_v40, %v9581_v59 }
 0x4eb   : > { %v16562_v11 = vadd.f32 %v12104_v45, %v8011_v50  ;;  %v8009_v37 = vadd.f32 %v7882_v33, %v16382_v42  ;;  %v8208_v38 = vpop.f32.mrf.mxu0  ;;  %v9643_v42 = vpack.c.bf16 %v9616_v22, %v9583_v23  ;;  %v9586_v50 = vld [vmem:[#allocation2 + $0x81] sm:$0xff]  ;;  %v9620_v22 = vmul.f32 %v18241_v44, %v9588_v54  ;;  %v9587_v23 = vld [vmem:[#allocation2 + $0x89] sm:$0xff] }
 0x4ec   : > { %v12071_v31 = vpop.f32.mrf.mxu1  ;;  %v9618_v40 = vmul.f32 %v18338_v60, %v9586_v50  ;;  %v9949_v44 = vld [vmem:[%s17249_s9] sm:$0x3] }
 0x4ed   : > { %v16566_v41 = vadd.f32 %v8208_v38, %v8009_v37  ;;  %v8012_v6 = vadd.f32 %v12071_v31, %v16385_v28  ;;  %v12105_v58 = vpop.f32.mrf.mxu0  ;;  %12369 = vmatprep.subr.msk.bf16.mxu0 %vm1108_vm0, %v9949_v44 }
 0x4ee   : > { %v7885_v0 = vpop.f32.mrf.mxu1 }
 0x4ef   : > { %v16569_v12 = vadd.f32 %v12105_v58, %v8012_v6  ;;  %v16572_v18 = vadd.f32 %v7885_v0, %v16392_v56  ;;  %v16574_v51 = vpop.f32.mrf.mxu0 }
 0x4f0   : > { %v12074_v3 = vpop.f32.mrf.mxu1  ;;  %12277 = vmatmul.mubr.msk.bf16.gmra.mxu1 %vm420_vm1, %v9642_v62 }
 0x4f1   : > { %v8015_v28 = vadd.f32 %v12074_v3, %v16403_v52  ;;  %v12108_v45 = vpop.f32.mrf.mxu0  ;;  %12280 = vmatprep.mubr.msk.bf16.mxu1 %vm420_vm1, %v9643_v42  ;;  %v9585_v52 = vld [vmem:[#allocation2 + $0x79] sm:$0xff] }
 0x4f2   : > { %v7898_v33 = vpop.f32.mrf.mxu1  ;;  %v9644_v62 = vpack.c.bf16 %v9618_v40, %v9585_v52  ;;  %v18339_v40 = vld [vmem:[#allocation49_spill] sm:$0xff] }
 0x4f3   : > { %v16580_v37 = vadd.f32 %v12108_v45, %v8015_v28  ;;  %v8013_v56 = vadd.f32 %v7898_v33, %v16406_v15  ;;  %v8224_v38 = vpop.f32.mrf.mxu0  ;;  %v9645_v15 = vpack.c.bf16 %v9620_v22, %v9587_v23  ;;  %v9590_v28 = vld [vmem:[#allocation2 + $0xa1] sm:$0xff] }
 0x4f4   : > { %v12075_v31 = vpop.f32.mrf.mxu1 }
 0x4f5   : > { %v16584_v6 = vadd.f32 %v8224_v38, %v8013_v56  ;;  %v8016_v58 = vadd.f32 %v12075_v31, %v16409_v20  ;;  %v12109_v59 = vpop.f32.mrf.mxu0  ;;  %v9592_v20 = vld [vmem:[#allocation2 + $0xb1] sm:$0xff]  ;;  %v9622_v56 = vmul.f32 %v18339_v40, %v9590_v28 }
 0x4f6   : > { %v7901_v0 = vpop.f32.mrf.mxu1  ;;  %v18340_v40 = vld [vmem:[#allocation51_spill] sm:$0xff] }
 0x4f7   : > { %v16587_v42 = vadd.f32 %v12109_v59, %v8016_v58  ;;  %v16590_v50 = vadd.f32 %v7901_v0, %v16416_v7  ;;  %v16592_v3 = vpop.f32.mrf.mxu0  ;;  %v10006_v7 = vsel %vm1108_vm0, %v9949_v44, 0  ;;  %v9624_v58 = vmul.f32 %v18246_v63, %v9592_v20  ;;  %v9591_v44 = vld [vmem:[#allocation2 + $0xa9] sm:$0xff]  ;;  %v9596_v20 = vld [vmem:[#allocation2 + $0xd1] sm:$0xff] }
 0x4f8   : > { %v12078_v54 = vpop.f32.mrf.mxu1  ;;  %12281 = vmatmul.mubr.msk.bf16.gmra.mxu1 %vm420_vm1, %v9644_v62  ;;  %12305 = vmatpush3.bf16.msra.mxu0 %v10006_v7  ;;  %v9589_v62 = vld [vmem:[#allocation2 + $0x99] sm:$0xff]  ;;  %vm10233_vm0 = vcmask 130048  }
 0x4f9   : > { %v8019_v45 = vadd.f32 %v12078_v54, %v16427_v53  ;;  %v12112_v33 = vpop.f32.mrf.mxu0  ;;  %12284 = vmatprep.mubr.msk.bf16.mxu1 %vm420_vm1, %v9645_v15  ;;  %v9646_v15 = vpack.c.bf16 %v9622_v56, %v9589_v62 }
 0x4fa   : > { %v7914_v60 = vpop.f32.mrf.mxu1 }
 0x4fb   : > { %v16603_v38 = vadd.f32 %v12112_v33, %v8019_v45  ;;  %v8017_v22 = vadd.f32 %v7914_v60, %v16430_v14  ;;  %v8240_v31 = vpop.f32.mrf.mxu0  ;;  %v9647_v14 = vpack.c.bf16 %v9624_v58, %v9591_v44  ;;  %v9594_v33 = vld [vmem:[#allocation2 + $0xc1] sm:$0xff]  ;;  %v9628_v58 = vmul.f32 %v18248_v34, %v9596_v20  ;;  %v9595_v44 = vld [vmem:[#allocation2 + $0xc9] sm:$0xff]  ;;  %v9600_v20 = vld [vmem:[#allocation2 + $0xf1] sm:$0xff] }
 0x4fc   : > { %v12079_v59 = vpop.f32.mrf.mxu1  ;;  %v9626_v56 = vmul.f32 %v18340_v40, %v9594_v33 }
 0x4fd   : > { %v16607_v52 = vadd.f32 %v8240_v31, %v8017_v22  ;;  %v8020_v53 = vadd.f32 %v12079_v59, %v16433_v13  ;;  %v12113_v0 = vpop.f32.mrf.mxu0 }
 0x4fe   : > { %v7917_v23 = vpop.f32.mrf.mxu1 }
 0x4ff   : > { %v16610_v54 = vadd.f32 %v12113_v0, %v8020_v53  ;;  %v16613_v28 = vadd.f32 %v7917_v23, %v16440_v47  ;;  %v16615_v45 = vpop.f32.mrf.mxu0 }
 0x500   : > { %v12082_v63 = vpop.f32.mrf.mxu1  ;;  %12285 = vmatmul.mubr.msk.bf16.gmra.mxu1 %vm420_vm1, %v9646_v15 }
 0x501   : > { %v8023_v13 = vadd.f32 %v12082_v63, %v16451_v10  ;;  %v12116_v7 = vpop.f32.mrf.mxu0  ;;  %12288 = vmatprep.mubr.msk.bf16.mxu1 %vm420_vm1, %v9647_v14  ;;  %v9593_v10 = vld [vmem:[#allocation2 + $0xb9] sm:$0xff] }
 0x502   : > { %v7930_v60 = vpop.f32.mrf.mxu1  ;;  %v9648_v15 = vpack.c.bf16 %v9626_v56, %v9593_v10  ;;  %v18341_v56 = vld [vmem:[#allocation31_spill] sm:$0xff] }
 0x503   : > { %v16621_v22 = vadd.f32 %v12116_v7, %v8023_v13  ;;  %v8021_v47 = vadd.f32 %v7930_v60, %v16454_v55  ;;  %v8256_v31 = vpop.f32.mrf.mxu0  ;;  %v9649_v55 = vpack.c.bf16 %v9628_v58, %v9595_v44  ;;  %v9598_v13 = vld [vmem:[#allocation2 + $0xe1] sm:$0xff] }
 0x504   : > { %v12083_v59 = vpop.f32.mrf.mxu1 }
 0x505   : > { %v16625_v53 = vadd.f32 %v8256_v31, %v8021_v47  ;;  %v8024_v0 = vadd.f32 %v12083_v59, %v16457_v25  ;;  %v12117_v62 = vpop.f32.mrf.mxu0  ;;  %v7406_v25 = vadd.f32 %v16363_v39, %v16481_v19  ;;  %v9632_v59 = vmul.f32 %v18253_v29, %v9600_v20 }
 0x506   : > { %v7933_v23 = vpop.f32.mrf.mxu1  ;;  %v7410_v29 = vadd.f32 %v16363_v39, %v16506_v17 }
 0x507   : > { %v16628_v14 = vadd.f32 %v12117_v62, %v8024_v0  ;;  %v16631_v33 = vadd.f32 %v7933_v23, %v16464_v8  ;;  %v16633_v63 = vpop.f32.mrf.mxu0  ;;  %v9630_v8 = vmul.f32 %v18341_v56, %v9598_v13  ;;  %v7700_v62 = vadd.f32 %v16485_v32, %v7406_v25  ;;  %v9597_v23 = vld [vmem:[#allocation2 + $0xd9] sm:$0xff] }
 0x508   : > { %v12086_v34 = vpop.f32.mrf.mxu1  ;;  %12289 = vmatmul.mubr.msk.bf16.gmra.mxu1 %vm420_vm1, %v9648_v15  ;;  %v18342_v56 = vld [vmem:[#allocation32_spill] sm:$0xff] }
 0x509   : > { %v8027_v7 = vadd.f32 %v12086_v34, %v16475_v24  ;;  %v12120_v60 = vpop.f32.mrf.mxu0  ;;  %12292 = vmatprep.mubr.msk.bf16.mxu1 %vm420_vm1, %v9649_v55  ;;  %v9650_v44 = vpack.c.bf16 %v9630_v8, %v9597_v23  ;;  %v9599_v55 = vld [vmem:[#allocation2 + $0xe9] sm:$0xff]  ;;  %v9606_v23 = vld [vmem:[#allocation2 + $0x121] sm:$0xff] }
 0x50a   : > { %v7946_v40 = vpop.f32.mrf.mxu1 }
 0x50b   : > { %v16641_v47 = vadd.f32 %v12120_v60, %v8027_v7  ;;  %v8025_v31 = vadd.f32 %v7946_v40, %v16478_v30  ;;  %v8272_v58 = vpop.f32.mrf.mxu0  ;;  %v9651_v30 = vpack.c.bf16 %v9632_v59, %v9599_v55  ;;  %v9602_v60 = vld [vmem:[#allocation2 + $0x101] sm:$0xff] }
 0x50c   : > { %v12087_v0 = vpop.f32.mrf.mxu1  ;;  %v9634_v8 = vmul.f32 %v18342_v56, %v9602_v60 }
 0x50d   : > { %v16646_v10 = vadd.f32 %v8272_v58, %v8025_v31  ;;  %v8028_v24 = vadd.f32 %v12087_v0, %v16483_v61  ;;  %v12121_v19 = vpop.f32.mrf.mxu0 }
 0x50e   : > { %v7949_v15 = vpop.f32.mrf.mxu1 }
 0x50f   : > { %v16649_v13 = vadd.f32 %v12121_v19, %v8028_v24  ;;  %v8026_v34 = vadd.f32 %v7949_v15, %v7700_v62  ;;  %v8275_v7 = vpop.f32.mrf.mxu0  ;;  %v7704_v62 = vadd.f32 %v16510_v26, %v7410_v29  ;;  %v7414_v26 = vadd.f32 %v16363_v39, %v16531_v49  ;;  %v18343_v29 = vld [vmem:[#allocation24_spill] sm:$0xff] }
 0x510   : > { %v12090_v40 = vpop.f32.mrf.mxu1  ;;  %12293 = vmatmul.mubr.msk.bf16.gmra.mxu1 %vm420_vm1, %v9650_v44 }
 0x511   : > { %v16654_v32 = vadd.f32 %v8275_v7, %v8026_v34  ;;  %v8031_v61 = vadd.f32 %v12090_v40, %v16500_v4  ;;  %v12124_v20 = vpop.f32.mrf.mxu0  ;;  %12296 = vmatprep.mubr.msk.bf16.mxu1 %vm420_vm1, %v9651_v30  ;;  %v9601_v4 = vld [vmem:[#allocation2 + $0xf9] sm:$0xff]  ;;  %v7708_v49 = vadd.f32 %v16535_v1, %v7414_v26 }
 0x512   : > { %v7962_v25 = vpop.f32.mrf.mxu1  ;;  %v9652_v44 = vpack.c.bf16 %v9634_v8, %v9601_v4 }
 0x513   : > { %v16659_v31 = vadd.f32 %v12124_v20, %v8031_v61  ;;  %v8029_v58 = vadd.f32 %v7962_v25, %v16503_v2  ;;  %v8288_v59 = vpop.f32.mrf.mxu0  ;;  %v9638_v2 = vmul.f32 %v18260_v36, %v9606_v23  ;;  %v18344_v61 = vpack.c.bf16 %v18343_v29, %v16102_v16  ;;  %v9605_v20 = vld [vmem:[#allocation2 + $0x119] sm:$0xff] }
 0x514   : > { %v12091_v0 = vpop.f32.mrf.mxu1 }
 0x515   : > { %v16663_v24 = vadd.f32 %v8288_v59, %v8029_v58  ;;  %v8032_v17 = vadd.f32 %v12091_v0, %v16508_v9  ;;  %v12125_v19 = vpop.f32.mrf.mxu0  ;;  %v9654_v59 = vpack.c.bf16 %v9638_v2, %v9605_v20 }
 0x516   : > { %v7965_v15 = vpop.f32.mrf.mxu1 }
 0x517   : > { %v16666_v55 = vadd.f32 %v12125_v19, %v8032_v17  ;;  %v8030_v34 = vadd.f32 %v7965_v15, %v7704_v62  ;;  %v8291_v7 = vpop.f32.mrf.mxu0 }
 0x518   : > { %v12094_v30 = vpop.f32.mrf.mxu1  ;;  %12297 = vmatmul.mubr.msk.bf16.gmra.mxu1 %vm420_vm1, %v9652_v44 }
 0x519   : > { %v16672_v60 = vadd.f32 %v8291_v7, %v8030_v34  ;;  %v8035_v9 = vadd.f32 %v12094_v30, %v16525_v46  ;;  %v12128_v40 = vpop.f32.mrf.mxu0  ;;  %12300 = vmatprep.mubr.msk.bf16.mxu1 %vm420_vm1, %v18344_v61 }
 0x51a   : > { %v7978_v25 = vpop.f32.mrf.mxu1 }
 0x51b   : > { %v16679_v56 = vadd.f32 %v12128_v40, %v8035_v9  ;;  %v8033_v8 = vadd.f32 %v7978_v25, %v16528_v35  ;;  %v8304_v36 = vpop.f32.mrf.mxu0  ;;  %v7418_v35 = vadd.f32 %v16363_v39, %v16552_v27 }
 0x51c   : > { %v12095_v58 = vpop.f32.mrf.mxu1 }
 0x51d   : > { %v16683_v0 = vadd.f32 %v8304_v36, %v8033_v8  ;;  %v8036_v46 = vadd.f32 %v12095_v58, %v16533_v48  ;;  %v12129_v62 = vpop.f32.mrf.mxu0  ;;  %v7712_v26 = vadd.f32 %v16556_v21, %v7418_v35 }
 0x51e   : > { %v7981_v17 = vpop.f32.mrf.mxu1 }
 0x51f   : > { %v16686_v16 = vadd.f32 %v12129_v62, %v8036_v46  ;;  %v8034_v19 = vadd.f32 %v7981_v17, %v7708_v49  ;;  %v8307_v4 = vpop.f32.mrf.mxu0 }
 0x520   : > { %v12098_v23 = vpop.f32.mrf.mxu1  ;;  %12301 = vmatmul.mubr.msk.bf16.gmra.mxu1 %vm420_vm1, %v9654_v59 }
 0x521   : > { %v16691_v15 = vadd.f32 %v8307_v4, %v8034_v19  ;;  %v8039_v1 = vadd.f32 %v12098_v23, %v16545_v43  ;;  %v12132_v44 = vpop.f32.mrf.mxu0 }
 0x522   : > { %v7994_v34 = vpop.f32.mrf.mxu1 }
 0x523   : > { %v16694_v7 = vadd.f32 %v12132_v44, %v8039_v1  ;;  %v8037_v48 = vadd.f32 %v7994_v34, %v16549_v57  ;;  %v8320_v30 = vpop.f32.mrf.mxu0 }
 0x524   : > { %v12099_v2 = vpop.f32.mrf.mxu1 }
 0x525   : > { %v16698_v9 = vadd.f32 %v8320_v30, %v8037_v48  ;;  %v8040_v40 = vadd.f32 %v12099_v2, %v16554_v5  ;;  %v12133_v29 = vpop.f32.mrf.mxu0  ;;  %v8336_v5 = vadd.f32 %v16574_v51, %v16572_v18 }
 0x526   : > { %v7997_v39 = vpop.f32.mrf.mxu1 }
 0x527   : > { %v16701_v27 = vadd.f32 %v12133_v29, %v8040_v40  ;;  %v8038_v61 = vadd.f32 %v7997_v39, %v7712_v26  ;;  %v8323_v43 = vpop.f32.mrf.mxu0 }
 0x528   : > { %v12138_v20 = vpop.f32.mrf.mxu1 }
 0x529   : > { %v16703_v25 = vadd.f32 %v8323_v43, %v8038_v61  ;;  %v8599_v8 = vadd.f32 %v12138_v20, %v16562_v11  ;;  %v12172_v57 = vpop.f32.mrf.mxu0 }
 0x52a   : > { %v8470_v36 = vpop.f32.mrf.mxu1 }
 0x52b   : > { %v16706_v58 = vadd.f32 %v12172_v57, %v8599_v8  ;;  %v8597_v21 = vadd.f32 %v8470_v36, %v16566_v41  ;;  %v8796_v59 = vpop.f32.mrf.mxu0 }
 0x52c   : > { %v12139_v49 = vpop.f32.mrf.mxu1 }
 0x52d   : > { %v16711_v46 = vadd.f32 %v8796_v59, %v8597_v21  ;;  %v16714_v62 = vadd.f32 %v12139_v49, %v16569_v12  ;;  %v16716_v17 = vpop.f32.mrf.mxu0  ;;  %v8340_v12 = vadd.f32 %v16592_v3, %v16590_v50 }
 0x52e   : > { %v8473_v19 = vpop.f32.mrf.mxu1 }
 0x52f   : > { %v16718_v11 = vadd.f32 %v8473_v19, %v8336_v5  ;;  %v16720_v4 = vpop.f32.mrf.mxu0 }
 0x530   : > { %v12142_v23 = vpop.f32.mrf.mxu1 }
 0x531   : > { %v8603_v41 = vadd.f32 %v12142_v23, %v16580_v37  ;;  %v12176_v35 = vpop.f32.mrf.mxu0 }
 0x532   : > { %v8486_v1 = vpop.f32.mrf.mxu1 }
 0x533   : > { %v16723_v44 = vadd.f32 %v12176_v35, %v8603_v41  ;;  %v8601_v18 = vadd.f32 %v8486_v1, %v16584_v6  ;;  %v8812_v51 = vpop.f32.mrf.mxu0 }
 0x534   : > { %v12143_v34 = vpop.f32.mrf.mxu1 }
 0x535   : > { %v16728_v48 = vadd.f32 %v8812_v51, %v8601_v18  ;;  %v16731_v30 = vadd.f32 %v12143_v34, %v16587_v42  ;;  %v16733_v2 = vpop.f32.mrf.mxu0  ;;  %v8344_v42 = vadd.f32 %v16615_v45, %v16613_v28 }
 0x536   : > { %v8489_v26 = vpop.f32.mrf.mxu1 }
 0x537   : > { %v16735_v37 = vadd.f32 %v8489_v26, %v8340_v12  ;;  %v16737_v40 = vpop.f32.mrf.mxu0 }
 0x538   : > { %v12146_v29 = vpop.f32.mrf.mxu1 }
 0x539   : > { %v8607_v6 = vadd.f32 %v12146_v29, %v16603_v38  ;;  %v12180_v39 = vpop.f32.mrf.mxu0 }
 0x53a   : > { %v8502_v61 = vpop.f32.mrf.mxu1 }
 0x53b   : > { %v16740_v43 = vadd.f32 %v12180_v39, %v8607_v6  ;;  %v8605_v50 = vadd.f32 %v8502_v61, %v16607_v52  ;;  %v8828_v3 = vpop.f32.mrf.mxu0 }
 0x53c   : > { %v12147_v20 = vpop.f32.mrf.mxu1 }
 0x53d   : > { %v16745_v8 = vadd.f32 %v8828_v3, %v8605_v50  ;;  %v16748_v57 = vadd.f32 %v12147_v20, %v16610_v54  ;;  %v16750_v36 = vpop.f32.mrf.mxu0  ;;  %v8348_v54 = vadd.f32 %v16633_v63, %v16631_v33 }
 0x53e   : > { %v8505_v21 = vpop.f32.mrf.mxu1 }
 0x53f   : > { %v16752_v38 = vadd.f32 %v8505_v21, %v8344_v42  ;;  %v16754_v59 = vpop.f32.mrf.mxu0 }
 0x540   : > { %v12150_v49 = vpop.f32.mrf.mxu1 }
 0x541   : > { %v8611_v52 = vadd.f32 %v12150_v49, %v16621_v22  ;;  %v12184_v5 = vpop.f32.mrf.mxu0 }
 0x542   : > { %v8518_v19 = vpop.f32.mrf.mxu1 }
 0x543   : > { %v16757_v23 = vadd.f32 %v12184_v5, %v8611_v52  ;;  %v8609_v28 = vadd.f32 %v8518_v19, %v16625_v53  ;;  %v8844_v45 = vpop.f32.mrf.mxu0 }
 0x544   : > { %v12151_v41 = vpop.f32.mrf.mxu1 }
 0x545   : > { %v16762_v35 = vadd.f32 %v8844_v45, %v8609_v28  ;;  %v16765_v1 = vadd.f32 %v12151_v41, %v16628_v14  ;;  %v16767_v18 = vpop.f32.mrf.mxu0 }
 0x546   : > { %v8521_v51 = vpop.f32.mrf.mxu1 }
 0x547   : > { %v16769_v22 = vadd.f32 %v8521_v51, %v8348_v54  ;;  %v16771_v34 = vpop.f32.mrf.mxu0 }
 0x548   : > { %v12154_v12 = vpop.f32.mrf.mxu1 }
 0x549   : > { %v8615_v53 = vadd.f32 %v12154_v12, %v16641_v47  ;;  %v12188_v26 = vpop.f32.mrf.mxu0 }
 0x54a   : > { %v8534_v29 = vpop.f32.mrf.mxu1 }
 0x54b   : > { %v16774_v6 = vadd.f32 %v12188_v26, %v8615_v53  ;;  %v8613_v33 = vadd.f32 %v8534_v29, %v16646_v10  ;;  %v8860_v63 = vpop.f32.mrf.mxu0 }
 0x54c   : > { %v12155_v39 = vpop.f32.mrf.mxu1 }
 0x54d   : > { %v16777_v14 = vadd.f32 %v8860_v63, %v8613_v33  ;;  %v16780_v61 = vadd.f32 %v12155_v39, %v16649_v13  ;;  %v16782_v50 = vpop.f32.mrf.mxu0 }
 0x54e   : > { %v8537_v3 = vpop.f32.mrf.mxu1 }
 0x54f   : > { %v16785_v20 = vadd.f32 %v8537_v3, %v16654_v32  ;;  %v16787_v47 = vpop.f32.mrf.mxu0 }
 0x550   : > { %v12158_v42 = vpop.f32.mrf.mxu1 }
 0x551   : > { %v8619_v21 = vadd.f32 %v12158_v42, %v16659_v31  ;;  %v12192_v49 = vpop.f32.mrf.mxu0 }
 0x552   : > { %v8550_v10 = vpop.f32.mrf.mxu1 }
 0x553   : > { %v16790_v52 = vadd.f32 %v12192_v49, %v8619_v21  ;;  %v8617_v5 = vadd.f32 %v8550_v10, %v16663_v24  ;;  %v8876_v19 = vpop.f32.mrf.mxu0 }
 0x554   : > { %v12159_v13 = vpop.f32.mrf.mxu1 }
 0x555   : > { %v16793_v28 = vadd.f32 %v8876_v19, %v8617_v5  ;;  %v16796_v45 = vadd.f32 %v12159_v13, %v16666_v55  ;;  %v16798_v32 = vpop.f32.mrf.mxu0 }
 0x556   : > { %18346 = vst [vmem:[#allocation99_spill] sm:$0xff] %v16798_v32  ;;  %v8553_v41 = vpop.f32.mrf.mxu1 }
 0x557   : > { %18345 = vst [vmem:[#allocation94_spill] sm:$0xff] %v16796_v45  ;;  %v16801_v54 = vadd.f32 %v8553_v41, %v16672_v60  ;;  %v16803_v31 = vpop.f32.mrf.mxu0 }
 0x558   : > { %18348 = vst [vmem:[#allocation69_spill] sm:$0xff] %v16803_v31  ;;  %v12162_v51 = vpop.f32.mrf.mxu1 }
 0x559   : > { %18347 = vst [vmem:[#allocation131_spill] sm:$0xff] %v16801_v54  ;;  %v8623_v12 = vadd.f32 %v12162_v51, %v16679_v56  ;;  %v12196_v53 = vpop.f32.mrf.mxu0 }
 0x55a   : > { %v8566_v24 = vpop.f32.mrf.mxu1 }
 0x55b   : > { %v16806_v26 = vadd.f32 %v12196_v53, %v8623_v12  ;;  %v8621_v29 = vadd.f32 %v8566_v24, %v16683_v0  ;;  %v8892_v33 = vpop.f32.mrf.mxu0 }
 0x55c   : > { %v12163_v55 = vpop.f32.mrf.mxu1 }
 0x55d   : > { %v16809_v63 = vadd.f32 %v8892_v33, %v8621_v29  ;;  %v16812_v39 = vadd.f32 %v12163_v55, %v16686_v16  ;;  %v16814_v60 = vpop.f32.mrf.mxu0 }
 0x55e   : > { %18350 = vst [vmem:[#allocation79_spill] sm:$0xff] %v16814_v60  ;;  %v8569_v3 = vpop.f32.mrf.mxu1 }
 0x55f   : > { %18349 = vst [vmem:[#allocation122_spill] sm:$0xff] %v16812_v39  ;;  %v16817_v42 = vadd.f32 %v8569_v3, %v16691_v15  ;;  %v16819_v56 = vpop.f32.mrf.mxu0 }
 0x560   : > { %18352 = vst [vmem:[#allocation25_spill] sm:$0xff] %v16819_v56  ;;  %v12166_v21 = vpop.f32.mrf.mxu1 }
 0x561   : > { %18351 = vst [vmem:[#allocation74_spill] sm:$0xff] %v16817_v42  ;;  %v8627_v49 = vadd.f32 %v12166_v21, %v16694_v7  ;;  %v12200_v10 = vpop.f32.mrf.mxu0 }
 0x562   : > { %v8582_v0 = vpop.f32.mrf.mxu1 }
 0x563   : > { %v16822_v5 = vadd.f32 %v12200_v10, %v8627_v49  ;;  %v8625_v19 = vadd.f32 %v8582_v0, %v16698_v9  ;;  %v8908_v13 = vpop.f32.mrf.mxu0 }
 0x564   : > { %v12167_v16 = vpop.f32.mrf.mxu1 }
 0x565   : > { %v16825_v41 = vadd.f32 %v8908_v13, %v8625_v19  ;;  %v16828_v51 = vadd.f32 %v12167_v16, %v16701_v27  ;;  %v16830_v15 = vpop.f32.mrf.mxu0 }
 0x566   : > { %18354 = vst [vmem:[#allocation134_spill] sm:$0xff] %v16830_v15  ;;  %v8585_v12 = vpop.f32.mrf.mxu1 }
 0x567   : > { %18353 = vst [vmem:[#allocation132_spill] sm:$0xff] %v16828_v51  ;;  %v16833_v53 = vadd.f32 %v8585_v12, %v16703_v25  ;;  %v16835_v7 = vpop.f32.mrf.mxu0 }
 0x568   : > { %18356 = vst [vmem:[#allocation98_spill] sm:$0xff] %v16835_v7  ;;  %v12206_v24 = vpop.f32.mrf.mxu1 }
 0x569   : > { %18355 = vst [vmem:[#allocation26_spill] sm:$0xff] %v16833_v53  ;;  %v16838_v29 = vadd.f32 %v12206_v24, %v16706_v58  ;;  %v16840_v9 = vpop.f32.mrf.mxu0 }
 0x56a   : > { %v9122_v33 = vpop.f32.mrf.mxu1 }
 0x56b   : > { %v16843_v55 = vadd.f32 %v9122_v33, %v16711_v46  ;;  %v16845_v27 = vpop.f32.mrf.mxu0 }
 0x56c   : > { %v12207_v3 = vpop.f32.mrf.mxu1 }
 0x56d   : > { %v16849_v49 = vpop.f32.mrf.mxu0 }
 0x56e   : > { %v16847_v21 = vpop.f32.mrf.mxu1 }
 0x56f   : > { %v16857_v19 = vpop.f32.mrf.mxu0 }
 0x570   : > { %v12210_v25 = vpop.f32.mrf.mxu1 }
 0x571   : > { %v16852_v10 = vadd.f32 %v12210_v25, %v16723_v44  ;;  %v16863_v16 = vpop.f32.mrf.mxu0 }
 0x572   : > { %v9138_v0 = vpop.f32.mrf.mxu1 }
 0x573   : > { %v16855_v58 = vadd.f32 %v9138_v0, %v16728_v48  ;;  %v16871_v25 = vpop.f32.mrf.mxu0 }
 0x574   : > { %v16859_v13 = vpop.f32.mrf.mxu1 }
 0x575   : > { %v16877_v7 = vpop.f32.mrf.mxu0 }
 0x576   : > { %v16861_v46 = vpop.f32.mrf.mxu1 }
 0x578   : > { %v12214_v12 = vpop.f32.mrf.mxu1 }
 0x579   : > { %v16866_v24 = vadd.f32 %v12214_v12, %v16740_v43  ;;  %v16885_v12 = vpop.f32.mrf.mxu0 }
 0x57a   : > { %v9154_v33 = vpop.f32.mrf.mxu1 }
 0x57b   : > { %v16869_v44 = vadd.f32 %v9154_v33, %v16745_v8  ;;  %v16891_v56 = vpop.f32.mrf.mxu0 }
 0x57c   : > { %v16873_v48 = vpop.f32.mrf.mxu1 }
 0x57e   : > { %v16875_v0 = vpop.f32.mrf.mxu1 }
 0x580   : > { %v12218_v53 = vpop.f32.mrf.mxu1 }
 0x581   : > { %v16880_v15 = vadd.f32 %v12218_v53, %v16757_v23  ;;  %v16899_v53 = vpop.f32.mrf.mxu0 }
 0x582   : > { %v9170_v51 = vpop.f32.mrf.mxu1 }
 0x583   : > { %v16883_v43 = vadd.f32 %v9170_v51, %v16762_v35  ;;  %v16905_v31 = vpop.f32.mrf.mxu0 }
 0x584   : > { %v16887_v8 = vpop.f32.mrf.mxu1 }
 0x586   : > { %v16889_v33 = vpop.f32.mrf.mxu1 }
 0x588   : > { %v12222_v42 = vpop.f32.mrf.mxu1 }
 0x589   : > { %v16894_v60 = vadd.f32 %v12222_v42, %v16774_v6  ;;  %v16913_v42 = vpop.f32.mrf.mxu0 }
 0x58a   : > { %v9186_v39 = vpop.f32.mrf.mxu1 }
 0x58b   : > { %18357 = vst [vmem:[#allocation81_spill] sm:$0xff] %v16894_v60  ;;  %v16897_v23 = vadd.f32 %v9186_v39, %v16777_v14 }
 0x58c   : > { %v16901_v35 = vpop.f32.mrf.mxu1 }
 0x58d   : > { %18358 = vst [vmem:[#allocation82_spill] sm:$0xff] %v16897_v23  ;;  %18359 = vst [vmem:[#allocation83_spill] sm:$0xff] %v16901_v35  ;;  %v16919_v23 = vpop.f32.mrf.mxu0 }
 0x58e   : > { %v16903_v51 = vpop.f32.mrf.mxu1 }
 0x58f   : > { %18360 = vst [vmem:[#allocation100_spill] sm:$0xff] %v16903_v51 }
 0x590   : > { %v12226_v54 = vpop.f32.mrf.mxu1 }
 0x591   : > { %v16908_v32 = vadd.f32 %v12226_v54, %v16790_v52  ;;  %v16927_v54 = vpop.f32.mrf.mxu0 }
 0x592   : > { %v9202_v45 = vpop.f32.mrf.mxu1 }
 0x593   : > { %18361 = vst [vmem:[#allocation27_spill] sm:$0xff] %v16908_v32  ;;  %v16911_v6 = vadd.f32 %v9202_v45, %v16793_v28 }
 0x594   : > { %v16915_v14 = vpop.f32.mrf.mxu1 }
 0x595   : > { %18362 = vst [vmem:[#allocation135_spill] sm:$0xff] %v16911_v6  ;;  %18363 = vst [vmem:[#allocation101_spill] sm:$0xff] %v16915_v14  ;;  %v16933_v6 = vpop.f32.mrf.mxu0 }
 0x596   : > { %v16917_v39 = vpop.f32.mrf.mxu1 }
 0x597   : > { %18364 = vst [vmem:[#allocation28_spill] sm:$0xff] %v16917_v39 }
 0x598   : > { %v12230_v60 = vpop.f32.mrf.mxu1 }
 0x599   : > { %v16922_v51 = vadd.f32 %v12230_v60, %v16806_v26  ;;  %v16941_v60 = vpop.f32.mrf.mxu0 }
 0x59a   : > { %v9218_v35 = vpop.f32.mrf.mxu1 }
 0x59b   : > { %18365 = vst [vmem:[#allocation148_spill] sm:$0xff] %v16922_v51  ;;  %v16925_v52 = vadd.f32 %v9218_v35, %v16809_v63  ;;  %v8926_v35 = vadd.f32 %v16716_v17, %v16714_v62 }
 0x59c   : > { %v16929_v28 = vpop.f32.mrf.mxu1 }
 0x59d   : > { %18366 = vst [vmem:[#allocation80_spill] sm:$0xff] %v16925_v52  ;;  %18367 = vst [vmem:[#allocation123_spill] sm:$0xff] %v16929_v28  ;;  %v9252_v51 = vadd.f32 %v12207_v3, %v8926_v35  ;;  %v16951_v28 = vpop.f32.mrf.mxu0 }
 0x59e   : > { %v16931_v45 = vpop.f32.mrf.mxu1 }
 0x59f   : > { %18368 = vst [vmem:[#allocation130_spill] sm:$0xff] %v16931_v45  ;;  %v8924_v45 = vadd.f32 %v16720_v4, %v16718_v11  ;;  %v9546_v62 = vadd.f32 %v16849_v49, %v9252_v51  ;;  %v8930_v11 = vadd.f32 %v16733_v2, %v16731_v30  ;;  %v9549_v51 = vadd.f32 %v16863_v16, %v16852_v10 }
 0x5a0   : > { %v12234_v32 = vpop.f32.mrf.mxu1  ;;  %v8934_v10 = vadd.f32 %v16750_v36, %v16748_v57  ;;  %v9553_v57 = vadd.f32 %v16891_v56, %v16866_v24  ;;  %v8938_v56 = vadd.f32 %v16767_v18, %v16765_v1  ;;  %v9557_v1 = vadd.f32 %v16919_v23, %v16880_v15 }
 0x5a1   : > { %v16936_v39 = vadd.f32 %v12234_v32, %v16822_v5  ;;  %v9545_v5 = vadd.f32 %v16840_v9, %v16838_v29  ;;  %v8928_v29 = vadd.f32 %v16737_v40, %v16735_v37  ;;  %v9547_v37 = vadd.f32 %v16871_v25, %v16855_v58 }
 0x5a2   : > { %v9234_v14 = vpop.f32.mrf.mxu1  ;;  %v8942_v15 = vadd.f32 %v16782_v50, %v16780_v61 }
 0x5a3   : > { %18369 = vst [vmem:[#allocation149_spill] sm:$0xff] %v16936_v39  ;;  %v16939_v26 = vadd.f32 %v9234_v14, %v16825_v41  ;;  %v9250_v41 = vadd.f32 %v16847_v21, %v8924_v45  ;;  %v9256_v21 = vadd.f32 %v16859_v13, %v8930_v11  ;;  %v9254_v30 = vadd.f32 %v16861_v46, %v8928_v29 }
 0x5a4   : > { %v16943_v63 = vpop.f32.mrf.mxu1 }
 0x5a5   : > { %18370 = vst [vmem:[#allocation29_spill] sm:$0xff] %v16939_v26  ;;  %v9543_v26 = vadd.f32 %v16845_v27, %v16843_v55  ;;  %v9544_v4 = vadd.f32 %v16857_v19, %v9250_v41  ;;  %v9550_v40 = vadd.f32 %v16877_v7, %v9256_v21  ;;  %v9548_v16 = vadd.f32 %v16885_v12, %v9254_v30 }
 0x5a6   : > { %v16947_v52 = vpop.f32.mrf.mxu1  ;;  %v9260_v7 = vadd.f32 %v16873_v48, %v8934_v10 }
 0x5a7   : > { %18371 = vst [vmem:[#allocation150_spill] sm:$0xff] %v16947_v52  ;;  %v16959_v52 = vpop.f32.mrf.mxu0 }
 0x5a8   : > { %v12274_v32 = vpop.f32.mrf.mxu1  ;;  %v9554_v48 = vadd.f32 %v16905_v31, %v9260_v7  ;;  %v9264_v31 = vadd.f32 %v16887_v8, %v8938_v56  ;;  %v18374_v7 = vld [vmem:[#allocation100_spill] sm:$0xff]  ;;  %v18378_v56 = vld [vmem:[#allocation131_spill] sm:$0xff] }
 0x5a9   : > { %v9871_v17 = vadd.f32 %v12274_v32, %v9545_v5  ;;  %v16969_v45 = vpop.f32.mrf.mxu0 }
 0x5aa   : > { %v9742_v14 = vpop.f32.mrf.mxu1 }
 0x5ab   : > { %v9869_v3 = vadd.f32 %v9742_v14, %v9543_v26  ;;  %v9903_v55 = vmax.f32 %v9871_v17, 0.0  ;;  %v16975_v41 = vpop.f32.mrf.mxu0  ;;  %v8932_v17 = vadd.f32 %v16754_v59, %v16752_v38  ;;  %v9551_v59 = vadd.f32 %v16899_v53, %v16869_v44 }
 0x5ac   : > { %v12275_v39 = vpop.f32.mrf.mxu1 }
 0x5ad   : > { %v9872_v35 = vadd.f32 %v12275_v39, %v9546_v62  ;;  %v9901_v2 = vmax.f32 %v9869_v3, 0.0  ;;  %v16987_v36 = vpop.f32.mrf.mxu0  ;;  %v9258_v3 = vadd.f32 %v16875_v0, %v8932_v17 }
 0x5ae   : > { %v9745_v9 = vpop.f32.mrf.mxu1 }
 0x5af   : > { %v9904_v27 = vmax.f32 %v9872_v35, 0.0  ;;  %v9870_v49 = vadd.f32 %v9745_v9, %v9544_v4  ;;  %v9552_v24 = vadd.f32 %v16913_v42, %v9258_v3 }
 0x5b0   : > { %v12278_v32 = vpop.f32.mrf.mxu1 }
 0x5b1   : > { %v9934_v19 = vpack.c.bf16 %v9904_v27, %v9903_v55  ;;  %v9902_v39 = vmax.f32 %v9870_v49, 0.0  ;;  %v9875_v5 = vadd.f32 %v12278_v32, %v9549_v51  ;;  %v16993_v27 = vpop.f32.mrf.mxu0  ;;  %v8936_v32 = vadd.f32 %v16771_v34, %v16769_v22 }
 0x5b2   : > { %v9758_v26 = vpop.f32.mrf.mxu1  ;;  %v9555_v22 = vadd.f32 %v16927_v54, %v16883_v43  ;;  %v9558_v34 = vadd.f32 %v16933_v6, %v9264_v31  ;;  %v18372_v43 = vld [vmem:[#allocation83_spill] sm:$0xff] }
 0x5b3   : > { %v9933_v13 = vpack.c.bf16 %v9902_v39, %v9901_v2  ;;  %v9873_v46 = vadd.f32 %v9758_v26, %v9547_v37  ;;  %v9907_v25 = vmax.f32 %v9875_v5, 0.0  ;;  %v12261_v18 = vpop.f32.mrf.mxu0  ;;  %v9268_v6 = vadd.f32 %v18372_v43, %v8942_v15  ;;  %v18386_v43 = vld [vmem:[#allocation74_spill] sm:$0xff] }
 0x5b4   : > { %v12279_v14 = vpop.f32.mrf.mxu1 }
 0x5b5   : > { %v9876_v62 = vadd.f32 %v12279_v14, %v9550_v40  ;;  %12306 = vmatprep.mubr.msk.bf16.mxu0 %vm420_vm1, %v9933_v13  ;;  %v9905_v35 = vmax.f32 %v9873_v46, 0.0  ;;  %v9499_v5 = vpop.f32.mrf.mxu0  ;;  %v9562_v3 = vadd.f32 %v16969_v45, %v9268_v6  ;;  %v18387_v6 = vld [vmem:[#allocation25_spill] sm:$0xff] }
 0x5b6   : > { %v9761_v58 = vpop.f32.mrf.mxu1  ;;  %12307 = vmatmul.mubr.msk.bf16.vlgmr.msra.gmra.mxu0 %vm420_vm1, %v9934_v19  ;;  %v9262_v19 = vadd.f32 %v16889_v33, %v8936_v32 }
 0x5b7   : > { %v9908_v11 = vmax.f32 %v9876_v62, 0.0  ;;  %v9874_v4 = vadd.f32 %v9761_v58, %v9548_v16  ;;  %v8940_v16 = vadd.f32 %v16787_v47, %v16785_v20  ;;  %v18373_v58 = vld [vmem:[#allocation81_spill] sm:$0xff]  ;;  %v12264_v50 = vpop.f32.mrf.mxu0  ;;  %v18375_v20 = vld [vmem:[#allocation82_spill] sm:$0xff] }
 0x5b8   : > { %v12282_v12 = vpop.f32.mrf.mxu1  ;;  %v9556_v23 = vadd.f32 %v16941_v60, %v9262_v19  ;;  %v9561_v61 = vadd.f32 %v16951_v28, %v18373_v58  ;;  %v9559_v47 = vadd.f32 %v16959_v52, %v18375_v20  ;;  %v18380_v52 = vld [vmem:[#allocation101_spill] sm:$0xff] }
 0x5b9   : > { %v9936_v29 = vpack.c.bf16 %v9908_v11, %v9907_v25  ;;  %v9906_v9 = vmax.f32 %v9874_v4, 0.0  ;;  %v9879_v55 = vadd.f32 %v12282_v12, %v9553_v57  ;;  %v9266_v25 = vadd.f32 %v18374_v7, %v8940_v16  ;;  %v18389_v7 = vld [vmem:[#allocation148_spill] sm:$0xff] }
 0x5ba   : > { %v9774_v38 = vpop.f32.mrf.mxu1 }
 0x5bb   : > { %v9935_v21 = vpack.c.bf16 %v9906_v9, %v9905_v35  ;;  %v9877_v0 = vadd.f32 %v9774_v38, %v9551_v59  ;;  %v9911_v53 = vmax.f32 %v9879_v55, 0.0  ;;  %v9512_v9 = vpop.f32.mrf.mxu0  ;;  %v18376_v59 = vld [vmem:[#allocation94_spill] sm:$0xff] }
 0x5bc   : > { %v12283_v49 = vpop.f32.mrf.mxu1 }
 0x5bd   : > { %v9880_v51 = vadd.f32 %v12283_v49, %v9554_v48  ;;  %12310 = vmatprep.mubr.msk.bf16.mxu0 %vm420_vm1, %v9935_v21  ;;  %v9909_v39 = vmax.f32 %v9877_v0, 0.0  ;;  %v18377_v48 = vld [vmem:[#allocation99_spill] sm:$0xff]  ;;  %v9560_v21 = vadd.f32 %v16975_v41, %v9266_v25  ;;  %v9569_v25 = vadd.f32 %v12264_v50, %v18389_v7 }
 0x5be   : > { %v9777_v44 = vpop.f32.mrf.mxu1  ;;  %12311 = vmatmul.mubr.msk.bf16.gmra.mxu0 %vm420_vm1, %v9936_v29  ;;  %v8946_v28 = vadd.f32 %v18377_v48, %v18376_v59 }
 0x5bf   : > { %v9912_v30 = vmax.f32 %v9880_v51, 0.0  ;;  %v9878_v2 = vadd.f32 %v9777_v44, %v9552_v24  ;;  %v18379_v24 = vld [vmem:[#allocation69_spill] sm:$0xff] }
 0x5c0   : > { %v12286_v42 = vpop.f32.mrf.mxu1  ;;  %v8944_v0 = vadd.f32 %v18379_v24, %v18378_v56  ;;  %v9272_v45 = vadd.f32 %v18380_v52, %v8946_v28 }
 0x5c1   : > { %v9938_v26 = vpack.c.bf16 %v9912_v30, %v9911_v53  ;;  %v9910_v37 = vmax.f32 %v9878_v2, 0.0  ;;  %v9883_v13 = vadd.f32 %v12286_v42, %v9557_v1  ;;  %v18381_v53 = vld [vmem:[#allocation27_spill] sm:$0xff]  ;;  %v12265_v2 = vpop.f32.mrf.mxu0  ;;  %v18382_v1 = vld [vmem:[#allocation28_spill] sm:$0xff] }
 0x5c2   : > { %v9790_v40 = vpop.f32.mrf.mxu1  ;;  %v9565_v30 = vadd.f32 %v16987_v36, %v18381_v53  ;;  %v9270_v42 = vadd.f32 %v18382_v1, %v8944_v0  ;;  %v18394_v0 = vld [vmem:[#allocation26_spill] sm:$0xff] }
 0x5c3   : > { %v9937_v8 = vpack.c.bf16 %v9910_v37, %v9909_v39  ;;  %v9881_v10 = vadd.f32 %v9790_v40, %v9555_v22  ;;  %v9915_v54 = vmax.f32 %v9883_v13, 0.0  ;;  %v18383_v40 = vld [vmem:[#allocation135_spill] sm:$0xff]  ;;  %v18397_v1 = vld [vmem:[#allocation150_spill] sm:$0xff] }
 0x5c4   : > { %v12287_v14 = vpop.f32.mrf.mxu1  ;;  %v9563_v22 = vadd.f32 %v16993_v27, %v18383_v40  ;;  %v9564_v36 = vadd.f32 %v9499_v5, %v9270_v42  ;;  %v18388_v27 = vld [vmem:[#allocation123_spill] sm:$0xff]  ;;  %v18390_v5 = vld [vmem:[#allocation130_spill] sm:$0xff] }
 0x5c5   : > { %v9884_v33 = vadd.f32 %v12287_v14, %v9558_v34  ;;  %12314 = vmatprep.mubr.msk.bf16.mxu0 %vm420_vm1, %v9937_v8  ;;  %v9913_v11 = vmax.f32 %v9881_v10, 0.0  ;;  %v9566_v34 = vadd.f32 %v12261_v18, %v9272_v45  ;;  %v9515_v14 = vpop.f32.mrf.mxu0  ;;  %v18385_v10 = vld [vmem:[#allocation79_spill] sm:$0xff] }
 0x5c6   : > { %v9793_v46 = vpop.f32.mrf.mxu1  ;;  %12315 = vmatmul.mubr.msk.bf16.gmra.mxu0 %vm420_vm1, %v9938_v26 }
 0x5c7   : > { %v9916_v62 = vmax.f32 %v9884_v33, 0.0  ;;  %v9882_v17 = vadd.f32 %v9793_v46, %v9556_v23  ;;  %v18384_v23 = vld [vmem:[#allocation122_spill] sm:$0xff] }
 0x5c8   : > { %v12290_v60 = vpop.f32.mrf.mxu1  ;;  %v8950_v33 = vadd.f32 %v18385_v10, %v18384_v23 }
 0x5c9   : > { %v9940_v4 = vpack.c.bf16 %v9916_v62, %v9915_v54  ;;  %v9914_v57 = vmax.f32 %v9882_v17, 0.0  ;;  %v9887_v29 = vadd.f32 %v12290_v60, %v9561_v61  ;;  %v8948_v54 = vadd.f32 %v18387_v6, %v18386_v43  ;;  %v12268_v62 = vpop.f32.mrf.mxu0 }
 0x5ca   : > { %v9806_v12 = vpop.f32.mrf.mxu1  ;;  %v9276_v18 = vadd.f32 %v18388_v27, %v8950_v33 }
 0x5cb   : > { %v9939_v35 = vpack.c.bf16 %v9914_v57, %v9913_v11  ;;  %v9885_v55 = vadd.f32 %v9806_v12, %v9559_v47  ;;  %v9919_v32 = vmax.f32 %v9887_v29, 0.0  ;;  %v9528_v47 = vpop.f32.mrf.mxu0 }
 0x5cc   : > { %v12291_v38 = vpop.f32.mrf.mxu1 }
 0x5cd   : > { %v9888_v49 = vadd.f32 %v12291_v38, %v9562_v3  ;;  %12318 = vmatprep.mubr.msk.bf16.mxu0 %vm420_vm1, %v9939_v35  ;;  %v9917_v19 = vmax.f32 %v9885_v55, 0.0  ;;  %v18391_v35 = vld [vmem:[#allocation80_spill] sm:$0xff]  ;;  %v9570_v38 = vadd.f32 %v12265_v2, %v9276_v18  ;;  %v18393_v55 = vld [vmem:[#allocation134_spill] sm:$0xff]  ;;  %v12269_v45 = vpop.f32.mrf.mxu0 }
 0x5ce   : > { %v9809_v51 = vpop.f32.mrf.mxu1  ;;  %12319 = vmatmul.mubr.msk.bf16.gmra.mxu0 %vm420_vm1, %v9940_v4  ;;  %v9274_v4 = vadd.f32 %v18390_v5, %v8948_v54  ;;  %v9567_v29 = vadd.f32 %v9512_v9, %v18391_v35  ;;  %v18401_v35 = vld [vmem:[#allocation53_spill] sm:$0xff] }
 0x5cf   : > { %v9920_v44 = vmax.f32 %v9888_v49, 0.0  ;;  %v9886_v31 = vadd.f32 %v9809_v51, %v9560_v21  ;;  %v18392_v21 = vld [vmem:[#allocation132_spill] sm:$0xff]  ;;  %v18395_v51 = vld [vmem:[#allocation98_spill] sm:$0xff] }
 0x5d0   : > { %v12294_v41 = vpop.f32.mrf.mxu1  ;;  %v8954_v49 = vadd.f32 %v18393_v55, %v18392_v21  ;;  %v9568_v56 = vadd.f32 %v9515_v14, %v9274_v4  ;;  %v8952_v52 = vadd.f32 %v18395_v51, %v18394_v0  ;;  %v18400_v4 = vld [vmem:[#allocation40_spill] sm:$0xff]  ;;  %v18403_v0 = vld [vmem:[#allocation7_spill] sm:$0xff] }
 0x5d1   : > { %v9942_v39 = vpack.c.bf16 %v9920_v44, %v9919_v32  ;;  %v9918_v26 = vmax.f32 %v9886_v31, 0.0  ;;  %v9891_v13 = vadd.f32 %v12294_v41, %v9565_v30  ;;  %v18396_v30 = vld [vmem:[#allocation149_spill] sm:$0xff]  ;;  %v18402_v21 = vld [vmem:[#allocation4_spill] sm:$0xff] }
 0x5d2   : > { %v9822_v37 = vpop.f32.mrf.mxu1  ;;  %v9280_v9 = vadd.f32 %v16943_v63, %v8954_v49  ;;  %v9573_v2 = vadd.f32 %v12268_v62, %v18396_v30  ;;  %v9278_v42 = vadd.f32 %v18397_v1, %v8952_v52  ;;  %v18405_v1 = vld [vmem:[#allocation13_spill] sm:$0xff] }
 0x5d3   : > { %v9941_v8 = vpack.c.bf16 %v9918_v26, %v9917_v19  ;;  %v9889_v16 = vadd.f32 %v9822_v37, %v9563_v22  ;;  %v9923_v58 = vmax.f32 %v9891_v13, 0.0  ;;  %v9531_v37 = vpop.f32.mrf.mxu0  ;;  %v18398_v22 = vld [vmem:[#allocation29_spill] sm:$0xff] }
 0x5d4   : > { %v12295_v15 = vpop.f32.mrf.mxu1  ;;  %v9572_v63 = vadd.f32 %v9531_v37, %v9278_v42 }
 0x5d5   : > { %v9892_v46 = vadd.f32 %v12295_v15, %v9566_v34  ;;  %12322 = vmatprep.mubr.msk.bf16.mxu0 %vm420_vm1, %v9941_v8  ;;  %v9921_v57 = vmax.f32 %v9889_v16, 0.0  ;;  %v9571_v34 = vadd.f32 %v9528_v47, %v18398_v22  ;;  %v9574_v8 = vadd.f32 %v12269_v45, %v9280_v9 }
 0x5d6   : > { %v9825_v17 = vpop.f32.mrf.mxu1  ;;  %12323 = vmatmul.mubr.msk.bf16.gmra.mxu0 %vm420_vm1, %v9942_v39 }
 0x5d7   : > { %v9924_v61 = vmax.f32 %v9892_v46, 0.0  ;;  %v9890_v60 = vadd.f32 %v9825_v17, %v9564_v36  ;;  %v17063_v17 = vld [vmem:[%s17250_s10] ss:$0 sm:$0xff] }
 0x5d8   : > { %v12298_v11 = vpop.f32.mrf.mxu1 }
 0x5d9   : > { %v9944_v12 = vpack.c.bf16 %v9924_v61, %v9923_v58  ;;  %v9922_v20 = vmax.f32 %v9890_v60, 0.0  ;;  %v9895_v48 = vadd.f32 %v12298_v11, %v9569_v25  ;;  %v17069_v58 = vld [vmem:[%s17242_s2] ss:$0 sm:$0xff]  ;;  %v18399_v60 = vld [vmem:[#allocation11_spill] sm:$0xff] }
 0x5da   : > { %v9838_v3 = vpop.f32.mrf.mxu1  ;;  %v1155_v7 = vadd.f32 %v18399_v60, %v17069_v58  ;;  %v1150_v55 = vadd.f32 %v17069_v58, %v18402_v21  ;;  %v1171_v51 = vadd.f32 %v18403_v0, %v17069_v58  ;;  %v1174_v42 = vadd.f32 %v18405_v1, %v17069_v58 }
 0x5db   : > { %v9943_v59 = vpack.c.bf16 %v9922_v20, %v9921_v57  ;;  %v9893_v24 = vadd.f32 %v9838_v3, %v9567_v29  ;;  %v9927_v44 = vmax.f32 %v9895_v48, 0.0  ;;  %v1147_v57 = vadd.f32 %v17069_v58, %v18400_v4 }
 0x5dc   : > { %v12299_v28 = vpop.f32.mrf.mxu1  ;;  %v1158_v29 = vadd.f32 %v18401_v35, %v17069_v58 }
 0x5dd   : > { %v9896_v50 = vadd.f32 %v12299_v28, %v9570_v38  ;;  %12326 = vmatprep.mubr.msk.bf16.mxu0 %vm420_vm1, %v9943_v59  ;;  %v9925_v19 = vmax.f32 %v9893_v24, 0.0 }
 0x5de   : > { %v9841_v32 = vpop.f32.mrf.mxu1  ;;  %12327 = vmatmul.mubr.msk.bf16.gmra.mxu0 %vm420_vm1, %v9944_v12 }
 0x5df   : > { %v9928_v31 = vmax.f32 %v9896_v50, 0.0  ;;  %v9894_v53 = vadd.f32 %v9841_v32, %v9568_v56 }
 0x5e0   : > { %v12302_v41 = vpop.f32.mrf.mxu1 }
 0x5e1   : > { %v9946_v39 = vpack.c.bf16 %v9928_v31, %v9927_v44  ;;  %v9926_v26 = vmax.f32 %v9894_v53, 0.0  ;;  %v9899_v14 = vadd.f32 %v12302_v41, %v9573_v2  ;;  %v18404_v44 = vld [vmem:[#allocation9_spill] sm:$0xff] }
 0x5e2   : > { %v9854_v40 = vpop.f32.mrf.mxu1  ;;  %v1163_v31 = vadd.f32 %v17069_v58, %v18404_v44 }
 0x5e3   : > { %v9945_v13 = vpack.c.bf16 %v9926_v26, %v9925_v19  ;;  %v9897_v23 = vadd.f32 %v9854_v40, %v9571_v34  ;;  %v9931_v36 = vmax.f32 %v9899_v14, 0.0  ;;  %v18406_v40 = vld [vmem:[#allocation15_spill] sm:$0xff] }
 0x5e4   : > { %v12303_v15 = vpop.f32.mrf.mxu1  ;;  %v1166_v22 = vadd.f32 %v17069_v58, %v18406_v40 }
 0x5e5   : > { %v9900_v10 = vadd.f32 %v12303_v15, %v9574_v8  ;;  %12330 = vmatprep.mubr.msk.bf16.mxu0 %vm420_vm1, %v9945_v13  ;;  %v9929_v43 = vmax.f32 %v9897_v23, 0.0  ;;  %v18407_v15 = vld [vmem:[#allocation17_spill] sm:$0xff] }
 0x5e6   : > { %v9857_v33 = vpop.f32.mrf.mxu1  ;;  %12331 = vmatmul.mubr.msk.bf16.gmra.mxu0 %vm420_vm1, %v9946_v39 }
 0x5e7   : > { %v9932_v16 = vmax.f32 %v9900_v10, 0.0  ;;  %v9898_v46 = vadd.f32 %v9857_v33, %v9572_v63  ;;  %v1187_v63 = vadd.f32 %v18407_v15, %v17069_v58 }
 0x5e9   : > { %v9948_v6 = vpack.c.bf16 %v9932_v16, %v9931_v36  ;;  %v9930_v54 = vmax.f32 %v9898_v46, 0.0  ;;  %v18408_v16 = vld [vmem:[#allocation56_spill] sm:$0xff] }
 0x5ea   : > { %v1179_v46 = vadd.f32 %v17069_v58, %v18408_v16 }
 0x5eb   : > { %v9947_v62 = vpack.c.bf16 %v9930_v54, %v9929_v43 }
 0x5ed   : > { %12334 = vmatprep.mubr.msk.bf16.mxu0 %vm420_vm1, %v9947_v62 }
 0x5ee   : > { %12335 = vmatmul.mubr.msk.bf16.gmra.mxu0 %vm420_vm1, %v9948_v6 }
 0x676   : > { %v12308_v27 = vpop.f32.mrf.mxu0 }
 0x677   : > { %v10051_v18 = vadd.f32 %v12308_v27, %v17063_v17  ;;  %v18409_v27 = vld [vmem:[#allocation18_spill] sm:$0xff] }
 0x678   : > { %v10042_v61 = vpop.f32.mrf.mxu0 }
 0x679   : > { %v10171_v25 = vmul.f32 0.25, %v10051_v18  ;;  %v10043_v11 = vadd.f32 %v17063_v17, %v10042_v61  ;;  %v1190_v18 = vadd.f32 %v18409_v27, %v17069_v58 }
 0x67a   : > { %v12309_v5 = vpop.f32.mrf.mxu0 }
 0x67b   : > { %v10203_v12 = vadd.f32 %v10171_v25, %v1155_v7  ;;  %v10169_v20 = vmul.f32 0.25, %v10043_v11  ;;  %v10054_v47 = vadd.f32 %v12309_v5, %v17063_v17  ;;  %v18410_v11 = vld [vmem:[#allocation58_spill] sm:$0xff] }
 0x67c   : > { %v10045_v3 = vpop.f32.mrf.mxu0  ;;  %v1182_v5 = vadd.f32 %v17069_v58, %v18410_v11 }
 0x67d   : > { %10236 = vst.msk [vmem:[%s17079_s15 + $0x10] sm:$0xff] %vm10233_vm0, %v10203_v12  ;;  %v10201_v38 = vadd.f32 %v10169_v20, %v1147_v57  ;;  %v10172_v59 = vmul.f32 0.25, %v10054_v47  ;;  %v10046_v48 = vadd.f32 %v17063_v17, %v10045_v3  ;;  %v18411_v47 = vld [vmem:[#allocation60_spill] sm:$0xff] }
 0x67e   : > { %v12312_v28 = vpop.f32.mrf.mxu0  ;;  %v1203_v3 = vadd.f32 %v18411_v47, %v17069_v58 }
 0x67f   : > { %10234 = vst.msk [vmem:[%s17079_s15] sm:$0xff] %vm10233_vm0, %v10201_v38  ;;  %v10204_v49 = vadd.f32 %v10172_v59, %v1158_v29  ;;  %v10170_v56 = vmul.f32 0.25, %v10046_v48  ;;  %v10067_v24 = vadd.f32 %v12312_v28, %v17063_v17  ;;  %v18412_v48 = vld [vmem:[#allocation62_spill] sm:$0xff] }
 0x680   : > { %v10058_v50 = vpop.f32.mrf.mxu0  ;;  %v1195_v28 = vadd.f32 %v17069_v58, %v18412_v48 }
 0x681   : > { %10237 = vst.msk [vmem:[%s17079_s15 + $0x18] sm:$0xff] %vm10233_vm0, %v10204_v49  ;;  %v10202_v52 = vadd.f32 %v10170_v56, %v1150_v55  ;;  %v10175_v45 = vmul.f32 0.25, %v10067_v24  ;;  %v10059_v32 = vadd.f32 %v17063_v17, %v10058_v50  ;;  %v18413_v24 = vld [vmem:[#allocation64_spill] sm:$0xff] }
 0x682   : > { %v12313_v9 = vpop.f32.mrf.mxu0  ;;  %v1206_v50 = vadd.f32 %v18413_v24, %v17069_v58 }
 0x683   : > { %10235 = vst.msk [vmem:[%s17079_s15 + $0x8] sm:$0xff] %vm10233_vm0, %v10202_v52  ;;  %v10207_v53 = vadd.f32 %v10175_v45, %v1171_v51  ;;  %v10173_v30 = vmul.f32 0.25, %v10059_v32  ;;  %v10070_v2 = vadd.f32 %v12313_v9, %v17063_v17  ;;  %v18414_v32 = vld [vmem:[#allocation66_spill] sm:$0xff] }
 0x684   : > { %v10061_v41 = vpop.f32.mrf.mxu0  ;;  %v1198_v9 = vadd.f32 %v17069_v58, %v18414_v32 }
 0x685   : > { %10240 = vst.msk [vmem:[%s17079_s15 + $0x30] sm:$0xff] %vm10233_vm0, %v10207_v53  ;;  %v10205_v19 = vadd.f32 %v10173_v30, %v1163_v31  ;;  %v10176_v39 = vmul.f32 0.25, %v10070_v2  ;;  %v10062_v26 = vadd.f32 %v17063_v17, %v10061_v41  ;;  %v18415_v2 = vld [vmem:[#allocation10_spill] sm:$0xff] }
 0x686   : > { %v12316_v37 = vpop.f32.mrf.mxu0  ;;  %v1219_v41 = vadd.f32 %v18415_v2, %v17069_v58 }
 0x687   : > { %10238 = vst.msk [vmem:[%s17079_s15 + $0x20] sm:$0xff] %vm10233_vm0, %v10205_v19  ;;  %v10208_v34 = vadd.f32 %v10176_v39, %v1174_v42  ;;  %v10174_v8 = vmul.f32 0.25, %v10062_v26  ;;  %v10083_v13 = vadd.f32 %v12316_v37, %v17063_v17  ;;  %v18416_v26 = vld [vmem:[#allocation39_spill] sm:$0xff] }
 0x688   : > { %v10074_v14 = vpop.f32.mrf.mxu0  ;;  %v1211_v37 = vadd.f32 %v17069_v58, %v18416_v26 }
 0x689   : > { %10241 = vst.msk [vmem:[%s17079_s15 + $0x38] sm:$0xff] %vm10233_vm0, %v10208_v34  ;;  %v10206_v23 = vadd.f32 %v10174_v8, %v1166_v22  ;;  %v10179_v10 = vmul.f32 0.25, %v10083_v13  ;;  %v10075_v33 = vadd.f32 %v17063_v17, %v10074_v14  ;;  %v18417_v13 = vld [vmem:[#allocation6_spill] sm:$0xff] }
 0x68a   : > { %v12317_v36 = vpop.f32.mrf.mxu0  ;;  %v1222_v14 = vadd.f32 %v18417_v13, %v17069_v58 }
 0x68b   : > { %10239 = vst.msk [vmem:[%s17079_s15 + $0x28] sm:$0xff] %vm10233_vm0, %v10206_v23  ;;  %v10211_v43 = vadd.f32 %v10179_v10, %v1187_v63  ;;  %v10177_v6 = vmul.f32 0.25, %v10075_v33  ;;  %v10086_v54 = vadd.f32 %v12317_v36, %v17063_v17  ;;  %v18418_v33 = vld [vmem:[#allocation3_spill] sm:$0xff] }
 0x68c   : > { %v10077_v62 = vpop.f32.mrf.mxu0  ;;  %v1214_v36 = vadd.f32 %v17069_v58, %v18418_v33 }
 0x68d   : > { %10244 = vst.msk [vmem:[%s17079_s15 + $0x50] sm:$0xff] %vm10233_vm0, %v10211_v43  ;;  %v10209_v61 = vadd.f32 %v10177_v6, %v1179_v46  ;;  %v10180_v60 = vmul.f32 0.25, %v10086_v54  ;;  %v10078_v7 = vadd.f32 %v17063_v17, %v10077_v62  ;;  %v18419_v54 = vld [vmem:[#allocation5_spill] sm:$0xff] }
 0x68e   : > { %v12320_v25 = vpop.f32.mrf.mxu0  ;;  %v1235_v62 = vadd.f32 %v18419_v54, %v17069_v58 }
 0x68f   : > { %10242 = vst.msk [vmem:[%s17079_s15 + $0x40] sm:$0xff] %vm10233_vm0, %v10209_v61  ;;  %v10212_v4 = vadd.f32 %v10180_v60, %v1190_v18  ;;  %v10178_v57 = vmul.f32 0.25, %v10078_v7  ;;  %v10099_v12 = vadd.f32 %v12320_v25, %v17063_v17  ;;  %v18420_v7 = vld [vmem:[#allocation8_spill] sm:$0xff] }
 0x690   : > { %v10090_v20 = vpop.f32.mrf.mxu0  ;;  %v1227_v25 = vadd.f32 %v17069_v58, %v18420_v7 }
 0x691   : > { %10245 = vst.msk [vmem:[%s17079_s15 + $0x58] sm:$0xff] %vm10233_vm0, %v10212_v4  ;;  %v10210_v35 = vadd.f32 %v10178_v57, %v1182_v5  ;;  %v10183_v29 = vmul.f32 0.25, %v10099_v12  ;;  %v10091_v38 = vadd.f32 %v17063_v17, %v10090_v20  ;;  %v18421_v12 = vld [vmem:[#allocation12_spill] sm:$0xff] }
 0x692   : > { %v12321_v59 = vpop.f32.mrf.mxu0  ;;  %v1238_v20 = vadd.f32 %v18421_v12, %v17069_v58 }
 0x693   : > { %10243 = vst.msk [vmem:[%s17079_s15 + $0x48] sm:$0xff] %vm10233_vm0, %v10210_v35  ;;  %v10215_v21 = vadd.f32 %v10183_v29, %v1203_v3  ;;  %v10181_v55 = vmul.f32 0.25, %v10091_v38  ;;  %v10102_v49 = vadd.f32 %v12321_v59, %v17063_v17  ;;  %v18422_v38 = vld [vmem:[#allocation14_spill] sm:$0xff] }
 0x694   : > { %v10093_v56 = vpop.f32.mrf.mxu0  ;;  %v1230_v59 = vadd.f32 %v17069_v58, %v18422_v38 }
 0x695   : > { %10248 = vst.msk [vmem:[%s17079_s15 + $0x70] sm:$0xff] %vm10233_vm0, %v10215_v21  ;;  %v10213_v0 = vadd.f32 %v10181_v55, %v1195_v28  ;;  %v10184_v51 = vmul.f32 0.25, %v10102_v49  ;;  %v10094_v52 = vadd.f32 %v17063_v17, %v10093_v56  ;;  %v18423_v49 = vld [vmem:[#allocation16_spill] sm:$0xff] }
 0x696   : > { %v12324_v45 = vpop.f32.mrf.mxu0  ;;  %v1251_v56 = vadd.f32 %v18423_v49, %v17069_v58 }
 0x697   : > { %10246 = vst.msk [vmem:[%s17079_s15 + $0x60] sm:$0xff] %vm10233_vm0, %v10213_v0  ;;  %v10216_v44 = vadd.f32 %v10184_v51, %v1206_v50  ;;  %v10182_v31 = vmul.f32 0.25, %v10094_v52  ;;  %v10115_v53 = vadd.f32 %v12324_v45, %v17063_v17  ;;  %v18424_v52 = vld [vmem:[#allocation55_spill] sm:$0xff] }
 0x698   : > { %v10106_v30 = vpop.f32.mrf.mxu0  ;;  %v1243_v45 = vadd.f32 %v17069_v58, %v18424_v52 }
 0x699   : > { %10249 = vst.msk [vmem:[%s17079_s15 + $0x78] sm:$0xff] %vm10233_vm0, %v10216_v44  ;;  %v10214_v1 = vadd.f32 %v10182_v31, %v1198_v9  ;;  %v10187_v42 = vmul.f32 0.25, %v10115_v53  ;;  %v10107_v19 = vadd.f32 %v17063_v17, %v10106_v30  ;;  %v18425_v53 = vld [vmem:[#allocation57_spill] sm:$0xff] }
 0x69a   : > { %v12325_v39 = vpop.f32.mrf.mxu0  ;;  %v1254_v30 = vadd.f32 %v18425_v53, %v17069_v58 }
 0x69b   : > { %10247 = vst.msk [vmem:[%s17079_s15 + $0x68] sm:$0xff] %vm10233_vm0, %v10214_v1  ;;  %v10219_v40 = vadd.f32 %v10187_v42, %v1219_v41  ;;  %v10185_v22 = vmul.f32 0.25, %v10107_v19  ;;  %v10118_v34 = vadd.f32 %v12325_v39, %v17063_v17  ;;  %v18426_v19 = vld [vmem:[#allocation19_spill] sm:$0xff] }
 0x69c   : > { %v10109_v8 = vpop.f32.mrf.mxu0  ;;  %v1246_v39 = vadd.f32 %v17069_v58, %v18426_v19 }
 0x69d   : > { %10252 = vst.msk [vmem:[%s17079_s15 + $0x90] sm:$0xff] %vm10233_vm0, %v10219_v40  ;;  %v10217_v15 = vadd.f32 %v10185_v22, %v1211_v37  ;;  %v10188_v63 = vmul.f32 0.25, %v10118_v34  ;;  %v10110_v23 = vadd.f32 %v17063_v17, %v10109_v8  ;;  %v18427_v34 = vld [vmem:[#allocation59_spill] sm:$0xff] }
 0x69e   : > { %v12328_v10 = vpop.f32.mrf.mxu0  ;;  %v1267_v8 = vadd.f32 %v18427_v34, %v17069_v58 }
 0x69f   : > { %10250 = vst.msk [vmem:[%s17079_s15 + $0x80] sm:$0xff] %vm10233_vm0, %v10217_v15  ;;  %v10220_v16 = vadd.f32 %v10188_v63, %v1222_v14  ;;  %v10186_v46 = vmul.f32 0.25, %v10110_v23  ;;  %v10131_v43 = vadd.f32 %v12328_v10, %v17063_v17  ;;  %v18428_v23 = vld [vmem:[#allocation61_spill] sm:$0xff] }
 0x6a0   : > { %v10122_v6 = vpop.f32.mrf.mxu0  ;;  %v1259_v10 = vadd.f32 %v17069_v58, %v18428_v23 }
 0x6a1   : > { %10253 = vst.msk [vmem:[%s17079_s15 + $0x98] sm:$0xff] %vm10233_vm0, %v10220_v16  ;;  %v10218_v27 = vadd.f32 %v10186_v46, %v1214_v36  ;;  %v10191_v18 = vmul.f32 0.25, %v10131_v43  ;;  %v10123_v61 = vadd.f32 %v17063_v17, %v10122_v6  ;;  %v18429_v43 = vld [vmem:[#allocation63_spill] sm:$0xff] }
 0x6a2   : > { %v12329_v60 = vpop.f32.mrf.mxu0  ;;  %v1270_v6 = vadd.f32 %v18429_v43, %v17069_v58 }
 0x6a3   : > { %10251 = vst.msk [vmem:[%s17079_s15 + $0x88] sm:$0xff] %vm10233_vm0, %v10218_v27  ;;  %v10223_v11 = vadd.f32 %v10191_v18, %v1235_v62  ;;  %v10189_v5 = vmul.f32 0.25, %v10123_v61  ;;  %v10134_v4 = vadd.f32 %v12329_v60, %v17063_v17  ;;  %v18430_v18 = vld [vmem:[#allocation65_spill] sm:$0xff] }
 0x6a4   : > { %v10125_v57 = vpop.f32.mrf.mxu0  ;;  %v1262_v61 = vadd.f32 %v17069_v58, %v18430_v18 }
 0x6a5   : > { %10256 = vst.msk [vmem:[%s17079_s15 + $0xb0] sm:$0xff] %vm10233_vm0, %v10223_v11  ;;  %v10221_v47 = vadd.f32 %v10189_v5, %v1227_v25  ;;  %v10192_v3 = vmul.f32 0.25, %v10134_v4  ;;  %v10126_v35 = vadd.f32 %v17063_v17, %v10125_v57 }
 0x6a6   : > { %v12332_v29 = vpop.f32.mrf.mxu0 }
 0x6a7   : > { %10254 = vst.msk [vmem:[%s17079_s15 + $0xa0] sm:$0xff] %vm10233_vm0, %v10221_v47  ;;  %v10224_v48 = vadd.f32 %v10192_v3, %v1238_v20  ;;  %v10190_v28 = vmul.f32 0.25, %v10126_v35  ;;  %v10147_v21 = vadd.f32 %v12332_v29, %v17063_v17 }
 0x6a8   : > { %v10138_v55 = vpop.f32.mrf.mxu0 }
 0x6a9   : > { %10257 = vst.msk [vmem:[%s17079_s15 + $0xb8] sm:$0xff] %vm10233_vm0, %v10224_v48  ;;  %v10222_v24 = vadd.f32 %v10190_v28, %v1230_v59  ;;  %v10195_v50 = vmul.f32 0.25, %v10147_v21  ;;  %v10139_v0 = vadd.f32 %v17063_v17, %v10138_v55 }
 0x6aa   : > { %v12333_v51 = vpop.f32.mrf.mxu0 }
 0x6ab   : > { %10255 = vst.msk [vmem:[%s17079_s15 + $0xa8] sm:$0xff] %vm10233_vm0, %v10222_v24  ;;  %v10227_v32 = vadd.f32 %v10195_v50, %v1251_v56  ;;  %v10193_v9 = vmul.f32 0.25, %v10139_v0  ;;  %v10150_v44 = vadd.f32 %v12333_v51, %v17063_v17 }
 0x6ac   : > { %v10141_v31 = vpop.f32.mrf.mxu0 }
 0x6ad   : > { %10260 = vst.msk [vmem:[%s17079_s15 + $0xd0] sm:$0xff] %vm10233_vm0, %v10227_v32  ;;  %v10225_v2 = vadd.f32 %v10193_v9, %v1243_v45  ;;  %v10196_v41 = vmul.f32 0.25, %v10150_v44  ;;  %v10142_v1 = vadd.f32 %v17063_v17, %v10141_v31 }
 0x6ae   : > { %v12336_v42 = vpop.f32.mrf.mxu0 }
 0x6af   : > { %10258 = vst.msk [vmem:[%s17079_s15 + $0xc0] sm:$0xff] %vm10233_vm0, %v10225_v2  ;;  %v10228_v26 = vadd.f32 %v10196_v41, %v1254_v30  ;;  %v10194_v37 = vmul.f32 0.25, %v10142_v1  ;;  %v10163_v40 = vadd.f32 %v12336_v42, %v17063_v17 }
 0x6b0   : > { %v10154_v22 = vpop.f32.mrf.mxu0 }
 0x6b1   : > { %10261 = vst.msk [vmem:[%s17079_s15 + $0xd8] sm:$0xff] %vm10233_vm0, %v10228_v26  ;;  %v10226_v13 = vadd.f32 %v10194_v37, %v1246_v39  ;;  %v10199_v14 = vmul.f32 0.25, %v10163_v40  ;;  %v10155_v15 = vadd.f32 %v17063_v17, %v10154_v22 }
 0x6b2   : > { %v12337_v63 = vpop.f32.mrf.mxu0 }
 0x6b3   : > { %10259 = vst.msk [vmem:[%s17079_s15 + $0xc8] sm:$0xff] %vm10233_vm0, %v10226_v13  ;;  %v10231_v33 = vadd.f32 %v10199_v14, %v1267_v8  ;;  %v10197_v36 = vmul.f32 0.25, %v10155_v15  ;;  %v10166_v16 = vadd.f32 %v12337_v63, %v17063_v17 }
 0x6b4   : > { %v10157_v46 = vpop.f32.mrf.mxu0 }
 0x6b5   : > { %10264 = vst.msk [vmem:[%s17079_s15 + $0xf0] sm:$0xff] %vm10233_vm0, %v10231_v33  ;;  %v10229_v54 = vadd.f32 %v10197_v36, %v1259_v10  ;;  %v10200_v62 = vmul.f32 0.25, %v10166_v16  ;;  %v10158_v27 = vadd.f32 %v17063_v17, %v10157_v46 }
 0x6b7   : > { %10262 = vst.msk [vmem:[%s17079_s15 + $0xe0] sm:$0xff] %vm10233_vm0, %v10229_v54  ;;  %v10232_v60 = vadd.f32 %v10200_v62, %v1270_v6  ;;  %v10198_v7 = vmul.f32 0.25, %v10158_v27 }
 0x6b9   : > { %10265 = vst.msk [vmem:[%s17079_s15 + $0xf8] sm:$0xff] %vm10233_vm0, %v10232_v60  ;;  %v10230_v25 = vadd.f32 %v10198_v7, %v1262_v61 }
 0x6bb   : > { %10263 = vst.msk [vmem:[%s17079_s15 + $0xe8] sm:$0xff] %vm10233_vm0, %v10230_v25 }
 0x6bc PF: > { %s21_s17 = sadd.s32 1, %s12389_s17  }
 0x6bd   : > { %p18_p4 = scmp.ge.s32.totalorder %s21_s17, 4  }
 0x6bf   :  { %20 = sbr.rel (!%p18_p4) target bundleno = 1 (0x1), region = 118 }

</bundles_post_ra>
